<compile_context>
chip_gen: v6e
topology: v6e:2x2x1
jax: 0.10.0
libtpu: 0.0.40
codegen_flags: <defaults>
</compile_context>

<pallas_src>
import functools

import jax
import jax.numpy as jnp
from jax.experimental import pallas as pl
from jax.experimental.pallas import tpu as pltpu


# ----------------------------------------------------------------------------
# Generation-aware tiling constants
# ----------------------------------------------------------------------------
def _tpu_vmem_capacity_bytes():
    try:
        return int(pltpu.get_tpu_info().vmem_capacity_bytes)
    except Exception:
        return 64 * 1024 * 1024          # conservative (v7x per-TensorCore VMEM)


_VMEM_CAP = _tpu_vmem_capacity_bytes()
# Larger row tiles on 128 MiB chips (v5e/v6e); conservative on v7x (64 MiB).
_ROW_TILE_CAP = 512 if _VMEM_CAP > 96 * 1024 * 1024 else 256
# Raise the scoped-VMEM limit above the 16/32 MiB defaults, keep headroom.
_VMEM_LIMIT = min(_VMEM_CAP - 16 * 1024 * 1024, 100 * 1024 * 1024)

_COMPILER_PARAMS = pltpu.CompilerParams(
    dimension_semantics=("parallel",),
    vmem_limit_bytes=_VMEM_LIMIT,
)


def _choose_row_tiling(m, cap=None):
    """Pick (row_tile, padded_rows): tile is a multiple of 8 dividing padded_rows,
    capped by VMEM budget, and yielding >=2 grid steps when possible (v7x 2 TCs)."""
    cap = cap or _ROW_TILE_CAP
    m8 = ((m + 7) // 8) * 8
    if m8 <= 8:
        return 8, 8
    steps = max(2, pl.cdiv(m8, cap))
    bm = min(cap, ((pl.cdiv(m8, steps) + 7) // 8) * 8)
    padded = pl.cdiv(m8, bm) * bm
    return bm, padded


def _pad_rows(x, target_rows):
    pad = target_rows - x.shape[0]
    if pad:
        x = jnp.pad(x, ((0, pad), (0, 0)))
    return x


# ----------------------------------------------------------------------------
# Kernel 1: embedding linear  y = x @ W   (bf16 operands, f32 accumulation)
# ----------------------------------------------------------------------------
def _embed_kernel(x_ref, w_ref, o_ref):
    y = jnp.dot(x_ref[...].astype(jnp.bfloat16), w_ref[...],
                preferred_element_type=jnp.float32)
    o_ref[...] = y.astype(o_ref.dtype)


def pallas_embed(x, w):
    M, K = x.shape
    N = w.shape[1]
    bm, Mp = _choose_row_tiling(M)
    xp = _pad_rows(x, Mp)
    y = pl.pallas_call(
        _embed_kernel,
        out_shape=jax.ShapeDtypeStruct((Mp, N), x.dtype),
        grid_spec=pltpu.PrefetchScalarGridSpec(
            num_scalar_prefetch=0,
            grid=(Mp // bm,),
            in_specs=[
                pl.BlockSpec((bm, K), lambda i: (i, 0)),
                pl.BlockSpec((K, N), lambda i: (0, 0)),   # weight VMEM resident
            ],
            out_specs=pl.BlockSpec((bm, N), lambda i: (i, 0)),
        ),
        compiler_params=_COMPILER_PARAMS,
    )(xp, w)
    return y if Mp == M else y[:M]


# ----------------------------------------------------------------------------
# Kernel 2: fused multi-head attention block (one launch per layer).
#   QKV projection + per-head softmax attention + fc projection + residual + LN.
#   One batch element per grid step; per-head results accumulate directly
#   through the corresponding fc rows into the f32 residual accumulator
#   (no concat, no (L, H*dv) intermediate).
# ----------------------------------------------------------------------------
def _attn_block_kernel(x_ref, bias_ref, wqkv_ref, fc_ref, g_ref, beta_ref, o_ref,
                       *, n_head, d_k, d_v, eps):
    x = x_ref[0]                                   # (L, d_model) f32
    bias = bias_ref[0]                             # (1, L) additive mask (0 / -1e9)

    # Fused Q/K/V projection; 1/sqrt(d_k) already folded into the Q columns.
    qkv = jnp.dot(x.astype(jnp.bfloat16), wqkv_ref[...],
                  preferred_element_type=jnp.float32)   # (L, H*(2*dk+dv))

    hdk = n_head * d_k
    acc = x                                        # residual accumulator, f32
    for h in range(n_head):                        # static unroll, one head live
        qh = qkv[:, h * d_k:(h + 1) * d_k]
        kh = qkv[:, hdk + h * d_k: hdk + (h + 1) * d_k]
        vh = qkv[:, 2 * hdk + h * d_v: 2 * hdk + (h + 1) * d_v]

        s = jax.lax.dot_general(qh.astype(jnp.bfloat16), kh.astype(jnp.bfloat16),
                                (((1,), (1,)), ((), ())),
                                preferred_element_type=jnp.float32)   # (L, L)
        s = s + bias                               # masked_fill(mask==0, -1e9)
        s = s - jnp.max(s, axis=-1, keepdims=True)
        p = jnp.exp(s)
        p = p * pl.reciprocal(jnp.sum(p, axis=-1, keepdims=True), approx=True)

        ph = jnp.dot(p.astype(jnp.bfloat16), vh.astype(jnp.bfloat16),
                     preferred_element_type=jnp.float32)              # (L, dv)
        # Head's contribution through its fc rows, straight into the residual.
        acc = acc + jnp.dot(ph.astype(jnp.bfloat16),
                            fc_ref[h * d_v:(h + 1) * d_v, :],
                            preferred_element_type=jnp.float32)       # (L, d_model)

    # LayerNorm(eps) over the feature dim.
    mean = jnp.mean(acc, axis=-1, keepdims=True)
    var = jnp.mean(jnp.square(acc - mean), axis=-1, keepdims=True)
    y = (acc - mean) * jax.lax.rsqrt(var + eps)
    y = y * g_ref[...] + beta_ref[...]
    o_ref[0] = y.astype(o_ref.dtype)
    # TODO(synk): for L >> 1k (esp. v7x 64 MiB VMEM) switch to flash-style KV
    # tiling instead of materializing the per-head (L, L) score matrix.


def pallas_attention_block(x, mask_bias, w_qkv, fc, ln_g, ln_b,
                           *, n_head, d_k, d_v, eps=1e-6):
    B, L, D = x.shape
    F = w_qkv.shape[1]
    kernel = functools.partial(_attn_block_kernel, n_head=n_head, d_k=d_k,
                               d_v=d_v, eps=eps)
    return pl.pallas_call(
        kernel,
        out_shape=jax.ShapeDtypeStruct((B, L, D), x.dtype),
        grid_spec=pltpu.PrefetchScalarGridSpec(
            num_scalar_prefetch=0,
            grid=(B,),
            in_specs=[
                pl.BlockSpec((1, L, D), lambda b: (b, 0, 0)),
                pl.BlockSpec((1, 1, L), lambda b: (b, 0, 0)),
                pl.BlockSpec((D, F), lambda b: (0, 0)),
                pl.BlockSpec((n_head * d_v, D), lambda b: (0, 0)),
                pl.BlockSpec((1, D), lambda b: (0, 0)),
                pl.BlockSpec((1, D), lambda b: (0, 0)),
            ],
            out_specs=pl.BlockSpec((1, L, D), lambda b: (b, 0, 0)),
        ),
        compiler_params=_COMPILER_PARAMS,
    )(x, mask_bias, w_qkv, fc, ln_g, ln_b)


# ----------------------------------------------------------------------------
# Kernel 3: fused position-wise FFN block (one launch per layer).
#   h = relu(x @ w1 + b1);  y = LN(h @ w2 + b2 + x)
# ----------------------------------------------------------------------------
def _ffn_block_kernel(x_ref, w1_ref, b1_ref, w2_ref, b2_ref, g_ref, beta_ref,
                      o_ref, *, eps):
    x = x_ref[...]                                             # (bm, d_model) f32
    h = jnp.dot(x.astype(jnp.bfloat16), w1_ref[...],
                preferred_element_type=jnp.float32)
    h = jnp.maximum(h + b1_ref[...], 0.0)
    y = jnp.dot(h.astype(jnp.bfloat16), w2_ref[...],
                preferred_element_type=jnp.float32)
    y = y + b2_ref[...] + x                                    # bias + residual
    mean = jnp.mean(y, axis=-1, keepdims=True)
    var = jnp.mean(jnp.square(y - mean), axis=-1, keepdims=True)
    y = (y - mean) * jax.lax.rsqrt(var + eps)
    y = y * g_ref[...] + beta_ref[...]
    o_ref[...] = y.astype(o_ref.dtype)


def pallas_ffn_block(x, w1, b1, w2, b2, ln_g, ln_b, *, eps=1e-6):
    M, D = x.shape
    Di = w1.shape[1]
    bm, Mp = _choose_row_tiling(M)
    xp = _pad_rows(x, Mp)
    y = pl.pallas_call(
        functools.partial(_ffn_block_kernel, eps=eps),
        out_shape=jax.ShapeDtypeStruct((Mp, D), x.dtype),
        grid_spec=pltpu.PrefetchScalarGridSpec(
            num_scalar_prefetch=0,
            grid=(Mp // bm,),
            in_specs=[
                pl.BlockSpec((bm, D), lambda i: (i, 0)),
                pl.BlockSpec((D, Di), lambda i: (0, 0)),
                pl.BlockSpec((1, Di), lambda i: (0, 0)),
                pl.BlockSpec((Di, D), lambda i: (0, 0)),
                pl.BlockSpec((1, D), lambda i: (0, 0)),
                pl.BlockSpec((1, D), lambda i: (0, 0)),
                pl.BlockSpec((1, D), lambda i: (0, 0)),
            ],
            out_specs=pl.BlockSpec((bm, D), lambda i: (i, 0)),
        ),
        compiler_params=_COMPILER_PARAMS,
    )(xp, w1, b1, w2, b2, ln_g, ln_b)
    return y if Mp == M else y[:M]


# ----------------------------------------------------------------------------
# Parameter init (deterministic, synthetic) + fusion + Encoder_p forward
# ----------------------------------------------------------------------------
def init_encoder_p_params(key, n_layers, n_head, d_k, d_v, d_model, d_inner):
    # PyTorch nn.Linear stores weight as (out, in); we store the transposed
    # (in, out) version so the kernel computes x @ W directly.
    def nrm(k, shape):
        return 0.02 * jax.random.normal(k, shape, jnp.float32)

    keys = jax.random.split(key, 1 + n_layers)
    params = {"emb_w": nrm(keys[0], (768, 512)), "layers": []}
    for l in range(n_layers):
        lk = jax.random.split(keys[1 + l], 6)
        params["layers"].append(dict(
            w_qs=nrm(lk[0], (d_model, n_head * d_k)),
            w_ks=nrm(lk[1], (d_model, n_head * d_k)),
            w_vs=nrm(lk[2], (d_model, n_head * d_v)),
            fc=nrm(lk[3], (n_head * d_v, d_model)),
            ln1_g=jnp.ones((d_model,), jnp.float32),
            ln1_b=jnp.zeros((d_model,), jnp.float32),
            ffn_w1=nrm(lk[4], (d_model, d_inner)),
            ffn_b1=jnp.zeros((d_inner,), jnp.float32),
            ffn_w2=nrm(lk[5], (d_inner, d_model)),
            ffn_b2=jnp.zeros((d_model,), jnp.float32),
            ln2_g=jnp.ones((d_model,), jnp.float32),
            ln2_b=jnp.zeros((d_model,), jnp.float32),
        ))
    return params


def fuse_encoder_p_params(params, *, d_k):
    """One-time (outside jit) fusion:
       w_qkv = [w_qs / sqrt(d_k) | w_ks | w_vs], matmul weights cast to bf16,
       biases / LayerNorm params reshaped to (1, N) f32."""
    scale = 1.0 / (d_k ** 0.5)
    bf16 = jnp.bfloat16
    fused = {"emb_w": params["emb_w"].astype(bf16), "layers": []}
    for layer in params["layers"]:
        fused["layers"].append(dict(
            w_qkv=jnp.concatenate(
                [layer["w_qs"] * scale, layer["w_ks"], layer["w_vs"]],
                axis=1).astype(bf16),
            fc=layer["fc"].astype(bf16),
            ln1_g=layer["ln1_g"].reshape(1, -1),
            ln1_b=layer["ln1_b"].reshape(1, -1),
            ffn_w1=layer["ffn_w1"].astype(bf16),
            ffn_b1=layer["ffn_b1"].reshape(1, -1),
            ffn_w2=layer["ffn_w2"].astype(bf16),
            ffn_b2=layer["ffn_b2"].reshape(1, -1),
            ln2_g=layer["ln2_g"].reshape(1, -1),
            ln2_b=layer["ln2_b"].reshape(1, -1),
        ))
    return fused


def encoder_p_forward(params, src_seq, src_mask, *, n_head, d_k, d_v):
    B, L, _ = src_seq.shape
    d_model = params["emb_w"].shape[1]
    M = B * L

    # PyTorch attn.masked_fill(mask == 0, -1e9)  ->  additive bias (0 / -1e9).
    mask_bias = jnp.where(src_mask == 0, jnp.float32(-1e9), jnp.float32(0.0))

    # self.emb : Linear(768, 512, bias=False);  self.dropout : identity (eval)
    x = pallas_embed(src_seq.reshape(M, -1), params["emb_w"])       # (M, d_model)

    for layer in params["layers"]:
        # Fused MultiHeadAttention: QKV + attention + fc + residual + LN (1 launch)
        x = pallas_attention_block(
            x.reshape(B, L, d_model), mask_bias,
            layer["w_qkv"], layer["fc"], layer["ln1_g"], layer["ln1_b"],
            n_head=n_head, d_k=d_k, d_v=d_v).reshape(M, d_model)
        # Fused PositionwiseFeedForward: w1+ReLU + w2 + residual + LN (1 launch)
        x = pallas_ffn_block(
            x, layer["ffn_w1"], layer["ffn_b1"],
            layer["ffn_w2"], layer["ffn_b2"],
            layer["ln2_g"], layer["ln2_b"])

    return x.reshape(B, L, d_model)


# TODO(synk): F_CPI_S does not ship EncoderLayer in this snippet; the standard
# jadore801120 post-LN EncoderLayer (returning only enc_output) is assumed.

if __name__ == "__main__":
    # Small, module-consistent shapes: emb is hard-coded Linear(768 -> 512),
    # so feature-in = 768 and d_model = 512.
    B, L = 2, 8
    n_layers, n_head, d_k, d_v = 2, 4, 64, 64
    d_model, d_inner = 512, 256

    root = jax.random.PRNGKey(0)
    k_param, k_seq = jax.random.split(root)

    raw_params = init_encoder_p_params(k_param, n_layers, n_head, d_k, d_v,
                                       d_model, d_inner)
    params = fuse_encoder_p_params(raw_params, d_k=d_k)

    src_seq = jax.random.normal(k_seq, (B, L, 768), jnp.float32)
    # src_mask: (B, 1, L) int32, 1 = valid token, 0 = padding.
    lengths = jnp.array([L, L - 2], jnp.int32)
    src_mask = (jnp.arange(L)[None, :] < lengths[:, None]).astype(jnp.int32)
    src_mask = src_mask[:, None, :]

    fwd = jax.jit(functools.partial(encoder_p_forward,
                                    n_head=n_head, d_k=d_k, d_v=d_v))
    out = fwd(params, src_seq, src_mask)
    out = jax.block_until_ready(out)
    assert out.shape == (B, L, d_model) and bool(jnp.all(jnp.isfinite(out)))
    print("KERNEL_OK")
</pallas_src>

<mosaic_0001>
module attributes {stable_mosaic.version = 11 : i64} {
  func.func @_embed_kernel(%arg0: i32, %arg1: memref<8x768xf32, #tpu.memory_space<vmem>>, %arg2: memref<768x512xbf16, #tpu.memory_space<vmem>>, %arg3: memref<8x512xf32, #tpu.memory_space<vmem>>) attributes {dimension_semantics = [#tpu.dimension_semantics<parallel>], iteration_bounds = array<i64: 2>, scalar_prefetch = 0 : i64, scratch_operands = 0 : i64, tpu.core_type = #tpu.core_type<tc>, window_params = [{transform_indices = @transform_0, window_bounds = array<i64: 8, 768>}, {pipeline_mode = #tpu.pipeline_mode<synchronous>, transform_indices = @transform_1, window_bounds = array<i64: 768, 512>}, {transform_indices = @transform_2, window_bounds = array<i64: 8, 512>}]} {
    %c0 = arith.constant 0 : index
    %c0_0 = arith.constant 0 : index
    %0 = vector.load %arg1[%c0, %c0_0] : memref<8x768xf32, #tpu.memory_space<vmem>>, vector<8x768xf32>
    %1 = arith.truncf %0 : vector<8x768xf32> to vector<8x768xbf16>
    %c0_1 = arith.constant 0 : index
    %c0_2 = arith.constant 0 : index
    %2 = vector.load %arg2[%c0_1, %c0_2] : memref<768x512xbf16, #tpu.memory_space<vmem>>, vector<768x512xbf16>
    %cst = arith.constant dense<0.000000e+00> : vector<8x512xf32>
    %3 = tpu.matmul %1, %2, %cst {dimension_numbers = #tpu.dot_dimension_numbers<[1], [0], [0], [1], [0, 0, 1, 1], [], []>} : vector<8x768xbf16>, vector<768x512xbf16>, vector<8x512xf32> -> vector<8x512xf32>
    %c0_3 = arith.constant 0 : index
    %c0_4 = arith.constant 0 : index
    %4 = vector.load %arg3[%c0_3, %c0_4] : memref<8x512xf32, #tpu.memory_space<vmem>>, vector<8x512xf32>
    tpu.vector_store %arg3[%c0_3, %c0_4], %3 {strides = array<i32>} : memref<8x512xf32, #tpu.memory_space<vmem>>, vector<8x512xf32>,
    return
  }
  func.func @transform_0(%arg0: i32) -> (i32, i32) {
    %c0_i32 = arith.constant 0 : i32
    %c0_i32_0 = arith.constant 0 : i32
    return %arg0, %c0_i32 : i32, i32
  }
  func.func @transform_1(%arg0: i32) -> (i32, i32) {
    %c0_i32 = arith.constant 0 : i32
    %c0_i32_0 = arith.constant 0 : i32
    %c0_i32_1 = arith.constant 0 : i32
    return %c0_i32, %c0_i32_0 : i32, i32
  }
  func.func @transform_2(%arg0: i32) -> (i32, i32) {
    %c0_i32 = arith.constant 0 : i32
    %c0_i32_0 = arith.constant 0 : i32
    return %arg0, %c0_i32 : i32, i32
  }
}

module attributes {stable_mosaic.version = 11 : i64} {
  func.func @_ffn_block_kernel(%arg0: i32, %arg1: memref<8x512xf32, #tpu.memory_space<vmem>>, %arg2: memref<512x256xbf16, #tpu.memory_space<vmem>>, %arg3: memref<1x256xf32, #tpu.memory_space<vmem>>, %arg4: memref<256x512xbf16, #tpu.memory_space<vmem>>, %arg5: memref<1x512xf32, #tpu.memory_space<vmem>>, %arg6: memref<1x512xf32, #tpu.memory_space<vmem>>, %arg7: memref<1x512xf32, #tpu.memory_space<vmem>>, %arg8: memref<8x512xf32, #tpu.memory_space<vmem>>) attributes {dimension_semantics = [#tpu.dimension_semantics<parallel>], iteration_bounds = array<i64: 2>, scalar_prefetch = 0 : i64, scratch_operands = 0 : i64, tpu.core_type = #tpu.core_type<tc>, window_params = [{transform_indices = @transform_0, window_bounds = array<i64: 8, 512>}, {pipeline_mode = #tpu.pipeline_mode<synchronous>, transform_indices = @transform_1, window_bounds = array<i64: 512, 256>}, {pipeline_mode = #tpu.pipeline_mode<synchronous>, transform_indices = @transform_2, window_bounds = array<i64: 1, 256>}, {pipeline_mode = #tpu.pipeline_mode<synchronous>, transform_indices = @transform_3, window_bounds = array<i64: 256, 512>}, {pipeline_mode = #tpu.pipeline_mode<synchronous>, transform_indices = @transform_4, window_bounds = array<i64: 1, 512>}, {pipeline_mode = #tpu.pipeline_mode<synchronous>, transform_indices = @transform_5, window_bounds = array<i64: 1, 512>}, {pipeline_mode = #tpu.pipeline_mode<synchronous>, transform_indices = @transform_6, window_bounds = array<i64: 1, 512>}, {transform_indices = @transform_7, window_bounds = array<i64: 8, 512>}]} {
    %c0 = arith.constant 0 : index
    %c0_0 = arith.constant 0 : index
    %0 = vector.load %arg1[%c0, %c0_0] : memref<8x512xf32, #tpu.memory_space<vmem>>, vector<8x512xf32>
    %1 = arith.truncf %0 : vector<8x512xf32> to vector<8x512xbf16>
    %c0_1 = arith.constant 0 : index
    %c0_2 = arith.constant 0 : index
    %2 = vector.load %arg2[%c0_1, %c0_2] : memref<512x256xbf16, #tpu.memory_space<vmem>>, vector<512x256xbf16>
    %cst = arith.constant dense<0.000000e+00> : vector<8x256xf32>
    %3 = tpu.matmul %1, %2, %cst {dimension_numbers = #tpu.dot_dimension_numbers<[1], [0], [0], [1], [0, 0, 1, 1], [], []>} : vector<8x512xbf16>, vector<512x256xbf16>, vector<8x256xf32> -> vector<8x256xf32>
    %c0_3 = arith.constant 0 : index
    %c0_4 = arith.constant 0 : index
    %4 = vector.load %arg3[%c0_3, %c0_4] : memref<1x256xf32, #tpu.memory_space<vmem>>, vector<1x256xf32>
    %5 = vector.broadcast %4 : vector<1x256xf32> to vector<8x256xf32>
    %6 = arith.addf %3, %5 : vector<8x256xf32>
    %cst_5 = arith.constant 0.000000e+00 : f32
    %7 = vector.broadcast %cst_5 : f32 to vector<8x256xf32>
    %8 = arith.maximumf %6, %7 : vector<8x256xf32>
    %9 = arith.truncf %8 : vector<8x256xf32> to vector<8x256xbf16>
    %c0_6 = arith.constant 0 : index
    %c0_7 = arith.constant 0 : index
    %10 = vector.load %arg4[%c0_6, %c0_7] : memref<256x512xbf16, #tpu.memory_space<vmem>>, vector<256x512xbf16>
    %cst_8 = arith.constant dense<0.000000e+00> : vector<8x512xf32>
    %11 = tpu.matmul %9, %10, %cst_8 {dimension_numbers = #tpu.dot_dimension_numbers<[1], [0], [0], [1], [0, 0, 1, 1], [], []>} : vector<8x256xbf16>, vector<256x512xbf16>, vector<8x512xf32> -> vector<8x512xf32>
    %c0_9 = arith.constant 0 : index
    %c0_10 = arith.constant 0 : index
    %12 = vector.load %arg5[%c0_9, %c0_10] : memref<1x512xf32, #tpu.memory_space<vmem>>, vector<1x512xf32>
    %13 = vector.broadcast %12 : vector<1x512xf32> to vector<8x512xf32>
    %14 = arith.addf %11, %13 : vector<8x512xf32>
    %15 = arith.addf %14, %0 : vector<8x512xf32>
    %cst_11 = arith.constant dense<0.000000e+00> : vector<8xf32>
    %16 = vector.multi_reduction <add>, %15, %cst_11 [1] : vector<8x512xf32> to vector<8xf32>
    %17 = vector.shape_cast %16 : vector<8xf32> to vector<8x1xf32>
    %cst_12 = arith.constant 5.120000e+02 : f32
    %18 = vector.broadcast %cst_12 : f32 to vector<8x1xf32>
    %19 = arith.divf %17, %18 : vector<8x1xf32>
    %20 = vector.broadcast %19 : vector<8x1xf32> to vector<8x512xf32>
    %21 = arith.subf %15, %20 : vector<8x512xf32>
    %22 = arith.mulf %21, %21 : vector<8x512xf32>
    %cst_13 = arith.constant dense<0.000000e+00> : vector<8xf32>
    %23 = vector.multi_reduction <add>, %22, %cst_13 [1] : vector<8x512xf32> to vector<8xf32>
    %24 = vector.shape_cast %23 : vector<8xf32> to vector<8x1xf32>
    %cst_14 = arith.constant 5.120000e+02 : f32
    %25 = vector.broadcast %cst_14 : f32 to vector<8x1xf32>
    %26 = arith.divf %24, %25 : vector<8x1xf32>
    %27 = vector.broadcast %19 : vector<8x1xf32> to vector<8x512xf32>
    %28 = arith.subf %15, %27 : vector<8x512xf32>
    %cst_15 = arith.constant 9.99999997E-7 : f32
    %29 = vector.broadcast %cst_15 : f32 to vector<8x1xf32>
    %30 = arith.addf %26, %29 : vector<8x1xf32>
    %31 = math.rsqrt %30 : vector<8x1xf32>
    %32 = vector.broadcast %31 : vector<8x1xf32> to vector<8x512xf32>
    %33 = arith.mulf %28, %32 : vector<8x512xf32>
    %c0_16 = arith.constant 0 : index
    %c0_17 = arith.constant 0 : index
    %34 = vector.load %arg6[%c0_16, %c0_17] : memref<1x512xf32, #tpu.memory_space<vmem>>, vector<1x512xf32>
    %35 = vector.broadcast %34 : vector<1x512xf32> to vector<8x512xf32>
    %36 = arith.mulf %33, %35 : vector<8x512xf32>
    %c0_18 = arith.constant 0 : index
    %c0_19 = arith.constant 0 : index
    %37 = vector.load %arg7[%c0_18, %c0_19] : memref<1x512xf32, #tpu.memory_space<vmem>>, vector<1x512xf32>
    %38 = vector.broadcast %37 : vector<1x512xf32> to vector<8x512xf32>
    %39 = arith.addf %36, %38 : vector<8x512xf32>
    %c0_20 = arith.constant 0 : index
    %c0_21 = arith.constant 0 : index
    %40 = vector.load %arg8[%c0_20, %c0_21] : memref<8x512xf32, #tpu.memory_space<vmem>>, vector<8x512xf32>
    tpu.vector_store %arg8[%c0_20, %c0_21], %39 {strides = array<i32>} : memref<8x512xf32, #tpu.memory_space<vmem>>, vector<8x512xf32>,
    return
  }
  func.func @transform_0(%arg0: i32) -> (i32, i32) {
    %c0_i32 = arith.constant 0 : i32
    %c0_i32_0 = arith.constant 0 : i32
    return %arg0, %c0_i32 : i32, i32
  }
  func.func @transform_1(%arg0: i32) -> (i32, i32) {
    %c0_i32 = arith.constant 0 : i32
    %c0_i32_0 = arith.constant 0 : i32
    %c0_i32_1 = arith.constant 0 : i32
    return %c0_i32, %c0_i32_0 : i32, i32
  }
  func.func @transform_2(%arg0: i32) -> (i32, i32) {
    %c0_i32 = arith.constant 0 : i32
    %c0_i32_0 = arith.constant 0 : i32
    %c0_i32_1 = arith.constant 0 : i32
    return %c0_i32, %c0_i32_0 : i32, i32
  }
  func.func @transform_3(%arg0: i32) -> (i32, i32) {
    %c0_i32 = arith.constant 0 : i32
    %c0_i32_0 = arith.constant 0 : i32
    %c0_i32_1 = arith.constant 0 : i32
    return %c0_i32, %c0_i32_0 : i32, i32
  }
  func.func @transform_4(%arg0: i32) -> (i32, i32) {
    %c0_i32 = arith.constant 0 : i32
    %c0_i32_0 = arith.constant 0 : i32
    %c0_i32_1 = arith.constant 0 : i32
    return %c0_i32, %c0_i32_0 : i32, i32
  }
  func.func @transform_5(%arg0: i32) -> (i32, i32) {
    %c0_i32 = arith.constant 0 : i32
    %c0_i32_0 = arith.constant 0 : i32
    %c0_i32_1 = arith.constant 0 : i32
    return %c0_i32, %c0_i32_0 : i32, i32
  }
  func.func @transform_6(%arg0: i32) -> (i32, i32) {
    %c0_i32 = arith.constant 0 : i32
    %c0_i32_0 = arith.constant 0 : i32
    %c0_i32_1 = arith.constant 0 : i32
    return %c0_i32, %c0_i32_0 : i32, i32
  }
  func.func @transform_7(%arg0: i32) -> (i32, i32) {
    %c0_i32 = arith.constant 0 : i32
    %c0_i32_0 = arith.constant 0 : i32
    return %arg0, %c0_i32 : i32, i32
  }
}

module attributes {stable_mosaic.version = 11 : i64} {
  func.func @_attn_block_kernel(%arg0: i32, %arg1: memref<1x8x512xf32, #tpu.memory_space<vmem>>, %arg2: memref<1x1x8xf32, #tpu.memory_space<vmem>>, %arg3: memref<512x768xbf16, #tpu.memory_space<vmem>>, %arg4: memref<256x512xbf16, #tpu.memory_space<vmem>>, %arg5: memref<1x512xf32, #tpu.memory_space<vmem>>, %arg6: memref<1x512xf32, #tpu.memory_space<vmem>>, %arg7: memref<1x8x512xf32, #tpu.memory_space<vmem>>) attributes {dimension_semantics = [#tpu.dimension_semantics<parallel>], iteration_bounds = array<i64: 2>, scalar_prefetch = 0 : i64, scratch_operands = 0 : i64, tpu.core_type = #tpu.core_type<tc>, window_params = [{transform_indices = @transform_0, window_bounds = array<i64: 1, 8, 512>}, {transform_indices = @transform_1, window_bounds = array<i64: 1, 1, 8>}, {pipeline_mode = #tpu.pipeline_mode<synchronous>, transform_indices = @transform_2, window_bounds = array<i64: 512, 768>}, {pipeline_mode = #tpu.pipeline_mode<synchronous>, transform_indices = @transform_3, window_bounds = array<i64: 256, 512>}, {pipeline_mode = #tpu.pipeline_mode<synchronous>, transform_indices = @transform_4, window_bounds = array<i64: 1, 512>}, {pipeline_mode = #tpu.pipeline_mode<synchronous>, transform_indices = @transform_5, window_bounds = array<i64: 1, 512>}, {transform_indices = @transform_6, window_bounds = array<i64: 1, 8, 512>}]} {
    %c0 = arith.constant 0 : index
    %c0_0 = arith.constant 0 : index
    %c0_1 = arith.constant 0 : index
    %0 = vector.load %arg1[%c0, %c0_0, %c0_1] : memref<1x8x512xf32, #tpu.memory_space<vmem>>, vector<1x8x512xf32>
    %1 = vector.shape_cast %0 : vector<1x8x512xf32> to vector<8x512xf32>
    %c0_2 = arith.constant 0 : index
    %c0_3 = arith.constant 0 : index
    %c0_4 = arith.constant 0 : index
    %2 = vector.load %arg2[%c0_2, %c0_3, %c0_4] : memref<1x1x8xf32, #tpu.memory_space<vmem>>, vector<1x1x8xf32>
    %3 = vector.shape_cast %2 : vector<1x1x8xf32> to vector<1x8xf32>
    %4 = arith.truncf %1 : vector<8x512xf32> to vector<8x512xbf16>
    %c0_5 = arith.constant 0 : index
    %c0_6 = arith.constant 0 : index
    %5 = vector.load %arg3[%c0_5, %c0_6] : memref<512x768xbf16, #tpu.memory_space<vmem>>, vector<512x768xbf16>
    %cst = arith.constant dense<0.000000e+00> : vector<8x768xf32>
    %6 = tpu.matmul %4, %5, %cst {dimension_numbers = #tpu.dot_dimension_numbers<[1], [0], [0], [1], [0, 0, 1, 1], [], []>} : vector<8x512xbf16>, vector<512x768xbf16>, vector<8x768xf32> -> vector<8x768xf32>
    %7 = vector.extract_strided_slice %6 {offsets = [0, 0], sizes = [8, 64], strides = [1, 1]} : vector<8x768xf32> to vector<8x64xf32>
    %8 = vector.extract_strided_slice %6 {offsets = [0, 256], sizes = [8, 64], strides = [1, 1]} : vector<8x768xf32> to vector<8x64xf32>
    %9 = vector.extract_strided_slice %6 {offsets = [0, 512], sizes = [8, 64], strides = [1, 1]} : vector<8x768xf32> to vector<8x64xf32>
    %10 = arith.truncf %7 : vector<8x64xf32> to vector<8x64xbf16>
    %11 = arith.truncf %8 : vector<8x64xf32> to vector<8x64xbf16>
    %cst_7 = arith.constant dense<0.000000e+00> : vector<8x8xf32>
    %12 = tpu.matmul %10, %11, %cst_7 {dimension_numbers = #tpu.dot_dimension_numbers<[1], [1], [0], [0], [0, 0, 1, 0], [], []>} : vector<8x64xbf16>, vector<8x64xbf16>, vector<8x8xf32> -> vector<8x8xf32>
    %13 = vector.broadcast %3 : vector<1x8xf32> to vector<8x8xf32>
    %14 = arith.addf %12, %13 : vector<8x8xf32>
    %cst_8 = arith.constant dense<0xFF800000> : vector<8xf32>
    %15 = vector.multi_reduction <maximumf>, %14, %cst_8 [1] : vector<8x8xf32> to vector<8xf32>
    %16 = vector.shape_cast %15 : vector<8xf32> to vector<8x1xf32>
    %17 = vector.broadcast %16 : vector<8x1xf32> to vector<8x8xf32>
    %18 = arith.subf %14, %17 : vector<8x8xf32>
    %19 = math.exp %18 : vector<8x8xf32>
    %cst_9 = arith.constant dense<0.000000e+00> : vector<8xf32>
    %20 = vector.multi_reduction <add>, %19, %cst_9 [1] : vector<8x8xf32> to vector<8xf32>
    %21 = vector.shape_cast %20 : vector<8xf32> to vector<8x1xf32>
    %22 = tpu.reciprocal %21 {approx = true} : vector<8x1xf32> -> vector<8x1xf32>
    %23 = vector.broadcast %22 : vector<8x1xf32> to vector<8x8xf32>
    %24 = arith.mulf %19, %23 : vector<8x8xf32>
    %25 = arith.truncf %24 : vector<8x8xf32> to vector<8x8xbf16>
    %26 = arith.truncf %9 : vector<8x64xf32> to vector<8x64xbf16>
    %cst_10 = arith.constant dense<0.000000e+00> : vector<8x64xf32>
    %27 = tpu.matmul %25, %26, %cst_10 {dimension_numbers = #tpu.dot_dimension_numbers<[1], [0], [0], [1], [0, 0, 1, 1], [], []>} : vector<8x8xbf16>, vector<8x64xbf16>, vector<8x64xf32> -> vector<8x64xf32>
    %28 = arith.truncf %27 : vector<8x64xf32> to vector<8x64xbf16>
    %c0_11 = arith.constant 0 : index
    %c0_12 = arith.constant 0 : index
    %29 = vector.load %arg4[%c0_11, %c0_12] : memref<256x512xbf16, #tpu.memory_space<vmem>>, vector<64x512xbf16>
    %cst_13 = arith.constant dense<0.000000e+00> : vector<8x512xf32>
    %30 = tpu.matmul %28, %29, %cst_13 {dimension_numbers = #tpu.dot_dimension_numbers<[1], [0], [0], [1], [0, 0, 1, 1], [], []>} : vector<8x64xbf16>, vector<64x512xbf16>, vector<8x512xf32> -> vector<8x512xf32>
    %31 = arith.addf %1, %30 : vector<8x512xf32>
    %32 = vector.extract_strided_slice %6 {offsets = [0, 64], sizes = [8, 64], strides = [1, 1]} : vector<8x768xf32> to vector<8x64xf32>
    %33 = vector.extract_strided_slice %6 {offsets = [0, 320], sizes = [8, 64], strides = [1, 1]} : vector<8x768xf32> to vector<8x64xf32>
    %34 = vector.extract_strided_slice %6 {offsets = [0, 576], sizes = [8, 64], strides = [1, 1]} : vector<8x768xf32> to vector<8x64xf32>
    %35 = arith.truncf %32 : vector<8x64xf32> to vector<8x64xbf16>
    %36 = arith.truncf %33 : vector<8x64xf32> to vector<8x64xbf16>
    %cst_14 = arith.constant dense<0.000000e+00> : vector<8x8xf32>
    %37 = tpu.matmul %35, %36, %cst_14 {dimension_numbers = #tpu.dot_dimension_numbers<[1], [1], [0], [0], [0, 0, 1, 0], [], []>} : vector<8x64xbf16>, vector<8x64xbf16>, vector<8x8xf32> -> vector<8x8xf32>
    %38 = vector.broadcast %3 : vector<1x8xf32> to vector<8x8xf32>
    %39 = arith.addf %37, %38 : vector<8x8xf32>
    %cst_15 = arith.constant dense<0xFF800000> : vector<8xf32>
    %40 = vector.multi_reduction <maximumf>, %39, %cst_15 [1] : vector<8x8xf32> to vector<8xf32>
    %41 = vector.shape_cast %40 : vector<8xf32> to vector<8x1xf32>
    %42 = vector.broadcast %41 : vector<8x1xf32> to vector<8x8xf32>
    %43 = arith.subf %39, %42 : vector<8x8xf32>
    %44 = math.exp %43 : vector<8x8xf32>
    %cst_16 = arith.constant dense<0.000000e+00> : vector<8xf32>
    %45 = vector.multi_reduction <add>, %44, %cst_16 [1] : vector<8x8xf32> to vector<8xf32>
    %46 = vector.shape_cast %45 : vector<8xf32> to vector<8x1xf32>
    %47 = tpu.reciprocal %46 {approx = true} : vector<8x1xf32> -> vector<8x1xf32>
    %48 = vector.broadcast %47 : vector<8x1xf32> to vector<8x8xf32>
    %49 = arith.mulf %44, %48 : vector<8x8xf32>
    %50 = arith.truncf %49 : vector<8x8xf32> to vector<8x8xbf16>
    %51 = arith.truncf %34 : vector<8x64xf32> to vector<8x64xbf16>
    %cst_17 = arith.constant dense<0.000000e+00> : vector<8x64xf32>
    %52 = tpu.matmul %50, %51, %cst_17 {dimension_numbers = #tpu.dot_dimension_numbers<[1], [0], [0], [1], [0, 0, 1, 1], [], []>} : vector<8x8xbf16>, vector<8x64xbf16>, vector<8x64xf32> -> vector<8x64xf32>
    %53 = arith.truncf %52 : vector<8x64xf32> to vector<8x64xbf16>
    %c64 = arith.constant 64 : index
    %c0_18 = arith.constant 0 : index
    %54 = vector.load %arg4[%c64, %c0_18] : memref<256x512xbf16, #tpu.memory_space<vmem>>, vector<64x512xbf16>
    %cst_19 = arith.constant dense<0.000000e+00> : vector<8x512xf32>
    %55 = tpu.matmul %53, %54, %cst_19 {dimension_numbers = #tpu.dot_dimension_numbers<[1], [0], [0], [1], [0, 0, 1, 1], [], []>} : vector<8x64xbf16>, vector<64x512xbf16>, vector<8x512xf32> -> vector<8x512xf32>
    %56 = arith.addf %31, %55 : vector<8x512xf32>
    %57 = vector.extract_strided_slice %6 {offsets = [0, 128], sizes = [8, 64], strides = [1, 1]} : vector<8x768xf32> to vector<8x64xf32>
    %58 = vector.extract_strided_slice %6 {offsets = [0, 384], sizes = [8, 64], strides = [1, 1]} : vector<8x768xf32> to vector<8x64xf32>
    %59 = vector.extract_strided_slice %6 {offsets = [0, 640], sizes = [8, 64], strides = [1, 1]} : vector<8x768xf32> to vector<8x64xf32>
    %60 = arith.truncf %57 : vector<8x64xf32> to vector<8x64xbf16>
    %61 = arith.truncf %58 : vector<8x64xf32> to vector<8x64xbf16>
    %cst_20 = arith.constant dense<0.000000e+00> : vector<8x8xf32>
    %62 = tpu.matmul %60, %61, %cst_20 {dimension_numbers = #tpu.dot_dimension_numbers<[1], [1], [0], [0], [0, 0, 1, 0], [], []>} : vector<8x64xbf16>, vector<8x64xbf16>, vector<8x8xf32> -> vector<8x8xf32>
    %63 = vector.broadcast %3 : vector<1x8xf32> to vector<8x8xf32>
    %64 = arith.addf %62, %63 : vector<8x8xf32>
    %cst_21 = arith.constant dense<0xFF800000> : vector<8xf32>
    %65 = vector.multi_reduction <maximumf>, %64, %cst_21 [1] : vector<8x8xf32> to vector<8xf32>
    %66 = vector.shape_cast %65 : vector<8xf32> to vector<8x1xf32>
    %67 = vector.broadcast %66 : vector<8x1xf32> to vector<8x8xf32>
    %68 = arith.subf %64, %67 : vector<8x8xf32>
    %69 = math.exp %68 : vector<8x8xf32>
    %cst_22 = arith.constant dense<0.000000e+00> : vector<8xf32>
    %70 = vector.multi_reduction <add>, %69, %cst_22 [1] : vector<8x8xf32> to vector<8xf32>
    %71 = vector.shape_cast %70 : vector<8xf32> to vector<8x1xf32>
    %72 = tpu.reciprocal %71 {approx = true} : vector<8x1xf32> -> vector<8x1xf32>
    %73 = vector.broadcast %72 : vector<8x1xf32> to vector<8x8xf32>
    %74 = arith.mulf %69, %73 : vector<8x8xf32>
    %75 = arith.truncf %74 : vector<8x8xf32> to vector<8x8xbf16>
    %76 = arith.truncf %59 : vector<8x64xf32> to vector<8x64xbf16>
    %cst_23 = arith.constant dense<0.000000e+00> : vector<8x64xf32>
    %77 = tpu.matmul %75, %76, %cst_23 {dimension_numbers = #tpu.dot_dimension_numbers<[1], [0], [0], [1], [0, 0, 1, 1], [], []>} : vector<8x8xbf16>, vector<8x64xbf16>, vector<8x64xf32> -> vector<8x64xf32>
    %78 = arith.truncf %77 : vector<8x64xf32> to vector<8x64xbf16>
    %c128 = arith.constant 128 : index
    %c0_24 = arith.constant 0 : index
    %79 = vector.load %arg4[%c128, %c0_24] : memref<256x512xbf16, #tpu.memory_space<vmem>>, vector<64x512xbf16>
    %cst_25 = arith.constant dense<0.000000e+00> : vector<8x512xf32>
    %80 = tpu.matmul %78, %79, %cst_25 {dimension_numbers = #tpu.dot_dimension_numbers<[1], [0], [0], [1], [0, 0, 1, 1], [], []>} : vector<8x64xbf16>, vector<64x512xbf16>, vector<8x512xf32> -> vector<8x512xf32>
    %81 = arith.addf %56, %80 : vector<8x512xf32>
    %82 = vector.extract_strided_slice %6 {offsets = [0, 192], sizes = [8, 64], strides = [1, 1]} : vector<8x768xf32> to vector<8x64xf32>
    %83 = vector.extract_strided_slice %6 {offsets = [0, 448], sizes = [8, 64], strides = [1, 1]} : vector<8x768xf32> to vector<8x64xf32>
    %84 = vector.extract_strided_slice %6 {offsets = [0, 704], sizes = [8, 64], strides = [1, 1]} : vector<8x768xf32> to vector<8x64xf32>
    %85 = arith.truncf %82 : vector<8x64xf32> to vector<8x64xbf16>
    %86 = arith.truncf %83 : vector<8x64xf32> to vector<8x64xbf16>
    %cst_26 = arith.constant dense<0.000000e+00> : vector<8x8xf32>
    %87 = tpu.matmul %85, %86, %cst_26 {dimension_numbers = #tpu.dot_dimension_numbers<[1], [1], [0], [0], [0, 0, 1, 0], [], []>} : vector<8x64xbf16>, vector<8x64xbf16>, vector<8x8xf32> -> vector<8x8xf32>
    %88 = vector.broadcast %3 : vector<1x8xf32> to vector<8x8xf32>
    %89 = arith.addf %87, %88 : vector<8x8xf32>
    %cst_27 = arith.constant dense<0xFF800000> : vector<8xf32>
    %90 = vector.multi_reduction <maximumf>, %89, %cst_27 [1] : vector<8x8xf32> to vector<8xf32>
    %91 = vector.shape_cast %90 : vector<8xf32> to vector<8x1xf32>
    %92 = vector.broadcast %91 : vector<8x1xf32> to vector<8x8xf32>
    %93 = arith.subf %89, %92 : vector<8x8xf32>
    %94 = math.exp %93 : vector<8x8xf32>
    %cst_28 = arith.constant dense<0.000000e+00> : vector<8xf32>
    %95 = vector.multi_reduction <add>, %94, %cst_28 [1] : vector<8x8xf32> to vector<8xf32>
    %96 = vector.shape_cast %95 : vector<8xf32> to vector<8x1xf32>
    %97 = tpu.reciprocal %96 {approx = true} : vector<8x1xf32> -> vector<8x1xf32>
    %98 = vector.broadcast %97 : vector<8x1xf32> to vector<8x8xf32>
    %99 = arith.mulf %94, %98 : vector<8x8xf32>
    %100 = arith.truncf %99 : vector<8x8xf32> to vector<8x8xbf16>
    %101 = arith.truncf %84 : vector<8x64xf32> to vector<8x64xbf16>
    %cst_29 = arith.constant dense<0.000000e+00> : vector<8x64xf32>
    %102 = tpu.matmul %100, %101, %cst_29 {dimension_numbers = #tpu.dot_dimension_numbers<[1], [0], [0], [1], [0, 0, 1, 1], [], []>} : vector<8x8xbf16>, vector<8x64xbf16>, vector<8x64xf32> -> vector<8x64xf32>
    %103 = arith.truncf %102 : vector<8x64xf32> to vector<8x64xbf16>
    %c192 = arith.constant 192 : index
    %c0_30 = arith.constant 0 : index
    %104 = vector.load %arg4[%c192, %c0_30] : memref<256x512xbf16, #tpu.memory_space<vmem>>, vector<64x512xbf16>
    %cst_31 = arith.constant dense<0.000000e+00> : vector<8x512xf32>
    %105 = tpu.matmul %103, %104, %cst_31 {dimension_numbers = #tpu.dot_dimension_numbers<[1], [0], [0], [1], [0, 0, 1, 1], [], []>} : vector<8x64xbf16>, vector<64x512xbf16>, vector<8x512xf32> -> vector<8x512xf32>
    %106 = arith.addf %81, %105 : vector<8x512xf32>
    %cst_32 = arith.constant dense<0.000000e+00> : vector<8xf32>
    %107 = vector.multi_reduction <add>, %106, %cst_32 [1] : vector<8x512xf32> to vector<8xf32>
    %108 = vector.shape_cast %107 : vector<8xf32> to vector<8x1xf32>
    %cst_33 = arith.constant 5.120000e+02 : f32
    %109 = vector.broadcast %cst_33 : f32 to vector<8x1xf32>
    %110 = arith.divf %108, %109 : vector<8x1xf32>
    %111 = vector.broadcast %110 : vector<8x1xf32> to vector<8x512xf32>
    %112 = arith.subf %106, %111 : vector<8x512xf32>
    %113 = arith.mulf %112, %112 : vector<8x512xf32>
    %cst_34 = arith.constant dense<0.000000e+00> : vector<8xf32>
    %114 = vector.multi_reduction <add>, %113, %cst_34 [1] : vector<8x512xf32> to vector<8xf32>
    %115 = vector.shape_cast %114 : vector<8xf32> to vector<8x1xf32>
    %cst_35 = arith.constant 5.120000e+02 : f32
    %116 = vector.broadcast %cst_35 : f32 to vector<8x1xf32>
    %117 = arith.divf %115, %116 : vector<8x1xf32>
    %118 = vector.broadcast %110 : vector<8x1xf32> to vector<8x512xf32>
    %119 = arith.subf %106, %118 : vector<8x512xf32>
    %cst_36 = arith.constant 9.99999997E-7 : f32
    %120 = vector.broadcast %cst_36 : f32 to vector<8x1xf32>
    %121 = arith.addf %117, %120 : vector<8x1xf32>
    %122 = math.rsqrt %121 : vector<8x1xf32>
    %123 = vector.broadcast %122 : vector<8x1xf32> to vector<8x512xf32>
    %124 = arith.mulf %119, %123 : vector<8x512xf32>
    %c0_37 = arith.constant 0 : index
    %c0_38 = arith.constant 0 : index
    %125 = vector.load %arg5[%c0_37, %c0_38] : memref<1x512xf32, #tpu.memory_space<vmem>>, vector<1x512xf32>
    %126 = vector.broadcast %125 : vector<1x512xf32> to vector<8x512xf32>
    %127 = arith.mulf %124, %126 : vector<8x512xf32>
    %c0_39 = arith.constant 0 : index
    %c0_40 = arith.constant 0 : index
    %128 = vector.load %arg6[%c0_39, %c0_40] : memref<1x512xf32, #tpu.memory_space<vmem>>, vector<1x512xf32>
    %129 = vector.broadcast %128 : vector<1x512xf32> to vector<8x512xf32>
    %130 = arith.addf %127, %129 : vector<8x512xf32>
    %c0_41 = arith.constant 0 : index
    %c0_42 = arith.constant 0 : index
    %c0_43 = arith.constant 0 : index
    %131 = vector.load %arg7[%c0_41, %c0_42, %c0_43] : memref<1x8x512xf32, #tpu.memory_space<vmem>>, vector<1x8x512xf32>
    %132 = vector.shape_cast %131 : vector<1x8x512xf32> to vector<8x512xf32>
    %133 = vector.shape_cast %130 : vector<8x512xf32> to vector<1x8x512xf32>
    tpu.vector_store %arg7[%c0_41, %c0_42, %c0_43], %133 {strides = array<i32>} : memref<1x8x512xf32, #tpu.memory_space<vmem>>, vector<1x8x512xf32>,
    return
  }
  func.func @transform_0(%arg0: i32) -> (i32, i32, i32) {
    %c0_i32 = arith.constant 0 : i32
    %c0_i32_0 = arith.constant 0 : i32
    %c0_i32_1 = arith.constant 0 : i32
    return %arg0, %c0_i32, %c0_i32_0 : i32, i32, i32
  }
  func.func @transform_1(%arg0: i32) -> (i32, i32, i32) {
    %c0_i32 = arith.constant 0 : i32
    %c0_i32_0 = arith.constant 0 : i32
    %c0_i32_1 = arith.constant 0 : i32
    return %arg0, %c0_i32, %c0_i32_0 : i32, i32, i32
  }
  func.func @transform_2(%arg0: i32) -> (i32, i32) {
    %c0_i32 = arith.constant 0 : i32
    %c0_i32_0 = arith.constant 0 : i32
    %c0_i32_1 = arith.constant 0 : i32
    return %c0_i32, %c0_i32_0 : i32, i32
  }
  func.func @transform_3(%arg0: i32) -> (i32, i32) {
    %c0_i32 = arith.constant 0 : i32
    %c0_i32_0 = arith.constant 0 : i32
    %c0_i32_1 = arith.constant 0 : i32
    return %c0_i32, %c0_i32_0 : i32, i32
  }
  func.func @transform_4(%arg0: i32) -> (i32, i32) {
    %c0_i32 = arith.constant 0 : i32
    %c0_i32_0 = arith.constant 0 : i32
    %c0_i32_1 = arith.constant 0 : i32
    return %c0_i32, %c0_i32_0 : i32, i32
  }
  func.func @transform_5(%arg0: i32) -> (i32, i32) {
    %c0_i32 = arith.constant 0 : i32
    %c0_i32_0 = arith.constant 0 : i32
    %c0_i32_1 = arith.constant 0 : i32
    return %c0_i32, %c0_i32_0 : i32, i32
  }
  func.func @transform_6(%arg0: i32) -> (i32, i32, i32) {
    %c0_i32 = arith.constant 0 : i32
    %c0_i32_0 = arith.constant 0 : i32
    %c0_i32_1 = arith.constant 0 : i32
    return %arg0, %c0_i32, %c0_i32_0 : i32, i32, i32
  }
}

module attributes {stable_mosaic.version = 11 : i64} {
  func.func @_attn_block_kernel(%arg0: i32, %arg1: memref<1x8x512xf32, #tpu.memory_space<vmem>>, %arg2: memref<1x1x8xf32, #tpu.memory_space<vmem>>, %arg3: memref<512x768xbf16, #tpu.memory_space<vmem>>, %arg4: memref<256x512xbf16, #tpu.memory_space<vmem>>, %arg5: memref<1x512xf32, #tpu.memory_space<vmem>>, %arg6: memref<1x512xf32, #tpu.memory_space<vmem>>, %arg7: memref<1x8x512xf32, #tpu.memory_space<vmem>>) attributes {dimension_semantics = [#tpu.dimension_semantics<parallel>], iteration_bounds = array<i64: 2>, scalar_prefetch = 0 : i64, scratch_operands = 0 : i64, tpu.core_type = #tpu.core_type<tc>, window_params = [{transform_indices = @transform_0, window_bounds = array<i64: 1, 8, 512>}, {transform_indices = @transform_1, window_bounds = array<i64: 1, 1, 8>}, {pipeline_mode = #tpu.pipeline_mode<synchronous>, transform_indices = @transform_2, window_bounds = array<i64: 512, 768>}, {pipeline_mode = #tpu.pipeline_mode<synchronous>, transform_indices = @transform_3, window_bounds = array<i64: 256, 512>}, {pipeline_mode = #tpu.pipeline_mode<synchronous>, transform_indices = @transform_4, window_bounds = array<i64: 1, 512>}, {pipeline_mode = #tpu.pipeline_mode<synchronous>, transform_indices = @transform_5, window_bounds = array<i64: 1, 512>}, {transform_indices = @transform_6, window_bounds = array<i64: 1, 8, 512>}]} {
    %c0 = arith.constant 0 : index
    %c0_0 = arith.constant 0 : index
    %c0_1 = arith.constant 0 : index
    %0 = vector.load %arg1[%c0, %c0_0, %c0_1] : memref<1x8x512xf32, #tpu.memory_space<vmem>>, vector<1x8x512xf32>
    %1 = vector.shape_cast %0 : vector<1x8x512xf32> to vector<8x512xf32>
    %c0_2 = arith.constant 0 : index
    %c0_3 = arith.constant 0 : index
    %c0_4 = arith.constant 0 : index
    %2 = vector.load %arg2[%c0_2, %c0_3, %c0_4] : memref<1x1x8xf32, #tpu.memory_space<vmem>>, vector<1x1x8xf32>
    %3 = vector.shape_cast %2 : vector<1x1x8xf32> to vector<1x8xf32>
    %4 = arith.truncf %1 : vector<8x512xf32> to vector<8x512xbf16>
    %c0_5 = arith.constant 0 : index
    %c0_6 = arith.constant 0 : index
    %5 = vector.load %arg3[%c0_5, %c0_6] : memref<512x768xbf16, #tpu.memory_space<vmem>>, vector<512x768xbf16>
    %cst = arith.constant dense<0.000000e+00> : vector<8x768xf32>
    %6 = tpu.matmul %4, %5, %cst {dimension_numbers = #tpu.dot_dimension_numbers<[1], [0], [0], [1], [0, 0, 1, 1], [], []>} : vector<8x512xbf16>, vector<512x768xbf16>, vector<8x768xf32> -> vector<8x768xf32>
    %7 = vector.extract_strided_slice %6 {offsets = [0, 0], sizes = [8, 64], strides = [1, 1]} : vector<8x768xf32> to vector<8x64xf32>
    %8 = vector.extract_strided_slice %6 {offsets = [0, 256], sizes = [8, 64], strides = [1, 1]} : vector<8x768xf32> to vector<8x64xf32>
    %9 = vector.extract_strided_slice %6 {offsets = [0, 512], sizes = [8, 64], strides = [1, 1]} : vector<8x768xf32> to vector<8x64xf32>
    %10 = arith.truncf %7 : vector<8x64xf32> to vector<8x64xbf16>
    %11 = arith.truncf %8 : vector<8x64xf32> to vector<8x64xbf16>
    %cst_7 = arith.constant dense<0.000000e+00> : vector<8x8xf32>
    %12 = tpu.matmul %10, %11, %cst_7 {dimension_numbers = #tpu.dot_dimension_numbers<[1], [1], [0], [0], [0, 0, 1, 0], [], []>} : vector<8x64xbf16>, vector<8x64xbf16>, vector<8x8xf32> -> vector<8x8xf32>
    %13 = vector.broadcast %3 : vector<1x8xf32> to vector<8x8xf32>
    %14 = arith.addf %12, %13 : vector<8x8xf32>
    %cst_8 = arith.constant dense<0xFF800000> : vector<8xf32>
    %15 = vector.multi_reduction <maximumf>, %14, %cst_8 [1] : vector<8x8xf32> to vector<8xf32>
    %16 = vector.shape_cast %15 : vector<8xf32> to vector<8x1xf32>
    %17 = vector.broadcast %16 : vector<8x1xf32> to vector<8x8xf32>
    %18 = arith.subf %14, %17 : vector<8x8xf32>
    %19 = math.exp %18 : vector<8x8xf32>
    %cst_9 = arith.constant dense<0.000000e+00> : vector<8xf32>
    %20 = vector.multi_reduction <add>, %19, %cst_9 [1] : vector<8x8xf32> to vector<8xf32>
    %21 = vector.shape_cast %20 : vector<8xf32> to vector<8x1xf32>
    %22 = tpu.reciprocal %21 {approx = true} : vector<8x1xf32> -> vector<8x1xf32>
    %23 = vector.broadcast %22 : vector<8x1xf32> to vector<8x8xf32>
    %24 = arith.mulf %19, %23 : vector<8x8xf32>
    %25 = arith.truncf %24 : vector<8x8xf32> to vector<8x8xbf16>
    %26 = arith.truncf %9 : vector<8x64xf32> to vector<8x64xbf16>
    %cst_10 = arith.constant dense<0.000000e+00> : vector<8x64xf32>
    %27 = tpu.matmul %25, %26, %cst_10 {dimension_numbers = #tpu.dot_dimension_numbers<[1], [0], [0], [1], [0, 0, 1, 1], [], []>} : vector<8x8xbf16>, vector<8x64xbf16>, vector<8x64xf32> -> vector<8x64xf32>
    %28 = arith.truncf %27 : vector<8x64xf32> to vector<8x64xbf16>
    %c0_11 = arith.constant 0 : index
    %c0_12 = arith.constant 0 : index
    %29 = vector.load %arg4[%c0_11, %c0_12] : memref<256x512xbf16, #tpu.memory_space<vmem>>, vector<64x512xbf16>
    %cst_13 = arith.constant dense<0.000000e+00> : vector<8x512xf32>
    %30 = tpu.matmul %28, %29, %cst_13 {dimension_numbers = #tpu.dot_dimension_numbers<[1], [0], [0], [1], [0, 0, 1, 1], [], []>} : vector<8x64xbf16>, vector<64x512xbf16>, vector<8x512xf32> -> vector<8x512xf32>
    %31 = arith.addf %1, %30 : vector<8x512xf32>
    %32 = vector.extract_strided_slice %6 {offsets = [0, 64], sizes = [8, 64], strides = [1, 1]} : vector<8x768xf32> to vector<8x64xf32>
    %33 = vector.extract_strided_slice %6 {offsets = [0, 320], sizes = [8, 64], strides = [1, 1]} : vector<8x768xf32> to vector<8x64xf32>
    %34 = vector.extract_strided_slice %6 {offsets = [0, 576], sizes = [8, 64], strides = [1, 1]} : vector<8x768xf32> to vector<8x64xf32>
    %35 = arith.truncf %32 : vector<8x64xf32> to vector<8x64xbf16>
    %36 = arith.truncf %33 : vector<8x64xf32> to vector<8x64xbf16>
    %cst_14 = arith.constant dense<0.000000e+00> : vector<8x8xf32>
    %37 = tpu.matmul %35, %36, %cst_14 {dimension_numbers = #tpu.dot_dimension_numbers<[1], [1], [0], [0], [0, 0, 1, 0], [], []>} : vector<8x64xbf16>, vector<8x64xbf16>, vector<8x8xf32> -> vector<8x8xf32>
    %38 = vector.broadcast %3 : vector<1x8xf32> to vector<8x8xf32>
    %39 = arith.addf %37, %38 : vector<8x8xf32>
    %cst_15 = arith.constant dense<0xFF800000> : vector<8xf32>
    %40 = vector.multi_reduction <maximumf>, %39, %cst_15 [1] : vector<8x8xf32> to vector<8xf32>
    %41 = vector.shape_cast %40 : vector<8xf32> to vector<8x1xf32>
    %42 = vector.broadcast %41 : vector<8x1xf32> to vector<8x8xf32>
    %43 = arith.subf %39, %42 : vector<8x8xf32>
    %44 = math.exp %43 : vector<8x8xf32>
    %cst_16 = arith.constant dense<0.000000e+00> : vector<8xf32>
    %45 = vector.multi_reduction <add>, %44, %cst_16 [1] : vector<8x8xf32> to vector<8xf32>
    %46 = vector.shape_cast %45 : vector<8xf32> to vector<8x1xf32>
    %47 = tpu.reciprocal %46 {approx = true} : vector<8x1xf32> -> vector<8x1xf32>
    %48 = vector.broadcast %47 : vector<8x1xf32> to vector<8x8xf32>
    %49 = arith.mulf %44, %48 : vector<8x8xf32>
    %50 = arith.truncf %49 : vector<8x8xf32> to vector<8x8xbf16>
    %51 = arith.truncf %34 : vector<8x64xf32> to vector<8x64xbf16>
    %cst_17 = arith.constant dense<0.000000e+00> : vector<8x64xf32>
    %52 = tpu.matmul %50, %51, %cst_17 {dimension_numbers = #tpu.dot_dimension_numbers<[1], [0], [0], [1], [0, 0, 1, 1], [], []>} : vector<8x8xbf16>, vector<8x64xbf16>, vector<8x64xf32> -> vector<8x64xf32>
    %53 = arith.truncf %52 : vector<8x64xf32> to vector<8x64xbf16>
    %c64 = arith.constant 64 : index
    %c0_18 = arith.constant 0 : index
    %54 = vector.load %arg4[%c64, %c0_18] : memref<256x512xbf16, #tpu.memory_space<vmem>>, vector<64x512xbf16>
    %cst_19 = arith.constant dense<0.000000e+00> : vector<8x512xf32>
    %55 = tpu.matmul %53, %54, %cst_19 {dimension_numbers = #tpu.dot_dimension_numbers<[1], [0], [0], [1], [0, 0, 1, 1], [], []>} : vector<8x64xbf16>, vector<64x512xbf16>, vector<8x512xf32> -> vector<8x512xf32>
    %56 = arith.addf %31, %55 : vector<8x512xf32>
    %57 = vector.extract_strided_slice %6 {offsets = [0, 128], sizes = [8, 64], strides = [1, 1]} : vector<8x768xf32> to vector<8x64xf32>
    %58 = vector.extract_strided_slice %6 {offsets = [0, 384], sizes = [8, 64], strides = [1, 1]} : vector<8x768xf32> to vector<8x64xf32>
    %59 = vector.extract_strided_slice %6 {offsets = [0, 640], sizes = [8, 64], strides = [1, 1]} : vector<8x768xf32> to vector<8x64xf32>
    %60 = arith.truncf %57 : vector<8x64xf32> to vector<8x64xbf16>
    %61 = arith.truncf %58 : vector<8x64xf32> to vector<8x64xbf16>
    %cst_20 = arith.constant dense<0.000000e+00> : vector<8x8xf32>
    %62 = tpu.matmul %60, %61, %cst_20 {dimension_numbers = #tpu.dot_dimension_numbers<[1], [1], [0], [0], [0, 0, 1, 0], [], []>} : vector<8x64xbf16>, vector<8x64xbf16>, vector<8x8xf32> -> vector<8x8xf32>
    %63 = vector.broadcast %3 : vector<1x8xf32> to vector<8x8xf32>
    %64 = arith.addf %62, %63 : vector<8x8xf32>
    %cst_21 = arith.constant dense<0xFF800000> : vector<8xf32>
    %65 = vector.multi_reduction <maximumf>, %64, %cst_21 [1] : vector<8x8xf32> to vector<8xf32>
    %66 = vector.shape_cast %65 : vector<8xf32> to vector<8x1xf32>
    %67 = vector.broadcast %66 : vector<8x1xf32> to vector<8x8xf32>
    %68 = arith.subf %64, %67 : vector<8x8xf32>
    %69 = math.exp %68 : vector<8x8xf32>
    %cst_22 = arith.constant dense<0.000000e+00> : vector<8xf32>
    %70 = vector.multi_reduction <add>, %69, %cst_22 [1] : vector<8x8xf32> to vector<8xf32>
    %71 = vector.shape_cast %70 : vector<8xf32> to vector<8x1xf32>
    %72 = tpu.reciprocal %71 {approx = true} : vector<8x1xf32> -> vector<8x1xf32>
    %73 = vector.broadcast %72 : vector<8x1xf32> to vector<8x8xf32>
    %74 = arith.mulf %69, %73 : vector<8x8xf32>
    %75 = arith.truncf %74 : vector<8x8xf32> to vector<8x8xbf16>
    %76 = arith.truncf %59 : vector<8x64xf32> to vector<8x64xbf16>
    %cst_23 = arith.constant dense<0.000000e+00> : vector<8x64xf32>
    %77 = tpu.matmul %75, %76, %cst_23 {dimension_numbers = #tpu.dot_dimension_numbers<[1], [0], [0], [1], [0, 0, 1, 1], [], []>} : vector<8x8xbf16>, vector<8x64xbf16>, vector<8x64xf32> -> vector<8x64xf32>
    %78 = arith.truncf %77 : vector<8x64xf32> to vector<8x64xbf16>
    %c128 = arith.constant 128 : index
    %c0_24 = arith.constant 0 : index
    %79 = vector.load %arg4[%c128, %c0_24] : memref<256x512xbf16, #tpu.memory_space<vmem>>, vector<64x512xbf16>
    %cst_25 = arith.constant dense<0.000000e+00> : vector<8x512xf32>
    %80 = tpu.matmul %78, %79, %cst_25 {dimension_numbers = #tpu.dot_dimension_numbers<[1], [0], [0], [1], [0, 0, 1, 1], [], []>} : vector<8x64xbf16>, vector<64x512xbf16>, vector<8x512xf32> -> vector<8x512xf32>
    %81 = arith.addf %56, %80 : vector<8x512xf32>
    %82 = vector.extract_strided_slice %6 {offsets = [0, 192], sizes = [8, 64], strides = [1, 1]} : vector<8x768xf32> to vector<8x64xf32>
    %83 = vector.extract_strided_slice %6 {offsets = [0, 448], sizes = [8, 64], strides = [1, 1]} : vector<8x768xf32> to vector<8x64xf32>
    %84 = vector.extract_strided_slice %6 {offsets = [0, 704], sizes = [8, 64], strides = [1, 1]} : vector<8x768xf32> to vector<8x64xf32>
    %85 = arith.truncf %82 : vector<8x64xf32> to vector<8x64xbf16>
    %86 = arith.truncf %83 : vector<8x64xf32> to vector<8x64xbf16>
    %cst_26 = arith.constant dense<0.000000e+00> : vector<8x8xf32>
    %87 = tpu.matmul %85, %86, %cst_26 {dimension_numbers = #tpu.dot_dimension_numbers<[1], [1], [0], [0], [0, 0, 1, 0], [], []>} : vector<8x64xbf16>, vector<8x64xbf16>, vector<8x8xf32> -> vector<8x8xf32>
    %88 = vector.broadcast %3 : vector<1x8xf32> to vector<8x8xf32>
    %89 = arith.addf %87, %88 : vector<8x8xf32>
    %cst_27 = arith.constant dense<0xFF800000> : vector<8xf32>
    %90 = vector.multi_reduction <maximumf>, %89, %cst_27 [1] : vector<8x8xf32> to vector<8xf32>
    %91 = vector.shape_cast %90 : vector<8xf32> to vector<8x1xf32>
    %92 = vector.broadcast %91 : vector<8x1xf32> to vector<8x8xf32>
    %93 = arith.subf %89, %92 : vector<8x8xf32>
    %94 = math.exp %93 : vector<8x8xf32>
    %cst_28 = arith.constant dense<0.000000e+00> : vector<8xf32>
    %95 = vector.multi_reduction <add>, %94, %cst_28 [1] : vector<8x8xf32> to vector<8xf32>
    %96 = vector.shape_cast %95 : vector<8xf32> to vector<8x1xf32>
    %97 = tpu.reciprocal %96 {approx = true} : vector<8x1xf32> -> vector<8x1xf32>
    %98 = vector.broadcast %97 : vector<8x1xf32> to vector<8x8xf32>
    %99 = arith.mulf %94, %98 : vector<8x8xf32>
    %100 = arith.truncf %99 : vector<8x8xf32> to vector<8x8xbf16>
    %101 = arith.truncf %84 : vector<8x64xf32> to vector<8x64xbf16>
    %cst_29 = arith.constant dense<0.000000e+00> : vector<8x64xf32>
    %102 = tpu.matmul %100, %101, %cst_29 {dimension_numbers = #tpu.dot_dimension_numbers<[1], [0], [0], [1], [0, 0, 1, 1], [], []>} : vector<8x8xbf16>, vector<8x64xbf16>, vector<8x64xf32> -> vector<8x64xf32>
    %103 = arith.truncf %102 : vector<8x64xf32> to vector<8x64xbf16>
    %c192 = arith.constant 192 : index
    %c0_30 = arith.constant 0 : index
    %104 = vector.load %arg4[%c192, %c0_30] : memref<256x512xbf16, #tpu.memory_space<vmem>>, vector<64x512xbf16>
    %cst_31 = arith.constant dense<0.000000e+00> : vector<8x512xf32>
    %105 = tpu.matmul %103, %104, %cst_31 {dimension_numbers = #tpu.dot_dimension_numbers<[1], [0], [0], [1], [0, 0, 1, 1], [], []>} : vector<8x64xbf16>, vector<64x512xbf16>, vector<8x512xf32> -> vector<8x512xf32>
    %106 = arith.addf %81, %105 : vector<8x512xf32>
    %cst_32 = arith.constant dense<0.000000e+00> : vector<8xf32>
    %107 = vector.multi_reduction <add>, %106, %cst_32 [1] : vector<8x512xf32> to vector<8xf32>
    %108 = vector.shape_cast %107 : vector<8xf32> to vector<8x1xf32>
    %cst_33 = arith.constant 5.120000e+02 : f32
    %109 = vector.broadcast %cst_33 : f32 to vector<8x1xf32>
    %110 = arith.divf %108, %109 : vector<8x1xf32>
    %111 = vector.broadcast %110 : vector<8x1xf32> to vector<8x512xf32>
    %112 = arith.subf %106, %111 : vector<8x512xf32>
    %113 = arith.mulf %112, %112 : vector<8x512xf32>
    %cst_34 = arith.constant dense<0.000000e+00> : vector<8xf32>
    %114 = vector.multi_reduction <add>, %113, %cst_34 [1] : vector<8x512xf32> to vector<8xf32>
    %115 = vector.shape_cast %114 : vector<8xf32> to vector<8x1xf32>
    %cst_35 = arith.constant 5.120000e+02 : f32
    %116 = vector.broadcast %cst_35 : f32 to vector<8x1xf32>
    %117 = arith.divf %115, %116 : vector<8x1xf32>
    %118 = vector.broadcast %110 : vector<8x1xf32> to vector<8x512xf32>
    %119 = arith.subf %106, %118 : vector<8x512xf32>
    %cst_36 = arith.constant 9.99999997E-7 : f32
    %120 = vector.broadcast %cst_36 : f32 to vector<8x1xf32>
    %121 = arith.addf %117, %120 : vector<8x1xf32>
    %122 = math.rsqrt %121 : vector<8x1xf32>
    %123 = vector.broadcast %122 : vector<8x1xf32> to vector<8x512xf32>
    %124 = arith.mulf %119, %123 : vector<8x512xf32>
    %c0_37 = arith.constant 0 : index
    %c0_38 = arith.constant 0 : index
    %125 = vector.load %arg5[%c0_37, %c0_38] : memref<1x512xf32, #tpu.memory_space<vmem>>, vector<1x512xf32>
    %126 = vector.broadcast %125 : vector<1x512xf32> to vector<8x512xf32>
    %127 = arith.mulf %124, %126 : vector<8x512xf32>
    %c0_39 = arith.constant 0 : index
    %c0_40 = arith.constant 0 : index
    %128 = vector.load %arg6[%c0_39, %c0_40] : memref<1x512xf32, #tpu.memory_space<vmem>>, vector<1x512xf32>
    %129 = vector.broadcast %128 : vector<1x512xf32> to vector<8x512xf32>
    %130 = arith.addf %127, %129 : vector<8x512xf32>
    %c0_41 = arith.constant 0 : index
    %c0_42 = arith.constant 0 : index
    %c0_43 = arith.constant 0 : index
    %131 = vector.load %arg7[%c0_41, %c0_42, %c0_43] : memref<1x8x512xf32, #tpu.memory_space<vmem>>, vector<1x8x512xf32>
    %132 = vector.shape_cast %131 : vector<1x8x512xf32> to vector<8x512xf32>
    %133 = vector.shape_cast %130 : vector<8x512xf32> to vector<1x8x512xf32>
    tpu.vector_store %arg7[%c0_41, %c0_42, %c0_43], %133 {strides = array<i32>} : memref<1x8x512xf32, #tpu.memory_space<vmem>>, vector<1x8x512xf32>,
    return
  }
  func.func @transform_0(%arg0: i32) -> (i32, i32, i32) {
    %c0_i32 = arith.constant 0 : i32
    %c0_i32_0 = arith.constant 0 : i32
    %c0_i32_1 = arith.constant 0 : i32
    return %arg0, %c0_i32, %c0_i32_0 : i32, i32, i32
  }
  func.func @transform_1(%arg0: i32) -> (i32, i32, i32) {
    %c0_i32 = arith.constant 0 : i32
    %c0_i32_0 = arith.constant 0 : i32
    %c0_i32_1 = arith.constant 0 : i32
    return %arg0, %c0_i32, %c0_i32_0 : i32, i32, i32
  }
  func.func @transform_2(%arg0: i32) -> (i32, i32) {
    %c0_i32 = arith.constant 0 : i32
    %c0_i32_0 = arith.constant 0 : i32
    %c0_i32_1 = arith.constant 0 : i32
    return %c0_i32, %c0_i32_0 : i32, i32
  }
  func.func @transform_3(%arg0: i32) -> (i32, i32) {
    %c0_i32 = arith.constant 0 : i32
    %c0_i32_0 = arith.constant 0 : i32
    %c0_i32_1 = arith.constant 0 : i32
    return %c0_i32, %c0_i32_0 : i32, i32
  }
  func.func @transform_4(%arg0: i32) -> (i32, i32) {
    %c0_i32 = arith.constant 0 : i32
    %c0_i32_0 = arith.constant 0 : i32
    %c0_i32_1 = arith.constant 0 : i32
    return %c0_i32, %c0_i32_0 : i32, i32
  }
  func.func @transform_5(%arg0: i32) -> (i32, i32) {
    %c0_i32 = arith.constant 0 : i32
    %c0_i32_0 = arith.constant 0 : i32
    %c0_i32_1 = arith.constant 0 : i32
    return %c0_i32, %c0_i32_0 : i32, i32
  }
  func.func @transform_6(%arg0: i32) -> (i32, i32, i32) {
    %c0_i32 = arith.constant 0 : i32
    %c0_i32_0 = arith.constant 0 : i32
    %c0_i32_1 = arith.constant 0 : i32
    return %arg0, %c0_i32, %c0_i32_0 : i32, i32, i32
  }
}

module attributes {stable_mosaic.version = 11 : i64} {
  func.func @_ffn_block_kernel(%arg0: i32, %arg1: memref<8x512xf32, #tpu.memory_space<vmem>>, %arg2: memref<512x256xbf16, #tpu.memory_space<vmem>>, %arg3: memref<1x256xf32, #tpu.memory_space<vmem>>, %arg4: memref<256x512xbf16, #tpu.memory_space<vmem>>, %arg5: memref<1x512xf32, #tpu.memory_space<vmem>>, %arg6: memref<1x512xf32, #tpu.memory_space<vmem>>, %arg7: memref<1x512xf32, #tpu.memory_space<vmem>>, %arg8: memref<8x512xf32, #tpu.memory_space<vmem>>) attributes {dimension_semantics = [#tpu.dimension_semantics<parallel>], iteration_bounds = array<i64: 2>, scalar_prefetch = 0 : i64, scratch_operands = 0 : i64, tpu.core_type = #tpu.core_type<tc>, window_params = [{transform_indices = @transform_0, window_bounds = array<i64: 8, 512>}, {pipeline_mode = #tpu.pipeline_mode<synchronous>, transform_indices = @transform_1, window_bounds = array<i64: 512, 256>}, {pipeline_mode = #tpu.pipeline_mode<synchronous>, transform_indices = @transform_2, window_bounds = array<i64: 1, 256>}, {pipeline_mode = #tpu.pipeline_mode<synchronous>, transform_indices = @transform_3, window_bounds = array<i64: 256, 512>}, {pipeline_mode = #tpu.pipeline_mode<synchronous>, transform_indices = @transform_4, window_bounds = array<i64: 1, 512>}, {pipeline_mode = #tpu.pipeline_mode<synchronous>, transform_indices = @transform_5, window_bounds = array<i64: 1, 512>}, {pipeline_mode = #tpu.pipeline_mode<synchronous>, transform_indices = @transform_6, window_bounds = array<i64: 1, 512>}, {transform_indices = @transform_7, window_bounds = array<i64: 8, 512>}]} {
    %c0 = arith.constant 0 : index
    %c0_0 = arith.constant 0 : index
    %0 = vector.load %arg1[%c0, %c0_0] : memref<8x512xf32, #tpu.memory_space<vmem>>, vector<8x512xf32>
    %1 = arith.truncf %0 : vector<8x512xf32> to vector<8x512xbf16>
    %c0_1 = arith.constant 0 : index
    %c0_2 = arith.constant 0 : index
    %2 = vector.load %arg2[%c0_1, %c0_2] : memref<512x256xbf16, #tpu.memory_space<vmem>>, vector<512x256xbf16>
    %cst = arith.constant dense<0.000000e+00> : vector<8x256xf32>
    %3 = tpu.matmul %1, %2, %cst {dimension_numbers = #tpu.dot_dimension_numbers<[1], [0], [0], [1], [0, 0, 1, 1], [], []>} : vector<8x512xbf16>, vector<512x256xbf16>, vector<8x256xf32> -> vector<8x256xf32>
    %c0_3 = arith.constant 0 : index
    %c0_4 = arith.constant 0 : index
    %4 = vector.load %arg3[%c0_3, %c0_4] : memref<1x256xf32, #tpu.memory_space<vmem>>, vector<1x256xf32>
    %5 = vector.broadcast %4 : vector<1x256xf32> to vector<8x256xf32>
    %6 = arith.addf %3, %5 : vector<8x256xf32>
    %cst_5 = arith.constant 0.000000e+00 : f32
    %7 = vector.broadcast %cst_5 : f32 to vector<8x256xf32>
    %8 = arith.maximumf %6, %7 : vector<8x256xf32>
    %9 = arith.truncf %8 : vector<8x256xf32> to vector<8x256xbf16>
    %c0_6 = arith.constant 0 : index
    %c0_7 = arith.constant 0 : index
    %10 = vector.load %arg4[%c0_6, %c0_7] : memref<256x512xbf16, #tpu.memory_space<vmem>>, vector<256x512xbf16>
    %cst_8 = arith.constant dense<0.000000e+00> : vector<8x512xf32>
    %11 = tpu.matmul %9, %10, %cst_8 {dimension_numbers = #tpu.dot_dimension_numbers<[1], [0], [0], [1], [0, 0, 1, 1], [], []>} : vector<8x256xbf16>, vector<256x512xbf16>, vector<8x512xf32> -> vector<8x512xf32>
    %c0_9 = arith.constant 0 : index
    %c0_10 = arith.constant 0 : index
    %12 = vector.load %arg5[%c0_9, %c0_10] : memref<1x512xf32, #tpu.memory_space<vmem>>, vector<1x512xf32>
    %13 = vector.broadcast %12 : vector<1x512xf32> to vector<8x512xf32>
    %14 = arith.addf %11, %13 : vector<8x512xf32>
    %15 = arith.addf %14, %0 : vector<8x512xf32>
    %cst_11 = arith.constant dense<0.000000e+00> : vector<8xf32>
    %16 = vector.multi_reduction <add>, %15, %cst_11 [1] : vector<8x512xf32> to vector<8xf32>
    %17 = vector.shape_cast %16 : vector<8xf32> to vector<8x1xf32>
    %cst_12 = arith.constant 5.120000e+02 : f32
    %18 = vector.broadcast %cst_12 : f32 to vector<8x1xf32>
    %19 = arith.divf %17, %18 : vector<8x1xf32>
    %20 = vector.broadcast %19 : vector<8x1xf32> to vector<8x512xf32>
    %21 = arith.subf %15, %20 : vector<8x512xf32>
    %22 = arith.mulf %21, %21 : vector<8x512xf32>
    %cst_13 = arith.constant dense<0.000000e+00> : vector<8xf32>
    %23 = vector.multi_reduction <add>, %22, %cst_13 [1] : vector<8x512xf32> to vector<8xf32>
    %24 = vector.shape_cast %23 : vector<8xf32> to vector<8x1xf32>
    %cst_14 = arith.constant 5.120000e+02 : f32
    %25 = vector.broadcast %cst_14 : f32 to vector<8x1xf32>
    %26 = arith.divf %24, %25 : vector<8x1xf32>
    %27 = vector.broadcast %19 : vector<8x1xf32> to vector<8x512xf32>
    %28 = arith.subf %15, %27 : vector<8x512xf32>
    %cst_15 = arith.constant 9.99999997E-7 : f32
    %29 = vector.broadcast %cst_15 : f32 to vector<8x1xf32>
    %30 = arith.addf %26, %29 : vector<8x1xf32>
    %31 = math.rsqrt %30 : vector<8x1xf32>
    %32 = vector.broadcast %31 : vector<8x1xf32> to vector<8x512xf32>
    %33 = arith.mulf %28, %32 : vector<8x512xf32>
    %c0_16 = arith.constant 0 : index
    %c0_17 = arith.constant 0 : index
    %34 = vector.load %arg6[%c0_16, %c0_17] : memref<1x512xf32, #tpu.memory_space<vmem>>, vector<1x512xf32>
    %35 = vector.broadcast %34 : vector<1x512xf32> to vector<8x512xf32>
    %36 = arith.mulf %33, %35 : vector<8x512xf32>
    %c0_18 = arith.constant 0 : index
    %c0_19 = arith.constant 0 : index
    %37 = vector.load %arg7[%c0_18, %c0_19] : memref<1x512xf32, #tpu.memory_space<vmem>>, vector<1x512xf32>
    %38 = vector.broadcast %37 : vector<1x512xf32> to vector<8x512xf32>
    %39 = arith.addf %36, %38 : vector<8x512xf32>
    %c0_20 = arith.constant 0 : index
    %c0_21 = arith.constant 0 : index
    %40 = vector.load %arg8[%c0_20, %c0_21] : memref<8x512xf32, #tpu.memory_space<vmem>>, vector<8x512xf32>
    tpu.vector_store %arg8[%c0_20, %c0_21], %39 {strides = array<i32>} : memref<8x512xf32, #tpu.memory_space<vmem>>, vector<8x512xf32>,
    return
  }
  func.func @transform_0(%arg0: i32) -> (i32, i32) {
    %c0_i32 = arith.constant 0 : i32
    %c0_i32_0 = arith.constant 0 : i32
    return %arg0, %c0_i32 : i32, i32
  }
  func.func @transform_1(%arg0: i32) -> (i32, i32) {
    %c0_i32 = arith.constant 0 : i32
    %c0_i32_0 = arith.constant 0 : i32
    %c0_i32_1 = arith.constant 0 : i32
    return %c0_i32, %c0_i32_0 : i32, i32
  }
  func.func @transform_2(%arg0: i32) -> (i32, i32) {
    %c0_i32 = arith.constant 0 : i32
    %c0_i32_0 = arith.constant 0 : i32
    %c0_i32_1 = arith.constant 0 : i32
    return %c0_i32, %c0_i32_0 : i32, i32
  }
  func.func @transform_3(%arg0: i32) -> (i32, i32) {
    %c0_i32 = arith.constant 0 : i32
    %c0_i32_0 = arith.constant 0 : i32
    %c0_i32_1 = arith.constant 0 : i32
    return %c0_i32, %c0_i32_0 : i32, i32
  }
  func.func @transform_4(%arg0: i32) -> (i32, i32) {
    %c0_i32 = arith.constant 0 : i32
    %c0_i32_0 = arith.constant 0 : i32
    %c0_i32_1 = arith.constant 0 : i32
    return %c0_i32, %c0_i32_0 : i32, i32
  }
  func.func @transform_5(%arg0: i32) -> (i32, i32) {
    %c0_i32 = arith.constant 0 : i32
    %c0_i32_0 = arith.constant 0 : i32
    %c0_i32_1 = arith.constant 0 : i32
    return %c0_i32, %c0_i32_0 : i32, i32
  }
  func.func @transform_6(%arg0: i32) -> (i32, i32) {
    %c0_i32 = arith.constant 0 : i32
    %c0_i32_0 = arith.constant 0 : i32
    %c0_i32_1 = arith.constant 0 : i32
    return %c0_i32, %c0_i32_0 : i32, i32
  }
  func.func @transform_7(%arg0: i32) -> (i32, i32) {
    %c0_i32 = arith.constant 0 : i32
    %c0_i32_0 = arith.constant 0 : i32
    return %arg0, %c0_i32 : i32, i32
  }
}

</mosaic_0001>

<bundles_post_ra>
// kernel: encoder_p_forward.7
= control target key start
LH: loop header
LB: loop body
LE: loop exit
PB: predicated region body
PF: predicated region fallthrough
CT: control target
= control target key end

     0   :  { %12 = vsyncpa [#allocation3], 0  ;;  %s1865_s24 = smov 0   ;;  %s2163_s0 = inlined_call_operand.vmem [shape: f32[16,512], index: 0, kind: input, shape index: {}]   ;;  %s2164_s1 = inlined_call_operand.vmem [shape: bf16[512,256], index: 1, kind: input, shape index: {}]   ;;  %s2165_s2 = inlined_call_operand.vmem [shape: f32[1,256], index: 2, kind: input, shape index: {}]   ;;  %s2166_s3 = inlined_call_operand.hbm [shape: bf16[256,512], index: 3, kind: input, shape index: {}]   ;;  %s2167_s4 = inlined_call_operand.vmem [shape: f32[1,512], index: 4, kind: input, shape index: {}]   ;;  %s2168_s5 = inlined_call_operand.vmem [shape: f32[1,512], index: 5, kind: input, shape index: {}]   ;;  %s2169_s6 = inlined_call_operand.vmem [shape: f32[1,512], index: 6, kind: input, shape index: {}]   ;;  %s2170_s7 = inlined_call_operand.vmem [shape: f32[16,512], index: 7, kind: output, shape index: {}]  }
   0x1 LB: > { %s1871_s25 = sadd.s32 4294967295, %s1820_s24   ;;  %p1428_p0 = scmp.ge.s32.totalorder %s1820_s24, 1  ;;  %s1820_s24 = sphi %s1865_s24, %s18_s24  }
   0x2   : > { %p201_p1 = scmp.lt.s32.totalorder %s1820_s24, 3  ;;  %s1822_s26 = smov [#allocation2]  }
   0x3   : > { %s219_s27 = sshll.u32 %s1822_s26, 4  ;;  %p1577_p3 = scmp.eq.s32.totalorder %s1871_s25, 0  ;;  %s220_s27 = int_to_ptr.vmem [resolvable:$true] %s219_s27 }
   0x4   : > { %p1875_p2 = pnand %p1428_p0, %p201_p1  ;;  %s1795_s29 = scalar_lea.vmem %s220_s27, 8192 }
   0x5   : > { %p1796_p7 = scmp.ne.s32.totalorder %s220_s27, %s1795_s29  ;;  %p1803_p10 = scmp.lt.s32.totalorder %s220_s27, %s220_s27 }
   0x6   : > { %p1573_p4 = pneg %p1875_p2  ;;  %p1804_p11 = scmp.lt.s32.totalorder %s1795_s29, %s1795_s29 }
   0x8   : > { %p1574_p5 = pnand %p1577_p3, %p1573_p4  ;;  %p1805_p12 = por %p1804_p11, %p1803_p10 }
   0xa   : > { %p1786_p6 = pneg %p1574_p5 }
   0xc   : > { %p1798_p8 = pnand %p1796_p7, %p1786_p6 }
   0xe   : > { %p1799_p9 = pneg %p1798_p8 }
  0x10   : > { %p1806_p13 = pnand %p1805_p12, %p1799_p9 }
  0x12   : > { %1809 = shalt.err (!%p1806_p13)
}
  0x13   : > { %s1823_s30 = smov 256   ;;  %s1824_s8 = smov 16  }
  0x14   : > { %1576 = dma.hbm_to_vmem [thread:$0]  (!%p1574_p5), %s2166_s3, 8192, %s220_s27, [#allocation3], %s1823_s30, %s1823_s30, %s1824_s8  }
  0x15   : > { %252 = sbr.rel (%p1875_p2) target bundleno = 815 (0x32f), region = 48 }
  0x1a   : > { %1815 = dma.done.wait (%p1577_p3), [#allocation3], 8192  }
  0x1b   : > { %1817 = vsyncadd (%p1577_p3), [#allocation3], 4294959104  ;;  %v1590_v0 = vld [vmem:[%s2164_s1 + $0x74] ss:$8 sps:$4 sm:$0xff]   ;;  %v1594_v2 = vld [vmem:[%s2164_s1 + $0x70] ss:$8 sps:$4 sm:$0xff]  }
  0x1c   : > { %v1592_v1 = vld [vmem:[%s2164_s1 + $0x174] ss:$8 sps:$4 sm:$0xff]   ;;  %698 = vmatprep.subr.bf16.mxu0 %v1590_v0  ;;  %v1595_v3 = vld [vmem:[%s2164_s1 + $0x170] ss:$8 sps:$4 sm:$0xff]   ;;  %v1596_v4 = vld [vmem:[%s2164_s1 + $0x64] ss:$8 sps:$4 sm:$0xff]  }
  0x1d   : > { %739 = vmatprep.subr.bf16.mxu1 %v1592_v1  ;;  %699 = vmatpush1.bf16.msra.mxu0 %v1594_v2  ;;  %v1598_v5 = vld [vmem:[%s2164_s1 + $0x164] ss:$8 sps:$4 sm:$0xff]   ;;  %v1600_v6 = vld [vmem:[%s2164_s1 + $0x60] ss:$8 sps:$4 sm:$0xff]   ;;  %v1602_v8 = vld [vmem:[%s2164_s1 + $0x54] ss:$8 sps:$4 sm:$0xff]  }
  0x1e   : > { %740 = vmatpush1.bf16.msra.mxu1 %v1595_v3  ;;  %700 = vmatprep.subr.bf16.mxu0 %v1596_v4  ;;  %v1601_v7 = vld [vmem:[%s2164_s1 + $0x160] ss:$8 sps:$4 sm:$0xff]   ;;  %v1604_v9 = vld [vmem:[%s2164_s1 + $0x154] ss:$8 sps:$4 sm:$0xff]   ;;  %v1606_v10 = vld [vmem:[%s2164_s1 + $0x50] ss:$8 sps:$4 sm:$0xff]  }
  0x1f   : > { %741 = vmatprep.subr.bf16.mxu1 %v1598_v5  ;;  %v1607_v11 = vld [vmem:[%s2164_s1 + $0x150] ss:$8 sps:$4 sm:$0xff]   ;;  %v1608_v12 = vld [vmem:[%s2164_s1 + $0x44] ss:$8 sps:$4 sm:$0xff]   ;;  %v1612_v14 = vld [vmem:[%s2164_s1 + $0x40] ss:$8 sps:$4 sm:$0xff]  }
  0x20   : > { %v1610_v13 = vld [vmem:[%s2164_s1 + $0x144] ss:$8 sps:$4 sm:$0xff]   ;;  %v1613_v15 = vld [vmem:[%s2164_s1 + $0x140] ss:$8 sps:$4 sm:$0xff]   ;;  %v1614_v16 = vld [vmem:[%s2164_s1 + $0x34] ss:$8 sps:$4 sm:$0xff]  }
  0x21   : > { %701 = vmatpush1.bf16.msra.mxu0 %v1600_v6  ;;  %v1616_v17 = vld [vmem:[%s2164_s1 + $0x134] ss:$8 sps:$4 sm:$0xff]   ;;  %v1618_v18 = vld [vmem:[%s2164_s1 + $0x30] ss:$8 sps:$4 sm:$0xff]   ;;  %v1620_v20 = vld [vmem:[%s2164_s1 + $0x24] ss:$8 sps:$4 sm:$0xff]  }
  0x22   : > { %742 = vmatpush1.bf16.msra.mxu1 %v1601_v7  ;;  %702 = vmatprep.subr.bf16.mxu0 %v1602_v8  ;;  %v1619_v19 = vld [vmem:[%s2164_s1 + $0x130] ss:$8 sps:$4 sm:$0xff]   ;;  %v1622_v21 = vld [vmem:[%s2164_s1 + $0x124] ss:$8 sps:$4 sm:$0xff]   ;;  %v1624_v22 = vld [vmem:[%s2164_s1 + $0x20] ss:$8 sps:$4 sm:$0xff]  }
  0x23   : > { %743 = vmatprep.subr.bf16.mxu1 %v1604_v9  ;;  %v1625_v23 = vld [vmem:[%s2164_s1 + $0x120] ss:$8 sps:$4 sm:$0xff]   ;;  %v1626_v24 = vld [vmem:[%s2164_s1 + $0x14] ss:$8 sps:$4 sm:$0xff]   ;;  %v1630_v26 = vld [vmem:[%s2164_s1 + $0x10] ss:$8 sps:$4 sm:$0xff]  }
  0x24   : > { %v1628_v25 = vld [vmem:[%s2164_s1 + $0x114] ss:$8 sps:$4 sm:$0xff]   ;;  %v1631_v27 = vld [vmem:[%s2164_s1 + $0x110] ss:$8 sps:$4 sm:$0xff]   ;;  %v1632_v28 = vld [vmem:[%s2164_s1 + $0x4] ss:$8 sps:$4 sm:$0xff]  }
  0x25   : > { %703 = vmatpush1.bf16.msra.mxu0 %v1606_v10  ;;  %v1634_v29 = vld [vmem:[%s2164_s1 + $0x104] ss:$8 sps:$4 sm:$0xff]   ;;  %v1636_v30 = vld [vmem:[%s2164_s1] ss:$8 sps:$4 sm:$0xff]   ;;  %v1638_v32 = vld [vmem:[%s2164_s1 + $0xf4] ss:$8 sps:$4 sm:$0xff]  }
  0x26   : > { %744 = vmatpush1.bf16.msra.mxu1 %v1607_v11  ;;  %704 = vmatprep.subr.bf16.mxu0 %v1608_v12  ;;  %v1637_v31 = vld [vmem:[%s2164_s1 + $0x100] ss:$8 sps:$4 sm:$0xff]   ;;  %p284_p0 = scmp.lt.s32.totalorder %s1871_s25, 1  ;;  %v1640_v33 = vld [vmem:[%s2164_s1 + $0x1f4] ss:$8 sps:$4 sm:$0xff]  }
  0x27   : > { %745 = vmatprep.subr.bf16.mxu1 %v1610_v13  ;;  %v1642_v34 = vld [vmem:[%s2164_s1 + $0xf0] ss:$8 sps:$4 sm:$0xff]   ;;  %v1644_v36 = vld [vmem:[%s2164_s1 + $0xe4] ss:$8 sps:$4 sm:$0xff]   ;;  %v1648_v38 = vld [vmem:[%s2164_s1 + $0xe0] ss:$8 sps:$4 sm:$0xff]  }
  0x28   : > { %v1643_v35 = vld [vmem:[%s2164_s1 + $0x1f0] ss:$8 sps:$4 sm:$0xff]   ;;  %s2173_s25 = smov (!%p284_p0, %s1871_s25), 1  ;;  %v1646_v37 = vld [vmem:[%s2164_s1 + $0x1e4] ss:$8 sps:$4 sm:$0xff]  }
  0x29   : > { %705 = vmatpush1.bf16.msra.mxu0 %v1612_v14  ;;  %v1649_v39 = vld [vmem:[%s2164_s1 + $0x1e0] ss:$8 sps:$4 sm:$0xff]   ;;  %v1650_v40 = vld [vmem:[%s2164_s1 + $0xd4] ss:$8 sps:$4 sm:$0xff]   ;;  %s1567_s9 = sshll.u32 %s2173_s25, 5 }
  0x2a   : > { %746 = vmatpush1.bf16.msra.mxu1 %v1613_v15  ;;  %706 = vmatprep.subr.bf16.mxu0 %v1614_v16  ;;  %v1652_v41 = vld [vmem:[%s2164_s1 + $0x1d4] ss:$8 sps:$4 sm:$0xff]   ;;  %v1654_v42 = vld [vmem:[%s2164_s1 + $0xd0] ss:$8 sps:$4 sm:$0xff]   ;;  %s2035_s18 = scalar_lea.vmem %s2163_s0, %s1567_s9  ;;  %v1656_v44 = vld [vmem:[%s2164_s1 + $0xc4] ss:$8 sps:$4 sm:$0xff]   ;;  %s293_s10 = scalar_lea.vmem %s2170_s7, %s1567_s9 }
  0x2b   : > { %747 = vmatprep.subr.bf16.mxu1 %v1616_v17  ;;  %v1655_v43 = vld [vmem:[%s2164_s1 + $0x1d0] ss:$8 sps:$4 sm:$0xff]   ;;  %v1658_v45 = vld [vmem:[%s2164_s1 + $0x1c4] ss:$8 sps:$4 sm:$0xff]   ;;  %v1660_v47 = vld [vmem:[%s2164_s1 + $0xc0] ss:$8 sps:$4 sm:$0xff]  }
  0x2c   : > { %v2044_v46 = vld [vmem:[%s2035_s18 + $0x8] sm:$0xff]  ;;  %v2055_v50 = vld [vmem:[%s2035_s18 + $0x18] sm:$0xff]  ;;  %v2108_v4 = vld [vmem:[%s2035_s18] sm:$0xff] }
  0x2d   : > { %707 = vmatpush1.bf16.msra.mxu0 %v1618_v18  ;;  %v1661_v48 = vld [vmem:[%s2164_s1 + $0x1c0] ss:$8 sps:$4 sm:$0xff]   ;;  %v299_v49 = vpack.c.bf16 %v2044_v46, %v2044_v46  ;;  %v1662_v51 = vld [vmem:[%s2164_s1 + $0xb4] ss:$8 sps:$4 sm:$0xff]   ;;  %v301_v52 = vpack.c.bf16 %v2055_v50, %v2055_v50  ;;  %v1666_v54 = vld [vmem:[%s2164_s1 + $0xb0] ss:$8 sps:$4 sm:$0xff]   ;;  %v298_v8 = vpack.c.bf16 %v2108_v4, %v2108_v4 }
  0x2e   : > { %748 = vmatpush1.bf16.msra.mxu1 %v1619_v19  ;;  %708 = vmatprep.subr.bf16.mxu0 %v1620_v20  ;;  %v1664_v53 = vld [vmem:[%s2164_s1 + $0x1b4] ss:$8 sps:$4 sm:$0xff]   ;;  %v1667_v55 = vld [vmem:[%s2164_s1 + $0x1b0] ss:$8 sps:$4 sm:$0xff]   ;;  %v1668_v56 = vld [vmem:[%s2164_s1 + $0xa4] ss:$8 sps:$4 sm:$0xff]  }
  0x2f   : > { %749 = vmatprep.subr.bf16.mxu1 %v1622_v21  ;;  %730 = vmatprep.mubr.bf16.mxu0 %v299_v49  ;;  %v1670_v57 = vld [vmem:[%s2164_s1 + $0x1a4] ss:$8 sps:$4 sm:$0xff]   ;;  %v1672_v58 = vld [vmem:[%s2164_s1 + $0xa0] ss:$8 sps:$4 sm:$0xff]   ;;  %v1674_v60 = vld [vmem:[%s2164_s1 + $0x94] ss:$8 sps:$4 sm:$0xff]  }
  0x30   : > { %771 = vmatprep.mubr.bf16.mxu1 %v301_v52  ;;  %v1673_v59 = vld [vmem:[%s2164_s1 + $0x1a0] ss:$8 sps:$4 sm:$0xff]   ;;  %v1676_v61 = vld [vmem:[%s2164_s1 + $0x194] ss:$8 sps:$4 sm:$0xff]   ;;  %v1678_v62 = vld [vmem:[%s2164_s1 + $0x90] ss:$8 sps:$4 sm:$0xff]  }
  0x31   : > { %709 = vmatpush1.bf16.msra.mxu0 %v1624_v22  ;;  %v1679_v63 = vld [vmem:[%s2164_s1 + $0x190] ss:$8 sps:$4 sm:$0xff]   ;;  %v1680_v0 = vld [vmem:[%s2164_s1 + $0x84] ss:$8 sps:$4 sm:$0xff]   ;;  %v1684_v2 = vld [vmem:[%s2164_s1 + $0x80] ss:$8 sps:$4 sm:$0xff]  }
  0x32   : > { %750 = vmatpush1.bf16.msra.mxu1 %v1625_v23  ;;  %710 = vmatprep.subr.bf16.mxu0 %v1626_v24  ;;  %v1682_v1 = vld [vmem:[%s2164_s1 + $0x184] ss:$8 sps:$4 sm:$0xff]   ;;  %v1685_v3 = vld [vmem:[%s2164_s1 + $0x180] ss:$8 sps:$4 sm:$0xff]   ;;  %v2111_v5 = vld [vmem:[%s2035_s18 + $0x10] sm:$0xff] }
  0x33   : > { %751 = vmatprep.subr.bf16.mxu1 %v1628_v25  ;;  %v1688_v6 = vld [vmem:[#allocation2 + $0xe4] ss:$16 sps:$4 sm:$0xff]   ;;  %v1691_v7 = vld [vmem:[#allocation2 + $0xec] ss:$16 sps:$4 sm:$0xff]   ;;  %v300_v9 = vpack.c.bf16 %v2111_v5, %v2111_v5  ;;  %v1686_v10 = vld [vmem:[#allocation2 + $0xe0] ss:$16 sps:$4 sm:$0xff]  }
  0x34   : > { %v1689_v11 = vld [vmem:[#allocation2 + $0xe8] ss:$16 sps:$4 sm:$0xff]   ;;  %v1694_v12 = vld [vmem:[#allocation2 + $0xc4] ss:$16 sps:$4 sm:$0xff]   ;;  %v1697_v13 = vld [vmem:[#allocation2 + $0xcc] ss:$16 sps:$4 sm:$0xff]  }
  0x35   : > { %711 = vmatpush1.bf16.msra.mxu0 %v1630_v26  ;;  %v1692_v14 = vld [vmem:[#allocation2 + $0xc0] ss:$16 sps:$4 sm:$0xff]   ;;  %v1695_v15 = vld [vmem:[#allocation2 + $0xc8] ss:$16 sps:$4 sm:$0xff]   ;;  %v1700_v16 = vld [vmem:[#allocation2 + $0xa4] ss:$16 sps:$4 sm:$0xff]  }
  0x36   : > { %752 = vmatpush1.bf16.msra.mxu1 %v1631_v27  ;;  %712 = vmatprep.subr.bf16.mxu0 %v1632_v28  ;;  %v1703_v17 = vld [vmem:[#allocation2 + $0xac] ss:$16 sps:$4 sm:$0xff]   ;;  %v1698_v18 = vld [vmem:[#allocation2 + $0xa0] ss:$16 sps:$4 sm:$0xff]   ;;  %v1701_v19 = vld [vmem:[#allocation2 + $0xa8] ss:$16 sps:$4 sm:$0xff]  }
  0x37   : > { %753 = vmatprep.subr.bf16.mxu1 %v1634_v29  ;;  %v1706_v20 = vld [vmem:[#allocation2 + $0x84] ss:$16 sps:$4 sm:$0xff]   ;;  %v1709_v21 = vld [vmem:[#allocation2 + $0x8c] ss:$16 sps:$4 sm:$0xff]   ;;  %v1704_v22 = vld [vmem:[#allocation2 + $0x80] ss:$16 sps:$4 sm:$0xff]  }
  0x38   : > { %v1707_v23 = vld [vmem:[#allocation2 + $0x88] ss:$16 sps:$4 sm:$0xff]   ;;  %v1712_v24 = vld [vmem:[#allocation2 + $0x64] ss:$16 sps:$4 sm:$0xff]   ;;  %v1715_v25 = vld [vmem:[#allocation2 + $0x6c] ss:$16 sps:$4 sm:$0xff]  }
  0x39   : > { %713 = vmatpush1.bf16.msra.mxu0 %v1636_v30  ;;  %v1710_v26 = vld [vmem:[#allocation2 + $0x60] ss:$16 sps:$4 sm:$0xff]   ;;  %v1713_v27 = vld [vmem:[#allocation2 + $0x68] ss:$16 sps:$4 sm:$0xff]   ;;  %v1718_v28 = vld [vmem:[#allocation2 + $0x44] ss:$16 sps:$4 sm:$0xff]  }
  0x3a   : > { %754 = vmatpush1.bf16.msra.mxu1 %v1637_v31  ;;  %714 = vmatprep.subr.bf16.mxu0 %v1638_v32  ;;  %v1721_v29 = vld [vmem:[#allocation2 + $0x4c] ss:$16 sps:$4 sm:$0xff]   ;;  %v1716_v30 = vld [vmem:[#allocation2 + $0x40] ss:$16 sps:$4 sm:$0xff]   ;;  %v1719_v31 = vld [vmem:[#allocation2 + $0x48] ss:$16 sps:$4 sm:$0xff]  }
  0x3b   : > { %755 = vmatprep.subr.bf16.mxu1 %v1640_v33  ;;  %v1724_v32 = vld [vmem:[#allocation2 + $0x24] ss:$16 sps:$4 sm:$0xff]   ;;  %v1727_v33 = vld [vmem:[#allocation2 + $0x2c] ss:$16 sps:$4 sm:$0xff]   ;;  %v1746_v52 = vld [vmem:[#allocation2 + $0x1a0] ss:$16 sps:$4 sm:$0xff]  }
  0x3c   : > { %v1748_v49 = vld [vmem:[#allocation2 + $0x1a4] ss:$16 sps:$4 sm:$0xff]  }
  0x3d   : > { %715 = vmatpush2.bf16.msra.mxu0 %v1642_v34  ;;  %v1722_v34 = vld [vmem:[#allocation2 + $0x20] ss:$16 sps:$4 sm:$0xff]  }
  0x3e   : > { %756 = vmatpush2.bf16.msra.mxu1 %v1643_v35  ;;  %716 = vmatprep.subr.bf16.mxu0 %v1644_v36  ;;  %v1725_v35 = vld [vmem:[#allocation2 + $0x28] ss:$16 sps:$4 sm:$0xff]   ;;  %v1730_v36 = vld [vmem:[#allocation2 + $0x4] ss:$16 sps:$4 sm:$0xff]  }
  0x3f   : > { %757 = vmatprep.subr.bf16.mxu1 %v1646_v37  ;;  %v1733_v37 = vld [vmem:[#allocation2 + $0xc] ss:$16 sps:$4 sm:$0xff]  }
  0x41   : > { %717 = vmatpush2.bf16.msra.mxu0 %v1648_v38  ;;  %v1728_v38 = vld [vmem:[#allocation2] ss:$16 sps:$4 sm:$0xff]  }
  0x42   : > { %758 = vmatpush2.bf16.msra.mxu1 %v1649_v39  ;;  %718 = vmatprep.subr.bf16.mxu0 %v1650_v40  ;;  %v1731_v39 = vld [vmem:[#allocation2 + $0x8] ss:$16 sps:$4 sm:$0xff]   ;;  %v1736_v40 = vld [vmem:[#allocation2 + $0x1e4] ss:$16 sps:$4 sm:$0xff]  }
  0x43   : > { %759 = vmatprep.subr.bf16.mxu1 %v1652_v41  ;;  %v1739_v41 = vld [vmem:[#allocation2 + $0x1ec] ss:$16 sps:$4 sm:$0xff]  }
  0x45   : > { %719 = vmatpush2.bf16.msra.mxu0 %v1654_v42  ;;  %v1734_v42 = vld [vmem:[#allocation2 + $0x1e0] ss:$16 sps:$4 sm:$0xff]  }
  0x46   : > { %760 = vmatpush2.bf16.msra.mxu1 %v1655_v43  ;;  %720 = vmatprep.subr.bf16.mxu0 %v1656_v44  ;;  %v1737_v43 = vld [vmem:[#allocation2 + $0x1e8] ss:$16 sps:$4 sm:$0xff]   ;;  %v1742_v44 = vld [vmem:[#allocation2 + $0x1c4] ss:$16 sps:$4 sm:$0xff]  }
  0x47   : > { %761 = vmatprep.subr.bf16.mxu1 %v1658_v45  ;;  %v1745_v45 = vld [vmem:[#allocation2 + $0x1cc] ss:$16 sps:$4 sm:$0xff]  }
  0x49   : > { %721 = vmatpush2.bf16.msra.mxu0 %v1660_v47  ;;  %v1740_v47 = vld [vmem:[#allocation2 + $0x1c0] ss:$16 sps:$4 sm:$0xff]  }
  0x4a   : > { %762 = vmatpush2.bf16.msra.mxu1 %v1661_v48  ;;  %722 = vmatprep.subr.bf16.mxu0 %v1662_v51  ;;  %v1743_v48 = vld [vmem:[#allocation2 + $0x1c8] ss:$16 sps:$4 sm:$0xff]   ;;  %v1751_v51 = vld [vmem:[#allocation2 + $0x1ac] ss:$16 sps:$4 sm:$0xff]  }
  0x4b   : > { %763 = vmatprep.subr.bf16.mxu1 %v1664_v53  ;;  %v1749_v53 = vld [vmem:[#allocation2 + $0x1a8] ss:$16 sps:$4 sm:$0xff]  }
  0x4d   : > { %723 = vmatpush2.bf16.msra.mxu0 %v1666_v54  ;;  %v1754_v54 = vld [vmem:[#allocation2 + $0x184] ss:$16 sps:$4 sm:$0xff]  }
  0x4e   : > { %764 = vmatpush2.bf16.msra.mxu1 %v1667_v55  ;;  %724 = vmatprep.subr.bf16.mxu0 %v1668_v56  ;;  %v1757_v55 = vld [vmem:[#allocation2 + $0x18c] ss:$16 sps:$4 sm:$0xff]   ;;  %v1752_v56 = vld [vmem:[#allocation2 + $0x180] ss:$16 sps:$4 sm:$0xff]  }
  0x4f   : > { %765 = vmatprep.subr.bf16.mxu1 %v1670_v57  ;;  %v1755_v57 = vld [vmem:[#allocation2 + $0x188] ss:$16 sps:$4 sm:$0xff]  }
  0x51   : > { %725 = vmatpush2.bf16.msra.mxu0 %v1672_v58  ;;  %v1760_v58 = vld [vmem:[#allocation2 + $0x164] ss:$16 sps:$4 sm:$0xff]  }
  0x52   : > { %766 = vmatpush2.bf16.msra.mxu1 %v1673_v59  ;;  %726 = vmatprep.subr.bf16.mxu0 %v1674_v60  ;;  %v1763_v59 = vld [vmem:[#allocation2 + $0x16c] ss:$16 sps:$4 sm:$0xff]   ;;  %v1758_v60 = vld [vmem:[#allocation2 + $0x160] ss:$16 sps:$4 sm:$0xff]  }
  0x53   : > { %767 = vmatprep.subr.bf16.mxu1 %v1676_v61  ;;  %v1761_v61 = vld [vmem:[#allocation2 + $0x168] ss:$16 sps:$4 sm:$0xff]  }
  0x55   : > { %727 = vmatpush2.bf16.msra.mxu0 %v1678_v62  ;;  %v1766_v62 = vld [vmem:[#allocation2 + $0x144] ss:$16 sps:$4 sm:$0xff]  }
  0x56   : > { %768 = vmatpush2.bf16.msra.mxu1 %v1679_v63  ;;  %728 = vmatprep.subr.bf16.mxu0 %v1680_v0  ;;  %v1769_v63 = vld [vmem:[#allocation2 + $0x14c] ss:$16 sps:$4 sm:$0xff]   ;;  %v1764_v0 = vld [vmem:[#allocation2 + $0x140] ss:$16 sps:$4 sm:$0xff]  }
  0x57   : > { %769 = vmatprep.subr.bf16.mxu1 %v1682_v1  ;;  %v1767_v1 = vld [vmem:[#allocation2 + $0x148] ss:$16 sps:$4 sm:$0xff]  }
  0x59   : > { %729 = vmatpush2.bf16.msra.mxu0 %v1684_v2  ;;  %v1772_v2 = vld [vmem:[#allocation2 + $0x124] ss:$16 sps:$4 sm:$0xff]  }
  0x5a   : > { %770 = vmatpush2.bf16.msra.mxu1 %v1685_v3  ;;  %1190 = vmatprep.subr.bf16.mxu0 %v1688_v6  ;;  %v1775_v3 = vld [vmem:[#allocation2 + $0x12c] ss:$16 sps:$4 sm:$0xff]   ;;  %v1770_v6 = vld [vmem:[#allocation2 + $0x120] ss:$16 sps:$4 sm:$0xff]  }
  0x5b   : > { %1231 = vmatprep.subr.bf16.mxu1 %v1691_v7  ;;  %v1773_v7 = vld [vmem:[#allocation2 + $0x128] ss:$16 sps:$4 sm:$0xff]  }
  0x5c   : > { %731 = vmatmul.mubr.bf16.vlgmr.msra.gmra.mxu0 %v298_v8  ;;  %v1778_v8 = vld [vmem:[#allocation2 + $0x104] ss:$16 sps:$4 sm:$0xff]  }
  0x5d   : > { %772 = vmatmul.mubr.bf16.vlgmr.msra.gmra.mxu1 %v300_v9  ;;  %1191 = vmatpush1.bf16.msra.mxu0 %v1686_v10  ;;  %v1781_v9 = vld [vmem:[#allocation2 + $0x10c] ss:$16 sps:$4 sm:$0xff]   ;;  %v1776_v10 = vld [vmem:[#allocation2 + $0x100] ss:$16 sps:$4 sm:$0xff]  }
  0x5e   : > { %1232 = vmatpush1.bf16.msra.mxu1 %v1689_v11  ;;  %1192 = vmatprep.subr.bf16.mxu0 %v1694_v12  ;;  %v1779_v11 = vld [vmem:[#allocation2 + $0x108] ss:$16 sps:$4 sm:$0xff]   ;;  %v368_v12 = vlaneseq }
  0x5f   : > { %1233 = vmatprep.subr.bf16.mxu1 %v1697_v13 }
  0x60   : > { %v369_v13 = vshrl.u32 %v368_v12, 7 }
  0x61   : > { %1193 = vmatpush1.bf16.msra.mxu0 %v1692_v14 }
  0x62   : > { %1234 = vmatpush1.bf16.msra.mxu1 %v1695_v15  ;;  %1194 = vmatprep.subr.bf16.mxu0 %v1700_v16  ;;  %v2117_v14 = vsub.s32 0, %v369_v13  ;;  %v366_v15 = vld [vmem:[%s2165_s2] sm:$0x3]  ;;  %v2122_v16 = vsub.s32 1, %v369_v13 }
  0x63   : > { %1235 = vmatprep.subr.bf16.mxu1 %v1703_v17 }
  0x64   : > { %v371_v17 = vrot.slane %v366_v15, %v2117_v14 }
  0x65   : > { %1195 = vmatpush1.bf16.msra.mxu0 %v1698_v18  ;;  %v375_v18 = vrot.slane %v366_v15, %v2122_v16  ;;  %v1329_v15 = vld [vmem:[%s2169_s6] sm:$0xf] }
  0x66   : > { %1236 = vmatpush1.bf16.msra.mxu1 %v1701_v19  ;;  %1196 = vmatprep.subr.bf16.mxu0 %v1706_v20 }
  0x67   : > { %1237 = vmatprep.subr.bf16.mxu1 %v1709_v21 }
  0x69   : > { %1197 = vmatpush1.bf16.msra.mxu0 %v1704_v22 }
  0x6a   : > { %1238 = vmatpush1.bf16.msra.mxu1 %v1707_v23  ;;  %1198 = vmatprep.subr.bf16.mxu0 %v1712_v24 }
  0x6b   : > { %1239 = vmatprep.subr.bf16.mxu1 %v1715_v25 }
  0x6d   : > { %1199 = vmatpush1.bf16.msra.mxu0 %v1710_v26 }
  0x6e   : > { %1240 = vmatpush1.bf16.msra.mxu1 %v1713_v27  ;;  %1200 = vmatprep.subr.bf16.mxu0 %v1718_v28 }
  0x6f   : > { %1241 = vmatprep.subr.bf16.mxu1 %v1721_v29 }
  0x71   : > { %1201 = vmatpush1.bf16.msra.mxu0 %v1716_v30 }
  0x72   : > { %1242 = vmatpush1.bf16.msra.mxu1 %v1719_v31  ;;  %1202 = vmatprep.subr.bf16.mxu0 %v1724_v32 }
  0x73   : > { %1243 = vmatprep.subr.bf16.mxu1 %v1727_v33 }
  0x75   : > { %1203 = vmatpush1.bf16.msra.mxu0 %v1722_v34 }
  0x76   : > { %1244 = vmatpush1.bf16.msra.mxu1 %v1725_v35  ;;  %1204 = vmatprep.subr.bf16.mxu0 %v1730_v36  ;;  %v848_v35 = vld [vmem:[%s2167_s4] sm:$0xf]  ;;  %v2129_v36 = vsub.s32 2, %v369_v13 }
  0x77   : > { %1245 = vmatprep.subr.bf16.mxu1 %v1733_v37  ;;  %v853_v37 = vrot.slane %v848_v35, %v2117_v14 }
  0x79   : > { %1205 = vmatpush1.bf16.msra.mxu0 %v1728_v38  ;;  %v2132_v38 = vsub.s32 3, %v369_v13  ;;  %v1303_v13 = vld [vmem:[%s2168_s5] sm:$0xf] }
  0x7a   : > { %1246 = vmatpush1.bf16.msra.mxu1 %v1731_v39  ;;  %1206 = vmatprep.subr.bf16.mxu0 %v1736_v40  ;;  %v861_v39 = vrot.slane %v848_v35, %v2129_v36  ;;  %v857_v40 = vrot.slane %v848_v35, %v2122_v16 }
  0x7b   : > { %1247 = vmatprep.subr.bf16.mxu1 %v1739_v41 }
  0x7d   : > { %1207 = vmatpush2.bf16.msra.mxu0 %v1734_v42 }
  0x7e   : > { %1248 = vmatpush2.bf16.msra.mxu1 %v1737_v43  ;;  %1208 = vmatprep.subr.bf16.mxu0 %v1742_v44  ;;  %v865_v44 = vrot.slane %v848_v35, %v2132_v38 }
  0x7f   : > { %1249 = vmatprep.subr.bf16.mxu1 %v1745_v45 }
  0x81   : > { %1209 = vmatpush2.bf16.msra.mxu0 %v1740_v47 }
  0x82   : > { %1250 = vmatpush2.bf16.msra.mxu1 %v1743_v48  ;;  %1210 = vmatprep.subr.bf16.mxu0 %v1748_v49 }
  0x83   : > { %1251 = vmatprep.subr.bf16.mxu1 %v1751_v51 }
  0x85   : > { %1211 = vmatpush2.bf16.msra.mxu0 %v1746_v52 }
  0x86   : > { %1252 = vmatpush2.bf16.msra.mxu1 %v1749_v53  ;;  %1212 = vmatprep.subr.bf16.mxu0 %v1754_v54 }
  0x87   : > { %1253 = vmatprep.subr.bf16.mxu1 %v1757_v55 }
  0x89   : > { %1213 = vmatpush2.bf16.msra.mxu0 %v1752_v56 }
  0x8a   : > { %1254 = vmatpush2.bf16.msra.mxu1 %v1755_v57  ;;  %1214 = vmatprep.subr.bf16.mxu0 %v1760_v58 }
  0x8b   : > { %1255 = vmatprep.subr.bf16.mxu1 %v1763_v59 }
  0x8d   : > { %1215 = vmatpush2.bf16.msra.mxu0 %v1758_v60 }
  0x8e   : > { %1256 = vmatpush2.bf16.msra.mxu1 %v1761_v61  ;;  %1216 = vmatprep.subr.bf16.mxu0 %v1766_v62 }
  0x8f   : > { %1257 = vmatprep.subr.bf16.mxu1 %v1769_v63 }
  0x91   : > { %1217 = vmatpush2.bf16.msra.mxu0 %v1764_v0 }
  0x92   : > { %1258 = vmatpush2.bf16.msra.mxu1 %v1767_v1  ;;  %1218 = vmatprep.subr.bf16.mxu0 %v1772_v2 }
  0x93   : > { %1259 = vmatprep.subr.bf16.mxu1 %v1775_v3 }
  0x95   : > { %1219 = vmatpush2.bf16.msra.mxu0 %v1770_v6 }
  0x96   : > { %1260 = vmatpush2.bf16.msra.mxu1 %v1773_v7  ;;  %1220 = vmatprep.subr.bf16.mxu0 %v1778_v8 }
  0x97   : > { %1261 = vmatprep.subr.bf16.mxu1 %v1781_v9 }
  0x99   : > { %1221 = vmatpush2.bf16.msra.mxu0 %v1776_v10 }
  0x9a   : > { %1262 = vmatpush2.bf16.msra.mxu1 %v1779_v11 }
 0x11c   : > { %v732_v19 = vpop.f32.mrf.mxu0 }
 0x11d   : > { %v773_v20 = vpop.f32.mrf.mxu1  ;;  %v733_v21 = vadd.f32 %v732_v19, %v371_v17  ;;  %v1308_v17 = vrot.slane %v1303_v13, %v2117_v14  ;;  %v1316_v19 = vrot.slane %v1303_v13, %v2129_v36 }
 0x11e   : > { %v734_v22 = vpop.f32.mrf.mxu0 }
 0x11f   : > { %v775_v23 = vpop.f32.mrf.mxu1  ;;  %v774_v24 = vadd.f32 %v773_v20, %v733_v21  ;;  %v735_v25 = vadd.f32 %v734_v22, %v375_v18  ;;  %v1312_v18 = vrot.slane %v1303_v13, %v2122_v16  ;;  %v1320_v20 = vrot.slane %v1303_v13, %v2132_v38 }
 0x120   : > { %v736_v26 = vpop.f32.mrf.mxu0  ;;  %v1334_v22 = vrot.slane %v1329_v15, %v2117_v14 }
 0x121   : > { %v777_v27 = vpop.f32.mrf.mxu1  ;;  %v776_v28 = vadd.f32 %v775_v23, %v735_v25  ;;  %v780_v29 = vmax.f32 %v774_v24, 0.0  ;;  %v1338_v23 = vrot.slane %v1329_v15, %v2122_v16  ;;  %v1342_v24 = vrot.slane %v1329_v15, %v2129_v36 }
 0x122   : > { %v737_v30 = vpop.f32.mrf.mxu0  ;;  %v1346_v25 = vrot.slane %v1329_v15, %v2132_v38 }
 0x123   : > { %v778_v31 = vpop.f32.mrf.mxu1  ;;  %v781_v32 = vmax.f32 %v776_v28, 0.0  ;;  %v782_v34 = vpack.c.bf16 %v780_v29, %v780_v29 }
 0x125   : > { %v783_v33 = vpack.c.bf16 %v781_v32, %v781_v32 }
 0x127   : > { %1222 = vmatprep.mubr.bf16.mxu0 %v783_v33  ;;  %1263 = vmatprep.mubr.bf16.mxu1 %v783_v33 }
 0x128   : > { %1223 = vmatmul.mubr.bf16.vlgmr.msra.gmra.mxu0 %v782_v34  ;;  %1264 = vmatmul.mubr.bf16.vlgmr.msra.gmra.mxu1 %v782_v34 }
 0x1e8   : > { %v1224_v41 = vpop.f32.mrf.mxu0  ;;  %v1265_v42 = vpop.f32.mrf.mxu1 }
 0x1e9   : > { %v1225_v43 = vadd.f32 %v1224_v41, %v853_v37  ;;  %v1266_v48 = vadd.f32 %v1265_v42, %v861_v39 }
 0x1ea   : > { %v1226_v45 = vpop.f32.mrf.mxu0  ;;  %v1267_v47 = vpop.f32.mrf.mxu1 }
 0x1eb   : > { %v1227_v49 = vadd.f32 %v1226_v45, %v857_v40  ;;  %v1272_v53 = vadd.f32 %v1225_v43, %v2108_v4  ;;  %v1268_v55 = vadd.f32 %v1267_v47, %v865_v44  ;;  %v1274_v58 = vadd.f32 %v1266_v48, %v2111_v5 }
 0x1ec   : > { %v1228_v51 = vpop.f32.mrf.mxu0  ;;  %v1269_v52 = vpop.f32.mrf.mxu1 }
 0x1ed   : > { %v1273_v54 = vadd.f32 %v1227_v49, %v2044_v46  ;;  %v1275_v60 = vadd.f32 %v1268_v55, %v2055_v50 }
 0x1ee   : > { %v1229_v56 = vpop.f32.mrf.mxu0  ;;  %v1270_v57 = vpop.f32.mrf.mxu1 }
 0x1ef   : > { %v1276_v59 = vadd.f32 %v1273_v54, %v1272_v53 }
 0x1f1   : > { %v1277_v61 = vadd.f32 %v1276_v59, %v1274_v58 }
 0x1f3   : > { %v1278_v62 = vadd.f32 %v1277_v61, %v1275_v60 }
 0x1f5   : > { %1279 = vadd.xlane.f32.xlu0 %v1278_v62 }
 0x27e   : > { %v1280_v63 = vpop.xlane.xlu0 %1279 }
 0x27f   : > { %v1282_v0 = vmul.f32 0.001953125, %v1280_v63 }
 0x281   : > { %v1283_v1 = vsub.f32 %v1272_v53, %v1282_v0  ;;  %v1284_v2 = vsub.f32 %v1273_v54, %v1282_v0  ;;  %v1285_v3 = vsub.f32 %v1274_v58, %v1282_v0  ;;  %v1286_v6 = vsub.f32 %v1275_v60, %v1282_v0 }
 0x283   : > { %v1287_v4 = vmul.f32 %v1283_v1, %v1283_v1  ;;  %v1288_v7 = vmul.f32 %v1284_v2, %v1284_v2  ;;  %v1289_v46 = vmul.f32 %v1285_v3, %v1285_v3  ;;  %v1290_v9 = vmul.f32 %v1286_v6, %v1286_v6 }
 0x285   : > { %v1291_v8 = vadd.f32 %v1288_v7, %v1287_v4 }
 0x287   : > { %v1292_v10 = vadd.f32 %v1291_v8, %v1289_v46 }
 0x289   : > { %v1293_v11 = vadd.f32 %v1292_v10, %v1290_v9 }
 0x28b   : > { %1294 = vadd.xlane.f32.xlu0 %v1293_v11 }
 0x314   : > { %v1295_v5 = vpop.xlane.xlu0 %1294 }
 0x315   : > { %v1296_v12 = vmul.f32 0.001953125, %v1295_v5 }
 0x317   : > { %v1297_v50 = vadd.f32 1e-06, %v1296_v12 }
 0x319   : > { %1782 = vrsqrt.f32 %v1297_v50 }
 0x326   : > { %v1783_v21 = vpop.eup %1782 }
 0x327   : > { %v1299_v26 = vmul.f32 %v1783_v21, %v1283_v1  ;;  %v1300_v27 = vmul.f32 %v1783_v21, %v1284_v2  ;;  %v1301_v28 = vmul.f32 %v1783_v21, %v1285_v3  ;;  %v1302_v29 = vmul.f32 %v1783_v21, %v1286_v6 }
 0x329   : > { %v1325_v30 = vmul.f32 %v1308_v17, %v1299_v26  ;;  %v1326_v31 = vmul.f32 %v1312_v18, %v1300_v27  ;;  %v1327_v32 = vmul.f32 %v1316_v19, %v1301_v28  ;;  %v1328_v33 = vmul.f32 %v1320_v20, %v1302_v29 }
 0x32b   : > { %v1351_v14 = vadd.f32 %v1334_v22, %v1325_v30  ;;  %v1352_v34 = vadd.f32 %v1338_v23, %v1326_v31  ;;  %v1353_v16 = vadd.f32 %v1342_v24, %v1327_v32  ;;  %v1354_v35 = vadd.f32 %v1346_v25, %v1328_v33 }
 0x32d   : > { %1355 = vst [vmem:[%s293_s10] sm:$0xff] %v1351_v14  ;;  %1356 = vst [vmem:[%s293_s10 + $0x8] sm:$0xff] %v1352_v34 }
 0x32e   : > { %1357 = vst [vmem:[%s293_s10 + $0x10] sm:$0xff] %v1353_v16  ;;  %1358 = vst [vmem:[%s293_s10 + $0x18] sm:$0xff] %v1354_v35 }
 0x32f PF: > { %s18_s24 = sadd.s32 1, %s1820_s24  }
 0x330   : > { %p15_p1 = scmp.ge.s32.totalorder %s18_s24, 4  }
 0x332   :  { %17 = sbr.rel (!%p15_p1) target bundleno = 1 (0x1), region = 83 }
 0x337   :  { %1380 = vsyncpa [#allocation3], 1 }
 0x338   :  { %1382 = vsyncpa [#allocation3 + $0x1], 1 }

// kernel: encoder_p_forward.5
= control target key start
LH: loop header
LB: loop body
LE: loop exit
PB: predicated region body
PF: predicated region fallthrough
CT: control target
= control target key end

     0   :  { %7 = vsyncpa [#allocation3], 0  ;;  %s2477_s0 = inlined_call_operand.hbm [shape: f32[16,768], index: 0, kind: input, shape index: {}]   ;;  %s2478_s1 = inlined_call_operand.hbm [shape: bf16[768,512], index: 1, kind: input, shape index: {}]   ;;  %s2479_s2 = inlined_call_operand.vmem [shape: f32[16,512], index: 2, kind: output, shape index: {}]  }
   0x1   :  { %9 = vsyncpa [#allocation3 + $0x1], 0 }
   0x2   :  { %10 = vsyncpa [#allocation5], 0  ;;  %s2328_s9 = smov 0   ;;  %s2330_s10 = smov 0  }
   0x3   :  { %s2332_s11 = smov 0   ;;  %s2334_s12 = smov 0  }
   0x4 LB: > { %s2347_s13 = sadd.s32 4294967295, %s2307_s12   ;;  %p36_p0 = scmp.ne.s32.totalorder %s2299_s10, %s2295_s9  ;;  %s2307_s12 = sphi %s2334_s12, %s2494_s12   ;;  %s2303_s11 = sphi %s2332_s11, %s2493_s11   ;;  %s2299_s10 = sphi %s2330_s10, %s2492_s10   ;;  %s2295_s9 = sphi %s2328_s9, %s2491_s9  }
   0x5   : > { %p2480_p1 = scmp.eq.s32.totalorder %s2347_s13, 0  ;;  %p1669_p2 = scmp.ge.s32.totalorder %s2307_s12, 1 }
   0x6   : > { %p94_p3 = scmp.lt.s32.totalorder %s2307_s12, 3  ;;  %s2309_s16 = smov [#allocation4]  }
   0x7   : > { %p2355_p4 = por %p2480_p1, %p36_p0  ;;  %s106_s17 = sshll.u32 %s2309_s16, 4  ;;  %s107_s17 = int_to_ptr.vmem [resolvable:$true] %s106_s17 }
   0x8   : > { %p2359_p5 = pnand %p1669_p2, %p94_p3  ;;  %s2372_s19 = sadd.s32 1, %s2307_s12  }
   0x9   : > { %s2483_s14 = scalar_select %p2355_p4, 1, 0 }
   0xa   : > { %s2484_s15 = scalar_select %p2359_p5, 1, 0 }
   0xb   : > { %p1881_p6 = pneg %p2359_p5  ;;  %s23_s20 = sadd.s32 1, %s2303_s11 }
   0xc   : > { %s20_s21 = ssub.s32 %s2307_s12, %s2372_s19  ;;  %s2226_s22 = scalar_lea.vmem %s107_s17, 24576 }
   0xd   : > { %p2367_p7 = pnand %p1881_p6, %p2480_p1  ;;  %p2227_p9 = scmp.ne.s32.totalorder %s107_s17, %s2226_s22 }
   0xe   : > { %p2234_p12 = scmp.lt.s32.totalorder %s107_s17, %s107_s17  ;;  %p2235_p13 = scmp.lt.s32.totalorder %s2226_s22, %s2226_s22 }
   0xf   : > { %p2217_p8 = pneg %p2367_p7 }
  0x10   : > { %p2236_p0 = por %p2235_p13, %p2234_p12 }
  0x11   : > { %p2229_p10 = pnand %p2227_p9, %p2217_p8 }
  0x13   : > { %p2230_p11 = pneg %p2229_p10 }
  0x15   : > { %p2237_p2 = pnand %p2236_p0, %p2230_p11 }
  0x17   : > { %2240 = shalt.err (!%p2237_p2)
}
  0x18   : > { %s2310_s23 = smov 256   ;;  %s2311_s24 = smov 16  }
  0x19   : > { %1884 = dma.hbm_to_vmem [thread:$0]  (!%p2367_p7), %s2478_s1, 24576, %s107_s17, [#allocation5], %s2310_s23, %s2310_s23, %s2311_s24  }
  0x1a   : > { %p21_p3 = scmp.eq.s32.totalorder %s20_s21, 0  ;;  %p30_p6 = scmp.ne.s32.totalorder %s2303_s11, %s2299_s10 }
  0x1b   : > { %p31_p8 = scmp.eq.s32.totalorder %s2307_s12, 0  ;;  %p1890_p9 = scmp.lt.s32.totalorder %s2307_s12, 2 }
  0x1c   : > { %s2389_s27 = scalar_select %p21_p3, %s2303_s11, %s23_s20  }
  0x1d   : > { %p32_p10 = por %p31_p8, %p30_p6  ;;  %s120_s28 = sand.u32 1, %s2303_s11  }
  0x1e   : > { %s1872_s29 = smul.u32 48, %s120_s28  ;;  %s121_s9 = scalar_lea.sflag [#allocation3], %s120_s28 }
  0x1f   : > { %s1873_s30 = smul.u32 768, %s2307_s12  ;;  %p2393_p11 = pnand %p1890_p9, %p32_p10 }
  0x20   : > { %s124_s7 = scalar_lea.vmem [#allocation2], %s1872_s29  ;;  %s2246_s18 = scalar_lea.hbm %s2477_s0, 1536 }
  0x21   : > { %s2400_s6 = scalar_lea.hbm %s2477_s0, %s1873_s30  ;;  %s132_s8 = sshll.u32 %s124_s7, 4  ;;  %s133_s8 = int_to_ptr.vmem [resolvable:$true] %s132_s8 }
  0x22   : > { %s2241_s16 = scalar_lea.hbm %s2400_s6, 768  ;;  %p2243_p12 = pneg %p2393_p11 }
  0x23   : > { %p2242_p7 = scmp.ne.s32.totalorder %s2400_s6, %s2241_s16  ;;  %p2247_p2 = scmp.lt.s32.totalorder %s2400_s6, %s2477_s0 }
  0x24   : > { %p2248_p3 = scmp.lt.s32.totalorder %s2246_s18, %s2241_s16 }
  0x25   : > { %p2244_p13 = pnand %p2243_p12, %p2242_p7 }
  0x26   : > { %p2249_p6 = por %p2248_p3, %p2247_p2 }
  0x27   : > { %p2245_p0 = pneg %p2244_p13 }
  0x29   : > { %p2250_p8 = pnand %p2249_p6, %p2245_p0 }
  0x2b   : > { %2253 = shalt.err (!%p2250_p8)
}
  0x2c   : > { %s2254_s22 = scalar_lea.vmem %s133_s8, 768  ;;  %s2312_s23 = smov [#allocation2]  }
  0x2d   : > { %p2255_p9 = scmp.ne.s32.totalorder %s133_s8, %s2254_s22  ;;  %s2259_s24 = sshll.u32 %s2312_s23, 4  ;;  %s2260_s24 = int_to_ptr.vmem [resolvable:$false] %s2259_s24 }
  0x2e   : > { %s2261_s25 = scalar_lea.vmem %s2260_s24, 1536  ;;  %p2262_p7 = scmp.lt.s32.totalorder %s133_s8, %s2260_s24 }
  0x2f   : > { %p2257_p10 = pnand %p2255_p9, %p2243_p12  ;;  %p2263_p13 = scmp.lt.s32.totalorder %s2261_s25, %s2254_s22 }
  0x31   : > { %p2258_p1 = pneg %p2257_p10  ;;  %p2264_p4 = por %p2263_p13, %p2262_p7 }
  0x33   : > { %p2265_p5 = pnand %p2264_p4, %p2258_p1 }
  0x35   : > { %2268 = shalt.err (!%p2265_p5)
}
  0x36   : > { %1888 = dma.hbm_to_vmem [thread:$0]  (!%p2393_p11), %s2400_s6, 768, %s133_s8, %s121_s9  }
  0x37   : > { %p2487_p0 = scmp.ne.s32.totalorder %s2484_s15, 0 }
  0x38   : > { %s143_s26 = sand.u32 (!%p2487_p0), 1, %s2299_s10   ;;  %p2488_p12 = scmp.ne.s32.totalorder (!%p2487_p0), %s2483_s14, 0 }
  0x39   : > { %141 = sbr.rel (%p2487_p0) target bundleno = 459 (0x1cb), region = 28  ;;  %s144_s29 = scalar_lea.sflag (!%p2487_p0), [#allocation3], %s143_s26 }
  0x3a   : > { %s1874_s28 = smul.u32 (!%p2487_p0), 48, %s143_s26 }
  0x3c   : > { %s2419_s30 = scalar_lea.vmem (!%p2487_p0), [#allocation2], %s1874_s28 }
  0x3e   : > { %2286 = dma.done.wait (%p2488_p12), %s144_s29, 768  }
  0x3f   : > { %2288 = vsyncadd (%p2488_p12), %s144_s29, 4294966528  ;;  %p2489_p1 = scmp.eq.s32.totalorder %s2347_s13, 0 }
  0x41   : > { %2290 = dma.done.wait (%p2489_p1), [#allocation5], 24576   ;;  %p2490_p4 = pmov %p2489_p1 }
  0x42   : > { %v1927_v0 = vld [vmem:[#allocation4 + $0xe4] ss:$16 sps:$4 sm:$0xff]   ;;  %v1931_v2 = vld [vmem:[#allocation4 + $0xe0] ss:$16 sps:$4 sm:$0xff]   ;;  %v178_v46 = vld [vmem:[%s2419_s30 + $0x8] sm:$0xff]  ;;  %p172_p5 = scmp.lt.s32.totalorder %s2347_s13, 1 }
  0x43   : > { %2292 = vsyncadd (%p2490_p4), [#allocation5], 4294942720  ;;  %v1929_v1 = vld [vmem:[#allocation4 + $0x2e4] ss:$16 sps:$4 sm:$0xff]   ;;  %1341 = vmatprep.subr.bf16.mxu0 %v1927_v0  ;;  %v1932_v3 = vld [vmem:[#allocation4 + $0x2e0] ss:$16 sps:$4 sm:$0xff]   ;;  %v2430_v49 = vpack.c.bf16 %v178_v46, %v178_v46 }
  0x44   : > { %1382 = vmatprep.subr.bf16.mxu1 %v1929_v1  ;;  %v1933_v4 = vld [vmem:[#allocation4 + $0xc4] ss:$16 sps:$4 sm:$0xff]   ;;  %1342 = vmatpush1.bf16.msra.mxu0 %v1931_v2  ;;  %v1937_v6 = vld [vmem:[#allocation4 + $0xc0] ss:$16 sps:$4 sm:$0xff]   ;;  %v180_v50 = vld [vmem:[%s2419_s30 + $0x18] sm:$0xff]  ;;  %s2496_s13 = smov (!%p172_p5, %s2347_s13), 1 }
  0x45   : > { %1383 = vmatpush1.bf16.msra.mxu1 %v1932_v3  ;;  %v1935_v5 = vld [vmem:[#allocation4 + $0x2c4] ss:$16 sps:$4 sm:$0xff]   ;;  %1343 = vmatprep.subr.bf16.mxu0 %v1933_v4  ;;  %v1938_v7 = vld [vmem:[#allocation4 + $0x2c0] ss:$16 sps:$4 sm:$0xff]   ;;  %v2433_v52 = vpack.c.bf16 %v180_v50, %v180_v50  ;;  %s1871_s14 = sshll.u32 %s2496_s13, 5 }
  0x46   : > { %1384 = vmatprep.subr.bf16.mxu1 %v1935_v5  ;;  %v1939_v8 = vld [vmem:[#allocation4 + $0xa4] ss:$16 sps:$4 sm:$0xff]   ;;  %v1943_v10 = vld [vmem:[#allocation4 + $0xa0] ss:$16 sps:$4 sm:$0xff]   ;;  %1373 = vmatprep.mubr.bf16.mxu0 %v2430_v49  ;;  %s176_s4 = scalar_lea.vmem %s2479_s2, %s1871_s14 }
  0x47   : > { %v1941_v9 = vld [vmem:[#allocation4 + $0x2a4] ss:$16 sps:$4 sm:$0xff]   ;;  %v1944_v11 = vld [vmem:[#allocation4 + $0x2a0] ss:$16 sps:$4 sm:$0xff]   ;;  %1414 = vmatprep.mubr.bf16.mxu1 %v2433_v52 }
  0x48   : > { %1344 = vmatpush1.bf16.msra.mxu0 %v1937_v6  ;;  %v1945_v12 = vld [vmem:[#allocation4 + $0x84] ss:$16 sps:$4 sm:$0xff]   ;;  %v1949_v14 = vld [vmem:[#allocation4 + $0x80] ss:$16 sps:$4 sm:$0xff]  }
  0x49   : > { %1385 = vmatpush1.bf16.msra.mxu1 %v1938_v7  ;;  %1345 = vmatprep.subr.bf16.mxu0 %v1939_v8  ;;  %v1947_v13 = vld [vmem:[#allocation4 + $0x284] ss:$16 sps:$4 sm:$0xff]   ;;  %v1950_v15 = vld [vmem:[#allocation4 + $0x280] ss:$16 sps:$4 sm:$0xff]   ;;  %v2028_v7 = vld [vmem:[#allocation4 + $0xec] ss:$16 sps:$4 sm:$0xff]  }
  0x4a   : > { %1386 = vmatprep.subr.bf16.mxu1 %v1941_v9  ;;  %v1951_v16 = vld [vmem:[#allocation4 + $0x64] ss:$16 sps:$4 sm:$0xff]   ;;  %v1955_v18 = vld [vmem:[#allocation4 + $0x60] ss:$16 sps:$4 sm:$0xff]  }
  0x4b   : > { %v1953_v17 = vld [vmem:[#allocation4 + $0x264] ss:$16 sps:$4 sm:$0xff]   ;;  %v1956_v19 = vld [vmem:[#allocation4 + $0x260] ss:$16 sps:$4 sm:$0xff]  }
  0x4c   : > { %1346 = vmatpush1.bf16.msra.mxu0 %v1943_v10  ;;  %v1957_v20 = vld [vmem:[#allocation4 + $0x44] ss:$16 sps:$4 sm:$0xff]   ;;  %v1961_v22 = vld [vmem:[#allocation4 + $0x40] ss:$16 sps:$4 sm:$0xff]  }
  0x4d   : > { %1387 = vmatpush1.bf16.msra.mxu1 %v1944_v11  ;;  %1347 = vmatprep.subr.bf16.mxu0 %v1945_v12  ;;  %v1959_v21 = vld [vmem:[#allocation4 + $0x244] ss:$16 sps:$4 sm:$0xff]   ;;  %v1962_v23 = vld [vmem:[#allocation4 + $0x240] ss:$16 sps:$4 sm:$0xff]   ;;  %v2026_v11 = vld [vmem:[#allocation4 + $0xe8] ss:$16 sps:$4 sm:$0xff]  }
  0x4e   : > { %1388 = vmatprep.subr.bf16.mxu1 %v1947_v13  ;;  %v1963_v24 = vld [vmem:[#allocation4 + $0x24] ss:$16 sps:$4 sm:$0xff]   ;;  %v1967_v26 = vld [vmem:[#allocation4 + $0x20] ss:$16 sps:$4 sm:$0xff]   ;;  %v2034_v13 = vld [vmem:[#allocation4 + $0xcc] ss:$16 sps:$4 sm:$0xff]  }
  0x4f   : > { %v1965_v25 = vld [vmem:[#allocation4 + $0x224] ss:$16 sps:$4 sm:$0xff]   ;;  %v1968_v27 = vld [vmem:[#allocation4 + $0x220] ss:$16 sps:$4 sm:$0xff]  }
  0x50   : > { %1348 = vmatpush1.bf16.msra.mxu0 %v1949_v14  ;;  %v1969_v28 = vld [vmem:[#allocation4 + $0x4] ss:$16 sps:$4 sm:$0xff]   ;;  %v1973_v30 = vld [vmem:[#allocation4] ss:$16 sps:$4 sm:$0xff]  }
  0x51   : > { %1389 = vmatpush1.bf16.msra.mxu1 %v1950_v15  ;;  %1349 = vmatprep.subr.bf16.mxu0 %v1951_v16  ;;  %v1971_v29 = vld [vmem:[#allocation4 + $0x204] ss:$16 sps:$4 sm:$0xff]   ;;  %v1974_v31 = vld [vmem:[#allocation4 + $0x200] ss:$16 sps:$4 sm:$0xff]   ;;  %v2032_v15 = vld [vmem:[#allocation4 + $0xc8] ss:$16 sps:$4 sm:$0xff]  }
  0x52   : > { %1390 = vmatprep.subr.bf16.mxu1 %v1953_v17  ;;  %v1975_v32 = vld [vmem:[#allocation4 + $0x1e4] ss:$16 sps:$4 sm:$0xff]   ;;  %v1979_v34 = vld [vmem:[#allocation4 + $0x1e0] ss:$16 sps:$4 sm:$0xff]   ;;  %v2040_v17 = vld [vmem:[#allocation4 + $0xac] ss:$16 sps:$4 sm:$0xff]  }
  0x53   : > { %v1977_v33 = vld [vmem:[#allocation4 + $0x3e4] ss:$16 sps:$4 sm:$0xff]   ;;  %v1980_v35 = vld [vmem:[#allocation4 + $0x3e0] ss:$16 sps:$4 sm:$0xff]  }
  0x54   : > { %1350 = vmatpush1.bf16.msra.mxu0 %v1955_v18  ;;  %v1981_v36 = vld [vmem:[#allocation4 + $0x1c4] ss:$16 sps:$4 sm:$0xff]   ;;  %v1985_v38 = vld [vmem:[#allocation4 + $0x1c0] ss:$16 sps:$4 sm:$0xff]  }
  0x55   : > { %1391 = vmatpush1.bf16.msra.mxu1 %v1956_v19  ;;  %1351 = vmatprep.subr.bf16.mxu0 %v1957_v20  ;;  %v1983_v37 = vld [vmem:[#allocation4 + $0x3c4] ss:$16 sps:$4 sm:$0xff]   ;;  %v1986_v39 = vld [vmem:[#allocation4 + $0x3c0] ss:$16 sps:$4 sm:$0xff]   ;;  %v2038_v19 = vld [vmem:[#allocation4 + $0xa8] ss:$16 sps:$4 sm:$0xff]  }
  0x56   : > { %1392 = vmatprep.subr.bf16.mxu1 %v1959_v21  ;;  %v1987_v40 = vld [vmem:[#allocation4 + $0x1a4] ss:$16 sps:$4 sm:$0xff]   ;;  %v1991_v42 = vld [vmem:[#allocation4 + $0x1a0] ss:$16 sps:$4 sm:$0xff]   ;;  %v2046_v21 = vld [vmem:[#allocation4 + $0x8c] ss:$16 sps:$4 sm:$0xff]  }
  0x57   : > { %v1989_v41 = vld [vmem:[#allocation4 + $0x3a4] ss:$16 sps:$4 sm:$0xff]   ;;  %v1992_v43 = vld [vmem:[#allocation4 + $0x3a0] ss:$16 sps:$4 sm:$0xff]  }
  0x58   : > { %1352 = vmatpush1.bf16.msra.mxu0 %v1961_v22  ;;  %v1993_v44 = vld [vmem:[#allocation4 + $0x184] ss:$16 sps:$4 sm:$0xff]   ;;  %v1997_v47 = vld [vmem:[#allocation4 + $0x180] ss:$16 sps:$4 sm:$0xff]  }
  0x59   : > { %1393 = vmatpush1.bf16.msra.mxu1 %v1962_v23  ;;  %1353 = vmatprep.subr.bf16.mxu0 %v1963_v24  ;;  %v1995_v45 = vld [vmem:[#allocation4 + $0x384] ss:$16 sps:$4 sm:$0xff]   ;;  %v1998_v48 = vld [vmem:[#allocation4 + $0x380] ss:$16 sps:$4 sm:$0xff]   ;;  %v2044_v23 = vld [vmem:[#allocation4 + $0x88] ss:$16 sps:$4 sm:$0xff]  }
  0x5a   : > { %1394 = vmatprep.subr.bf16.mxu1 %v1965_v25  ;;  %v1999_v51 = vld [vmem:[#allocation4 + $0x164] ss:$16 sps:$4 sm:$0xff]   ;;  %v2003_v54 = vld [vmem:[#allocation4 + $0x160] ss:$16 sps:$4 sm:$0xff]   ;;  %v2052_v25 = vld [vmem:[#allocation4 + $0x6c] ss:$16 sps:$4 sm:$0xff]  }
  0x5b   : > { %v2001_v53 = vld [vmem:[#allocation4 + $0x364] ss:$16 sps:$4 sm:$0xff]   ;;  %v2004_v55 = vld [vmem:[#allocation4 + $0x360] ss:$16 sps:$4 sm:$0xff]  }
  0x5c   : > { %1354 = vmatpush1.bf16.msra.mxu0 %v1967_v26  ;;  %v2005_v56 = vld [vmem:[#allocation4 + $0x144] ss:$16 sps:$4 sm:$0xff]   ;;  %v2009_v58 = vld [vmem:[#allocation4 + $0x140] ss:$16 sps:$4 sm:$0xff]  }
  0x5d   : > { %1395 = vmatpush1.bf16.msra.mxu1 %v1968_v27  ;;  %1355 = vmatprep.subr.bf16.mxu0 %v1969_v28  ;;  %v2007_v57 = vld [vmem:[#allocation4 + $0x344] ss:$16 sps:$4 sm:$0xff]   ;;  %v2010_v59 = vld [vmem:[#allocation4 + $0x340] ss:$16 sps:$4 sm:$0xff]   ;;  %v2050_v27 = vld [vmem:[#allocation4 + $0x68] ss:$16 sps:$4 sm:$0xff]  }
  0x5e   : > { %1396 = vmatprep.subr.bf16.mxu1 %v1971_v29  ;;  %v2011_v60 = vld [vmem:[#allocation4 + $0x124] ss:$16 sps:$4 sm:$0xff]   ;;  %v2015_v62 = vld [vmem:[#allocation4 + $0x120] ss:$16 sps:$4 sm:$0xff]   ;;  %v2058_v29 = vld [vmem:[#allocation4 + $0x4c] ss:$16 sps:$4 sm:$0xff]  }
  0x5f   : > { %v2013_v61 = vld [vmem:[#allocation4 + $0x324] ss:$16 sps:$4 sm:$0xff]   ;;  %v2016_v63 = vld [vmem:[#allocation4 + $0x320] ss:$16 sps:$4 sm:$0xff]  }
  0x60   : > { %1356 = vmatpush1.bf16.msra.mxu0 %v1973_v30  ;;  %v2017_v0 = vld [vmem:[#allocation4 + $0x104] ss:$16 sps:$4 sm:$0xff]   ;;  %v2021_v2 = vld [vmem:[#allocation4 + $0x100] ss:$16 sps:$4 sm:$0xff]  }
  0x61   : > { %1397 = vmatpush1.bf16.msra.mxu1 %v1974_v31  ;;  %1357 = vmatprep.subr.bf16.mxu0 %v1975_v32  ;;  %v2019_v1 = vld [vmem:[#allocation4 + $0x304] ss:$16 sps:$4 sm:$0xff]   ;;  %v2022_v3 = vld [vmem:[#allocation4 + $0x300] ss:$16 sps:$4 sm:$0xff]   ;;  %v2056_v31 = vld [vmem:[#allocation4 + $0x48] ss:$16 sps:$4 sm:$0xff]  }
  0x62   : > { %1398 = vmatprep.subr.bf16.mxu1 %v1977_v33  ;;  %v177_v4 = vld [vmem:[%s2419_s30] sm:$0xff]  ;;  %v179_v5 = vld [vmem:[%s2419_s30 + $0x10] sm:$0xff]  ;;  %v2064_v33 = vld [vmem:[#allocation4 + $0x2c] ss:$16 sps:$4 sm:$0xff]  }
  0x63   : > { %v2025_v6 = vld [vmem:[#allocation4 + $0x4e4] ss:$16 sps:$4 sm:$0xff]   ;;  %v2439_v8 = vpack.c.bf16 %v177_v4, %v177_v4  ;;  %v2441_v9 = vpack.c.bf16 %v179_v5, %v179_v5  ;;  %v2023_v10 = vld [vmem:[#allocation4 + $0x4e0] ss:$16 sps:$4 sm:$0xff]   ;;  %v2112_v4 = vld [vmem:[#allocation4 + $0x12c] ss:$16 sps:$4 sm:$0xff]  }
  0x64   : > { %1358 = vmatpush2.bf16.msra.mxu0 %v1979_v34  ;;  %v2031_v12 = vld [vmem:[#allocation4 + $0x4c4] ss:$16 sps:$4 sm:$0xff]   ;;  %v2029_v14 = vld [vmem:[#allocation4 + $0x4c0] ss:$16 sps:$4 sm:$0xff]   ;;  %v182_v34 = vld [vmem:[%s2419_s30 + $0x28] sm:$0xff] }
  0x65   : > { %1399 = vmatpush2.bf16.msra.mxu1 %v1980_v35  ;;  %1359 = vmatprep.subr.bf16.mxu0 %v1981_v36  ;;  %v2037_v16 = vld [vmem:[#allocation4 + $0x4a4] ss:$16 sps:$4 sm:$0xff]   ;;  %v2035_v18 = vld [vmem:[#allocation4 + $0x4a0] ss:$16 sps:$4 sm:$0xff]   ;;  %v2447_v35 = vpack.c.bf16 %v182_v34, %v182_v34  ;;  %v2154_v34 = vld [vmem:[#allocation4 + $0x44c] ss:$16 sps:$4 sm:$0xff]  }
  0x66   : > { %1400 = vmatprep.subr.bf16.mxu1 %v1983_v37  ;;  %v2043_v20 = vld [vmem:[#allocation4 + $0x484] ss:$16 sps:$4 sm:$0xff]   ;;  %v2041_v22 = vld [vmem:[#allocation4 + $0x480] ss:$16 sps:$4 sm:$0xff]   ;;  %v2062_v37 = vld [vmem:[#allocation4 + $0x28] ss:$16 sps:$4 sm:$0xff]  }
  0x67   : > { %v2049_v24 = vld [vmem:[#allocation4 + $0x464] ss:$16 sps:$4 sm:$0xff]   ;;  %v2047_v26 = vld [vmem:[#allocation4 + $0x460] ss:$16 sps:$4 sm:$0xff]  }
  0x68   : > { %1360 = vmatpush2.bf16.msra.mxu0 %v1985_v38  ;;  %v2055_v28 = vld [vmem:[#allocation4 + $0x444] ss:$16 sps:$4 sm:$0xff]   ;;  %v2053_v30 = vld [vmem:[#allocation4 + $0x440] ss:$16 sps:$4 sm:$0xff]  }
  0x69   : > { %1401 = vmatpush2.bf16.msra.mxu1 %v1986_v39  ;;  %1361 = vmatprep.subr.bf16.mxu0 %v1987_v40  ;;  %v2061_v32 = vld [vmem:[#allocation4 + $0x424] ss:$16 sps:$4 sm:$0xff]   ;;  %v2059_v36 = vld [vmem:[#allocation4 + $0x420] ss:$16 sps:$4 sm:$0xff]   ;;  %v2070_v39 = vld [vmem:[#allocation4 + $0xc] ss:$16 sps:$4 sm:$0xff]  }
  0x6a   : > { %1402 = vmatprep.subr.bf16.mxu1 %v1989_v41  ;;  %v2067_v38 = vld [vmem:[#allocation4 + $0x404] ss:$16 sps:$4 sm:$0xff]   ;;  %v2065_v40 = vld [vmem:[#allocation4 + $0x400] ss:$16 sps:$4 sm:$0xff]   ;;  %v2068_v41 = vld [vmem:[#allocation4 + $0x8] ss:$16 sps:$4 sm:$0xff]  }
  0x6b   : > { %v2079_v46 = vld [vmem:[#allocation4 + $0x5c4] ss:$16 sps:$4 sm:$0xff]   ;;  %v2107_v5 = vld [vmem:[#allocation4 + $0x520] ss:$16 sps:$4 sm:$0xff]  }
  0x6c   : > { %1362 = vmatpush2.bf16.msra.mxu0 %v1991_v42  ;;  %v2073_v42 = vld [vmem:[#allocation4 + $0x5e4] ss:$16 sps:$4 sm:$0xff]  }
  0x6d   : > { %1403 = vmatpush2.bf16.msra.mxu1 %v1992_v43  ;;  %1363 = vmatprep.subr.bf16.mxu0 %v1993_v44  ;;  %v2076_v43 = vld [vmem:[#allocation4 + $0x1ec] ss:$16 sps:$4 sm:$0xff]   ;;  %v2071_v44 = vld [vmem:[#allocation4 + $0x5e0] ss:$16 sps:$4 sm:$0xff]   ;;  %v2085_v50 = vld [vmem:[#allocation4 + $0x5a4] ss:$16 sps:$4 sm:$0xff]  }
  0x6e   : > { %1404 = vmatprep.subr.bf16.mxu1 %v1995_v45  ;;  %v2074_v45 = vld [vmem:[#allocation4 + $0x1e8] ss:$16 sps:$4 sm:$0xff]  }
  0x70   : > { %1364 = vmatpush2.bf16.msra.mxu0 %v1997_v47  ;;  %v2082_v47 = vld [vmem:[#allocation4 + $0x1cc] ss:$16 sps:$4 sm:$0xff]  }
  0x71   : > { %1405 = vmatpush2.bf16.msra.mxu1 %v1998_v48  ;;  %1365 = vmatprep.subr.bf16.mxu0 %v1999_v51  ;;  %v2077_v48 = vld [vmem:[#allocation4 + $0x5c0] ss:$16 sps:$4 sm:$0xff]   ;;  %v2088_v51 = vld [vmem:[#allocation4 + $0x1ac] ss:$16 sps:$4 sm:$0xff]  }
  0x72   : > { %1406 = vmatprep.subr.bf16.mxu1 %v2001_v53  ;;  %v2083_v53 = vld [vmem:[#allocation4 + $0x5a0] ss:$16 sps:$4 sm:$0xff]  }
  0x74   : > { %1366 = vmatpush2.bf16.msra.mxu0 %v2003_v54  ;;  %v2086_v54 = vld [vmem:[#allocation4 + $0x1a8] ss:$16 sps:$4 sm:$0xff]  }
  0x75   : > { %1407 = vmatpush2.bf16.msra.mxu1 %v2004_v55  ;;  %1367 = vmatprep.subr.bf16.mxu0 %v2005_v56  ;;  %v2091_v55 = vld [vmem:[#allocation4 + $0x584] ss:$16 sps:$4 sm:$0xff]   ;;  %v2094_v56 = vld [vmem:[#allocation4 + $0x18c] ss:$16 sps:$4 sm:$0xff]  }
  0x76   : > { %1408 = vmatprep.subr.bf16.mxu1 %v2007_v57  ;;  %v2089_v57 = vld [vmem:[#allocation4 + $0x580] ss:$16 sps:$4 sm:$0xff]  }
  0x78   : > { %1368 = vmatpush2.bf16.msra.mxu0 %v2009_v58  ;;  %v2092_v58 = vld [vmem:[#allocation4 + $0x188] ss:$16 sps:$4 sm:$0xff]  }
  0x79   : > { %1409 = vmatpush2.bf16.msra.mxu1 %v2010_v59  ;;  %1369 = vmatprep.subr.bf16.mxu0 %v2011_v60  ;;  %v2097_v59 = vld [vmem:[#allocation4 + $0x564] ss:$16 sps:$4 sm:$0xff]   ;;  %v2100_v60 = vld [vmem:[#allocation4 + $0x16c] ss:$16 sps:$4 sm:$0xff]  }
  0x7a   : > { %1410 = vmatprep.subr.bf16.mxu1 %v2013_v61  ;;  %v2095_v61 = vld [vmem:[#allocation4 + $0x560] ss:$16 sps:$4 sm:$0xff]  }
  0x7c   : > { %1370 = vmatpush2.bf16.msra.mxu0 %v2015_v62  ;;  %v2098_v62 = vld [vmem:[#allocation4 + $0x168] ss:$16 sps:$4 sm:$0xff]  }
  0x7d   : > { %1411 = vmatpush2.bf16.msra.mxu1 %v2016_v63  ;;  %1371 = vmatprep.subr.bf16.mxu0 %v2017_v0  ;;  %v2103_v63 = vld [vmem:[#allocation4 + $0x544] ss:$16 sps:$4 sm:$0xff]   ;;  %v2106_v0 = vld [vmem:[#allocation4 + $0x14c] ss:$16 sps:$4 sm:$0xff]  }
  0x7e   : > { %1412 = vmatprep.subr.bf16.mxu1 %v2019_v1  ;;  %v2101_v1 = vld [vmem:[#allocation4 + $0x540] ss:$16 sps:$4 sm:$0xff]  }
  0x80   : > { %1372 = vmatpush2.bf16.msra.mxu0 %v2021_v2  ;;  %v2104_v2 = vld [vmem:[#allocation4 + $0x148] ss:$16 sps:$4 sm:$0xff]  }
  0x81   : > { %1413 = vmatpush2.bf16.msra.mxu1 %v2022_v3  ;;  %1423 = vmatprep.subr.bf16.mxu0 %v2025_v6  ;;  %v2109_v3 = vld [vmem:[#allocation4 + $0x524] ss:$16 sps:$4 sm:$0xff]   ;;  %v2110_v6 = vld [vmem:[#allocation4 + $0x128] ss:$16 sps:$4 sm:$0xff]  }
  0x82   : > { %1464 = vmatprep.subr.bf16.mxu1 %v2028_v7  ;;  %v2115_v7 = vld [vmem:[#allocation4 + $0x504] ss:$16 sps:$4 sm:$0xff]  }
  0x83   : > { %1374 = vmatmul.mubr.bf16.vlgmr.msra.gmra.mxu0 %v2439_v8 }
  0x84   : > { %1415 = vmatmul.mubr.bf16.vlgmr.msra.gmra.mxu1 %v2441_v9  ;;  %1424 = vmatpush1.bf16.msra.mxu0 %v2023_v10  ;;  %v2118_v10 = vld [vmem:[#allocation4 + $0x10c] ss:$16 sps:$4 sm:$0xff]  }
  0x85   : > { %1465 = vmatpush1.bf16.msra.mxu1 %v2026_v11  ;;  %1425 = vmatprep.subr.bf16.mxu0 %v2031_v12  ;;  %v2113_v11 = vld [vmem:[#allocation4 + $0x500] ss:$16 sps:$4 sm:$0xff]   ;;  %v2116_v12 = vld [vmem:[#allocation4 + $0x108] ss:$16 sps:$4 sm:$0xff]  }
  0x86   : > { %1466 = vmatprep.subr.bf16.mxu1 %v2034_v13  ;;  %1496 = vmatprep.mubr.bf16.mxu1 %v2430_v49  ;;  %v2080_v49 = vld [vmem:[#allocation4 + $0x1c8] ss:$16 sps:$4 sm:$0xff]   ;;  %v181_v13 = vld [vmem:[%s2419_s30 + $0x20] sm:$0xff] }
  0x87   : > { %1455 = vmatprep.mubr.bf16.mxu0 %v2447_v35 }
  0x88   : > { %1426 = vmatpush1.bf16.msra.mxu0 %v2029_v14  ;;  %v2121_v14 = vld [vmem:[#allocation4 + $0x2ec] ss:$16 sps:$4 sm:$0xff]  }
  0x89   : > { %1467 = vmatpush1.bf16.msra.mxu1 %v2032_v15  ;;  %1427 = vmatprep.subr.bf16.mxu0 %v2037_v16  ;;  %v2124_v15 = vld [vmem:[#allocation4 + $0x4ec] ss:$16 sps:$4 sm:$0xff]   ;;  %v2451_v16 = vpack.c.bf16 %v181_v13, %v181_v13 }
  0x8a   : > { %1468 = vmatprep.subr.bf16.mxu1 %v2040_v17  ;;  %v2119_v17 = vld [vmem:[#allocation4 + $0x2e8] ss:$16 sps:$4 sm:$0xff]   ;;  %v2214_v13 = vld [vmem:[#allocation4 + $0x50c] ss:$16 sps:$4 sm:$0xff]  }
  0x8c   : > { %1428 = vmatpush1.bf16.msra.mxu0 %v2035_v18  ;;  %v2122_v18 = vld [vmem:[#allocation4 + $0x4e8] ss:$16 sps:$4 sm:$0xff]  }
  0x8d   : > { %1469 = vmatpush1.bf16.msra.mxu1 %v2038_v19  ;;  %1429 = vmatprep.subr.bf16.mxu0 %v2043_v20  ;;  %v2127_v19 = vld [vmem:[#allocation4 + $0x2cc] ss:$16 sps:$4 sm:$0xff]  }
  0x8e   : > { %1470 = vmatprep.subr.bf16.mxu1 %v2046_v21  ;;  %v2130_v20 = vld [vmem:[#allocation4 + $0x4cc] ss:$16 sps:$4 sm:$0xff]   ;;  %v2125_v21 = vld [vmem:[#allocation4 + $0x2c8] ss:$16 sps:$4 sm:$0xff]  }
  0x90   : > { %1430 = vmatpush1.bf16.msra.mxu0 %v2041_v22  ;;  %v2128_v22 = vld [vmem:[#allocation4 + $0x4c8] ss:$16 sps:$4 sm:$0xff]  }
  0x91   : > { %1471 = vmatpush1.bf16.msra.mxu1 %v2044_v23  ;;  %1431 = vmatprep.subr.bf16.mxu0 %v2049_v24  ;;  %v2133_v23 = vld [vmem:[#allocation4 + $0x2ac] ss:$16 sps:$4 sm:$0xff]  }
  0x92   : > { %1472 = vmatprep.subr.bf16.mxu1 %v2052_v25  ;;  %v2136_v24 = vld [vmem:[#allocation4 + $0x4ac] ss:$16 sps:$4 sm:$0xff]   ;;  %v2131_v25 = vld [vmem:[#allocation4 + $0x2a8] ss:$16 sps:$4 sm:$0xff]  }
  0x94   : > { %1432 = vmatpush1.bf16.msra.mxu0 %v2047_v26  ;;  %v2134_v26 = vld [vmem:[#allocation4 + $0x4a8] ss:$16 sps:$4 sm:$0xff]  }
  0x95   : > { %1473 = vmatpush1.bf16.msra.mxu1 %v2050_v27  ;;  %1433 = vmatprep.subr.bf16.mxu0 %v2055_v28  ;;  %v2139_v27 = vld [vmem:[#allocation4 + $0x28c] ss:$16 sps:$4 sm:$0xff]   ;;  %v2137_v28 = vld [vmem:[#allocation4 + $0x288] ss:$16 sps:$4 sm:$0xff]  }
  0x96   : > { %1474 = vmatprep.subr.bf16.mxu1 %v2058_v29  ;;  %v2140_v29 = vld [vmem:[#allocation4 + $0x488] ss:$16 sps:$4 sm:$0xff]  }
  0x98   : > { %1434 = vmatpush1.bf16.msra.mxu0 %v2053_v30  ;;  %v2145_v30 = vld [vmem:[#allocation4 + $0x26c] ss:$16 sps:$4 sm:$0xff]  }
  0x99   : > { %1475 = vmatpush1.bf16.msra.mxu1 %v2056_v31  ;;  %1435 = vmatprep.subr.bf16.mxu0 %v2061_v32  ;;  %v2148_v31 = vld [vmem:[#allocation4 + $0x46c] ss:$16 sps:$4 sm:$0xff]   ;;  %v2146_v32 = vld [vmem:[#allocation4 + $0x468] ss:$16 sps:$4 sm:$0xff]  }
  0x9a   : > { %1476 = vmatprep.subr.bf16.mxu1 %v2064_v33  ;;  %v2151_v33 = vld [vmem:[#allocation4 + $0x24c] ss:$16 sps:$4 sm:$0xff]  }
  0x9c   : > { %1436 = vmatpush1.bf16.msra.mxu0 %v2059_v36  ;;  %v2152_v36 = vld [vmem:[#allocation4 + $0x448] ss:$16 sps:$4 sm:$0xff]  }
  0x9d   : > { %1477 = vmatpush1.bf16.msra.mxu1 %v2062_v37  ;;  %1437 = vmatprep.subr.bf16.mxu0 %v2067_v38  ;;  %v2157_v37 = vld [vmem:[#allocation4 + $0x22c] ss:$16 sps:$4 sm:$0xff]  }
  0x9e   : > { %1478 = vmatprep.subr.bf16.mxu1 %v2070_v39  ;;  %v2160_v38 = vld [vmem:[#allocation4 + $0x42c] ss:$16 sps:$4 sm:$0xff]   ;;  %v2155_v39 = vld [vmem:[#allocation4 + $0x228] ss:$16 sps:$4 sm:$0xff]  }
  0xa0   : > { %1438 = vmatpush1.bf16.msra.mxu0 %v2065_v40  ;;  %v2158_v40 = vld [vmem:[#allocation4 + $0x428] ss:$16 sps:$4 sm:$0xff]  }
  0xa1   : > { %1479 = vmatpush1.bf16.msra.mxu1 %v2068_v41  ;;  %1439 = vmatprep.subr.bf16.mxu0 %v2073_v42  ;;  %v2163_v41 = vld [vmem:[#allocation4 + $0x20c] ss:$16 sps:$4 sm:$0xff]  }
  0xa2   : > { %1480 = vmatprep.subr.bf16.mxu1 %v2076_v43  ;;  %v2166_v42 = vld [vmem:[#allocation4 + $0x40c] ss:$16 sps:$4 sm:$0xff]   ;;  %v2161_v43 = vld [vmem:[#allocation4 + $0x208] ss:$16 sps:$4 sm:$0xff]  }
  0xa4   : > { %1440 = vmatpush2.bf16.msra.mxu0 %v2071_v44  ;;  %v2164_v44 = vld [vmem:[#allocation4 + $0x408] ss:$16 sps:$4 sm:$0xff]  }
  0xa5   : > { %1481 = vmatpush2.bf16.msra.mxu1 %v2074_v45  ;;  %1441 = vmatprep.subr.bf16.mxu0 %v2079_v46  ;;  %v2169_v45 = vld [vmem:[#allocation4 + $0x3ec] ss:$16 sps:$4 sm:$0xff]  }
  0xa6   : > { %1482 = vmatprep.subr.bf16.mxu1 %v2082_v47  ;;  %v2172_v46 = vld [vmem:[#allocation4 + $0x5ec] ss:$16 sps:$4 sm:$0xff]   ;;  %v2167_v47 = vld [vmem:[#allocation4 + $0x3e8] ss:$16 sps:$4 sm:$0xff]  }
  0xa8   : > { %1442 = vmatpush2.bf16.msra.mxu0 %v2077_v48  ;;  %v2170_v48 = vld [vmem:[#allocation4 + $0x5e8] ss:$16 sps:$4 sm:$0xff]  }
  0xa9   : > { %1483 = vmatpush2.bf16.msra.mxu1 %v2080_v49  ;;  %1443 = vmatprep.subr.bf16.mxu0 %v2085_v50  ;;  %v2175_v49 = vld [vmem:[#allocation4 + $0x3cc] ss:$16 sps:$4 sm:$0xff]  }
  0xaa   : > { %1484 = vmatprep.subr.bf16.mxu1 %v2088_v51  ;;  %v2178_v50 = vld [vmem:[#allocation4 + $0x5cc] ss:$16 sps:$4 sm:$0xff]   ;;  %v2173_v51 = vld [vmem:[#allocation4 + $0x3c8] ss:$16 sps:$4 sm:$0xff]  }
  0xac   : > { %1444 = vmatpush2.bf16.msra.mxu0 %v2083_v53  ;;  %v2176_v53 = vld [vmem:[#allocation4 + $0x5c8] ss:$16 sps:$4 sm:$0xff]  }
  0xad   : > { %1485 = vmatpush2.bf16.msra.mxu1 %v2086_v54  ;;  %1445 = vmatprep.subr.bf16.mxu0 %v2091_v55  ;;  %v2181_v54 = vld [vmem:[#allocation4 + $0x3ac] ss:$16 sps:$4 sm:$0xff]  }
  0xae   : > { %1486 = vmatprep.subr.bf16.mxu1 %v2094_v56  ;;  %v2184_v55 = vld [vmem:[#allocation4 + $0x5ac] ss:$16 sps:$4 sm:$0xff]   ;;  %v2179_v56 = vld [vmem:[#allocation4 + $0x3a8] ss:$16 sps:$4 sm:$0xff]  }
  0xb0   : > { %1446 = vmatpush2.bf16.msra.mxu0 %v2089_v57  ;;  %v2182_v57 = vld [vmem:[#allocation4 + $0x5a8] ss:$16 sps:$4 sm:$0xff]  }
  0xb1   : > { %1487 = vmatpush2.bf16.msra.mxu1 %v2092_v58  ;;  %1447 = vmatprep.subr.bf16.mxu0 %v2097_v59  ;;  %v2187_v58 = vld [vmem:[#allocation4 + $0x38c] ss:$16 sps:$4 sm:$0xff]  }
  0xb2   : > { %1488 = vmatprep.subr.bf16.mxu1 %v2100_v60  ;;  %v2190_v59 = vld [vmem:[#allocation4 + $0x58c] ss:$16 sps:$4 sm:$0xff]   ;;  %v2185_v60 = vld [vmem:[#allocation4 + $0x388] ss:$16 sps:$4 sm:$0xff]  }
  0xb4   : > { %1448 = vmatpush2.bf16.msra.mxu0 %v2095_v61  ;;  %v2188_v61 = vld [vmem:[#allocation4 + $0x588] ss:$16 sps:$4 sm:$0xff]  }
  0xb5   : > { %1489 = vmatpush2.bf16.msra.mxu1 %v2098_v62  ;;  %1449 = vmatprep.subr.bf16.mxu0 %v2103_v63  ;;  %v2193_v62 = vld [vmem:[#allocation4 + $0x36c] ss:$16 sps:$4 sm:$0xff]  }
  0xb6   : > { %1490 = vmatprep.subr.bf16.mxu1 %v2106_v0  ;;  %v2196_v63 = vld [vmem:[#allocation4 + $0x56c] ss:$16 sps:$4 sm:$0xff]   ;;  %v2191_v0 = vld [vmem:[#allocation4 + $0x368] ss:$16 sps:$4 sm:$0xff]  }
  0xb8   : > { %1450 = vmatpush2.bf16.msra.mxu0 %v2101_v1  ;;  %v2194_v1 = vld [vmem:[#allocation4 + $0x568] ss:$16 sps:$4 sm:$0xff]  }
  0xb9   : > { %1491 = vmatpush2.bf16.msra.mxu1 %v2104_v2  ;;  %1451 = vmatprep.subr.bf16.mxu0 %v2109_v3  ;;  %v2199_v2 = vld [vmem:[#allocation4 + $0x34c] ss:$16 sps:$4 sm:$0xff]  }
  0xba   : > { %1492 = vmatprep.subr.bf16.mxu1 %v2112_v4  ;;  %v2202_v3 = vld [vmem:[#allocation4 + $0x54c] ss:$16 sps:$4 sm:$0xff]   ;;  %v2197_v4 = vld [vmem:[#allocation4 + $0x348] ss:$16 sps:$4 sm:$0xff]  }
  0xbc   : > { %1452 = vmatpush2.bf16.msra.mxu0 %v2107_v5  ;;  %v2200_v5 = vld [vmem:[#allocation4 + $0x548] ss:$16 sps:$4 sm:$0xff]  }
  0xbd   : > { %1493 = vmatpush2.bf16.msra.mxu1 %v2110_v6  ;;  %1453 = vmatprep.subr.bf16.mxu0 %v2115_v7  ;;  %v2205_v6 = vld [vmem:[#allocation4 + $0x32c] ss:$16 sps:$4 sm:$0xff]  }
  0xbe   : > { %1494 = vmatprep.subr.bf16.mxu1 %v2118_v10  ;;  %v2208_v7 = vld [vmem:[#allocation4 + $0x52c] ss:$16 sps:$4 sm:$0xff]   ;;  %v2203_v10 = vld [vmem:[#allocation4 + $0x328] ss:$16 sps:$4 sm:$0xff]  }
  0xc0   : > { %1454 = vmatpush2.bf16.msra.mxu0 %v2113_v11  ;;  %v2206_v11 = vld [vmem:[#allocation4 + $0x528] ss:$16 sps:$4 sm:$0xff]  }
  0xc1   : > { %1495 = vmatpush2.bf16.msra.mxu1 %v2116_v12  ;;  %1505 = vmatprep.subr.bf16.mxu0 %v2121_v14  ;;  %v2211_v12 = vld [vmem:[#allocation4 + $0x30c] ss:$16 sps:$4 sm:$0xff]   ;;  %v2209_v14 = vld [vmem:[#allocation4 + $0x308] ss:$16 sps:$4 sm:$0xff]  }
  0xc2   : > { %1546 = vmatprep.subr.bf16.mxu1 %v2124_v15  ;;  %v2212_v15 = vld [vmem:[#allocation4 + $0x508] ss:$16 sps:$4 sm:$0xff]  }
  0xc3   : > { %1456 = vmatmul.mubr.bf16.vlgmr.msra.gmra.mxu0 %v2451_v16 }
  0xc4   : > { %1497 = vmatmul.mubr.bf16.vlgmr.msra.gmra.mxu1 %v2439_v8  ;;  %1506 = vmatpush1.bf16.msra.mxu0 %v2119_v17  ;;  %v2142_v8 = vld [vmem:[#allocation4 + $0x48c] ss:$16 sps:$4 sm:$0xff]  }
  0xc5   : > { %1547 = vmatpush1.bf16.msra.mxu1 %v2122_v18  ;;  %1507 = vmatprep.subr.bf16.mxu0 %v2127_v19 }
  0xc6   : > { %1548 = vmatprep.subr.bf16.mxu1 %v2130_v20  ;;  %1537 = vmatprep.mubr.bf16.mxu0 %v2433_v52  ;;  %v2143_v52 = vld [vmem:[#allocation4 + $0x268] ss:$16 sps:$4 sm:$0xff]  }
  0xc7   : > { %1578 = vmatprep.mubr.bf16.mxu1 %v2447_v35  ;;  %v2149_v35 = vld [vmem:[#allocation4 + $0x248] ss:$16 sps:$4 sm:$0xff]  }
  0xc8   : > { %1508 = vmatpush1.bf16.msra.mxu0 %v2125_v21 }
  0xc9   : > { %1549 = vmatpush1.bf16.msra.mxu1 %v2128_v22  ;;  %1509 = vmatprep.subr.bf16.mxu0 %v2133_v23 }
  0xca   : > { %1550 = vmatprep.subr.bf16.mxu1 %v2136_v24 }
  0xcc   : > { %1510 = vmatpush1.bf16.msra.mxu0 %v2131_v25 }
  0xcd   : > { %1551 = vmatpush1.bf16.msra.mxu1 %v2134_v26  ;;  %1511 = vmatprep.subr.bf16.mxu0 %v2139_v27 }
  0xce   : > { %1552 = vmatprep.subr.bf16.mxu1 %v2142_v8 }
  0xd0   : > { %1512 = vmatpush1.bf16.msra.mxu0 %v2137_v28 }
  0xd1   : > { %1553 = vmatpush1.bf16.msra.mxu1 %v2140_v29  ;;  %1513 = vmatprep.subr.bf16.mxu0 %v2145_v30 }
  0xd2   : > { %1554 = vmatprep.subr.bf16.mxu1 %v2148_v31 }
  0xd4   : > { %1514 = vmatpush1.bf16.msra.mxu0 %v2143_v52 }
  0xd5   : > { %1555 = vmatpush1.bf16.msra.mxu1 %v2146_v32  ;;  %1515 = vmatprep.subr.bf16.mxu0 %v2151_v33 }
  0xd6   : > { %1556 = vmatprep.subr.bf16.mxu1 %v2154_v34 }
  0xd8   : > { %1516 = vmatpush1.bf16.msra.mxu0 %v2149_v35 }
  0xd9   : > { %1557 = vmatpush1.bf16.msra.mxu1 %v2152_v36  ;;  %1517 = vmatprep.subr.bf16.mxu0 %v2157_v37 }
  0xda   : > { %1558 = vmatprep.subr.bf16.mxu1 %v2160_v38 }
  0xdc   : > { %1518 = vmatpush1.bf16.msra.mxu0 %v2155_v39 }
  0xdd   : > { %1559 = vmatpush1.bf16.msra.mxu1 %v2158_v40  ;;  %1519 = vmatprep.subr.bf16.mxu0 %v2163_v41 }
  0xde   : > { %1560 = vmatprep.subr.bf16.mxu1 %v2166_v42 }
  0xe0   : > { %1520 = vmatpush1.bf16.msra.mxu0 %v2161_v43 }
  0xe1   : > { %1561 = vmatpush1.bf16.msra.mxu1 %v2164_v44  ;;  %1521 = vmatprep.subr.bf16.mxu0 %v2169_v45 }
  0xe2   : > { %1562 = vmatprep.subr.bf16.mxu1 %v2172_v46 }
  0xe4   : > { %1522 = vmatpush2.bf16.msra.mxu0 %v2167_v47 }
  0xe5   : > { %1563 = vmatpush2.bf16.msra.mxu1 %v2170_v48  ;;  %1523 = vmatprep.subr.bf16.mxu0 %v2175_v49 }
  0xe6   : > { %1564 = vmatprep.subr.bf16.mxu1 %v2178_v50 }
  0xe8   : > { %1524 = vmatpush2.bf16.msra.mxu0 %v2173_v51 }
  0xe9   : > { %1565 = vmatpush2.bf16.msra.mxu1 %v2176_v53  ;;  %1525 = vmatprep.subr.bf16.mxu0 %v2181_v54 }
  0xea   : > { %1566 = vmatprep.subr.bf16.mxu1 %v2184_v55 }
  0xec   : > { %1526 = vmatpush2.bf16.msra.mxu0 %v2179_v56 }
  0xed   : > { %1567 = vmatpush2.bf16.msra.mxu1 %v2182_v57  ;;  %1527 = vmatprep.subr.bf16.mxu0 %v2187_v58 }
  0xee   : > { %1568 = vmatprep.subr.bf16.mxu1 %v2190_v59 }
  0xf0   : > { %1528 = vmatpush2.bf16.msra.mxu0 %v2185_v60 }
  0xf1   : > { %1569 = vmatpush2.bf16.msra.mxu1 %v2188_v61  ;;  %1529 = vmatprep.subr.bf16.mxu0 %v2193_v62 }
  0xf2   : > { %1570 = vmatprep.subr.bf16.mxu1 %v2196_v63 }
  0xf4   : > { %1530 = vmatpush2.bf16.msra.mxu0 %v2191_v0 }
  0xf5   : > { %1571 = vmatpush2.bf16.msra.mxu1 %v2194_v1  ;;  %1531 = vmatprep.subr.bf16.mxu0 %v2199_v2 }
  0xf6   : > { %1572 = vmatprep.subr.bf16.mxu1 %v2202_v3 }
  0xf8   : > { %1532 = vmatpush2.bf16.msra.mxu0 %v2197_v4 }
  0xf9   : > { %1573 = vmatpush2.bf16.msra.mxu1 %v2200_v5  ;;  %1533 = vmatprep.subr.bf16.mxu0 %v2205_v6 }
  0xfa   : > { %1574 = vmatprep.subr.bf16.mxu1 %v2208_v7 }
  0xfc   : > { %1534 = vmatpush2.bf16.msra.mxu0 %v2203_v10 }
  0xfd   : > { %1575 = vmatpush2.bf16.msra.mxu1 %v2206_v11  ;;  %1535 = vmatprep.subr.bf16.mxu0 %v2211_v12 }
  0xfe   : > { %1576 = vmatprep.subr.bf16.mxu1 %v2214_v13 }
 0x100   : > { %1536 = vmatpush2.bf16.msra.mxu0 %v2209_v14 }
 0x101   : > { %1577 = vmatpush2.bf16.msra.mxu1 %v2212_v15 }
 0x103   : > { %1538 = vmatmul.mubr.bf16.vlgmr.msra.gmra.mxu0 %v2441_v9 }
 0x104   : > { %1579 = vmatmul.mubr.bf16.vlgmr.msra.gmra.mxu1 %v2451_v16 }
 0x143   : > { %v1375_v17 = vpop.f32.mrf.mxu0 }
 0x144   : > { %v1416_v18 = vpop.f32.mrf.mxu1 }
 0x145   : > { %v1377_v19 = vpop.f32.mrf.mxu0  ;;  %v1417_v25 = vadd.f32 %v1416_v18, %v1375_v17 }
 0x146   : > { %v1418_v20 = vpop.f32.mrf.mxu1 }
 0x147   : > { %v1379_v21 = vpop.f32.mrf.mxu0  ;;  %v1419_v27 = vadd.f32 %v1418_v20, %v1377_v19 }
 0x148   : > { %v1420_v22 = vpop.f32.mrf.mxu1 }
 0x149   : > { %v1380_v23 = vpop.f32.mrf.mxu0 }
 0x14a   : > { %v1421_v24 = vpop.f32.mrf.mxu1 }
 0x183   : > { %v1457_v26 = vpop.f32.mrf.mxu0 }
 0x184   : > { %v1498_v9 = vpop.f32.mrf.mxu1  ;;  %v1458_v16 = vadd.f32 %v1457_v26, %v1417_v25 }
 0x185   : > { %v1459_v8 = vpop.f32.mrf.mxu0 }
 0x186   : > { %v1500_v28 = vpop.f32.mrf.mxu1  ;;  %1587 = vst [vmem:[%s176_s4] sm:$0xff] %v1458_v16  ;;  %v1460_v29 = vadd.f32 %v1459_v8, %v1419_v27 }
 0x187   : > { %v1461_v30 = vpop.f32.mrf.mxu0 }
 0x188   : > { %v1502_v31 = vpop.f32.mrf.mxu1  ;;  %1588 = vst [vmem:[%s176_s4 + $0x8] sm:$0xff] %v1460_v29 }
 0x189   : > { %v1462_v52 = vpop.f32.mrf.mxu0 }
 0x18a   : > { %v1503_v32 = vpop.f32.mrf.mxu1 }
 0x1c3   : > { %v1539_v33 = vpop.f32.mrf.mxu0 }
 0x1c4   : > { %v1580_v34 = vpop.f32.mrf.mxu1  ;;  %v1540_v35 = vadd.f32 %v1539_v33, %v1498_v9 }
 0x1c5   : > { %v1541_v36 = vpop.f32.mrf.mxu0 }
 0x1c6   : > { %v1582_v37 = vpop.f32.mrf.mxu1  ;;  %v1581_v38 = vadd.f32 %v1580_v34, %v1540_v35  ;;  %v1542_v39 = vadd.f32 %v1541_v36, %v1500_v28 }
 0x1c7   : > { %v1543_v40 = vpop.f32.mrf.mxu0 }
 0x1c8   : > { %v1584_v41 = vpop.f32.mrf.mxu1  ;;  %1589 = vst [vmem:[%s176_s4 + $0x10] sm:$0xff] %v1581_v38  ;;  %v1583_v42 = vadd.f32 %v1582_v37, %v1542_v39 }
 0x1c9   : > { %v1544_v43 = vpop.f32.mrf.mxu0 }
 0x1ca   : > { %v1585_v44 = vpop.f32.mrf.mxu1  ;;  %1590 = vst [vmem:[%s176_s4 + $0x18] sm:$0xff] %v1583_v42 }
 0x1cb PF: > { %p13_p11 = scmp.ge.s32.totalorder %s2372_s19, 4   ;;  %s2491_s9 = smov %s2299_s10 }
 0x1cc   : > { %s2492_s10 = smov %s2303_s11  ;;  %s2493_s11 = smov %s2389_s27 }
 0x1cd   : > { %s2494_s12 = smov %s2372_s19  ;;  %15 = sbr.rel (!%p13_p11) target bundleno = 4 (0x4), region = 72 }
 0x1d2   :  { %1612 = vsyncpa [#allocation3], 1 }
 0x1d3   :  { %1614 = vsyncpa [#allocation3 + $0x1], 1 }
 0x1d4   :  { %1615 = vsyncpa [#allocation5], 1 }

// kernel: encoder_p_forward.6
= control target key start
LH: loop header
LB: loop body
LE: loop exit
PB: predicated region body
PF: predicated region fallthrough
CT: control target
= control target key end

     0   :  { %11 = vsyncpa [#allocation3], 0  ;;  %s3904_s21 = smov 0   ;;  %s4698_s0 = inlined_call_operand.vmem [shape: f32[2,8,512], index: 0, kind: input, shape index: {}]   ;;  %s4699_s1 = inlined_call_operand.vmem [shape: f32[2,1,8], index: 1, kind: input, shape index: {}]   ;;  %s4700_s2 = inlined_call_operand.vmem [shape: bf16[512,768], index: 2, kind: input, shape index: {}]   ;;  %s4701_s3 = inlined_call_operand.hbm [shape: bf16[256,512], index: 3, kind: input, shape index: {}]   ;;  %s4702_s4 = inlined_call_operand.vmem [shape: f32[1,512], index: 4, kind: input, shape index: {}]   ;;  %s4703_s5 = inlined_call_operand.vmem [shape: f32[1,512], index: 5, kind: input, shape index: {}]   ;;  %s4704_s6 = inlined_call_operand.vmem [shape: f32[2,8,512], index: 6, kind: output, shape index: {}]  }
   0x1 LB: > { %s3910_s22 = sadd.s32 4294967295, %s3860_s21   ;;  %p3043_p0 = scmp.ge.s32.totalorder %s3860_s21, 1  ;;  %s3860_s21 = sphi %s3904_s21, %s17_s21  }
   0x2   : > { %p184_p1 = scmp.lt.s32.totalorder %s3860_s21, 3  ;;  %s3862_s23 = smov [#allocation2]  }
   0x3   : > { %s199_s24 = sshll.u32 %s3862_s23, 4  ;;  %p3401_p3 = scmp.eq.s32.totalorder %s3910_s22, 0  ;;  %s200_s24 = int_to_ptr.vmem [resolvable:$true] %s199_s24 }
   0x4   : > { %p3914_p2 = pnand %p3043_p0, %p184_p1  ;;  %s3835_s26 = scalar_lea.vmem %s200_s24, 8192 }
   0x5   : > { %p3836_p7 = scmp.ne.s32.totalorder %s200_s24, %s3835_s26  ;;  %p3843_p10 = scmp.lt.s32.totalorder %s200_s24, %s200_s24 }
   0x6   : > { %p3397_p4 = pneg %p3914_p2  ;;  %p3844_p11 = scmp.lt.s32.totalorder %s3835_s26, %s3835_s26 }
   0x8   : > { %p3398_p5 = pnand %p3401_p3, %p3397_p4  ;;  %p3845_p12 = por %p3844_p11, %p3843_p10 }
   0xa   : > { %p3826_p6 = pneg %p3398_p5 }
   0xc   : > { %p3838_p8 = pnand %p3836_p7, %p3826_p6 }
   0xe   : > { %p3839_p9 = pneg %p3838_p8 }
  0x10   : > { %p3846_p13 = pnand %p3845_p12, %p3839_p9 }
  0x12   : > { %3849 = shalt.err (!%p3846_p13)
}
  0x13   : > { %s3863_s27 = smov 256   ;;  %s3864_s28 = smov 16  }
  0x14   : > { %3400 = dma.hbm_to_vmem [thread:$0]  (!%p3398_p5), %s4701_s3, 8192, %s200_s24, [#allocation3], %s3863_s27, %s3863_s27, %s3864_s28  }
  0x15   : > { %235 = sbr.rel (%p3914_p2) target bundleno = 3719 (0xe87), region = 44 }
  0x1a   : > { %3855 = dma.done.wait (%p3401_p3), [#allocation3], 8192  }
  0x1b   : > { %3857 = vsyncadd (%p3401_p3), [#allocation3], 4294959104  ;;  %v3418_v0 = vld [vmem:[%s4700_s2 + $0x154] ss:$24 sps:$4 sm:$0xff]   ;;  %v3422_v2 = vld [vmem:[%s4700_s2 + $0x150] ss:$24 sps:$4 sm:$0xff]  }
  0x1c   : > { %v3420_v1 = vld [vmem:[%s4700_s2 + $0x454] ss:$24 sps:$4 sm:$0xff]   ;;  %1443 = vmatprep.subr.bf16.mxu0 %v3418_v0  ;;  %v3423_v3 = vld [vmem:[%s4700_s2 + $0x450] ss:$24 sps:$4 sm:$0xff]   ;;  %v3424_v4 = vld [vmem:[%s4700_s2 + $0x124] ss:$24 sps:$4 sm:$0xff]  }
  0x1d   : > { %1484 = vmatprep.subr.bf16.mxu1 %v3420_v1  ;;  %1444 = vmatpush1.bf16.msra.mxu0 %v3422_v2  ;;  %v3426_v5 = vld [vmem:[%s4700_s2 + $0x424] ss:$24 sps:$4 sm:$0xff]   ;;  %v3428_v6 = vld [vmem:[%s4700_s2 + $0x120] ss:$24 sps:$4 sm:$0xff]   ;;  %v3430_v8 = vld [vmem:[%s4700_s2 + $0xf4] ss:$24 sps:$4 sm:$0xff]  }
  0x1e   : > { %1485 = vmatpush1.bf16.msra.mxu1 %v3423_v3  ;;  %1445 = vmatprep.subr.bf16.mxu0 %v3424_v4  ;;  %v3429_v7 = vld [vmem:[%s4700_s2 + $0x420] ss:$24 sps:$4 sm:$0xff]   ;;  %v3432_v9 = vld [vmem:[%s4700_s2 + $0x3f4] ss:$24 sps:$4 sm:$0xff]   ;;  %v3434_v10 = vld [vmem:[%s4700_s2 + $0xf0] ss:$24 sps:$4 sm:$0xff]  }
  0x1f   : > { %1486 = vmatprep.subr.bf16.mxu1 %v3426_v5  ;;  %v3435_v11 = vld [vmem:[%s4700_s2 + $0x3f0] ss:$24 sps:$4 sm:$0xff]   ;;  %v3436_v12 = vld [vmem:[%s4700_s2 + $0xc4] ss:$24 sps:$4 sm:$0xff]   ;;  %v3440_v14 = vld [vmem:[%s4700_s2 + $0xc0] ss:$24 sps:$4 sm:$0xff]  }
  0x20   : > { %v3438_v13 = vld [vmem:[%s4700_s2 + $0x3c4] ss:$24 sps:$4 sm:$0xff]   ;;  %v3441_v15 = vld [vmem:[%s4700_s2 + $0x3c0] ss:$24 sps:$4 sm:$0xff]   ;;  %v3442_v16 = vld [vmem:[%s4700_s2 + $0x94] ss:$24 sps:$4 sm:$0xff]  }
  0x21   : > { %1446 = vmatpush1.bf16.msra.mxu0 %v3428_v6  ;;  %v3444_v17 = vld [vmem:[%s4700_s2 + $0x394] ss:$24 sps:$4 sm:$0xff]   ;;  %v3446_v18 = vld [vmem:[%s4700_s2 + $0x90] ss:$24 sps:$4 sm:$0xff]   ;;  %v3448_v20 = vld [vmem:[%s4700_s2 + $0x64] ss:$24 sps:$4 sm:$0xff]  }
  0x22   : > { %1487 = vmatpush1.bf16.msra.mxu1 %v3429_v7  ;;  %1447 = vmatprep.subr.bf16.mxu0 %v3430_v8  ;;  %v3447_v19 = vld [vmem:[%s4700_s2 + $0x390] ss:$24 sps:$4 sm:$0xff]   ;;  %v3450_v21 = vld [vmem:[%s4700_s2 + $0x364] ss:$24 sps:$4 sm:$0xff]   ;;  %v3452_v22 = vld [vmem:[%s4700_s2 + $0x60] ss:$24 sps:$4 sm:$0xff]  }
  0x23   : > { %1488 = vmatprep.subr.bf16.mxu1 %v3432_v9  ;;  %v3453_v23 = vld [vmem:[%s4700_s2 + $0x360] ss:$24 sps:$4 sm:$0xff]   ;;  %v3454_v24 = vld [vmem:[%s4700_s2 + $0x34] ss:$24 sps:$4 sm:$0xff]   ;;  %v3458_v26 = vld [vmem:[%s4700_s2 + $0x30] ss:$24 sps:$4 sm:$0xff]  }
  0x24   : > { %v3456_v25 = vld [vmem:[%s4700_s2 + $0x334] ss:$24 sps:$4 sm:$0xff]   ;;  %v3459_v27 = vld [vmem:[%s4700_s2 + $0x330] ss:$24 sps:$4 sm:$0xff]   ;;  %v3460_v28 = vld [vmem:[%s4700_s2 + $0x4] ss:$24 sps:$4 sm:$0xff]  }
  0x25   : > { %1448 = vmatpush1.bf16.msra.mxu0 %v3434_v10  ;;  %v3462_v29 = vld [vmem:[%s4700_s2 + $0x304] ss:$24 sps:$4 sm:$0xff]   ;;  %v3464_v30 = vld [vmem:[%s4700_s2] ss:$24 sps:$4 sm:$0xff]   ;;  %v3466_v32 = vld [vmem:[%s4700_s2 + $0x2d4] ss:$24 sps:$4 sm:$0xff]  }
  0x26   : > { %1489 = vmatpush1.bf16.msra.mxu1 %v3435_v11  ;;  %1449 = vmatprep.subr.bf16.mxu0 %v3436_v12  ;;  %v3465_v31 = vld [vmem:[%s4700_s2 + $0x300] ss:$24 sps:$4 sm:$0xff]   ;;  %p268_p0 = scmp.lt.s32.totalorder %s3910_s22, 1  ;;  %v3468_v33 = vld [vmem:[%s4700_s2 + $0x5d4] ss:$24 sps:$4 sm:$0xff]   ;;  %vm3866_vm0 = vmmov 0  }
  0x27   : > { %1490 = vmatprep.subr.bf16.mxu1 %v3438_v13  ;;  %v3470_v34 = vld [vmem:[%s4700_s2 + $0x2d0] ss:$24 sps:$4 sm:$0xff]   ;;  %v3472_v36 = vld [vmem:[%s4700_s2 + $0x2a4] ss:$24 sps:$4 sm:$0xff]   ;;  %v3476_v38 = vld [vmem:[%s4700_s2 + $0x2a0] ss:$24 sps:$4 sm:$0xff]  }
  0x28   : > { %v3471_v35 = vld [vmem:[%s4700_s2 + $0x5d0] ss:$24 sps:$4 sm:$0xff]   ;;  %s4707_s22 = smov (!%p268_p0, %s3910_s22), 1  ;;  %v3474_v37 = vld [vmem:[%s4700_s2 + $0x5a4] ss:$24 sps:$4 sm:$0xff]   ;;  %vm1697_vm1 = vcmask 523264  }
  0x29   : > { %1450 = vmatpush1.bf16.msra.mxu0 %v3440_v14  ;;  %v3477_v39 = vld [vmem:[%s4700_s2 + $0x5a0] ss:$24 sps:$4 sm:$0xff]   ;;  %v3478_v40 = vld [vmem:[%s4700_s2 + $0x274] ss:$24 sps:$4 sm:$0xff]   ;;  %s3327_s25 = sshll.u32 %s4707_s22, 5  ;;  %s3867_s30 = smov 64  }
  0x2a   : > { %1491 = vmatpush1.bf16.msra.mxu1 %v3441_v15  ;;  %1451 = vmatprep.subr.bf16.mxu0 %v3442_v16  ;;  %v3480_v41 = vld [vmem:[%s4700_s2 + $0x574] ss:$24 sps:$4 sm:$0xff]   ;;  %v3482_v42 = vld [vmem:[%s4700_s2 + $0x270] ss:$24 sps:$4 sm:$0xff]   ;;  %s4074_s10 = scalar_lea.vmem %s4698_s0, %s3327_s25  ;;  %v3484_v44 = vld [vmem:[%s4700_s2 + $0x244] ss:$24 sps:$4 sm:$0xff]   ;;  %s275_s9 = scalar_lea.vmem %s4699_s1, %s4707_s22 }
  0x2b   : > { %1492 = vmatprep.subr.bf16.mxu1 %v3444_v17  ;;  %v3483_v43 = vld [vmem:[%s4700_s2 + $0x570] ss:$24 sps:$4 sm:$0xff]   ;;  %v3486_v45 = vld [vmem:[%s4700_s2 + $0x544] ss:$24 sps:$4 sm:$0xff]   ;;  %v3488_v47 = vld [vmem:[%s4700_s2 + $0x240] ss:$24 sps:$4 sm:$0xff]   ;;  %s280_s16 = scalar_lea.vmem %s4704_s6, %s3327_s25 }
  0x2c   : > { %v283_v46 = vld [vmem:[%s4074_s10 + $0x8] sm:$0xff]  ;;  %v3489_v48 = vld [vmem:[%s4700_s2 + $0x540] ss:$24 sps:$4 sm:$0xff]   ;;  %v3496_v56 = vld [vmem:[%s4700_s2 + $0x1e4] ss:$24 sps:$4 sm:$0xff]   ;;  %vm1761_vm2 = vcmask 1043456  }
  0x2d   : > { %1452 = vmatpush1.bf16.msra.mxu0 %v3446_v18  ;;  %v4089_v49 = vpack.c.bf16 %v283_v46, %v283_v46  ;;  %v285_v50 = vld [vmem:[%s4074_s10 + $0x18] sm:$0xff]  ;;  %v3490_v51 = vld [vmem:[%s4700_s2 + $0x214] ss:$24 sps:$4 sm:$0xff]   ;;  %v3494_v54 = vld [vmem:[%s4700_s2 + $0x210] ss:$24 sps:$4 sm:$0xff]   ;;  %vm1744_vm3 = vcmask 64512  }
  0x2e   : > { %1493 = vmatpush1.bf16.msra.mxu1 %v3447_v19  ;;  %1453 = vmatprep.subr.bf16.mxu0 %v3448_v20  ;;  %v4095_v52 = vpack.c.bf16 %v285_v50, %v285_v50  ;;  %v3492_v53 = vld [vmem:[%s4700_s2 + $0x514] ss:$24 sps:$4 sm:$0xff]   ;;  %v3495_v55 = vld [vmem:[%s4700_s2 + $0x510] ss:$24 sps:$4 sm:$0xff]   ;;  %v3498_v57 = vld [vmem:[%s4700_s2 + $0x4e4] ss:$24 sps:$4 sm:$0xff]  }
  0x2f   : > { %1494 = vmatprep.subr.bf16.mxu1 %v3450_v21  ;;  %1475 = vmatprep.mubr.bf16.mxu0 %v4089_v49  ;;  %v3500_v58 = vld [vmem:[%s4700_s2 + $0x1e0] ss:$24 sps:$4 sm:$0xff]   ;;  %v3502_v60 = vld [vmem:[%s4700_s2 + $0x1b4] ss:$24 sps:$4 sm:$0xff]   ;;  %v3506_v62 = vld [vmem:[%s4700_s2 + $0x1b0] ss:$24 sps:$4 sm:$0xff]  }
  0x30   : > { %1516 = vmatprep.mubr.bf16.mxu1 %v4095_v52  ;;  %v3501_v59 = vld [vmem:[%s4700_s2 + $0x4e0] ss:$24 sps:$4 sm:$0xff]   ;;  %v3504_v61 = vld [vmem:[%s4700_s2 + $0x4b4] ss:$24 sps:$4 sm:$0xff]   ;;  %v3507_v63 = vld [vmem:[%s4700_s2 + $0x4b0] ss:$24 sps:$4 sm:$0xff]  }
  0x31   : > { %1454 = vmatpush1.bf16.msra.mxu0 %v3452_v22  ;;  %v3508_v0 = vld [vmem:[%s4700_s2 + $0x184] ss:$24 sps:$4 sm:$0xff]   ;;  %v3512_v2 = vld [vmem:[%s4700_s2 + $0x180] ss:$24 sps:$4 sm:$0xff]   ;;  %v284_v5 = vld [vmem:[%s4074_s10 + $0x10] sm:$0xff] }
  0x32   : > { %1495 = vmatpush1.bf16.msra.mxu1 %v3453_v23  ;;  %1455 = vmatprep.subr.bf16.mxu0 %v3454_v24  ;;  %v3510_v1 = vld [vmem:[%s4700_s2 + $0x484] ss:$24 sps:$4 sm:$0xff]   ;;  %v3513_v3 = vld [vmem:[%s4700_s2 + $0x480] ss:$24 sps:$4 sm:$0xff]   ;;  %v4154_v9 = vpack.c.bf16 %v284_v5, %v284_v5 }
  0x33   : > { %1496 = vmatprep.subr.bf16.mxu1 %v3456_v25  ;;  %v282_v4 = vld [vmem:[%s4074_s10] sm:$0xff]  ;;  %v3516_v6 = vld [vmem:[%s4700_s2 + $0x15c] ss:$24 sps:$4 sm:$0xff]   ;;  %v3514_v10 = vld [vmem:[%s4700_s2 + $0x158] ss:$24 sps:$4 sm:$0xff]  }
  0x34   : > { %v3519_v7 = vld [vmem:[%s4700_s2 + $0x45c] ss:$24 sps:$4 sm:$0xff]   ;;  %v4152_v8 = vpack.c.bf16 %v282_v4, %v282_v4  ;;  %v3517_v11 = vld [vmem:[%s4700_s2 + $0x458] ss:$24 sps:$4 sm:$0xff]   ;;  %v3522_v12 = vld [vmem:[%s4700_s2 + $0x12c] ss:$24 sps:$4 sm:$0xff]  }
  0x35   : > { %1456 = vmatpush1.bf16.msra.mxu0 %v3458_v26  ;;  %v3525_v13 = vld [vmem:[%s4700_s2 + $0x42c] ss:$24 sps:$4 sm:$0xff]   ;;  %v3520_v14 = vld [vmem:[%s4700_s2 + $0x128] ss:$24 sps:$4 sm:$0xff]   ;;  %v3528_v16 = vld [vmem:[%s4700_s2 + $0xfc] ss:$24 sps:$4 sm:$0xff]  }
  0x36   : > { %1497 = vmatpush1.bf16.msra.mxu1 %v3459_v27  ;;  %1457 = vmatprep.subr.bf16.mxu0 %v3460_v28  ;;  %v3523_v15 = vld [vmem:[%s4700_s2 + $0x428] ss:$24 sps:$4 sm:$0xff]   ;;  %v3531_v17 = vld [vmem:[%s4700_s2 + $0x3fc] ss:$24 sps:$4 sm:$0xff]   ;;  %v3526_v18 = vld [vmem:[%s4700_s2 + $0xf8] ss:$24 sps:$4 sm:$0xff]  }
  0x37   : > { %1498 = vmatprep.subr.bf16.mxu1 %v3462_v29  ;;  %v3529_v19 = vld [vmem:[%s4700_s2 + $0x3f8] ss:$24 sps:$4 sm:$0xff]   ;;  %v3534_v20 = vld [vmem:[%s4700_s2 + $0xcc] ss:$24 sps:$4 sm:$0xff]   ;;  %v3532_v22 = vld [vmem:[%s4700_s2 + $0xc8] ss:$24 sps:$4 sm:$0xff]  }
  0x38   : > { %v3537_v21 = vld [vmem:[%s4700_s2 + $0x3cc] ss:$24 sps:$4 sm:$0xff]   ;;  %v3535_v23 = vld [vmem:[%s4700_s2 + $0x3c8] ss:$24 sps:$4 sm:$0xff]   ;;  %v3540_v24 = vld [vmem:[%s4700_s2 + $0x9c] ss:$24 sps:$4 sm:$0xff]  }
  0x39   : > { %1458 = vmatpush1.bf16.msra.mxu0 %v3464_v30  ;;  %v3543_v25 = vld [vmem:[%s4700_s2 + $0x39c] ss:$24 sps:$4 sm:$0xff]   ;;  %v3538_v26 = vld [vmem:[%s4700_s2 + $0x98] ss:$24 sps:$4 sm:$0xff]   ;;  %v3546_v28 = vld [vmem:[%s4700_s2 + $0x6c] ss:$24 sps:$4 sm:$0xff]  }
  0x3a   : > { %1499 = vmatpush1.bf16.msra.mxu1 %v3465_v31  ;;  %1459 = vmatprep.subr.bf16.mxu0 %v3466_v32  ;;  %v3541_v27 = vld [vmem:[%s4700_s2 + $0x398] ss:$24 sps:$4 sm:$0xff]   ;;  %v3549_v29 = vld [vmem:[%s4700_s2 + $0x36c] ss:$24 sps:$4 sm:$0xff]   ;;  %v3544_v30 = vld [vmem:[%s4700_s2 + $0x68] ss:$24 sps:$4 sm:$0xff]  }
  0x3b   : > { %1500 = vmatprep.subr.bf16.mxu1 %v3468_v33  ;;  %v3547_v31 = vld [vmem:[%s4700_s2 + $0x368] ss:$24 sps:$4 sm:$0xff]   ;;  %v3552_v32 = vld [vmem:[%s4700_s2 + $0x3c] ss:$24 sps:$4 sm:$0xff]   ;;  %v3598_v4 = vld [vmem:[%s4700_s2 + $0x1b8] ss:$24 sps:$4 sm:$0xff]  }
  0x3c   : > { %v3555_v33 = vld [vmem:[%s4700_s2 + $0x33c] ss:$24 sps:$4 sm:$0xff]   ;;  %v3568_v46 = vld [vmem:[%s4700_s2 + $0x2a8] ss:$24 sps:$4 sm:$0xff]   ;;  %v3601_v5 = vld [vmem:[%s4700_s2 + $0x4b8] ss:$24 sps:$4 sm:$0xff]  }
  0x3d   : > { %1460 = vmatpush2.bf16.msra.mxu0 %v3470_v34  ;;  %v3550_v34 = vld [vmem:[%s4700_s2 + $0x38] ss:$24 sps:$4 sm:$0xff]   ;;  %v3579_v50 = vld [vmem:[%s4700_s2 + $0x57c] ss:$24 sps:$4 sm:$0xff]  }
  0x3e   : > { %1501 = vmatpush2.bf16.msra.mxu1 %v3471_v35  ;;  %1461 = vmatprep.subr.bf16.mxu0 %v3472_v36  ;;  %v3553_v35 = vld [vmem:[%s4700_s2 + $0x338] ss:$24 sps:$4 sm:$0xff]   ;;  %v3558_v36 = vld [vmem:[%s4700_s2 + $0xc] ss:$24 sps:$4 sm:$0xff]  }
  0x3f   : > { %1502 = vmatprep.subr.bf16.mxu1 %v3474_v37  ;;  %v3561_v37 = vld [vmem:[%s4700_s2 + $0x30c] ss:$24 sps:$4 sm:$0xff]  }
  0x41   : > { %1462 = vmatpush2.bf16.msra.mxu0 %v3476_v38  ;;  %v3556_v38 = vld [vmem:[%s4700_s2 + $0x8] ss:$24 sps:$4 sm:$0xff]  }
  0x42   : > { %1503 = vmatpush2.bf16.msra.mxu1 %v3477_v39  ;;  %1463 = vmatprep.subr.bf16.mxu0 %v3478_v40  ;;  %v3559_v39 = vld [vmem:[%s4700_s2 + $0x308] ss:$24 sps:$4 sm:$0xff]   ;;  %v3564_v40 = vld [vmem:[%s4700_s2 + $0x2dc] ss:$24 sps:$4 sm:$0xff]  }
  0x43   : > { %1504 = vmatprep.subr.bf16.mxu1 %v3480_v41  ;;  %v3567_v41 = vld [vmem:[%s4700_s2 + $0x5dc] ss:$24 sps:$4 sm:$0xff]  }
  0x45   : > { %1464 = vmatpush2.bf16.msra.mxu0 %v3482_v42  ;;  %v3562_v42 = vld [vmem:[%s4700_s2 + $0x2d8] ss:$24 sps:$4 sm:$0xff]  }
  0x46   : > { %1505 = vmatpush2.bf16.msra.mxu1 %v3483_v43  ;;  %1465 = vmatprep.subr.bf16.mxu0 %v3484_v44  ;;  %v3565_v43 = vld [vmem:[%s4700_s2 + $0x5d8] ss:$24 sps:$4 sm:$0xff]   ;;  %v3570_v44 = vld [vmem:[%s4700_s2 + $0x2ac] ss:$24 sps:$4 sm:$0xff]  }
  0x47   : > { %1506 = vmatprep.subr.bf16.mxu1 %v3486_v45  ;;  %v3573_v45 = vld [vmem:[%s4700_s2 + $0x5ac] ss:$24 sps:$4 sm:$0xff]  }
  0x49   : > { %1466 = vmatpush2.bf16.msra.mxu0 %v3488_v47  ;;  %v3571_v47 = vld [vmem:[%s4700_s2 + $0x5a8] ss:$24 sps:$4 sm:$0xff]  }
  0x4a   : > { %1507 = vmatpush2.bf16.msra.mxu1 %v3489_v48  ;;  %1467 = vmatprep.subr.bf16.mxu0 %v3490_v51  ;;  %v3576_v48 = vld [vmem:[%s4700_s2 + $0x27c] ss:$24 sps:$4 sm:$0xff]   ;;  %v3574_v51 = vld [vmem:[%s4700_s2 + $0x278] ss:$24 sps:$4 sm:$0xff]  }
  0x4b   : > { %1508 = vmatprep.subr.bf16.mxu1 %v3492_v53  ;;  %v3577_v53 = vld [vmem:[%s4700_s2 + $0x578] ss:$24 sps:$4 sm:$0xff]  }
  0x4d   : > { %1468 = vmatpush2.bf16.msra.mxu0 %v3494_v54  ;;  %v3582_v54 = vld [vmem:[%s4700_s2 + $0x24c] ss:$24 sps:$4 sm:$0xff]  }
  0x4e   : > { %1509 = vmatpush2.bf16.msra.mxu1 %v3495_v55  ;;  %1469 = vmatprep.subr.bf16.mxu0 %v3496_v56  ;;  %v3585_v55 = vld [vmem:[%s4700_s2 + $0x54c] ss:$24 sps:$4 sm:$0xff]   ;;  %v3580_v56 = vld [vmem:[%s4700_s2 + $0x248] ss:$24 sps:$4 sm:$0xff]  }
  0x4f   : > { %1510 = vmatprep.subr.bf16.mxu1 %v3498_v57  ;;  %v3583_v57 = vld [vmem:[%s4700_s2 + $0x548] ss:$24 sps:$4 sm:$0xff]  }
  0x51   : > { %1470 = vmatpush2.bf16.msra.mxu0 %v3500_v58  ;;  %v3588_v58 = vld [vmem:[%s4700_s2 + $0x21c] ss:$24 sps:$4 sm:$0xff]  }
  0x52   : > { %1511 = vmatpush2.bf16.msra.mxu1 %v3501_v59  ;;  %1471 = vmatprep.subr.bf16.mxu0 %v3502_v60  ;;  %v3591_v59 = vld [vmem:[%s4700_s2 + $0x51c] ss:$24 sps:$4 sm:$0xff]   ;;  %v3586_v60 = vld [vmem:[%s4700_s2 + $0x218] ss:$24 sps:$4 sm:$0xff]  }
  0x53   : > { %1512 = vmatprep.subr.bf16.mxu1 %v3504_v61  ;;  %v3589_v61 = vld [vmem:[%s4700_s2 + $0x518] ss:$24 sps:$4 sm:$0xff]  }
  0x55   : > { %1472 = vmatpush2.bf16.msra.mxu0 %v3506_v62  ;;  %v3594_v62 = vld [vmem:[%s4700_s2 + $0x1ec] ss:$24 sps:$4 sm:$0xff]  }
  0x56   : > { %1513 = vmatpush2.bf16.msra.mxu1 %v3507_v63  ;;  %1473 = vmatprep.subr.bf16.mxu0 %v3508_v0  ;;  %v3597_v63 = vld [vmem:[%s4700_s2 + $0x4ec] ss:$24 sps:$4 sm:$0xff]   ;;  %v3592_v0 = vld [vmem:[%s4700_s2 + $0x1e8] ss:$24 sps:$4 sm:$0xff]  }
  0x57   : > { %1514 = vmatprep.subr.bf16.mxu1 %v3510_v1  ;;  %v3595_v1 = vld [vmem:[%s4700_s2 + $0x4e8] ss:$24 sps:$4 sm:$0xff]  }
  0x59   : > { %1474 = vmatpush2.bf16.msra.mxu0 %v3512_v2  ;;  %v3600_v2 = vld [vmem:[%s4700_s2 + $0x1bc] ss:$24 sps:$4 sm:$0xff]  }
  0x5a   : > { %1515 = vmatpush2.bf16.msra.mxu1 %v3513_v3  ;;  %1525 = vmatprep.subr.bf16.mxu0 %v3516_v6  ;;  %v3603_v3 = vld [vmem:[%s4700_s2 + $0x4bc] ss:$24 sps:$4 sm:$0xff]   ;;  %v3606_v6 = vld [vmem:[%s4700_s2 + $0x18c] ss:$24 sps:$4 sm:$0xff]  }
  0x5b   : > { %1566 = vmatprep.subr.bf16.mxu1 %v3519_v7  ;;  %v3609_v7 = vld [vmem:[%s4700_s2 + $0x48c] ss:$24 sps:$4 sm:$0xff]  }
  0x5c   : > { %1476 = vmatmul.mubr.bf16.vlgmr.msra.gmra.mxu0 %v4152_v8 }
  0x5d   : > { %1517 = vmatmul.mubr.bf16.vlgmr.msra.gmra.mxu1 %v4154_v9  ;;  %1526 = vmatpush1.bf16.msra.mxu0 %v3514_v10  ;;  %v3604_v10 = vld [vmem:[%s4700_s2 + $0x188] ss:$24 sps:$4 sm:$0xff]  }
  0x5e   : > { %1567 = vmatpush1.bf16.msra.mxu1 %v3517_v11  ;;  %1527 = vmatprep.subr.bf16.mxu0 %v3522_v12  ;;  %v3607_v11 = vld [vmem:[%s4700_s2 + $0x488] ss:$24 sps:$4 sm:$0xff]   ;;  %v3612_v12 = vld [vmem:[%s4700_s2 + $0x164] ss:$24 sps:$4 sm:$0xff]  }
  0x5f   : > { %1568 = vmatprep.subr.bf16.mxu1 %v3525_v13  ;;  %1557 = vmatprep.mubr.bf16.mxu0 %v4089_v49  ;;  %v3610_v13 = vld [vmem:[%s4700_s2 + $0x160] ss:$24 sps:$4 sm:$0xff]  }
  0x60   : > { %1598 = vmatprep.mubr.bf16.mxu1 %v4095_v52 }
  0x61   : > { %1528 = vmatpush1.bf16.msra.mxu0 %v3520_v14  ;;  %v3615_v14 = vld [vmem:[%s4700_s2 + $0x134] ss:$24 sps:$4 sm:$0xff]  }
  0x62   : > { %1569 = vmatpush1.bf16.msra.mxu1 %v3523_v15  ;;  %1529 = vmatprep.subr.bf16.mxu0 %v3528_v16  ;;  %v3618_v15 = vld [vmem:[%s4700_s2 + $0x464] ss:$24 sps:$4 sm:$0xff]   ;;  %v3613_v16 = vld [vmem:[%s4700_s2 + $0x130] ss:$24 sps:$4 sm:$0xff]  }
  0x63   : > { %1570 = vmatprep.subr.bf16.mxu1 %v3531_v17  ;;  %v3616_v17 = vld [vmem:[%s4700_s2 + $0x460] ss:$24 sps:$4 sm:$0xff]  }
  0x65   : > { %1530 = vmatpush1.bf16.msra.mxu0 %v3526_v18  ;;  %v3621_v18 = vld [vmem:[%s4700_s2 + $0x104] ss:$24 sps:$4 sm:$0xff]  }
  0x66   : > { %1571 = vmatpush1.bf16.msra.mxu1 %v3529_v19  ;;  %1531 = vmatprep.subr.bf16.mxu0 %v3534_v20  ;;  %v3619_v19 = vld [vmem:[%s4700_s2 + $0x100] ss:$24 sps:$4 sm:$0xff]   ;;  %v3627_v20 = vld [vmem:[%s4700_s2 + $0xd4] ss:$24 sps:$4 sm:$0xff]  }
  0x67   : > { %1572 = vmatprep.subr.bf16.mxu1 %v3537_v21  ;;  %v3630_v21 = vld [vmem:[%s4700_s2 + $0x404] ss:$24 sps:$4 sm:$0xff]  }
  0x69   : > { %1532 = vmatpush1.bf16.msra.mxu0 %v3532_v22  ;;  %v3628_v22 = vld [vmem:[%s4700_s2 + $0x400] ss:$24 sps:$4 sm:$0xff]  }
  0x6a   : > { %1573 = vmatpush1.bf16.msra.mxu1 %v3535_v23  ;;  %1533 = vmatprep.subr.bf16.mxu0 %v3540_v24  ;;  %v3625_v23 = vld [vmem:[%s4700_s2 + $0xd0] ss:$24 sps:$4 sm:$0xff]   ;;  %v3636_v24 = vld [vmem:[%s4700_s2 + $0x3d4] ss:$24 sps:$4 sm:$0xff]  }
  0x6b   : > { %1574 = vmatprep.subr.bf16.mxu1 %v3543_v25  ;;  %v3633_v25 = vld [vmem:[%s4700_s2 + $0xa4] ss:$24 sps:$4 sm:$0xff]  }
  0x6d   : > { %1534 = vmatpush1.bf16.msra.mxu0 %v3538_v26  ;;  %v3634_v26 = vld [vmem:[%s4700_s2 + $0x3d0] ss:$24 sps:$4 sm:$0xff]  }
  0x6e   : > { %1575 = vmatpush1.bf16.msra.mxu1 %v3541_v27  ;;  %1535 = vmatprep.subr.bf16.mxu0 %v3546_v28  ;;  %v3631_v27 = vld [vmem:[%s4700_s2 + $0xa0] ss:$24 sps:$4 sm:$0xff]   ;;  %v3642_v28 = vld [vmem:[%s4700_s2 + $0x3a4] ss:$24 sps:$4 sm:$0xff]  }
  0x6f   : > { %1576 = vmatprep.subr.bf16.mxu1 %v3549_v29  ;;  %v3639_v29 = vld [vmem:[%s4700_s2 + $0x74] ss:$24 sps:$4 sm:$0xff]  }
  0x71   : > { %1536 = vmatpush1.bf16.msra.mxu0 %v3544_v30  ;;  %v3640_v30 = vld [vmem:[%s4700_s2 + $0x3a0] ss:$24 sps:$4 sm:$0xff]  }
  0x72   : > { %1577 = vmatpush1.bf16.msra.mxu1 %v3547_v31  ;;  %1537 = vmatprep.subr.bf16.mxu0 %v3552_v32  ;;  %v3637_v31 = vld [vmem:[%s4700_s2 + $0x70] ss:$24 sps:$4 sm:$0xff]   ;;  %v3648_v32 = vld [vmem:[%s4700_s2 + $0x374] ss:$24 sps:$4 sm:$0xff]  }
  0x73   : > { %1578 = vmatprep.subr.bf16.mxu1 %v3555_v33  ;;  %v3645_v33 = vld [vmem:[%s4700_s2 + $0x44] ss:$24 sps:$4 sm:$0xff]  }
  0x75   : > { %1538 = vmatpush1.bf16.msra.mxu0 %v3550_v34  ;;  %v3646_v34 = vld [vmem:[%s4700_s2 + $0x370] ss:$24 sps:$4 sm:$0xff]  }
  0x76   : > { %1579 = vmatpush1.bf16.msra.mxu1 %v3553_v35  ;;  %1539 = vmatprep.subr.bf16.mxu0 %v3558_v36  ;;  %v3643_v35 = vld [vmem:[%s4700_s2 + $0x40] ss:$24 sps:$4 sm:$0xff]   ;;  %v3654_v36 = vld [vmem:[%s4700_s2 + $0x344] ss:$24 sps:$4 sm:$0xff]  }
  0x77   : > { %1580 = vmatprep.subr.bf16.mxu1 %v3561_v37  ;;  %v3651_v37 = vld [vmem:[%s4700_s2 + $0x14] ss:$24 sps:$4 sm:$0xff]  }
  0x79   : > { %1540 = vmatpush1.bf16.msra.mxu0 %v3556_v38  ;;  %v3652_v38 = vld [vmem:[%s4700_s2 + $0x340] ss:$24 sps:$4 sm:$0xff]  }
  0x7a   : > { %1581 = vmatpush1.bf16.msra.mxu1 %v3559_v39  ;;  %1541 = vmatprep.subr.bf16.mxu0 %v3564_v40  ;;  %v3649_v39 = vld [vmem:[%s4700_s2 + $0x10] ss:$24 sps:$4 sm:$0xff]   ;;  %v3660_v40 = vld [vmem:[%s4700_s2 + $0x314] ss:$24 sps:$4 sm:$0xff]  }
  0x7b   : > { %1582 = vmatprep.subr.bf16.mxu1 %v3567_v41  ;;  %v3657_v41 = vld [vmem:[%s4700_s2 + $0x2e4] ss:$24 sps:$4 sm:$0xff]  }
  0x7d   : > { %1542 = vmatpush2.bf16.msra.mxu0 %v3562_v42  ;;  %v3658_v42 = vld [vmem:[%s4700_s2 + $0x310] ss:$24 sps:$4 sm:$0xff]  }
  0x7e   : > { %1583 = vmatpush2.bf16.msra.mxu1 %v3565_v43  ;;  %1543 = vmatprep.subr.bf16.mxu0 %v3570_v44  ;;  %v3655_v43 = vld [vmem:[%s4700_s2 + $0x2e0] ss:$24 sps:$4 sm:$0xff]   ;;  %v3666_v44 = vld [vmem:[%s4700_s2 + $0x5e4] ss:$24 sps:$4 sm:$0xff]  }
  0x7f   : > { %1584 = vmatprep.subr.bf16.mxu1 %v3573_v45  ;;  %v3663_v45 = vld [vmem:[%s4700_s2 + $0x2b4] ss:$24 sps:$4 sm:$0xff]  }
  0x81   : > { %1544 = vmatpush2.bf16.msra.mxu0 %v3568_v46  ;;  %v3664_v46 = vld [vmem:[%s4700_s2 + $0x5e0] ss:$24 sps:$4 sm:$0xff]  }
  0x82   : > { %1585 = vmatpush2.bf16.msra.mxu1 %v3571_v47  ;;  %1545 = vmatprep.subr.bf16.mxu0 %v3576_v48  ;;  %v3661_v47 = vld [vmem:[%s4700_s2 + $0x2b0] ss:$24 sps:$4 sm:$0xff]   ;;  %v3672_v48 = vld [vmem:[%s4700_s2 + $0x5b4] ss:$24 sps:$4 sm:$0xff]  }
  0x83   : > { %1586 = vmatprep.subr.bf16.mxu1 %v3579_v50  ;;  %v3669_v50 = vld [vmem:[%s4700_s2 + $0x284] ss:$24 sps:$4 sm:$0xff]  }
  0x85   : > { %1546 = vmatpush2.bf16.msra.mxu0 %v3574_v51  ;;  %v3670_v51 = vld [vmem:[%s4700_s2 + $0x5b0] ss:$24 sps:$4 sm:$0xff]  }
  0x86   : > { %1587 = vmatpush2.bf16.msra.mxu1 %v3577_v53  ;;  %1547 = vmatprep.subr.bf16.mxu0 %v3582_v54  ;;  %v3667_v53 = vld [vmem:[%s4700_s2 + $0x280] ss:$24 sps:$4 sm:$0xff]   ;;  %v3678_v54 = vld [vmem:[%s4700_s2 + $0x584] ss:$24 sps:$4 sm:$0xff]  }
  0x87   : > { %1588 = vmatprep.subr.bf16.mxu1 %v3585_v55  ;;  %v3675_v55 = vld [vmem:[%s4700_s2 + $0x254] ss:$24 sps:$4 sm:$0xff]  }
  0x89   : > { %1548 = vmatpush2.bf16.msra.mxu0 %v3580_v56  ;;  %v3676_v56 = vld [vmem:[%s4700_s2 + $0x580] ss:$24 sps:$4 sm:$0xff]  }
  0x8a   : > { %1589 = vmatpush2.bf16.msra.mxu1 %v3583_v57  ;;  %1549 = vmatprep.subr.bf16.mxu0 %v3588_v58  ;;  %v3673_v57 = vld [vmem:[%s4700_s2 + $0x250] ss:$24 sps:$4 sm:$0xff]   ;;  %v3684_v58 = vld [vmem:[%s4700_s2 + $0x554] ss:$24 sps:$4 sm:$0xff]  }
  0x8b   : > { %1590 = vmatprep.subr.bf16.mxu1 %v3591_v59  ;;  %v3681_v59 = vld [vmem:[%s4700_s2 + $0x224] ss:$24 sps:$4 sm:$0xff]  }
  0x8d   : > { %1550 = vmatpush2.bf16.msra.mxu0 %v3586_v60  ;;  %v3682_v60 = vld [vmem:[%s4700_s2 + $0x550] ss:$24 sps:$4 sm:$0xff]  }
  0x8e   : > { %1591 = vmatpush2.bf16.msra.mxu1 %v3589_v61  ;;  %1551 = vmatprep.subr.bf16.mxu0 %v3594_v62  ;;  %v3679_v61 = vld [vmem:[%s4700_s2 + $0x220] ss:$24 sps:$4 sm:$0xff]   ;;  %v3690_v62 = vld [vmem:[%s4700_s2 + $0x524] ss:$24 sps:$4 sm:$0xff]  }
  0x8f   : > { %1592 = vmatprep.subr.bf16.mxu1 %v3597_v63  ;;  %v3687_v63 = vld [vmem:[%s4700_s2 + $0x1f4] ss:$24 sps:$4 sm:$0xff]  }
  0x91   : > { %1552 = vmatpush2.bf16.msra.mxu0 %v3592_v0  ;;  %v3688_v0 = vld [vmem:[%s4700_s2 + $0x520] ss:$24 sps:$4 sm:$0xff]  }
  0x92   : > { %1593 = vmatpush2.bf16.msra.mxu1 %v3595_v1  ;;  %1553 = vmatprep.subr.bf16.mxu0 %v3600_v2  ;;  %v3685_v1 = vld [vmem:[%s4700_s2 + $0x1f0] ss:$24 sps:$4 sm:$0xff]   ;;  %v3696_v2 = vld [vmem:[%s4700_s2 + $0x4f4] ss:$24 sps:$4 sm:$0xff]  }
  0x93   : > { %1594 = vmatprep.subr.bf16.mxu1 %v3603_v3  ;;  %v3693_v3 = vld [vmem:[%s4700_s2 + $0x1c4] ss:$24 sps:$4 sm:$0xff]  }
  0x95   : > { %1554 = vmatpush2.bf16.msra.mxu0 %v3598_v4  ;;  %v3694_v4 = vld [vmem:[%s4700_s2 + $0x4f0] ss:$24 sps:$4 sm:$0xff]  }
  0x96   : > { %1595 = vmatpush2.bf16.msra.mxu1 %v3601_v5  ;;  %1555 = vmatprep.subr.bf16.mxu0 %v3606_v6  ;;  %v3691_v5 = vld [vmem:[%s4700_s2 + $0x1c0] ss:$24 sps:$4 sm:$0xff]   ;;  %v3702_v6 = vld [vmem:[%s4700_s2 + $0x4c4] ss:$24 sps:$4 sm:$0xff]  }
  0x97   : > { %1596 = vmatprep.subr.bf16.mxu1 %v3609_v7  ;;  %v3699_v7 = vld [vmem:[%s4700_s2 + $0x194] ss:$24 sps:$4 sm:$0xff]  }
  0x99   : > { %1556 = vmatpush2.bf16.msra.mxu0 %v3604_v10  ;;  %v3700_v10 = vld [vmem:[%s4700_s2 + $0x4c0] ss:$24 sps:$4 sm:$0xff]  }
  0x9a   : > { %1597 = vmatpush2.bf16.msra.mxu1 %v3607_v11  ;;  %1607 = vmatprep.subr.bf16.mxu0 %v3612_v12  ;;  %v3697_v11 = vld [vmem:[%s4700_s2 + $0x190] ss:$24 sps:$4 sm:$0xff]   ;;  %v3705_v12 = vld [vmem:[%s4700_s2 + $0x494] ss:$24 sps:$4 sm:$0xff]  }
  0x9b   : > { %1648 = vmatprep.subr.bf16.mxu1 %v3618_v15 }
  0x9c   : > { %1558 = vmatmul.mubr.bf16.vlgmr.msra.gmra.mxu0 %v4152_v8 }
  0x9d   : > { %1599 = vmatmul.mubr.bf16.vlgmr.msra.gmra.mxu1 %v4154_v9  ;;  %1608 = vmatpush1.bf16.msra.mxu0 %v3610_v13  ;;  %v3703_v13 = vld [vmem:[%s4700_s2 + $0x490] ss:$24 sps:$4 sm:$0xff]  }
  0x9e   : > { %1639 = vmatprep.mubr.bf16.mxu0 %v4089_v49  ;;  %1680 = vmatprep.mubr.bf16.mxu1 %v4095_v52  ;;  %v3624_v49 = vld [vmem:[%s4700_s2 + $0x434] ss:$24 sps:$4 sm:$0xff]   ;;  %v3622_v52 = vld [vmem:[%s4700_s2 + $0x430] ss:$24 sps:$4 sm:$0xff]  }
  0x9f   : > { %1609 = vmatprep.subr.bf16.mxu0 %v3615_v14  ;;  %1649 = vmatpush1.bf16.msra.mxu1 %v3616_v17  ;;  %v3865_v14 = vmov 0.0  }
  0xa0   : > { %1650 = vmatprep.subr.bf16.mxu1 %v3624_v49 }
  0xa1   : > { %1610 = vmatpush1.bf16.msra.mxu0 %v3613_v16 }
  0xa2   : > { %1611 = vmatprep.subr.bf16.mxu0 %v3621_v18 }
  0xa3   : > { %1651 = vmatpush1.bf16.msra.mxu1 %v3622_v52 }
  0xa4   : > { %1652 = vmatprep.subr.bf16.mxu1 %v3630_v21 }
  0xa5   : > { %1612 = vmatpush1.bf16.msra.mxu0 %v3619_v19 }
  0xa6   : > { %1613 = vmatprep.subr.bf16.mxu0 %v3627_v20 }
  0xa7   : > { %1653 = vmatpush1.bf16.msra.mxu1 %v3628_v22 }
  0xa8   : > { %1654 = vmatprep.subr.bf16.mxu1 %v3636_v24 }
  0xa9   : > { %1614 = vmatpush1.bf16.msra.mxu0 %v3625_v23 }
  0xaa   : > { %1615 = vmatprep.subr.bf16.mxu0 %v3633_v25 }
  0xab   : > { %1655 = vmatpush1.bf16.msra.mxu1 %v3634_v26 }
  0xac   : > { %1656 = vmatprep.subr.bf16.mxu1 %v3642_v28 }
  0xad   : > { %1616 = vmatpush1.bf16.msra.mxu0 %v3631_v27 }
  0xae   : > { %1617 = vmatprep.subr.bf16.mxu0 %v3639_v29 }
  0xaf   : > { %1657 = vmatpush1.bf16.msra.mxu1 %v3640_v30 }
  0xb0   : > { %1658 = vmatprep.subr.bf16.mxu1 %v3648_v32 }
  0xb1   : > { %1618 = vmatpush1.bf16.msra.mxu0 %v3637_v31 }
  0xb2   : > { %1619 = vmatprep.subr.bf16.mxu0 %v3645_v33 }
  0xb3   : > { %1659 = vmatpush1.bf16.msra.mxu1 %v3646_v34 }
  0xb4   : > { %1660 = vmatprep.subr.bf16.mxu1 %v3654_v36 }
  0xb5   : > { %1620 = vmatpush1.bf16.msra.mxu0 %v3643_v35 }
  0xb6   : > { %1621 = vmatprep.subr.bf16.mxu0 %v3651_v37 }
  0xb7   : > { %1661 = vmatpush1.bf16.msra.mxu1 %v3652_v38 }
  0xb8   : > { %1662 = vmatprep.subr.bf16.mxu1 %v3660_v40 }
  0xb9   : > { %1622 = vmatpush1.bf16.msra.mxu0 %v3649_v39 }
  0xba   : > { %1623 = vmatprep.subr.bf16.mxu0 %v3657_v41 }
  0xbb   : > { %1663 = vmatpush1.bf16.msra.mxu1 %v3658_v42 }
  0xbc   : > { %1664 = vmatprep.subr.bf16.mxu1 %v3666_v44 }
  0xbd   : > { %1624 = vmatpush2.bf16.msra.mxu0 %v3655_v43 }
  0xbe   : > { %1625 = vmatprep.subr.bf16.mxu0 %v3663_v45 }
  0xbf   : > { %1665 = vmatpush2.bf16.msra.mxu1 %v3664_v46  ;;  %v4568_v46 = vld [vmem:[%s275_s9] ss:$0 sm:$0xff] }
  0xc0   : > { %1666 = vmatprep.subr.bf16.mxu1 %v3672_v48 }
  0xc1   : > { %1626 = vmatpush2.bf16.msra.mxu0 %v3661_v47 }
  0xc2   : > { %1627 = vmatprep.subr.bf16.mxu0 %v3669_v50 }
  0xc3   : > { %1667 = vmatpush2.bf16.msra.mxu1 %v3670_v51 }
  0xc4   : > { %1668 = vmatprep.subr.bf16.mxu1 %v3678_v54 }
  0xc5   : > { %1628 = vmatpush2.bf16.msra.mxu0 %v3667_v53 }
  0xc6   : > { %1629 = vmatprep.subr.bf16.mxu0 %v3675_v55 }
  0xc7   : > { %1669 = vmatpush2.bf16.msra.mxu1 %v3676_v56 }
  0xc8   : > { %1670 = vmatprep.subr.bf16.mxu1 %v3684_v58 }
  0xc9   : > { %1630 = vmatpush2.bf16.msra.mxu0 %v3673_v57 }
  0xca   : > { %1631 = vmatprep.subr.bf16.mxu0 %v3681_v59 }
  0xcb   : > { %1671 = vmatpush2.bf16.msra.mxu1 %v3682_v60  ;;  %v3706_v60 = vld [vmem:[#allocation2 + $0x60] ss:$16 sps:$4 sm:$0xff]  }
  0xcc   : > { %1672 = vmatprep.subr.bf16.mxu1 %v3690_v62  ;;  %v3711_v62 = vld [vmem:[#allocation2 + $0x6c] ss:$16 sps:$4 sm:$0xff]  }
  0xcd   : > { %1632 = vmatpush2.bf16.msra.mxu0 %v3679_v61  ;;  %v3708_v61 = vld [vmem:[#allocation2 + $0x64] ss:$16 sps:$4 sm:$0xff]  }
  0xce   : > { %1633 = vmatprep.subr.bf16.mxu0 %v3687_v63  ;;  %v3714_v63 = vld [vmem:[#allocation2 + $0x44] ss:$16 sps:$4 sm:$0xff]  }
  0xcf   : > { %1673 = vmatpush2.bf16.msra.mxu1 %v3688_v0  ;;  %v3712_v0 = vld [vmem:[#allocation2 + $0x40] ss:$16 sps:$4 sm:$0xff]  }
  0xd0   : > { %1674 = vmatprep.subr.bf16.mxu1 %v3696_v2  ;;  %v3718_v2 = vld [vmem:[#allocation2 + $0x20] ss:$16 sps:$4 sm:$0xff]  }
  0xd1   : > { %1634 = vmatpush2.bf16.msra.mxu0 %v3685_v1  ;;  %v3720_v1 = vld [vmem:[#allocation2 + $0x24] ss:$16 sps:$4 sm:$0xff]  }
  0xd2   : > { %1635 = vmatprep.subr.bf16.mxu0 %v3693_v3  ;;  %v3726_v3 = vld [vmem:[#allocation2 + $0x4] ss:$16 sps:$4 sm:$0xff]  }
  0xd3   : > { %1675 = vmatpush2.bf16.msra.mxu1 %v3694_v4  ;;  %v3724_v4 = vld [vmem:[#allocation2] ss:$16 sps:$4 sm:$0xff]  }
  0xd4   : > { %1676 = vmatprep.subr.bf16.mxu1 %v3702_v6 }
  0xd5   : > { %1636 = vmatpush2.bf16.msra.mxu0 %v3691_v5 }
  0xd6   : > { %1637 = vmatprep.subr.bf16.mxu0 %v3699_v7 }
  0xd7   : > { %1677 = vmatpush2.bf16.msra.mxu1 %v3700_v10  ;;  %v3709_v10 = vld [vmem:[#allocation2 + $0x68] ss:$16 sps:$4 sm:$0xff]  }
  0xd8   : > { %1678 = vmatprep.subr.bf16.mxu1 %v3705_v12  ;;  %v3717_v12 = vld [vmem:[#allocation2 + $0x4c] ss:$16 sps:$4 sm:$0xff]  }
  0xd9   : > { %1638 = vmatpush2.bf16.msra.mxu0 %v3697_v11 }
  0xda   : > { %3345 = vmatprep.subr.bf16.mxu0 %v3865_v14 }
  0xdb   : > { %1679 = vmatpush2.bf16.msra.mxu1 %v3703_v13  ;;  %v3715_v13 = vld [vmem:[#allocation2 + $0x48] ss:$16 sps:$4 sm:$0xff]  }
  0xdc   : > { %1640 = vmatmul.mubr.bf16.vlgmr.msra.gmra.mxu0 %v4152_v8  ;;  %3351 = vmatprep.subr.bf16.mxu1 %v3865_v14 }
  0xdd   : > { %3347 = vmatprep.mubr.msk.bf16.mxu0 %vm3866_vm0, %v3865_v14 }
  0xde   : > { %1681 = vmatmul.mubr.bf16.vlgmr.msra.gmra.mxu1 %v4154_v9 }
  0xdf   : > { %3353 = vmatprep.mubr.msk.bf16.mxu1 %vm3866_vm0, %v3865_v14 }
 0x11c   : > { %v1477_v15 = vpop.f32.mrf.mxu0 }
 0x11d   : > { %v1518_v16 = vpop.f32.mrf.mxu1 }
 0x11e   : > { %v1519_v17 = vadd.f32 %v1518_v16, %v1477_v15  ;;  %v1479_v18 = vpop.f32.mrf.mxu0  ;;  %v3723_v15 = vld [vmem:[#allocation2 + $0x2c] ss:$16 sps:$4 sm:$0xff]   ;;  %v3721_v16 = vld [vmem:[#allocation2 + $0x28] ss:$16 sps:$4 sm:$0xff]  }
 0x11f   : > { %v1520_v8 = vpop.f32.mrf.mxu1 }
 0x120   : > { %v4550_v49 = vadd.f32 %v1520_v8, %v1479_v18  ;;  %v1481_v9 = vpop.f32.mrf.mxu0  ;;  %v1689_v33 = vpack.c.bf16 %v1519_v17, %v1519_v17  ;;  %v3729_v17 = vld [vmem:[#allocation2 + $0xc] ss:$16 sps:$4 sm:$0xff]   ;;  %v3727_v18 = vld [vmem:[#allocation2 + $0x8] ss:$16 sps:$4 sm:$0xff]   ;;  %v3868_v8 = vmov 0  }
 0x121   : > { %v1522_v19 = vpop.f32.mrf.mxu1 }
 0x122   : > { %v1482_v52 = vpop.f32.mrf.mxu0 }
 0x123   : > { %v1523_v20 = vpop.f32.mrf.mxu1 }
 0x15c   : > { %v1559_v21 = vpop.f32.mrf.mxu0 }
 0x15d   : > { %v1600_v22 = vpop.f32.mrf.mxu1 }
 0x15e   : > { %v1601_v23 = vadd.f32 %v1600_v22, %v1559_v21  ;;  %v1561_v24 = vpop.f32.mrf.mxu0 }
 0x15f   : > { %v1602_v25 = vpop.f32.mrf.mxu1 }
 0x160   : > { %v1690_v26 = vpack.c.bf16 %v1601_v23, %v1601_v23  ;;  %v4552_v27 = vadd.f32 %v1602_v25, %v1561_v24  ;;  %v1563_v28 = vpop.f32.mrf.mxu0 }
 0x161   : > { %v1604_v29 = vpop.f32.mrf.mxu1 }
 0x162   : > { %v1702_v30 = vsel %vm1697_vm1, %v1690_v26, 0  ;;  %1995 = vrot.lane.b32.xlu1 %v1690_v26, %s3867_s30  ;;  %v1564_v31 = vpop.f32.mrf.mxu0 }
 0x163   : > { %v1605_v32 = vpop.f32.mrf.mxu1  ;;  %3346 = vmatpush3.bf16.xpose.msra.mxu0 %v1702_v30 }
 0x164   : > { %1913 = vmatprep.subr.bf16.mxu0 %v3708_v61 }
 0x166   : > { %1992 = vrot.lane.b32.xlu1 %v1689_v33, %s3867_s30 }
 0x16a   : > { %3348 = vmatmul.mubr.msk.bf16.vlgmr.msra.gmra.mxu0 %vm1697_vm1, %v1689_v33 }
 0x16b   : > { %1914 = vmatpush1.bf16.msra.mxu0 %v3706_v60  ;;  %1937 = vmatprep.mubr.bf16.mxu0 %v3868_v8 }
 0x16c   : > { %1915 = vmatprep.subr.bf16.mxu0 %v3714_v63  ;;  %v3733_v63 = vld [vmem:[#allocation2 + $0xe8] ss:$16 sps:$4 sm:$0xff]  }
 0x16f   : > { %1916 = vmatpush1.bf16.msra.mxu0 %v3712_v0 }
 0x170   : > { %1917 = vmatprep.subr.bf16.mxu0 %v3720_v1  ;;  %v3741_v1 = vld [vmem:[#allocation2 + $0xcc] ss:$16 sps:$4 sm:$0xff]  }
 0x173   : > { %1918 = vmatpush1.bf16.msra.mxu0 %v3718_v2  ;;  %v3739_v2 = vld [vmem:[#allocation2 + $0xc8] ss:$16 sps:$4 sm:$0xff]  }
 0x174   : > { %1919 = vmatprep.subr.bf16.mxu0 %v3726_v3  ;;  %v3747_v3 = vld [vmem:[#allocation2 + $0xac] ss:$16 sps:$4 sm:$0xff]  }
 0x177   : > { %1920 = vmatpush1.bf16.msra.mxu0 %v3724_v4  ;;  %v3745_v4 = vld [vmem:[#allocation2 + $0xa8] ss:$16 sps:$4 sm:$0xff]  }
 0x178   : > { %3357 = vmatprep.subr.bf16.mxu0 %v3865_v14 }
 0x19c   : > { %v1641_v34 = vpop.f32.mrf.mxu0 }
 0x19e   : > { %v1643_v35 = vpop.f32.mrf.mxu0  ;;  %v1682_v36 = vpop.f32.mrf.mxu1 }
 0x19f   : > { %v1683_v38 = vadd.f32 %v1682_v36, %v1641_v34 }
 0x1a0   : > { %v1645_v37 = vpop.f32.mrf.mxu0  ;;  %v1684_v39 = vpop.f32.mrf.mxu1 }
 0x1a1   : > { %v4558_v40 = vpack.c.bf16 %v1683_v38, %v1683_v38  ;;  %v4560_v42 = vadd.f32 %v1684_v39, %v1643_v35 }
 0x1a2   : > { %v1646_v41 = vpop.f32.mrf.mxu0  ;;  %v1686_v43 = vpop.f32.mrf.mxu1 }
 0x1a3   : > { %v1763_v44 = vsel %vm1761_vm2, %v4558_v40, 0 }
 0x1a4   : > { %3352 = vmatpush3.bf16.msra.mxu1 %v1763_v44  ;;  %v1687_v45 = vpop.f32.mrf.mxu1 }
 0x1a5   : > { %1954 = vmatprep.subr.bf16.mxu1 %v3711_v62 }
 0x1d4   : > { %v1996_v9 = vpop.permute.xlu1 %1995 }
 0x1d5   : > { %v2001_v21 = vsel %vm1697_vm1, %v1996_v9, 0 }
 0x1d8   : > { %v1993_v24 = vpop.permute.xlu1 %1992 }
 0x22a   : > { %v1738_v47 = vpop.f32.mrf.mxu0 }
 0x22b   : > { %v1739_v48 = vadd.f32 %v4568_v46, %v1738_v47 }
 0x22c   : > { %v3349_v50 = vpop.f32.mrf.mxu0 }
 0x22d   : > { %v1745_v51 = vsel %vm1744_vm3, %v1739_v48, -inf }
 0x22e   : > { %1746 = vmax.xlane.f32.xlu0 %v1745_v51  ;;  %v1741_v53 = vpop.f32.mrf.mxu0  ;;  %v3730_v51 = vld [vmem:[#allocation2 + $0xe0] ss:$16 sps:$4 sm:$0xff]  }
 0x22f   : > { %v3732_v53 = vld [vmem:[#allocation2 + $0xe4] ss:$16 sps:$4 sm:$0xff]  }
 0x230   : > { %v3350_v54 = vpop.f32.mrf.mxu0 }
 0x231   : > { %v3735_v54 = vld [vmem:[#allocation2 + $0xec] ss:$16 sps:$4 sm:$0xff]  }
 0x2b7   : > { %v1747_v55 = vpop.xlane.xlu0 %1746 }
 0x2b8   : > { %v1748_v56 = vsub.f32 %v1739_v48, %v1747_v55  ;;  %v3738_v55 = vld [vmem:[#allocation2 + $0xc4] ss:$16 sps:$4 sm:$0xff]  }
 0x2ba   : > { %v1749_v57 = vmul.f32 1.442695, %v1748_v56  ;;  %v3744_v56 = vld [vmem:[#allocation2 + $0xa4] ss:$16 sps:$4 sm:$0xff]  }
 0x2bc   : > { %3802 = vpow2.f32 %v1749_v57  ;;  %v3742_v57 = vld [vmem:[#allocation2 + $0xa0] ss:$16 sps:$4 sm:$0xff]  }
 0x2c9   : > { %v3803_v58 = vpop.eup %3802 }
 0x2ca   : > { %v1751_v59 = vsel %vm1744_vm3, %v3803_v58, 0.0 }
 0x2cb   : > { %1752 = vadd.xlane.f32.xlu0 %v1751_v59  ;;  %v3748_v59 = vld [vmem:[#allocation2 + $0x80] ss:$16 sps:$4 sm:$0xff]  }
 0x354   : > { %v1753_v5 = vpop.xlane.xlu0 %1752 }
 0x355   : > { %3804 = vrcp.f32 %v1753_v5  ;;  %v3753_v5 = vld [vmem:[#allocation2 + $0x8c] ss:$16 sps:$4 sm:$0xff]  }
 0x362   : > { %v3805_v6 = vpop.eup %3804 }
 0x363   : > { %v1755_v7 = vmul.f32 %v3805_v6, %v3803_v58  ;;  %v3750_v58 = vld [vmem:[#allocation2 + $0x84] ss:$16 sps:$4 sm:$0xff]   ;;  %v3751_v6 = vld [vmem:[#allocation2 + $0x88] ss:$16 sps:$4 sm:$0xff]  }
 0x365   : > { %v1756_v11 = vpack.c.bf16 %v1755_v7, %v1755_v7  ;;  %v2291_v7 = vpack.c.bf16 %v4552_v27, %v4552_v27 }
 0x367   : > { %3354 = vmatmul.mubr.msk.bf16.vlgmr.msra.gmra.mxu1 %vm1744_vm3, %v1756_v11 }
 0x368   : > { %1955 = vmatpush1.bf16.msra.mxu1 %v3709_v10  ;;  %1978 = vmatprep.mubr.bf16.mxu1 %v3868_v8  ;;  %v4609_v10 = vpack.c.bf16 %v4560_v42, %v4560_v42 }
 0x369   : > { %1956 = vmatprep.subr.bf16.mxu1 %v3717_v12 }
 0x36c   : > { %1957 = vmatpush1.bf16.msra.mxu1 %v3715_v13 }
 0x36d   : > { %1958 = vmatprep.subr.bf16.mxu1 %v3723_v15  ;;  %v2296_v15 = vsel %vm1697_vm1, %v2291_v7, 0 }
 0x370   : > { %1959 = vmatpush1.bf16.msra.mxu1 %v3721_v16  ;;  %v2355_v16 = vsel %vm1761_vm2, %v4609_v10, 0 }
 0x371   : > { %1960 = vmatprep.subr.bf16.mxu1 %v3729_v17  ;;  %v2290_v17 = vpack.c.bf16 %v4550_v49, %v4550_v49 }
 0x374   : > { %1961 = vmatpush1.bf16.msra.mxu1 %v3727_v18  ;;  %v3820_v18 = vld [vmem:[%s4074_s10] sm:$0xff] }
 0x375   : > { %3363 = vmatprep.subr.bf16.mxu1 %v3865_v14 }
 0x427   : > { %v1799_v19 = vpop.f32.mrf.mxu1 }
 0x428   : > { %v1805_v52 = vpack.c.bf16 %v1799_v19, %v1799_v19  ;;  %v3821_v19 = vld [vmem:[%s4074_s10 + $0x10] sm:$0xff] }
 0x429   : > { %v3355_v20 = vpop.f32.mrf.mxu1 }
 0x42a   : > { %3263 = vmatmul.mubr.msk.bf16.vlgmr.msra.gmra.mxu0 %vm1697_vm1, %v1805_v52  ;;  %3264 = vmatmul.mubr.msk.bf16.vlgmr.msra.gmra.mxu1 %vm1697_vm1, %v1805_v52 }
 0x42b   : > { %3358 = vmatpush3.bf16.xpose.msra.mxu0 %v2001_v21  ;;  %v1802_v22 = vpop.f32.mrf.mxu1  ;;  %3359 = vmatprep.mubr.msk.bf16.mxu0 %vm3866_vm0, %v3865_v14 }
 0x42c   : > { %3365 = vmatprep.mubr.msk.bf16.mxu1 %vm3866_vm0, %v3865_v14  ;;  %2212 = vmatprep.subr.bf16.mxu0 %v3732_v53  ;;  %v3822_v22 = vld [vmem:[%s4074_s10 + $0x8] sm:$0xff]  ;;  %v3756_v53 = vld [vmem:[#allocation2 + $0x164] ss:$16 sps:$4 sm:$0xff]  }
 0x42d   : > { %v3356_v23 = vpop.f32.mrf.mxu1 }
 0x432   : > { %3360 = vmatmul.mubr.msk.bf16.vlgmr.msra.gmra.mxu0 %vm1697_vm1, %v1993_v24  ;;  %v3823_v24 = vld [vmem:[%s4074_s10 + $0x18] sm:$0xff] }
 0x433   : > { %2236 = vmatprep.mubr.bf16.mxu0 %v3868_v8  ;;  %2213 = vmatpush1.bf16.msra.mxu0 %v3730_v51  ;;  %v3754_v51 = vld [vmem:[#allocation2 + $0x160] ss:$16 sps:$4 sm:$0xff]  }
 0x434   : > { %2214 = vmatprep.subr.bf16.mxu0 %v3738_v55  ;;  %v3762_v55 = vld [vmem:[#allocation2 + $0x144] ss:$16 sps:$4 sm:$0xff]  }
 0x4ea   : > { %v4587_v25 = vpop.f32.mrf.mxu0  ;;  %v4589_v26 = vpop.f32.mrf.mxu1 }
 0x4eb   : > { %v1987_v9 = vadd.f32 %v3820_v18, %v4587_v25  ;;  %v1989_v52 = vadd.f32 %v3821_v19, %v4589_v26 }
 0x4ec   : > { %v4591_v28 = vpop.f32.mrf.mxu0  ;;  %v4593_v29 = vpop.f32.mrf.mxu1 }
 0x4ed   : > { %v1988_v23 = vadd.f32 %v3822_v22, %v4591_v28 }
 0x4ee   : > { %v1943_v30 = vpop.f32.mrf.mxu0  ;;  %v1984_v31 = vpop.f32.mrf.mxu1 }
 0x4ef   : > { %v1990_v30 = vadd.f32 %v3823_v24, %v4593_v29 }
 0x4f0   : > { %v1944_v32 = vpop.f32.mrf.mxu0  ;;  %v1985_v33 = vpop.f32.mrf.mxu1 }
 0x4f2   : > { %v2037_v34 = vpop.f32.mrf.mxu0 }
 0x4f3   : > { %v2038_v35 = vadd.f32 %v4568_v46, %v2037_v34 }
 0x4f4   : > { %v3361_v36 = vpop.f32.mrf.mxu0 }
 0x4f5   : > { %v2043_v37 = vsel %vm1744_vm3, %v2038_v35, -inf }
 0x4f6   : > { %2044 = vmax.xlane.f32.xlu0 %v2043_v37  ;;  %v2040_v38 = vpop.f32.mrf.mxu0 }
 0x4f8   : > { %v3362_v39 = vpop.f32.mrf.mxu0 }
 0x50c   : > { %2056 = vrot.lane.b32.xlu0 %v4558_v40, %s3867_s30  ;;  %v3736_v40 = vld [vmem:[#allocation2 + $0xc0] ss:$16 sps:$4 sm:$0xff]  }
 0x50d   : > { %2215 = vmatpush1.bf16.msra.mxu0 %v3736_v40  ;;  %v3760_v40 = vld [vmem:[#allocation2 + $0x140] ss:$16 sps:$4 sm:$0xff]  }
 0x50e   : > { %2216 = vmatprep.subr.bf16.mxu0 %v3744_v56  ;;  %v3768_v56 = vld [vmem:[#allocation2 + $0x124] ss:$16 sps:$4 sm:$0xff]  }
 0x511   : > { %2217 = vmatpush1.bf16.msra.mxu0 %v3742_v57  ;;  %v3766_v57 = vld [vmem:[#allocation2 + $0x120] ss:$16 sps:$4 sm:$0xff]  }
 0x512   : > { %2218 = vmatprep.subr.bf16.mxu0 %v3750_v58  ;;  %v3774_v58 = vld [vmem:[#allocation2 + $0x104] ss:$16 sps:$4 sm:$0xff]  }
 0x515   : > { %2219 = vmatpush1.bf16.msra.mxu0 %v3748_v59  ;;  %v3772_v59 = vld [vmem:[#allocation2 + $0x100] ss:$16 sps:$4 sm:$0xff]  }
 0x516   : > { %3369 = vmatprep.subr.bf16.mxu0 %v3865_v14 }
 0x57f   : > { %v2045_v41 = vpop.xlane.xlu0 %2044 }
 0x580   : > { %v2046_v43 = vsub.f32 %v2038_v35, %v2045_v41 }
 0x582   : > { %v2047_v44 = vmul.f32 1.442695, %v2046_v43 }
 0x583   : > { %v2057_v45 = vpop.permute.xlu0 %2056 }
 0x584   : > { %3806 = vpow2.f32 %v2047_v44  ;;  %v2062_v47 = vsel %vm1761_vm2, %v2057_v45, 0 }
 0x585   : > { %3364 = vmatpush3.bf16.msra.mxu1 %v2062_v47 }
 0x586   : > { %2253 = vmatprep.subr.bf16.mxu1 %v3735_v54  ;;  %v3759_v54 = vld [vmem:[#allocation2 + $0x16c] ss:$16 sps:$4 sm:$0xff]  }
 0x591   : > { %v3807_v48 = vpop.eup %3806 }
 0x592   : > { %v2049_v50 = vsel %vm1744_vm3, %v3807_v48, 0.0 }
 0x593   : > { %2050 = vadd.xlane.f32.xlu1 %v2049_v50 }
 0x61c   : > { %v2051_v60 = vpop.xlane.xlu1 %2050 }
 0x61d   : > { %3808 = vrcp.f32 %v2051_v60 }
 0x62a   : > { %v3809_v61 = vpop.eup %3808 }
 0x62b   : > { %v2053_v62 = vmul.f32 %v3809_v61, %v3807_v48 }
 0x62d   : > { %v2054_v0 = vpack.c.bf16 %v2053_v62, %v2053_v62 }
 0x62f   : > { %3366 = vmatmul.mubr.msk.bf16.vlgmr.msra.gmra.mxu1 %vm1744_vm3, %v2054_v0 }
 0x630   : > { %2254 = vmatpush1.bf16.msra.mxu1 %v3733_v63  ;;  %2277 = vmatprep.mubr.bf16.mxu1 %v3868_v8  ;;  %v3757_v63 = vld [vmem:[#allocation2 + $0x168] ss:$16 sps:$4 sm:$0xff]  }
 0x631   : > { %2255 = vmatprep.subr.bf16.mxu1 %v3741_v1  ;;  %v3765_v1 = vld [vmem:[#allocation2 + $0x14c] ss:$16 sps:$4 sm:$0xff]  }
 0x634   : > { %2256 = vmatpush1.bf16.msra.mxu1 %v3739_v2  ;;  %v3763_v2 = vld [vmem:[#allocation2 + $0x148] ss:$16 sps:$4 sm:$0xff]  }
 0x635   : > { %2257 = vmatprep.subr.bf16.mxu1 %v3747_v3  ;;  %v3771_v3 = vld [vmem:[#allocation2 + $0x12c] ss:$16 sps:$4 sm:$0xff]  }
 0x638   : > { %2258 = vmatpush1.bf16.msra.mxu1 %v3745_v4  ;;  %v3769_v4 = vld [vmem:[#allocation2 + $0x128] ss:$16 sps:$4 sm:$0xff]  }
 0x639   : > { %2259 = vmatprep.subr.bf16.mxu1 %v3753_v5  ;;  %v3777_v5 = vld [vmem:[#allocation2 + $0x10c] ss:$16 sps:$4 sm:$0xff]  }
 0x63c   : > { %2260 = vmatpush1.bf16.msra.mxu1 %v3751_v6  ;;  %v3775_v6 = vld [vmem:[#allocation2 + $0x108] ss:$16 sps:$4 sm:$0xff]  }
 0x63d   : > { %3375 = vmatprep.subr.bf16.mxu1 %v3865_v14 }
 0x6ef   : > { %v2098_v11 = vpop.f32.mrf.mxu1 }
 0x6f0   : > { %v2104_v12 = vpack.c.bf16 %v2098_v11, %v2098_v11 }
 0x6f1   : > { %v3367_v13 = vpop.f32.mrf.mxu1 }
 0x6f2   : > { %3283 = vmatmul.mubr.msk.bf16.vlgmr.msra.gmra.mxu0 %vm1697_vm1, %v2104_v12  ;;  %3284 = vmatmul.mubr.msk.bf16.vlgmr.msra.gmra.mxu1 %vm1697_vm1, %v2104_v12 }
 0x6f3   : > { %3370 = vmatpush3.bf16.xpose.msra.mxu0 %v2296_v15  ;;  %3376 = vmatpush3.bf16.msra.mxu1 %v2355_v16  ;;  %v2101_v27 = vpop.f32.mrf.mxu1 }
 0x6f4   : > { %3371 = vmatprep.mubr.msk.bf16.mxu0 %vm3866_vm0, %v3865_v14  ;;  %3377 = vmatprep.mubr.msk.bf16.mxu1 %vm3866_vm0, %v3865_v14 }
 0x6f5   : > { %v3368_v42 = vpop.f32.mrf.mxu1  ;;  %2505 = vmatprep.subr.bf16.mxu0 %v3756_v53  ;;  %2546 = vmatprep.subr.bf16.mxu1 %v3759_v54  ;;  %v3781_v54 = vld [vmem:[#allocation2 + $0x1e8] ss:$16 sps:$4 sm:$0xff]  }
 0x6fa   : > { %3372 = vmatmul.mubr.msk.bf16.vlgmr.msra.gmra.mxu0 %vm1697_vm1, %v2290_v17 }
 0x6fb   : > { %2529 = vmatprep.mubr.bf16.mxu0 %v3868_v8  ;;  %2506 = vmatpush1.bf16.msra.mxu0 %v3754_v51 }
 0x6fc   : > { %2507 = vmatprep.subr.bf16.mxu0 %v3762_v55 }
 0x6ff   : > { %2508 = vmatpush1.bf16.msra.mxu0 %v3760_v40  ;;  %v3789_v40 = vld [vmem:[#allocation2 + $0x1cc] ss:$16 sps:$4 sm:$0xff]  }
 0x700   : > { %2509 = vmatprep.subr.bf16.mxu0 %v3768_v56  ;;  %v3787_v56 = vld [vmem:[#allocation2 + $0x1c8] ss:$16 sps:$4 sm:$0xff]  }
 0x703   : > { %2510 = vmatpush1.bf16.msra.mxu0 %v3766_v57  ;;  %v3795_v57 = vld [vmem:[#allocation2 + $0x1ac] ss:$16 sps:$4 sm:$0xff]  }
 0x704   : > { %2511 = vmatprep.subr.bf16.mxu0 %v3774_v58  ;;  %v3793_v58 = vld [vmem:[#allocation2 + $0x1a8] ss:$16 sps:$4 sm:$0xff]  }
 0x707   : > { %2512 = vmatpush1.bf16.msra.mxu0 %v3772_v59  ;;  %v3801_v59 = vld [vmem:[#allocation2 + $0x18c] ss:$16 sps:$4 sm:$0xff]  }
 0x708   : > { %3381 = vmatprep.subr.bf16.mxu0 %v3865_v14 }
 0x7b2   : > { %v2238_v20 = vpop.f32.mrf.mxu0  ;;  %v2279_v21 = vpop.f32.mrf.mxu1 }
 0x7b3   : > { %v4632_v31 = vadd.f32 %v2238_v20, %v1987_v9  ;;  %v4634_v49 = vadd.f32 %v2279_v21, %v1989_v52 }
 0x7b4   : > { %v2240_v32 = vpop.f32.mrf.mxu0  ;;  %v2281_v33 = vpop.f32.mrf.mxu1 }
 0x7b5   : > { %v4636_v34 = vadd.f32 %v2240_v32, %v1988_v23  ;;  %v4638_v25 = vadd.f32 %v2281_v33, %v1990_v30 }
 0x7b6   : > { %v2242_v35 = vpop.f32.mrf.mxu0  ;;  %v2283_v26 = vpop.f32.mrf.mxu1 }
 0x7b8   : > { %v2243_v36 = vpop.f32.mrf.mxu0  ;;  %v2284_v37 = vpop.f32.mrf.mxu1 }
 0x7ba   : > { %v2332_v38 = vpop.f32.mrf.mxu0 }
 0x7bb   : > { %v2333_v28 = vadd.f32 %v4568_v46, %v2332_v38 }
 0x7bc   : > { %v3373_v39 = vpop.f32.mrf.mxu0 }
 0x7bd   : > { %v2338_v29 = vsel %vm1744_vm3, %v2333_v28, -inf  ;;  %v3778_v39 = vld [vmem:[#allocation2 + $0x1e0] ss:$16 sps:$4 sm:$0xff]  }
 0x7be   : > { %2339 = vmax.xlane.f32.xlu0 %v2338_v29  ;;  %v2335_v41 = vpop.f32.mrf.mxu0  ;;  %v3780_v29 = vld [vmem:[#allocation2 + $0x1e4] ss:$16 sps:$4 sm:$0xff]  }
 0x7bf   : > { %v3783_v41 = vld [vmem:[#allocation2 + $0x1ec] ss:$16 sps:$4 sm:$0xff]  }
 0x7c0   : > { %v3374_v43 = vpop.f32.mrf.mxu0 }
 0x7c1   : > { %v3786_v43 = vld [vmem:[#allocation2 + $0x1c4] ss:$16 sps:$4 sm:$0xff]  }
 0x7d4   : > { %2584 = vrot.lane.b32.xlu0 %v2290_v17, %s3867_s30 }
 0x847   : > { %v2340_v44 = vpop.xlane.xlu0 %2339 }
 0x848   : > { %v2341_v45 = vsub.f32 %v2333_v28, %v2340_v44  ;;  %v3792_v44 = vld [vmem:[#allocation2 + $0x1a4] ss:$16 sps:$4 sm:$0xff]  }
 0x84a   : > { %v2342_v47 = vmul.f32 1.442695, %v2341_v45  ;;  %v3790_v45 = vld [vmem:[#allocation2 + $0x1a0] ss:$16 sps:$4 sm:$0xff]  }
 0x84b   : > { %v2585_v42 = vpop.permute.xlu0 %2584 }
 0x84c   : > { %3810 = vpow2.f32 %v2342_v47  ;;  %v3798_v47 = vld [vmem:[#allocation2 + $0x184] ss:$16 sps:$4 sm:$0xff]  }
 0x859   : > { %v3811_v48 = vpop.eup %3810 }
 0x85a   : > { %v2344_v50 = vsel %vm1744_vm3, %v3811_v48, 0.0 }
 0x85b   : > { %2345 = vadd.xlane.f32.xlu1 %v2344_v50 }
 0x86c   : > { %2587 = vrot.lane.b32.xlu1 %v2291_v7, %s3867_s30 }
 0x8e4   : > { %v2346_v60 = vpop.xlane.xlu1 %2345 }
 0x8e5   : > { %3812 = vrcp.f32 %v2346_v60  ;;  %v3799_v60 = vld [vmem:[#allocation2 + $0x188] ss:$16 sps:$4 sm:$0xff]  }
 0x8e8   : > { %v2588_v7 = vpop.permute.xlu1 %2587 }
 0x8e9   : > { %v2593_v15 = vsel %vm1697_vm1, %v2588_v7, 0 }
 0x8f2   : > { %v3813_v61 = vpop.eup %3812 }
 0x8f3   : > { %v2348_v62 = vmul.f32 %v3813_v61, %v3811_v48  ;;  %v3796_v48 = vld [vmem:[#allocation2 + $0x180] ss:$16 sps:$4 sm:$0xff]  }
 0x8f5   : > { %v2349_v0 = vpack.c.bf16 %v2348_v62, %v2348_v62 }
 0x8f7   : > { %3378 = vmatmul.mubr.msk.bf16.vlgmr.msra.gmra.mxu1 %vm1744_vm3, %v2349_v0 }
 0x8f8   : > { %2547 = vmatpush1.bf16.msra.mxu1 %v3757_v63  ;;  %2570 = vmatprep.mubr.bf16.mxu1 %v3868_v8 }
 0x8f9   : > { %2548 = vmatprep.subr.bf16.mxu1 %v3765_v1 }
 0x8fc   : > { %2549 = vmatpush1.bf16.msra.mxu1 %v3763_v2 }
 0x8fd   : > { %2550 = vmatprep.subr.bf16.mxu1 %v3771_v3 }
 0x900   : > { %2551 = vmatpush1.bf16.msra.mxu1 %v3769_v4 }
 0x901   : > { %2552 = vmatprep.subr.bf16.mxu1 %v3777_v5 }
 0x904   : > { %2553 = vmatpush1.bf16.msra.mxu1 %v3775_v6 }
 0x905   : > { %3387 = vmatprep.subr.bf16.mxu1 %v3865_v14 }
 0x9b7   : > { %v2391_v11 = vpop.f32.mrf.mxu1 }
 0x9b8   : > { %v2397_v12 = vpack.c.bf16 %v2391_v11, %v2391_v11 }
 0x9b9   : > { %v3379_v13 = vpop.f32.mrf.mxu1 }
 0x9ba   : > { %3303 = vmatmul.mubr.msk.bf16.vlgmr.msra.gmra.mxu0 %vm1697_vm1, %v2397_v12  ;;  %3304 = vmatmul.mubr.msk.bf16.vlgmr.msra.gmra.mxu1 %vm1697_vm1, %v2397_v12 }
 0x9bb   : > { %3382 = vmatpush3.bf16.xpose.msra.mxu0 %v2593_v15  ;;  %v2394_v16 = vpop.f32.mrf.mxu1  ;;  %3383 = vmatprep.mubr.msk.bf16.mxu0 %vm3866_vm0, %v3865_v14 }
 0x9bc   : > { %3389 = vmatprep.mubr.msk.bf16.mxu1 %vm3866_vm0, %v3865_v14  ;;  %2804 = vmatprep.subr.bf16.mxu0 %v3780_v29 }
 0x9bd   : > { %v3380_v27 = vpop.f32.mrf.mxu1 }
 0x9c2   : > { %3384 = vmatmul.mubr.msk.bf16.vlgmr.msra.gmra.mxu0 %vm1697_vm1, %v2585_v42 }
 0x9c3   : > { %2828 = vmatprep.mubr.bf16.mxu0 %v3868_v8  ;;  %2805 = vmatpush1.bf16.msra.mxu0 %v3778_v39 }
 0x9c4   : > { %2806 = vmatprep.subr.bf16.mxu0 %v3786_v43 }
 0xa7a   : > { %v2531_v17 = vpop.f32.mrf.mxu0  ;;  %v2572_v18 = vpop.f32.mrf.mxu1 }
 0xa7b   : > { %v4659_v9 = vadd.f32 %v2531_v17, %v4632_v31  ;;  %v4662_v19 = vadd.f32 %v2572_v18, %v4634_v49 }
 0xa7c   : > { %v2533_v52 = vpop.f32.mrf.mxu0  ;;  %v2574_v20 = vpop.f32.mrf.mxu1 }
 0xa7d   : > { %v4665_v21 = vadd.f32 %v2533_v52, %v4636_v34  ;;  %v4668_v14 = vadd.f32 %v2574_v20, %v4638_v25 }
 0xa7e   : > { %v2535_v22 = vpop.f32.mrf.mxu0  ;;  %v2576_v23 = vpop.f32.mrf.mxu1 }
 0xa80   : > { %v2536_v24 = vpop.f32.mrf.mxu0  ;;  %v2577_v30 = vpop.f32.mrf.mxu1 }
 0xa82   : > { %v2629_v32 = vpop.f32.mrf.mxu0 }
 0xa83   : > { %v2630_v33 = vadd.f32 %v4568_v46, %v2629_v32 }
 0xa84   : > { %v3385_v31 = vpop.f32.mrf.mxu0 }
 0xa85   : > { %v2635_v35 = vsel %vm1744_vm3, %v2630_v33, -inf }
 0xa86   : > { %2636 = vmax.xlane.f32.xlu1 %v2635_v35  ;;  %v2632_v49 = vpop.f32.mrf.mxu0 }
 0xa88   : > { %v3386_v26 = vpop.f32.mrf.mxu0 }
 0xa89   : > { %v2911_v26 = vlaneseq }
 0xa97   : > { %2648 = vrot.lane.b32.xlu1 %v4609_v10, %s3867_s30  ;;  %v3784_v10 = vld [vmem:[#allocation2 + $0x1c0] ss:$16 sps:$4 sm:$0xff]  }
 0xa98   : > { %2807 = vmatpush1.bf16.msra.mxu0 %v3784_v10 }
 0xa99   : > { %2808 = vmatprep.subr.bf16.mxu0 %v3792_v44 }
 0xa9c   : > { %2809 = vmatpush1.bf16.msra.mxu0 %v3790_v45 }
 0xa9d   : > { %2810 = vmatprep.subr.bf16.mxu0 %v3798_v47 }
 0xaa0   : > { %2811 = vmatpush1.bf16.msra.mxu0 %v3796_v48 }
 0xb0f   : > { %v2637_v34 = vpop.xlane.xlu1 %2636 }
 0xb10   : > { %v2638_v36 = vsub.f32 %v2630_v33, %v2637_v34  ;;  %v2912_v34 = vshrl.u32 %v2911_v26, 7 }
 0xb12   : > { %v2639_v25 = vmul.f32 1.442695, %v2638_v36  ;;  %v2913_v36 = vsub.s32 0, %v2912_v34 }
 0xb13   : > { %v2649_v37 = vpop.permute.xlu1 %2648 }
 0xb14   : > { %3814 = vpow2.f32 %v2639_v25  ;;  %v2654_v38 = vsel %vm1761_vm2, %v2649_v37, 0  ;;  %v2917_v25 = vsub.s32 1, %v2912_v34  ;;  %v2921_v37 = vsub.s32 2, %v2912_v34 }
 0xb15   : > { %3388 = vmatpush3.bf16.msra.mxu1 %v2654_v38  ;;  %v2925_v38 = vsub.s32 3, %v2912_v34 }
 0xb16   : > { %2845 = vmatprep.subr.bf16.mxu1 %v3783_v41 }
 0xb21   : > { %v3815_v28 = vpop.eup %3814 }
 0xb22   : > { %v2641_v46 = vsel %vm1744_vm3, %v3815_v28, 0.0 }
 0xb23   : > { %2642 = vadd.xlane.f32.xlu0 %v2641_v46  ;;  %v2935_v46 = vld [vmem:[%s4703_s5] sm:$0xf] }
 0xb24   : > { %v2940_v44 = vrot.slane %v2935_v46, %v2913_v36  ;;  %v2944_v45 = vrot.slane %v2935_v46, %v2917_v25  ;;  %v2948_v47 = vrot.slane %v2935_v46, %v2921_v37  ;;  %v2952_v48 = vrot.slane %v2935_v46, %v2925_v38 }
 0xbac   : > { %v2643_v50 = vpop.xlane.xlu0 %2642 }
 0xbad   : > { %3816 = vrcp.f32 %v2643_v50 }
 0xbba   : > { %v3817_v51 = vpop.eup %3816 }
 0xbbb   : > { %v2645_v53 = vmul.f32 %v3817_v51, %v3815_v28  ;;  %v2909_v28 = vld [vmem:[%s4702_s4] sm:$0xf] }
 0xbbc   : > { %v2914_v39 = vrot.slane %v2909_v28, %v2913_v36  ;;  %v2918_v29 = vrot.slane %v2909_v28, %v2917_v25  ;;  %v2922_v41 = vrot.slane %v2909_v28, %v2921_v37  ;;  %v2926_v43 = vrot.slane %v2909_v28, %v2925_v38 }
 0xbbd   : > { %v2646_v55 = vpack.c.bf16 %v2645_v53, %v2645_v53 }
 0xbbf   : > { %3390 = vmatmul.mubr.msk.bf16.vlgmr.msra.gmra.mxu1 %vm1744_vm3, %v2646_v55 }
 0xbc0   : > { %2846 = vmatpush1.bf16.msra.mxu1 %v3781_v54  ;;  %2869 = vmatprep.mubr.bf16.mxu1 %v3868_v8 }
 0xbc1   : > { %2847 = vmatprep.subr.bf16.mxu1 %v3789_v40 }
 0xbc4   : > { %2848 = vmatpush1.bf16.msra.mxu1 %v3787_v56 }
 0xbc5   : > { %2849 = vmatprep.subr.bf16.mxu1 %v3795_v57 }
 0xbc8   : > { %2850 = vmatpush1.bf16.msra.mxu1 %v3793_v58 }
 0xbc9   : > { %2851 = vmatprep.subr.bf16.mxu1 %v3801_v59 }
 0xbcc   : > { %2852 = vmatpush1.bf16.msra.mxu1 %v3799_v60 }
 0xc7f   : > { %v2690_v61 = vpop.f32.mrf.mxu1 }
 0xc80   : > { %v2696_v62 = vpack.c.bf16 %v2690_v61, %v2690_v61 }
 0xc81   : > { %v3391_v63 = vpop.f32.mrf.mxu1 }
 0xc82   : > { %3323 = vmatmul.mubr.msk.bf16.vlgmr.msra.gmra.mxu0 %vm1697_vm1, %v2696_v62  ;;  %3324 = vmatmul.mubr.msk.bf16.vlgmr.msra.gmra.mxu1 %vm1697_vm1, %v2696_v62 }
 0xc83   : > { %v2693_v0 = vpop.f32.mrf.mxu1 }
 0xc85   : > { %v3392_v1 = vpop.f32.mrf.mxu1 }
 0xd42   : > { %v2830_v8 = vpop.f32.mrf.mxu0  ;;  %v2871_v2 = vpop.f32.mrf.mxu1 }
 0xd43   : > { %v2878_v5 = vadd.f32 %v2830_v8, %v4659_v9  ;;  %v2880_v12 = vadd.f32 %v2871_v2, %v4662_v19 }
 0xd44   : > { %v2832_v3 = vpop.f32.mrf.mxu0  ;;  %v2873_v4 = vpop.f32.mrf.mxu1 }
 0xd45   : > { %v2879_v6 = vadd.f32 %v2832_v3, %v4665_v21  ;;  %v2881_v27 = vadd.f32 %v2873_v4, %v4668_v14 }
 0xd46   : > { %v2834_v7 = vpop.f32.mrf.mxu0  ;;  %v2875_v11 = vpop.f32.mrf.mxu1 }
 0xd47   : > { %v2882_v13 = vadd.f32 %v2879_v6, %v2878_v5 }
 0xd48   : > { %v2835_v15 = vpop.f32.mrf.mxu0  ;;  %v2876_v16 = vpop.f32.mrf.mxu1 }
 0xd49   : > { %v2883_v42 = vadd.f32 %v2882_v13, %v2880_v12 }
 0xd4b   : > { %v2884_v17 = vadd.f32 %v2883_v42, %v2881_v27 }
 0xd4d   : > { %2885 = vadd.xlane.f32.xlu0 %v2884_v17 }
 0xdd6   : > { %v2886_v18 = vpop.xlane.xlu0 %2885 }
 0xdd7   : > { %v2888_v52 = vmul.f32 0.001953125, %v2886_v18 }
 0xdd9   : > { %v2889_v20 = vsub.f32 %v2878_v5, %v2888_v52  ;;  %v2890_v22 = vsub.f32 %v2879_v6, %v2888_v52  ;;  %v2891_v23 = vsub.f32 %v2880_v12, %v2888_v52  ;;  %v2892_v9 = vsub.f32 %v2881_v27, %v2888_v52 }
 0xddb   : > { %v2893_v24 = vmul.f32 %v2889_v20, %v2889_v20  ;;  %v2894_v21 = vmul.f32 %v2890_v22, %v2890_v22  ;;  %v2895_v30 = vmul.f32 %v2891_v23, %v2891_v23  ;;  %v2896_v33 = vmul.f32 %v2892_v9, %v2892_v9 }
 0xddd   : > { %v2897_v32 = vadd.f32 %v2894_v21, %v2893_v24 }
 0xddf   : > { %v2898_v19 = vadd.f32 %v2897_v32, %v2895_v30 }
 0xde1   : > { %v2899_v31 = vadd.f32 %v2898_v19, %v2896_v33 }
 0xde3   : > { %2900 = vadd.xlane.f32.xlu1 %v2899_v31 }
 0xe6c   : > { %v2901_v35 = vpop.xlane.xlu1 %2900 }
 0xe6d   : > { %v2902_v49 = vmul.f32 0.001953125, %v2901_v35 }
 0xe6f   : > { %v2903_v14 = vadd.f32 1e-06, %v2902_v49 }
 0xe71   : > { %3818 = vrsqrt.f32 %v2903_v14 }
 0xe7e   : > { %v3819_v10 = vpop.eup %3818 }
 0xe7f   : > { %v2905_v50 = vmul.f32 %v3819_v10, %v2889_v20  ;;  %v2906_v51 = vmul.f32 %v3819_v10, %v2890_v22  ;;  %v2907_v53 = vmul.f32 %v3819_v10, %v2891_v23  ;;  %v2908_v54 = vmul.f32 %v3819_v10, %v2892_v9 }
 0xe81   : > { %v2931_v55 = vmul.f32 %v2914_v39, %v2905_v50  ;;  %v2932_v40 = vmul.f32 %v2918_v29, %v2906_v51  ;;  %v2933_v56 = vmul.f32 %v2922_v41, %v2907_v53  ;;  %v2934_v57 = vmul.f32 %v2926_v43, %v2908_v54 }
 0xe83   : > { %v2957_v58 = vadd.f32 %v2940_v44, %v2931_v55  ;;  %v2958_v59 = vadd.f32 %v2944_v45, %v2932_v40  ;;  %v2959_v60 = vadd.f32 %v2948_v47, %v2933_v56  ;;  %v2960_v61 = vadd.f32 %v2952_v48, %v2934_v57 }
 0xe85   : > { %2961 = vst [vmem:[%s280_s16] sm:$0xff] %v2957_v58  ;;  %2962 = vst [vmem:[%s280_s16 + $0x8] sm:$0xff] %v2958_v59 }
 0xe86   : > { %2963 = vst [vmem:[%s280_s16 + $0x10] sm:$0xff] %v2959_v60  ;;  %2964 = vst [vmem:[%s280_s16 + $0x18] sm:$0xff] %v2960_v61 }
 0xe87 PF: > { %s17_s21 = sadd.s32 1, %s3860_s21  }
 0xe88   : > { %p14_p1 = scmp.ge.s32.totalorder %s17_s21, 4  }
 0xe8a   :  { %16 = sbr.rel (!%p14_p1) target bundleno = 1 (0x1), region = 82 }
 0xe8f   :  { %2986 = vsyncpa [#allocation3], 1 }
 0xe90   :  { %2988 = vsyncpa [#allocation3 + $0x1], 1 }

// kernel: encoder_p_forward.8
= control target key start
LH: loop header
LB: loop body
LE: loop exit
PB: predicated region body
PF: predicated region fallthrough
CT: control target
= control target key end

     0   :  { %s3829_s21 = smov 0   ;;  %s4797_s0 = inlined_call_operand.vmem [shape: f32[2,8,512], index: 0, kind: input, shape index: {}]   ;;  %s4798_s1 = inlined_call_operand.vmem [shape: f32[2,1,8], index: 1, kind: input, shape index: {}]   ;;  %s4799_s2 = inlined_call_operand.vmem [shape: bf16[512,768], index: 2, kind: input, shape index: {}]   ;;  %s4800_s3 = inlined_call_operand.vmem [shape: bf16[256,512], index: 3, kind: input, shape index: {}]   ;;  %s4801_s4 = inlined_call_operand.vmem [shape: f32[1,512], index: 4, kind: input, shape index: {}]   ;;  %s4802_s5 = inlined_call_operand.vmem [shape: f32[1,512], index: 5, kind: input, shape index: {}]   ;;  %s4803_s6 = inlined_call_operand.vmem [shape: f32[2,8,512], index: 6, kind: output, shape index: {}]  }
   0x1 LB: > { %s3014_s22 = sadd.s32 4294967295, %s3788_s21   ;;  %p3018_p0 = scmp.ge.s32.totalorder %s3788_s21, 1  ;;  %s3788_s21 = sphi %s3829_s21, %s16_s21  }
   0x2   : > { %p220_p1 = scmp.lt.s32.totalorder %s3788_s21, 3 }
   0x4   : > { %p221_p2 = pnand %p3018_p0, %p220_p1 }
   0x5   : > { %p253_p3 = scmp.lt.s32.totalorder (!%p221_p2), %s3014_s22, 1  ;;  %s3792_s20 = smov (!%p221_p2), 64  }
   0x6   : > { %224 = sbr.rel (%p221_p2) target bundleno = 3703 (0xe77), region = 44 }
   0xb   : > { %v3376_v0 = vld [vmem:[%s4799_s2 + $0x154] ss:$24 sps:$4 sm:$0xff]   ;;  %v3380_v2 = vld [vmem:[%s4799_s2 + $0x150] ss:$24 sps:$4 sm:$0xff]   ;;  %v3382_v4 = vld [vmem:[%s4799_s2 + $0x124] ss:$24 sps:$4 sm:$0xff]  }
   0xc   : > { %v3378_v1 = vld [vmem:[%s4799_s2 + $0x454] ss:$24 sps:$4 sm:$0xff]   ;;  %1428 = vmatprep.subr.bf16.mxu0 %v3376_v0  ;;  %v3381_v3 = vld [vmem:[%s4799_s2 + $0x450] ss:$24 sps:$4 sm:$0xff]   ;;  %v3384_v5 = vld [vmem:[%s4799_s2 + $0x424] ss:$24 sps:$4 sm:$0xff]  }
   0xd   : > { %1469 = vmatprep.subr.bf16.mxu1 %v3378_v1  ;;  %1429 = vmatpush1.bf16.msra.mxu0 %v3380_v2  ;;  %v3386_v6 = vld [vmem:[%s4799_s2 + $0x120] ss:$24 sps:$4 sm:$0xff]   ;;  %v3388_v8 = vld [vmem:[%s4799_s2 + $0xf4] ss:$24 sps:$4 sm:$0xff]   ;;  %v3392_v10 = vld [vmem:[%s4799_s2 + $0xf0] ss:$24 sps:$4 sm:$0xff]  }
   0xe   : > { %1470 = vmatpush1.bf16.msra.mxu1 %v3381_v3  ;;  %1430 = vmatprep.subr.bf16.mxu0 %v3382_v4  ;;  %v3387_v7 = vld [vmem:[%s4799_s2 + $0x420] ss:$24 sps:$4 sm:$0xff]   ;;  %v3390_v9 = vld [vmem:[%s4799_s2 + $0x3f4] ss:$24 sps:$4 sm:$0xff]   ;;  %v3393_v11 = vld [vmem:[%s4799_s2 + $0x3f0] ss:$24 sps:$4 sm:$0xff]  }
   0xf   : > { %1471 = vmatprep.subr.bf16.mxu1 %v3384_v5  ;;  %v3394_v12 = vld [vmem:[%s4799_s2 + $0xc4] ss:$24 sps:$4 sm:$0xff]   ;;  %v3398_v14 = vld [vmem:[%s4799_s2 + $0xc0] ss:$24 sps:$4 sm:$0xff]   ;;  %v3400_v16 = vld [vmem:[%s4799_s2 + $0x94] ss:$24 sps:$4 sm:$0xff]  }
  0x10   : > { %v3396_v13 = vld [vmem:[%s4799_s2 + $0x3c4] ss:$24 sps:$4 sm:$0xff]   ;;  %v3399_v15 = vld [vmem:[%s4799_s2 + $0x3c0] ss:$24 sps:$4 sm:$0xff]   ;;  %v3402_v17 = vld [vmem:[%s4799_s2 + $0x394] ss:$24 sps:$4 sm:$0xff]  }
  0x11   : > { %1431 = vmatpush1.bf16.msra.mxu0 %v3386_v6  ;;  %v3404_v18 = vld [vmem:[%s4799_s2 + $0x90] ss:$24 sps:$4 sm:$0xff]   ;;  %v3406_v20 = vld [vmem:[%s4799_s2 + $0x64] ss:$24 sps:$4 sm:$0xff]   ;;  %v3410_v22 = vld [vmem:[%s4799_s2 + $0x60] ss:$24 sps:$4 sm:$0xff]  }
  0x12   : > { %1472 = vmatpush1.bf16.msra.mxu1 %v3387_v7  ;;  %1432 = vmatprep.subr.bf16.mxu0 %v3388_v8  ;;  %v3405_v19 = vld [vmem:[%s4799_s2 + $0x390] ss:$24 sps:$4 sm:$0xff]   ;;  %v3408_v21 = vld [vmem:[%s4799_s2 + $0x364] ss:$24 sps:$4 sm:$0xff]   ;;  %v3411_v23 = vld [vmem:[%s4799_s2 + $0x360] ss:$24 sps:$4 sm:$0xff]  }
  0x13   : > { %1473 = vmatprep.subr.bf16.mxu1 %v3390_v9  ;;  %v3412_v24 = vld [vmem:[%s4799_s2 + $0x34] ss:$24 sps:$4 sm:$0xff]   ;;  %v3416_v26 = vld [vmem:[%s4799_s2 + $0x30] ss:$24 sps:$4 sm:$0xff]   ;;  %v3418_v28 = vld [vmem:[%s4799_s2 + $0x4] ss:$24 sps:$4 sm:$0xff]  }
  0x14   : > { %v3414_v25 = vld [vmem:[%s4799_s2 + $0x334] ss:$24 sps:$4 sm:$0xff]   ;;  %v3417_v27 = vld [vmem:[%s4799_s2 + $0x330] ss:$24 sps:$4 sm:$0xff]   ;;  %v3420_v29 = vld [vmem:[%s4799_s2 + $0x304] ss:$24 sps:$4 sm:$0xff]  }
  0x15   : > { %1433 = vmatpush1.bf16.msra.mxu0 %v3392_v10  ;;  %v3422_v30 = vld [vmem:[%s4799_s2] ss:$24 sps:$4 sm:$0xff]   ;;  %v3424_v32 = vld [vmem:[%s4799_s2 + $0x2d4] ss:$24 sps:$4 sm:$0xff]   ;;  %v3428_v34 = vld [vmem:[%s4799_s2 + $0x2d0] ss:$24 sps:$4 sm:$0xff]  }
  0x16   : > { %1474 = vmatpush1.bf16.msra.mxu1 %v3393_v11  ;;  %1434 = vmatprep.subr.bf16.mxu0 %v3394_v12  ;;  %v3423_v31 = vld [vmem:[%s4799_s2 + $0x300] ss:$24 sps:$4 sm:$0xff]   ;;  %v3426_v33 = vld [vmem:[%s4799_s2 + $0x5d4] ss:$24 sps:$4 sm:$0xff]   ;;  %v3429_v35 = vld [vmem:[%s4799_s2 + $0x5d0] ss:$24 sps:$4 sm:$0xff]  }
  0x17   : > { %1475 = vmatprep.subr.bf16.mxu1 %v3396_v13  ;;  %v3430_v36 = vld [vmem:[%s4799_s2 + $0x2a4] ss:$24 sps:$4 sm:$0xff]   ;;  %s4805_s22 = smov (!%p253_p3, %s3014_s22), 1  ;;  %v3434_v38 = vld [vmem:[%s4799_s2 + $0x2a0] ss:$24 sps:$4 sm:$0xff]   ;;  %vm3791_vm0 = vmmov 0  }
  0x18   : > { %v3432_v37 = vld [vmem:[%s4799_s2 + $0x5a4] ss:$24 sps:$4 sm:$0xff]   ;;  %v3435_v39 = vld [vmem:[%s4799_s2 + $0x5a0] ss:$24 sps:$4 sm:$0xff]   ;;  %v3436_v40 = vld [vmem:[%s4799_s2 + $0x274] ss:$24 sps:$4 sm:$0xff]   ;;  %s260_s25 = scalar_lea.vmem %s4798_s1, %s4805_s22 }
  0x19   : > { %1435 = vmatpush1.bf16.msra.mxu0 %v3398_v14  ;;  %s3298_s15 = sshll.u32 %s4805_s22, 5  ;;  %v3438_v41 = vld [vmem:[%s4799_s2 + $0x574] ss:$24 sps:$4 sm:$0xff]   ;;  %v3440_v42 = vld [vmem:[%s4799_s2 + $0x270] ss:$24 sps:$4 sm:$0xff]   ;;  %vm1682_vm1 = vcmask 523264  }
  0x1a   : > { %1476 = vmatpush1.bf16.msra.mxu1 %v3399_v15  ;;  %1436 = vmatprep.subr.bf16.mxu0 %v3400_v16  ;;  %v3441_v43 = vld [vmem:[%s4799_s2 + $0x570] ss:$24 sps:$4 sm:$0xff]   ;;  %s3981_s26 = scalar_lea.vmem %s4797_s0, %s3298_s15  ;;  %v3442_v44 = vld [vmem:[%s4799_s2 + $0x244] ss:$24 sps:$4 sm:$0xff]   ;;  %v3446_v47 = vld [vmem:[%s4799_s2 + $0x240] ss:$24 sps:$4 sm:$0xff]   ;;  %s265_s18 = scalar_lea.vmem %s4803_s6, %s3298_s15 }
  0x1b   : > { %1477 = vmatprep.subr.bf16.mxu1 %v3402_v17  ;;  %v3444_v45 = vld [vmem:[%s4799_s2 + $0x544] ss:$24 sps:$4 sm:$0xff]   ;;  %v268_v46 = vld [vmem:[%s3981_s26 + $0x8] sm:$0xff]  ;;  %v3447_v48 = vld [vmem:[%s4799_s2 + $0x540] ss:$24 sps:$4 sm:$0xff]   ;;  %vm1746_vm2 = vcmask 1043456  }
  0x1c   : > { %v3996_v49 = vpack.c.bf16 %v268_v46, %v268_v46  ;;  %v270_v50 = vld [vmem:[%s3981_s26 + $0x18] sm:$0xff]  ;;  %v3448_v51 = vld [vmem:[%s4799_s2 + $0x214] ss:$24 sps:$4 sm:$0xff]   ;;  %v3452_v54 = vld [vmem:[%s4799_s2 + $0x210] ss:$24 sps:$4 sm:$0xff]   ;;  %vm1729_vm3 = vcmask 64512  }
  0x1d   : > { %1437 = vmatpush1.bf16.msra.mxu0 %v3404_v18  ;;  %v4002_v52 = vpack.c.bf16 %v270_v50, %v270_v50  ;;  %v3450_v53 = vld [vmem:[%s4799_s2 + $0x514] ss:$24 sps:$4 sm:$0xff]   ;;  %v3453_v55 = vld [vmem:[%s4799_s2 + $0x510] ss:$24 sps:$4 sm:$0xff]   ;;  %v3454_v56 = vld [vmem:[%s4799_s2 + $0x1e4] ss:$24 sps:$4 sm:$0xff]  }
  0x1e   : > { %1478 = vmatpush1.bf16.msra.mxu1 %v3405_v19  ;;  %1438 = vmatprep.subr.bf16.mxu0 %v3406_v20  ;;  %v3456_v57 = vld [vmem:[%s4799_s2 + $0x4e4] ss:$24 sps:$4 sm:$0xff]   ;;  %v3458_v58 = vld [vmem:[%s4799_s2 + $0x1e0] ss:$24 sps:$4 sm:$0xff]   ;;  %v3460_v60 = vld [vmem:[%s4799_s2 + $0x1b4] ss:$24 sps:$4 sm:$0xff]  }
  0x1f   : > { %1479 = vmatprep.subr.bf16.mxu1 %v3408_v21  ;;  %1460 = vmatprep.mubr.bf16.mxu0 %v3996_v49  ;;  %v3459_v59 = vld [vmem:[%s4799_s2 + $0x4e0] ss:$24 sps:$4 sm:$0xff]   ;;  %v3462_v61 = vld [vmem:[%s4799_s2 + $0x4b4] ss:$24 sps:$4 sm:$0xff]   ;;  %v3464_v62 = vld [vmem:[%s4799_s2 + $0x1b0] ss:$24 sps:$4 sm:$0xff]  }
  0x20   : > { %1501 = vmatprep.mubr.bf16.mxu1 %v4002_v52  ;;  %v3465_v63 = vld [vmem:[%s4799_s2 + $0x4b0] ss:$24 sps:$4 sm:$0xff]   ;;  %v3466_v0 = vld [vmem:[%s4799_s2 + $0x184] ss:$24 sps:$4 sm:$0xff]   ;;  %v3470_v2 = vld [vmem:[%s4799_s2 + $0x180] ss:$24 sps:$4 sm:$0xff]  }
  0x21   : > { %1439 = vmatpush1.bf16.msra.mxu0 %v3410_v22  ;;  %v3468_v1 = vld [vmem:[%s4799_s2 + $0x484] ss:$24 sps:$4 sm:$0xff]   ;;  %v3471_v3 = vld [vmem:[%s4799_s2 + $0x480] ss:$24 sps:$4 sm:$0xff]   ;;  %v269_v5 = vld [vmem:[%s3981_s26 + $0x10] sm:$0xff] }
  0x22   : > { %1480 = vmatpush1.bf16.msra.mxu1 %v3411_v23  ;;  %1440 = vmatprep.subr.bf16.mxu0 %v3412_v24  ;;  %v267_v4 = vld [vmem:[%s3981_s26] sm:$0xff]  ;;  %v3474_v6 = vld [vmem:[%s4799_s2 + $0x15c] ss:$24 sps:$4 sm:$0xff]   ;;  %v4061_v9 = vpack.c.bf16 %v269_v5, %v269_v5  ;;  %v3472_v10 = vld [vmem:[%s4799_s2 + $0x158] ss:$24 sps:$4 sm:$0xff]  }
  0x23   : > { %1481 = vmatprep.subr.bf16.mxu1 %v3414_v25  ;;  %v3477_v7 = vld [vmem:[%s4799_s2 + $0x45c] ss:$24 sps:$4 sm:$0xff]   ;;  %v4059_v8 = vpack.c.bf16 %v267_v4, %v267_v4  ;;  %v3475_v11 = vld [vmem:[%s4799_s2 + $0x458] ss:$24 sps:$4 sm:$0xff]   ;;  %v3480_v12 = vld [vmem:[%s4799_s2 + $0x12c] ss:$24 sps:$4 sm:$0xff]  }
  0x24   : > { %v3483_v13 = vld [vmem:[%s4799_s2 + $0x42c] ss:$24 sps:$4 sm:$0xff]   ;;  %v3478_v14 = vld [vmem:[%s4799_s2 + $0x128] ss:$24 sps:$4 sm:$0xff]   ;;  %v3486_v16 = vld [vmem:[%s4799_s2 + $0xfc] ss:$24 sps:$4 sm:$0xff]  }
  0x25   : > { %1441 = vmatpush1.bf16.msra.mxu0 %v3416_v26  ;;  %v3481_v15 = vld [vmem:[%s4799_s2 + $0x428] ss:$24 sps:$4 sm:$0xff]   ;;  %v3489_v17 = vld [vmem:[%s4799_s2 + $0x3fc] ss:$24 sps:$4 sm:$0xff]   ;;  %v3484_v18 = vld [vmem:[%s4799_s2 + $0xf8] ss:$24 sps:$4 sm:$0xff]  }
  0x26   : > { %1482 = vmatpush1.bf16.msra.mxu1 %v3417_v27  ;;  %1442 = vmatprep.subr.bf16.mxu0 %v3418_v28  ;;  %v3487_v19 = vld [vmem:[%s4799_s2 + $0x3f8] ss:$24 sps:$4 sm:$0xff]   ;;  %v3492_v20 = vld [vmem:[%s4799_s2 + $0xcc] ss:$24 sps:$4 sm:$0xff]   ;;  %v3490_v22 = vld [vmem:[%s4799_s2 + $0xc8] ss:$24 sps:$4 sm:$0xff]  }
  0x27   : > { %1483 = vmatprep.subr.bf16.mxu1 %v3420_v29  ;;  %v3495_v21 = vld [vmem:[%s4799_s2 + $0x3cc] ss:$24 sps:$4 sm:$0xff]   ;;  %v3493_v23 = vld [vmem:[%s4799_s2 + $0x3c8] ss:$24 sps:$4 sm:$0xff]   ;;  %v3498_v24 = vld [vmem:[%s4799_s2 + $0x9c] ss:$24 sps:$4 sm:$0xff]  }
  0x28   : > { %v3501_v25 = vld [vmem:[%s4799_s2 + $0x39c] ss:$24 sps:$4 sm:$0xff]   ;;  %v3496_v26 = vld [vmem:[%s4799_s2 + $0x98] ss:$24 sps:$4 sm:$0xff]   ;;  %v3504_v28 = vld [vmem:[%s4799_s2 + $0x6c] ss:$24 sps:$4 sm:$0xff]  }
  0x29   : > { %1443 = vmatpush1.bf16.msra.mxu0 %v3422_v30  ;;  %v3499_v27 = vld [vmem:[%s4799_s2 + $0x398] ss:$24 sps:$4 sm:$0xff]   ;;  %v3507_v29 = vld [vmem:[%s4799_s2 + $0x36c] ss:$24 sps:$4 sm:$0xff]   ;;  %v3502_v30 = vld [vmem:[%s4799_s2 + $0x68] ss:$24 sps:$4 sm:$0xff]  }
  0x2a   : > { %1484 = vmatpush1.bf16.msra.mxu1 %v3423_v31  ;;  %1444 = vmatprep.subr.bf16.mxu0 %v3424_v32  ;;  %v3505_v31 = vld [vmem:[%s4799_s2 + $0x368] ss:$24 sps:$4 sm:$0xff]   ;;  %v3510_v32 = vld [vmem:[%s4799_s2 + $0x3c] ss:$24 sps:$4 sm:$0xff]   ;;  %v3556_v4 = vld [vmem:[%s4799_s2 + $0x1b8] ss:$24 sps:$4 sm:$0xff]  }
  0x2b   : > { %1485 = vmatprep.subr.bf16.mxu1 %v3426_v33  ;;  %v3513_v33 = vld [vmem:[%s4799_s2 + $0x33c] ss:$24 sps:$4 sm:$0xff]   ;;  %v3526_v46 = vld [vmem:[%s4799_s2 + $0x2a8] ss:$24 sps:$4 sm:$0xff]   ;;  %v3559_v5 = vld [vmem:[%s4799_s2 + $0x4b8] ss:$24 sps:$4 sm:$0xff]  }
  0x2c   : > { %v3537_v50 = vld [vmem:[%s4799_s2 + $0x57c] ss:$24 sps:$4 sm:$0xff]  }
  0x2d   : > { %1445 = vmatpush2.bf16.msra.mxu0 %v3428_v34  ;;  %v3508_v34 = vld [vmem:[%s4799_s2 + $0x38] ss:$24 sps:$4 sm:$0xff]  }
  0x2e   : > { %1486 = vmatpush2.bf16.msra.mxu1 %v3429_v35  ;;  %1446 = vmatprep.subr.bf16.mxu0 %v3430_v36  ;;  %v3511_v35 = vld [vmem:[%s4799_s2 + $0x338] ss:$24 sps:$4 sm:$0xff]   ;;  %v3516_v36 = vld [vmem:[%s4799_s2 + $0xc] ss:$24 sps:$4 sm:$0xff]  }
  0x2f   : > { %1487 = vmatprep.subr.bf16.mxu1 %v3432_v37  ;;  %v3519_v37 = vld [vmem:[%s4799_s2 + $0x30c] ss:$24 sps:$4 sm:$0xff]  }
  0x31   : > { %1447 = vmatpush2.bf16.msra.mxu0 %v3434_v38  ;;  %v3514_v38 = vld [vmem:[%s4799_s2 + $0x8] ss:$24 sps:$4 sm:$0xff]  }
  0x32   : > { %1488 = vmatpush2.bf16.msra.mxu1 %v3435_v39  ;;  %1448 = vmatprep.subr.bf16.mxu0 %v3436_v40  ;;  %v3517_v39 = vld [vmem:[%s4799_s2 + $0x308] ss:$24 sps:$4 sm:$0xff]   ;;  %v3522_v40 = vld [vmem:[%s4799_s2 + $0x2dc] ss:$24 sps:$4 sm:$0xff]  }
  0x33   : > { %1489 = vmatprep.subr.bf16.mxu1 %v3438_v41  ;;  %v3525_v41 = vld [vmem:[%s4799_s2 + $0x5dc] ss:$24 sps:$4 sm:$0xff]  }
  0x35   : > { %1449 = vmatpush2.bf16.msra.mxu0 %v3440_v42  ;;  %v3520_v42 = vld [vmem:[%s4799_s2 + $0x2d8] ss:$24 sps:$4 sm:$0xff]  }
  0x36   : > { %1490 = vmatpush2.bf16.msra.mxu1 %v3441_v43  ;;  %1450 = vmatprep.subr.bf16.mxu0 %v3442_v44  ;;  %v3523_v43 = vld [vmem:[%s4799_s2 + $0x5d8] ss:$24 sps:$4 sm:$0xff]   ;;  %v3528_v44 = vld [vmem:[%s4799_s2 + $0x2ac] ss:$24 sps:$4 sm:$0xff]  }
  0x37   : > { %1491 = vmatprep.subr.bf16.mxu1 %v3444_v45  ;;  %v3531_v45 = vld [vmem:[%s4799_s2 + $0x5ac] ss:$24 sps:$4 sm:$0xff]  }
  0x39   : > { %1451 = vmatpush2.bf16.msra.mxu0 %v3446_v47  ;;  %v3529_v47 = vld [vmem:[%s4799_s2 + $0x5a8] ss:$24 sps:$4 sm:$0xff]  }
  0x3a   : > { %1492 = vmatpush2.bf16.msra.mxu1 %v3447_v48  ;;  %1452 = vmatprep.subr.bf16.mxu0 %v3448_v51  ;;  %v3534_v48 = vld [vmem:[%s4799_s2 + $0x27c] ss:$24 sps:$4 sm:$0xff]   ;;  %v3532_v51 = vld [vmem:[%s4799_s2 + $0x278] ss:$24 sps:$4 sm:$0xff]  }
  0x3b   : > { %1493 = vmatprep.subr.bf16.mxu1 %v3450_v53  ;;  %v3535_v53 = vld [vmem:[%s4799_s2 + $0x578] ss:$24 sps:$4 sm:$0xff]  }
  0x3d   : > { %1453 = vmatpush2.bf16.msra.mxu0 %v3452_v54  ;;  %v3540_v54 = vld [vmem:[%s4799_s2 + $0x24c] ss:$24 sps:$4 sm:$0xff]  }
  0x3e   : > { %1494 = vmatpush2.bf16.msra.mxu1 %v3453_v55  ;;  %1454 = vmatprep.subr.bf16.mxu0 %v3454_v56  ;;  %v3543_v55 = vld [vmem:[%s4799_s2 + $0x54c] ss:$24 sps:$4 sm:$0xff]   ;;  %v3538_v56 = vld [vmem:[%s4799_s2 + $0x248] ss:$24 sps:$4 sm:$0xff]  }
  0x3f   : > { %1495 = vmatprep.subr.bf16.mxu1 %v3456_v57  ;;  %v3541_v57 = vld [vmem:[%s4799_s2 + $0x548] ss:$24 sps:$4 sm:$0xff]  }
  0x41   : > { %1455 = vmatpush2.bf16.msra.mxu0 %v3458_v58  ;;  %v3546_v58 = vld [vmem:[%s4799_s2 + $0x21c] ss:$24 sps:$4 sm:$0xff]  }
  0x42   : > { %1496 = vmatpush2.bf16.msra.mxu1 %v3459_v59  ;;  %1456 = vmatprep.subr.bf16.mxu0 %v3460_v60  ;;  %v3549_v59 = vld [vmem:[%s4799_s2 + $0x51c] ss:$24 sps:$4 sm:$0xff]   ;;  %v3544_v60 = vld [vmem:[%s4799_s2 + $0x218] ss:$24 sps:$4 sm:$0xff]  }
  0x43   : > { %1497 = vmatprep.subr.bf16.mxu1 %v3462_v61  ;;  %v3547_v61 = vld [vmem:[%s4799_s2 + $0x518] ss:$24 sps:$4 sm:$0xff]  }
  0x45   : > { %1457 = vmatpush2.bf16.msra.mxu0 %v3464_v62  ;;  %v3552_v62 = vld [vmem:[%s4799_s2 + $0x1ec] ss:$24 sps:$4 sm:$0xff]  }
  0x46   : > { %1498 = vmatpush2.bf16.msra.mxu1 %v3465_v63  ;;  %1458 = vmatprep.subr.bf16.mxu0 %v3466_v0  ;;  %v3555_v63 = vld [vmem:[%s4799_s2 + $0x4ec] ss:$24 sps:$4 sm:$0xff]   ;;  %v3550_v0 = vld [vmem:[%s4799_s2 + $0x1e8] ss:$24 sps:$4 sm:$0xff]  }
  0x47   : > { %1499 = vmatprep.subr.bf16.mxu1 %v3468_v1  ;;  %v3553_v1 = vld [vmem:[%s4799_s2 + $0x4e8] ss:$24 sps:$4 sm:$0xff]  }
  0x49   : > { %1459 = vmatpush2.bf16.msra.mxu0 %v3470_v2  ;;  %v3558_v2 = vld [vmem:[%s4799_s2 + $0x1bc] ss:$24 sps:$4 sm:$0xff]  }
  0x4a   : > { %1500 = vmatpush2.bf16.msra.mxu1 %v3471_v3  ;;  %1510 = vmatprep.subr.bf16.mxu0 %v3474_v6  ;;  %v3561_v3 = vld [vmem:[%s4799_s2 + $0x4bc] ss:$24 sps:$4 sm:$0xff]   ;;  %v3564_v6 = vld [vmem:[%s4799_s2 + $0x18c] ss:$24 sps:$4 sm:$0xff]  }
  0x4b   : > { %1551 = vmatprep.subr.bf16.mxu1 %v3477_v7  ;;  %v3567_v7 = vld [vmem:[%s4799_s2 + $0x48c] ss:$24 sps:$4 sm:$0xff]  }
  0x4c   : > { %1461 = vmatmul.mubr.bf16.vlgmr.msra.gmra.mxu0 %v4059_v8 }
  0x4d   : > { %1502 = vmatmul.mubr.bf16.vlgmr.msra.gmra.mxu1 %v4061_v9  ;;  %1511 = vmatpush1.bf16.msra.mxu0 %v3472_v10  ;;  %v3562_v10 = vld [vmem:[%s4799_s2 + $0x188] ss:$24 sps:$4 sm:$0xff]  }
  0x4e   : > { %1552 = vmatpush1.bf16.msra.mxu1 %v3475_v11  ;;  %1512 = vmatprep.subr.bf16.mxu0 %v3480_v12  ;;  %v3565_v11 = vld [vmem:[%s4799_s2 + $0x488] ss:$24 sps:$4 sm:$0xff]   ;;  %v3570_v12 = vld [vmem:[%s4799_s2 + $0x164] ss:$24 sps:$4 sm:$0xff]  }
  0x4f   : > { %1553 = vmatprep.subr.bf16.mxu1 %v3483_v13  ;;  %1542 = vmatprep.mubr.bf16.mxu0 %v3996_v49  ;;  %v3568_v13 = vld [vmem:[%s4799_s2 + $0x160] ss:$24 sps:$4 sm:$0xff]  }
  0x50   : > { %1583 = vmatprep.mubr.bf16.mxu1 %v4002_v52 }
  0x51   : > { %1513 = vmatpush1.bf16.msra.mxu0 %v3478_v14  ;;  %v3573_v14 = vld [vmem:[%s4799_s2 + $0x134] ss:$24 sps:$4 sm:$0xff]  }
  0x52   : > { %1554 = vmatpush1.bf16.msra.mxu1 %v3481_v15  ;;  %1514 = vmatprep.subr.bf16.mxu0 %v3486_v16  ;;  %v3576_v15 = vld [vmem:[%s4799_s2 + $0x464] ss:$24 sps:$4 sm:$0xff]   ;;  %v3571_v16 = vld [vmem:[%s4799_s2 + $0x130] ss:$24 sps:$4 sm:$0xff]  }
  0x53   : > { %1555 = vmatprep.subr.bf16.mxu1 %v3489_v17  ;;  %v3574_v17 = vld [vmem:[%s4799_s2 + $0x460] ss:$24 sps:$4 sm:$0xff]  }
  0x55   : > { %1515 = vmatpush1.bf16.msra.mxu0 %v3484_v18  ;;  %v3579_v18 = vld [vmem:[%s4799_s2 + $0x104] ss:$24 sps:$4 sm:$0xff]  }
  0x56   : > { %1556 = vmatpush1.bf16.msra.mxu1 %v3487_v19  ;;  %1516 = vmatprep.subr.bf16.mxu0 %v3492_v20  ;;  %v3577_v19 = vld [vmem:[%s4799_s2 + $0x100] ss:$24 sps:$4 sm:$0xff]   ;;  %v3585_v20 = vld [vmem:[%s4799_s2 + $0xd4] ss:$24 sps:$4 sm:$0xff]  }
  0x57   : > { %1557 = vmatprep.subr.bf16.mxu1 %v3495_v21  ;;  %v3588_v21 = vld [vmem:[%s4799_s2 + $0x404] ss:$24 sps:$4 sm:$0xff]  }
  0x59   : > { %1517 = vmatpush1.bf16.msra.mxu0 %v3490_v22  ;;  %v3586_v22 = vld [vmem:[%s4799_s2 + $0x400] ss:$24 sps:$4 sm:$0xff]  }
  0x5a   : > { %1558 = vmatpush1.bf16.msra.mxu1 %v3493_v23  ;;  %1518 = vmatprep.subr.bf16.mxu0 %v3498_v24  ;;  %v3583_v23 = vld [vmem:[%s4799_s2 + $0xd0] ss:$24 sps:$4 sm:$0xff]   ;;  %v3594_v24 = vld [vmem:[%s4799_s2 + $0x3d4] ss:$24 sps:$4 sm:$0xff]  }
  0x5b   : > { %1559 = vmatprep.subr.bf16.mxu1 %v3501_v25  ;;  %v3591_v25 = vld [vmem:[%s4799_s2 + $0xa4] ss:$24 sps:$4 sm:$0xff]  }
  0x5d   : > { %1519 = vmatpush1.bf16.msra.mxu0 %v3496_v26  ;;  %v3592_v26 = vld [vmem:[%s4799_s2 + $0x3d0] ss:$24 sps:$4 sm:$0xff]  }
  0x5e   : > { %1560 = vmatpush1.bf16.msra.mxu1 %v3499_v27  ;;  %1520 = vmatprep.subr.bf16.mxu0 %v3504_v28  ;;  %v3589_v27 = vld [vmem:[%s4799_s2 + $0xa0] ss:$24 sps:$4 sm:$0xff]   ;;  %v3600_v28 = vld [vmem:[%s4799_s2 + $0x3a4] ss:$24 sps:$4 sm:$0xff]  }
  0x5f   : > { %1561 = vmatprep.subr.bf16.mxu1 %v3507_v29  ;;  %v3597_v29 = vld [vmem:[%s4799_s2 + $0x74] ss:$24 sps:$4 sm:$0xff]  }
  0x61   : > { %1521 = vmatpush1.bf16.msra.mxu0 %v3502_v30  ;;  %v3598_v30 = vld [vmem:[%s4799_s2 + $0x3a0] ss:$24 sps:$4 sm:$0xff]  }
  0x62   : > { %1562 = vmatpush1.bf16.msra.mxu1 %v3505_v31  ;;  %1522 = vmatprep.subr.bf16.mxu0 %v3510_v32  ;;  %v3595_v31 = vld [vmem:[%s4799_s2 + $0x70] ss:$24 sps:$4 sm:$0xff]   ;;  %v3606_v32 = vld [vmem:[%s4799_s2 + $0x374] ss:$24 sps:$4 sm:$0xff]  }
  0x63   : > { %1563 = vmatprep.subr.bf16.mxu1 %v3513_v33  ;;  %v3603_v33 = vld [vmem:[%s4799_s2 + $0x44] ss:$24 sps:$4 sm:$0xff]  }
  0x65   : > { %1523 = vmatpush1.bf16.msra.mxu0 %v3508_v34  ;;  %v3604_v34 = vld [vmem:[%s4799_s2 + $0x370] ss:$24 sps:$4 sm:$0xff]  }
  0x66   : > { %1564 = vmatpush1.bf16.msra.mxu1 %v3511_v35  ;;  %1524 = vmatprep.subr.bf16.mxu0 %v3516_v36  ;;  %v3601_v35 = vld [vmem:[%s4799_s2 + $0x40] ss:$24 sps:$4 sm:$0xff]   ;;  %v3612_v36 = vld [vmem:[%s4799_s2 + $0x344] ss:$24 sps:$4 sm:$0xff]  }
  0x67   : > { %1565 = vmatprep.subr.bf16.mxu1 %v3519_v37  ;;  %v3609_v37 = vld [vmem:[%s4799_s2 + $0x14] ss:$24 sps:$4 sm:$0xff]  }
  0x69   : > { %1525 = vmatpush1.bf16.msra.mxu0 %v3514_v38  ;;  %v3610_v38 = vld [vmem:[%s4799_s2 + $0x340] ss:$24 sps:$4 sm:$0xff]  }
  0x6a   : > { %1566 = vmatpush1.bf16.msra.mxu1 %v3517_v39  ;;  %1526 = vmatprep.subr.bf16.mxu0 %v3522_v40  ;;  %v3607_v39 = vld [vmem:[%s4799_s2 + $0x10] ss:$24 sps:$4 sm:$0xff]   ;;  %v3618_v40 = vld [vmem:[%s4799_s2 + $0x314] ss:$24 sps:$4 sm:$0xff]  }
  0x6b   : > { %1567 = vmatprep.subr.bf16.mxu1 %v3525_v41  ;;  %v3615_v41 = vld [vmem:[%s4799_s2 + $0x2e4] ss:$24 sps:$4 sm:$0xff]  }
  0x6d   : > { %1527 = vmatpush2.bf16.msra.mxu0 %v3520_v42  ;;  %v3616_v42 = vld [vmem:[%s4799_s2 + $0x310] ss:$24 sps:$4 sm:$0xff]  }
  0x6e   : > { %1568 = vmatpush2.bf16.msra.mxu1 %v3523_v43  ;;  %1528 = vmatprep.subr.bf16.mxu0 %v3528_v44  ;;  %v3613_v43 = vld [vmem:[%s4799_s2 + $0x2e0] ss:$24 sps:$4 sm:$0xff]   ;;  %v3624_v44 = vld [vmem:[%s4799_s2 + $0x5e4] ss:$24 sps:$4 sm:$0xff]  }
  0x6f   : > { %1569 = vmatprep.subr.bf16.mxu1 %v3531_v45  ;;  %v3621_v45 = vld [vmem:[%s4799_s2 + $0x2b4] ss:$24 sps:$4 sm:$0xff]  }
  0x71   : > { %1529 = vmatpush2.bf16.msra.mxu0 %v3526_v46  ;;  %v3622_v46 = vld [vmem:[%s4799_s2 + $0x5e0] ss:$24 sps:$4 sm:$0xff]  }
  0x72   : > { %1570 = vmatpush2.bf16.msra.mxu1 %v3529_v47  ;;  %1530 = vmatprep.subr.bf16.mxu0 %v3534_v48  ;;  %v3619_v47 = vld [vmem:[%s4799_s2 + $0x2b0] ss:$24 sps:$4 sm:$0xff]   ;;  %v3630_v48 = vld [vmem:[%s4799_s2 + $0x5b4] ss:$24 sps:$4 sm:$0xff]  }
  0x73   : > { %1571 = vmatprep.subr.bf16.mxu1 %v3537_v50  ;;  %v3627_v50 = vld [vmem:[%s4799_s2 + $0x284] ss:$24 sps:$4 sm:$0xff]  }
  0x75   : > { %1531 = vmatpush2.bf16.msra.mxu0 %v3532_v51  ;;  %v3628_v51 = vld [vmem:[%s4799_s2 + $0x5b0] ss:$24 sps:$4 sm:$0xff]  }
  0x76   : > { %1572 = vmatpush2.bf16.msra.mxu1 %v3535_v53  ;;  %1532 = vmatprep.subr.bf16.mxu0 %v3540_v54  ;;  %v3625_v53 = vld [vmem:[%s4799_s2 + $0x280] ss:$24 sps:$4 sm:$0xff]   ;;  %v3636_v54 = vld [vmem:[%s4799_s2 + $0x584] ss:$24 sps:$4 sm:$0xff]  }
  0x77   : > { %1573 = vmatprep.subr.bf16.mxu1 %v3543_v55  ;;  %v3633_v55 = vld [vmem:[%s4799_s2 + $0x254] ss:$24 sps:$4 sm:$0xff]  }
  0x79   : > { %1533 = vmatpush2.bf16.msra.mxu0 %v3538_v56  ;;  %v3634_v56 = vld [vmem:[%s4799_s2 + $0x580] ss:$24 sps:$4 sm:$0xff]  }
  0x7a   : > { %1574 = vmatpush2.bf16.msra.mxu1 %v3541_v57  ;;  %1534 = vmatprep.subr.bf16.mxu0 %v3546_v58  ;;  %v3631_v57 = vld [vmem:[%s4799_s2 + $0x250] ss:$24 sps:$4 sm:$0xff]   ;;  %v3642_v58 = vld [vmem:[%s4799_s2 + $0x554] ss:$24 sps:$4 sm:$0xff]  }
  0x7b   : > { %1575 = vmatprep.subr.bf16.mxu1 %v3549_v59  ;;  %v3639_v59 = vld [vmem:[%s4799_s2 + $0x224] ss:$24 sps:$4 sm:$0xff]  }
  0x7d   : > { %1535 = vmatpush2.bf16.msra.mxu0 %v3544_v60  ;;  %v3640_v60 = vld [vmem:[%s4799_s2 + $0x550] ss:$24 sps:$4 sm:$0xff]  }
  0x7e   : > { %1576 = vmatpush2.bf16.msra.mxu1 %v3547_v61  ;;  %1536 = vmatprep.subr.bf16.mxu0 %v3552_v62  ;;  %v3637_v61 = vld [vmem:[%s4799_s2 + $0x220] ss:$24 sps:$4 sm:$0xff]   ;;  %v3648_v62 = vld [vmem:[%s4799_s2 + $0x524] ss:$24 sps:$4 sm:$0xff]  }
  0x7f   : > { %1577 = vmatprep.subr.bf16.mxu1 %v3555_v63  ;;  %v3645_v63 = vld [vmem:[%s4799_s2 + $0x1f4] ss:$24 sps:$4 sm:$0xff]  }
  0x81   : > { %1537 = vmatpush2.bf16.msra.mxu0 %v3550_v0  ;;  %v3646_v0 = vld [vmem:[%s4799_s2 + $0x520] ss:$24 sps:$4 sm:$0xff]  }
  0x82   : > { %1578 = vmatpush2.bf16.msra.mxu1 %v3553_v1  ;;  %1538 = vmatprep.subr.bf16.mxu0 %v3558_v2  ;;  %v3643_v1 = vld [vmem:[%s4799_s2 + $0x1f0] ss:$24 sps:$4 sm:$0xff]   ;;  %v3654_v2 = vld [vmem:[%s4799_s2 + $0x4f4] ss:$24 sps:$4 sm:$0xff]  }
  0x83   : > { %1579 = vmatprep.subr.bf16.mxu1 %v3561_v3  ;;  %v3651_v3 = vld [vmem:[%s4799_s2 + $0x1c4] ss:$24 sps:$4 sm:$0xff]  }
  0x85   : > { %1539 = vmatpush2.bf16.msra.mxu0 %v3556_v4  ;;  %v3652_v4 = vld [vmem:[%s4799_s2 + $0x4f0] ss:$24 sps:$4 sm:$0xff]  }
  0x86   : > { %1580 = vmatpush2.bf16.msra.mxu1 %v3559_v5  ;;  %1540 = vmatprep.subr.bf16.mxu0 %v3564_v6  ;;  %v3649_v5 = vld [vmem:[%s4799_s2 + $0x1c0] ss:$24 sps:$4 sm:$0xff]   ;;  %v3660_v6 = vld [vmem:[%s4799_s2 + $0x4c4] ss:$24 sps:$4 sm:$0xff]  }
  0x87   : > { %1581 = vmatprep.subr.bf16.mxu1 %v3567_v7  ;;  %v3657_v7 = vld [vmem:[%s4799_s2 + $0x194] ss:$24 sps:$4 sm:$0xff]  }
  0x89   : > { %1541 = vmatpush2.bf16.msra.mxu0 %v3562_v10  ;;  %v3658_v10 = vld [vmem:[%s4799_s2 + $0x4c0] ss:$24 sps:$4 sm:$0xff]  }
  0x8a   : > { %1582 = vmatpush2.bf16.msra.mxu1 %v3565_v11  ;;  %1592 = vmatprep.subr.bf16.mxu0 %v3570_v12  ;;  %v3655_v11 = vld [vmem:[%s4799_s2 + $0x190] ss:$24 sps:$4 sm:$0xff]   ;;  %v3663_v12 = vld [vmem:[%s4799_s2 + $0x494] ss:$24 sps:$4 sm:$0xff]  }
  0x8b   : > { %1633 = vmatprep.subr.bf16.mxu1 %v3576_v15 }
  0x8c   : > { %1543 = vmatmul.mubr.bf16.vlgmr.msra.gmra.mxu0 %v4059_v8 }
  0x8d   : > { %1584 = vmatmul.mubr.bf16.vlgmr.msra.gmra.mxu1 %v4061_v9  ;;  %1593 = vmatpush1.bf16.msra.mxu0 %v3568_v13  ;;  %v3661_v13 = vld [vmem:[%s4799_s2 + $0x490] ss:$24 sps:$4 sm:$0xff]  }
  0x8e   : > { %1624 = vmatprep.mubr.bf16.mxu0 %v3996_v49  ;;  %1665 = vmatprep.mubr.bf16.mxu1 %v4002_v52  ;;  %v3582_v49 = vld [vmem:[%s4799_s2 + $0x434] ss:$24 sps:$4 sm:$0xff]   ;;  %v3580_v52 = vld [vmem:[%s4799_s2 + $0x430] ss:$24 sps:$4 sm:$0xff]  }
  0x8f   : > { %1594 = vmatprep.subr.bf16.mxu0 %v3573_v14  ;;  %1634 = vmatpush1.bf16.msra.mxu1 %v3574_v17  ;;  %v3790_v14 = vmov 0.0  }
  0x90   : > { %1635 = vmatprep.subr.bf16.mxu1 %v3582_v49 }
  0x91   : > { %1595 = vmatpush1.bf16.msra.mxu0 %v3571_v16 }
  0x92   : > { %1596 = vmatprep.subr.bf16.mxu0 %v3579_v18 }
  0x93   : > { %1636 = vmatpush1.bf16.msra.mxu1 %v3580_v52 }
  0x94   : > { %1637 = vmatprep.subr.bf16.mxu1 %v3588_v21 }
  0x95   : > { %1597 = vmatpush1.bf16.msra.mxu0 %v3577_v19 }
  0x96   : > { %1598 = vmatprep.subr.bf16.mxu0 %v3585_v20 }
  0x97   : > { %1638 = vmatpush1.bf16.msra.mxu1 %v3586_v22 }
  0x98   : > { %1639 = vmatprep.subr.bf16.mxu1 %v3594_v24 }
  0x99   : > { %1599 = vmatpush1.bf16.msra.mxu0 %v3583_v23 }
  0x9a   : > { %1600 = vmatprep.subr.bf16.mxu0 %v3591_v25 }
  0x9b   : > { %1640 = vmatpush1.bf16.msra.mxu1 %v3592_v26 }
  0x9c   : > { %1641 = vmatprep.subr.bf16.mxu1 %v3600_v28 }
  0x9d   : > { %1601 = vmatpush1.bf16.msra.mxu0 %v3589_v27 }
  0x9e   : > { %1602 = vmatprep.subr.bf16.mxu0 %v3597_v29 }
  0x9f   : > { %1642 = vmatpush1.bf16.msra.mxu1 %v3598_v30 }
  0xa0   : > { %1643 = vmatprep.subr.bf16.mxu1 %v3606_v32 }
  0xa1   : > { %1603 = vmatpush1.bf16.msra.mxu0 %v3595_v31 }
  0xa2   : > { %1604 = vmatprep.subr.bf16.mxu0 %v3603_v33 }
  0xa3   : > { %1644 = vmatpush1.bf16.msra.mxu1 %v3604_v34 }
  0xa4   : > { %1645 = vmatprep.subr.bf16.mxu1 %v3612_v36 }
  0xa5   : > { %1605 = vmatpush1.bf16.msra.mxu0 %v3601_v35 }
  0xa6   : > { %1606 = vmatprep.subr.bf16.mxu0 %v3609_v37 }
  0xa7   : > { %1646 = vmatpush1.bf16.msra.mxu1 %v3610_v38 }
  0xa8   : > { %1647 = vmatprep.subr.bf16.mxu1 %v3618_v40 }
  0xa9   : > { %1607 = vmatpush1.bf16.msra.mxu0 %v3607_v39 }
  0xaa   : > { %1608 = vmatprep.subr.bf16.mxu0 %v3615_v41 }
  0xab   : > { %1648 = vmatpush1.bf16.msra.mxu1 %v3616_v42 }
  0xac   : > { %1649 = vmatprep.subr.bf16.mxu1 %v3624_v44 }
  0xad   : > { %1609 = vmatpush2.bf16.msra.mxu0 %v3613_v43 }
  0xae   : > { %1610 = vmatprep.subr.bf16.mxu0 %v3621_v45 }
  0xaf   : > { %1650 = vmatpush2.bf16.msra.mxu1 %v3622_v46  ;;  %v4475_v46 = vld [vmem:[%s260_s25] ss:$0 sm:$0xff] }
  0xb0   : > { %1651 = vmatprep.subr.bf16.mxu1 %v3630_v48 }
  0xb1   : > { %1611 = vmatpush2.bf16.msra.mxu0 %v3619_v47 }
  0xb2   : > { %1612 = vmatprep.subr.bf16.mxu0 %v3627_v50 }
  0xb3   : > { %1652 = vmatpush2.bf16.msra.mxu1 %v3628_v51 }
  0xb4   : > { %1653 = vmatprep.subr.bf16.mxu1 %v3636_v54 }
  0xb5   : > { %1613 = vmatpush2.bf16.msra.mxu0 %v3625_v53 }
  0xb6   : > { %1614 = vmatprep.subr.bf16.mxu0 %v3633_v55 }
  0xb7   : > { %1654 = vmatpush2.bf16.msra.mxu1 %v3634_v56 }
  0xb8   : > { %1655 = vmatprep.subr.bf16.mxu1 %v3642_v58 }
  0xb9   : > { %1615 = vmatpush2.bf16.msra.mxu0 %v3631_v57 }
  0xba   : > { %1616 = vmatprep.subr.bf16.mxu0 %v3639_v59 }
  0xbb   : > { %1656 = vmatpush2.bf16.msra.mxu1 %v3640_v60  ;;  %v3664_v60 = vld [vmem:[%s4800_s3 + $0x60] ss:$16 sps:$4 sm:$0xff]  }
  0xbc   : > { %1657 = vmatprep.subr.bf16.mxu1 %v3648_v62  ;;  %v3669_v62 = vld [vmem:[%s4800_s3 + $0x6c] ss:$16 sps:$4 sm:$0xff]  }
  0xbd   : > { %1617 = vmatpush2.bf16.msra.mxu0 %v3637_v61  ;;  %v3666_v61 = vld [vmem:[%s4800_s3 + $0x64] ss:$16 sps:$4 sm:$0xff]  }
  0xbe   : > { %1618 = vmatprep.subr.bf16.mxu0 %v3645_v63  ;;  %v3672_v63 = vld [vmem:[%s4800_s3 + $0x44] ss:$16 sps:$4 sm:$0xff]  }
  0xbf   : > { %1658 = vmatpush2.bf16.msra.mxu1 %v3646_v0  ;;  %v3670_v0 = vld [vmem:[%s4800_s3 + $0x40] ss:$16 sps:$4 sm:$0xff]  }
  0xc0   : > { %1659 = vmatprep.subr.bf16.mxu1 %v3654_v2  ;;  %v3676_v2 = vld [vmem:[%s4800_s3 + $0x20] ss:$16 sps:$4 sm:$0xff]  }
  0xc1   : > { %1619 = vmatpush2.bf16.msra.mxu0 %v3643_v1  ;;  %v3678_v1 = vld [vmem:[%s4800_s3 + $0x24] ss:$16 sps:$4 sm:$0xff]  }
  0xc2   : > { %1620 = vmatprep.subr.bf16.mxu0 %v3651_v3  ;;  %v3684_v3 = vld [vmem:[%s4800_s3 + $0x4] ss:$16 sps:$4 sm:$0xff]  }
  0xc3   : > { %1660 = vmatpush2.bf16.msra.mxu1 %v3652_v4  ;;  %v3682_v4 = vld [vmem:[%s4800_s3] ss:$16 sps:$4 sm:$0xff]  }
  0xc4   : > { %1661 = vmatprep.subr.bf16.mxu1 %v3660_v6 }
  0xc5   : > { %1621 = vmatpush2.bf16.msra.mxu0 %v3649_v5 }
  0xc6   : > { %1622 = vmatprep.subr.bf16.mxu0 %v3657_v7 }
  0xc7   : > { %1662 = vmatpush2.bf16.msra.mxu1 %v3658_v10  ;;  %v3667_v10 = vld [vmem:[%s4800_s3 + $0x68] ss:$16 sps:$4 sm:$0xff]  }
  0xc8   : > { %1663 = vmatprep.subr.bf16.mxu1 %v3663_v12  ;;  %v3675_v12 = vld [vmem:[%s4800_s3 + $0x4c] ss:$16 sps:$4 sm:$0xff]  }
  0xc9   : > { %1623 = vmatpush2.bf16.msra.mxu0 %v3655_v11 }
  0xca   : > { %3316 = vmatprep.subr.bf16.mxu0 %v3790_v14 }
  0xcb   : > { %1664 = vmatpush2.bf16.msra.mxu1 %v3661_v13  ;;  %v3673_v13 = vld [vmem:[%s4800_s3 + $0x48] ss:$16 sps:$4 sm:$0xff]  }
  0xcc   : > { %1625 = vmatmul.mubr.bf16.vlgmr.msra.gmra.mxu0 %v4059_v8  ;;  %3322 = vmatprep.subr.bf16.mxu1 %v3790_v14 }
  0xcd   : > { %3318 = vmatprep.mubr.msk.bf16.mxu0 %vm3791_vm0, %v3790_v14 }
  0xce   : > { %1666 = vmatmul.mubr.bf16.vlgmr.msra.gmra.mxu1 %v4061_v9 }
  0xcf   : > { %3324 = vmatprep.mubr.msk.bf16.mxu1 %vm3791_vm0, %v3790_v14 }
 0x10c   : > { %v1462_v15 = vpop.f32.mrf.mxu0 }
 0x10d   : > { %v1503_v16 = vpop.f32.mrf.mxu1 }
 0x10e   : > { %v1504_v17 = vadd.f32 %v1503_v16, %v1462_v15  ;;  %v1464_v18 = vpop.f32.mrf.mxu0  ;;  %v3681_v15 = vld [vmem:[%s4800_s3 + $0x2c] ss:$16 sps:$4 sm:$0xff]   ;;  %v3679_v16 = vld [vmem:[%s4800_s3 + $0x28] ss:$16 sps:$4 sm:$0xff]  }
 0x10f   : > { %v1505_v8 = vpop.f32.mrf.mxu1 }
 0x110   : > { %v4457_v49 = vadd.f32 %v1505_v8, %v1464_v18  ;;  %v1466_v9 = vpop.f32.mrf.mxu0  ;;  %v1674_v33 = vpack.c.bf16 %v1504_v17, %v1504_v17  ;;  %v3687_v17 = vld [vmem:[%s4800_s3 + $0xc] ss:$16 sps:$4 sm:$0xff]   ;;  %v3685_v18 = vld [vmem:[%s4800_s3 + $0x8] ss:$16 sps:$4 sm:$0xff]   ;;  %v3793_v8 = vmov 0  }
 0x111   : > { %v1507_v19 = vpop.f32.mrf.mxu1 }
 0x112   : > { %v1467_v52 = vpop.f32.mrf.mxu0 }
 0x113   : > { %v1508_v20 = vpop.f32.mrf.mxu1 }
 0x14c   : > { %v1544_v21 = vpop.f32.mrf.mxu0 }
 0x14d   : > { %v1585_v22 = vpop.f32.mrf.mxu1 }
 0x14e   : > { %v1586_v23 = vadd.f32 %v1585_v22, %v1544_v21  ;;  %v1546_v24 = vpop.f32.mrf.mxu0 }
 0x14f   : > { %v1587_v25 = vpop.f32.mrf.mxu1 }
 0x150   : > { %v1675_v26 = vpack.c.bf16 %v1586_v23, %v1586_v23  ;;  %v4459_v27 = vadd.f32 %v1587_v25, %v1546_v24  ;;  %v1548_v28 = vpop.f32.mrf.mxu0 }
 0x151   : > { %v1589_v29 = vpop.f32.mrf.mxu1 }
 0x152   : > { %v1687_v30 = vsel %vm1682_vm1, %v1675_v26, 0  ;;  %1980 = vrot.lane.b32.xlu1 %v1675_v26, %s3792_s20  ;;  %v1549_v31 = vpop.f32.mrf.mxu0 }
 0x153   : > { %v1590_v32 = vpop.f32.mrf.mxu1  ;;  %3317 = vmatpush3.bf16.xpose.msra.mxu0 %v1687_v30 }
 0x154   : > { %1898 = vmatprep.subr.bf16.mxu0 %v3666_v61 }
 0x156   : > { %1977 = vrot.lane.b32.xlu1 %v1674_v33, %s3792_s20 }
 0x15a   : > { %3319 = vmatmul.mubr.msk.bf16.vlgmr.msra.gmra.mxu0 %vm1682_vm1, %v1674_v33 }
 0x15b   : > { %1899 = vmatpush1.bf16.msra.mxu0 %v3664_v60  ;;  %1922 = vmatprep.mubr.bf16.mxu0 %v3793_v8 }
 0x15c   : > { %1900 = vmatprep.subr.bf16.mxu0 %v3672_v63  ;;  %v3691_v63 = vld [vmem:[%s4800_s3 + $0xe8] ss:$16 sps:$4 sm:$0xff]  }
 0x15f   : > { %1901 = vmatpush1.bf16.msra.mxu0 %v3670_v0 }
 0x160   : > { %1902 = vmatprep.subr.bf16.mxu0 %v3678_v1  ;;  %v3699_v1 = vld [vmem:[%s4800_s3 + $0xcc] ss:$16 sps:$4 sm:$0xff]  }
 0x163   : > { %1903 = vmatpush1.bf16.msra.mxu0 %v3676_v2  ;;  %v3697_v2 = vld [vmem:[%s4800_s3 + $0xc8] ss:$16 sps:$4 sm:$0xff]  }
 0x164   : > { %1904 = vmatprep.subr.bf16.mxu0 %v3684_v3  ;;  %v3705_v3 = vld [vmem:[%s4800_s3 + $0xac] ss:$16 sps:$4 sm:$0xff]  }
 0x167   : > { %1905 = vmatpush1.bf16.msra.mxu0 %v3682_v4  ;;  %v3703_v4 = vld [vmem:[%s4800_s3 + $0xa8] ss:$16 sps:$4 sm:$0xff]  }
 0x168   : > { %3328 = vmatprep.subr.bf16.mxu0 %v3790_v14 }
 0x18c   : > { %v1626_v34 = vpop.f32.mrf.mxu0 }
 0x18e   : > { %v1628_v35 = vpop.f32.mrf.mxu0  ;;  %v1667_v36 = vpop.f32.mrf.mxu1 }
 0x18f   : > { %v1668_v38 = vadd.f32 %v1667_v36, %v1626_v34 }
 0x190   : > { %v1630_v37 = vpop.f32.mrf.mxu0  ;;  %v1669_v39 = vpop.f32.mrf.mxu1 }
 0x191   : > { %v4465_v40 = vpack.c.bf16 %v1668_v38, %v1668_v38  ;;  %v4467_v42 = vadd.f32 %v1669_v39, %v1628_v35 }
 0x192   : > { %v1631_v41 = vpop.f32.mrf.mxu0  ;;  %v1671_v43 = vpop.f32.mrf.mxu1 }
 0x193   : > { %v1748_v44 = vsel %vm1746_vm2, %v4465_v40, 0 }
 0x194   : > { %3323 = vmatpush3.bf16.msra.mxu1 %v1748_v44  ;;  %v1672_v45 = vpop.f32.mrf.mxu1 }
 0x195   : > { %1939 = vmatprep.subr.bf16.mxu1 %v3669_v62 }
 0x1c4   : > { %v1981_v9 = vpop.permute.xlu1 %1980 }
 0x1c5   : > { %v1986_v21 = vsel %vm1682_vm1, %v1981_v9, 0 }
 0x1c8   : > { %v1978_v24 = vpop.permute.xlu1 %1977 }
 0x21a   : > { %v1723_v47 = vpop.f32.mrf.mxu0 }
 0x21b   : > { %v1724_v48 = vadd.f32 %v4475_v46, %v1723_v47 }
 0x21c   : > { %v3320_v50 = vpop.f32.mrf.mxu0 }
 0x21d   : > { %v1730_v51 = vsel %vm1729_vm3, %v1724_v48, -inf }
 0x21e   : > { %1731 = vmax.xlane.f32.xlu0 %v1730_v51  ;;  %v1726_v53 = vpop.f32.mrf.mxu0  ;;  %v3688_v51 = vld [vmem:[%s4800_s3 + $0xe0] ss:$16 sps:$4 sm:$0xff]  }
 0x21f   : > { %v3693_v53 = vld [vmem:[%s4800_s3 + $0xec] ss:$16 sps:$4 sm:$0xff]  }
 0x220   : > { %v3321_v54 = vpop.f32.mrf.mxu0 }
 0x221   : > { %v3696_v54 = vld [vmem:[%s4800_s3 + $0xc4] ss:$16 sps:$4 sm:$0xff]  }
 0x2a7   : > { %v1732_v55 = vpop.xlane.xlu0 %1731 }
 0x2a8   : > { %v1733_v56 = vsub.f32 %v1724_v48, %v1732_v55  ;;  %v3694_v55 = vld [vmem:[%s4800_s3 + $0xc0] ss:$16 sps:$4 sm:$0xff]  }
 0x2aa   : > { %v1734_v57 = vmul.f32 1.442695, %v1733_v56  ;;  %v3702_v56 = vld [vmem:[%s4800_s3 + $0xa4] ss:$16 sps:$4 sm:$0xff]  }
 0x2ac   : > { %3760 = vpow2.f32 %v1734_v57  ;;  %v3700_v57 = vld [vmem:[%s4800_s3 + $0xa0] ss:$16 sps:$4 sm:$0xff]  }
 0x2b9   : > { %v3761_v58 = vpop.eup %3760 }
 0x2ba   : > { %v1736_v59 = vsel %vm1729_vm3, %v3761_v58, 0.0 }
 0x2bb   : > { %1737 = vadd.xlane.f32.xlu0 %v1736_v59  ;;  %v3706_v59 = vld [vmem:[%s4800_s3 + $0x80] ss:$16 sps:$4 sm:$0xff]  }
 0x344   : > { %v1738_v5 = vpop.xlane.xlu0 %1737 }
 0x345   : > { %3762 = vrcp.f32 %v1738_v5  ;;  %v3711_v5 = vld [vmem:[%s4800_s3 + $0x8c] ss:$16 sps:$4 sm:$0xff]  }
 0x352   : > { %v3763_v6 = vpop.eup %3762 }
 0x353   : > { %v1740_v7 = vmul.f32 %v3763_v6, %v3761_v58  ;;  %v3708_v58 = vld [vmem:[%s4800_s3 + $0x84] ss:$16 sps:$4 sm:$0xff]   ;;  %v3709_v6 = vld [vmem:[%s4800_s3 + $0x88] ss:$16 sps:$4 sm:$0xff]  }
 0x355   : > { %v1741_v11 = vpack.c.bf16 %v1740_v7, %v1740_v7  ;;  %v2276_v7 = vpack.c.bf16 %v4459_v27, %v4459_v27 }
 0x357   : > { %3325 = vmatmul.mubr.msk.bf16.vlgmr.msra.gmra.mxu1 %vm1729_vm3, %v1741_v11 }
 0x358   : > { %1940 = vmatpush1.bf16.msra.mxu1 %v3667_v10  ;;  %1963 = vmatprep.mubr.bf16.mxu1 %v3793_v8  ;;  %v4612_v10 = vpack.c.bf16 %v4467_v42, %v4467_v42 }
 0x359   : > { %1941 = vmatprep.subr.bf16.mxu1 %v3675_v12 }
 0x35c   : > { %1942 = vmatpush1.bf16.msra.mxu1 %v3673_v13 }
 0x35d   : > { %1943 = vmatprep.subr.bf16.mxu1 %v3681_v15  ;;  %v2281_v15 = vsel %vm1682_vm1, %v2276_v7, 0 }
 0x360   : > { %1944 = vmatpush1.bf16.msra.mxu1 %v3679_v16  ;;  %v2340_v16 = vsel %vm1746_vm2, %v4612_v10, 0 }
 0x361   : > { %1945 = vmatprep.subr.bf16.mxu1 %v3687_v17  ;;  %v2275_v17 = vpack.c.bf16 %v4457_v49, %v4457_v49 }
 0x364   : > { %1946 = vmatpush1.bf16.msra.mxu1 %v3685_v18  ;;  %v3778_v18 = vld [vmem:[%s3981_s26] sm:$0xff] }
 0x365   : > { %3334 = vmatprep.subr.bf16.mxu1 %v3790_v14 }
 0x417   : > { %v1784_v19 = vpop.f32.mrf.mxu1 }
 0x418   : > { %v1790_v52 = vpack.c.bf16 %v1784_v19, %v1784_v19  ;;  %v3779_v19 = vld [vmem:[%s3981_s26 + $0x10] sm:$0xff] }
 0x419   : > { %v3326_v20 = vpop.f32.mrf.mxu1 }
 0x41a   : > { %3234 = vmatmul.mubr.msk.bf16.vlgmr.msra.gmra.mxu0 %vm1682_vm1, %v1790_v52  ;;  %3235 = vmatmul.mubr.msk.bf16.vlgmr.msra.gmra.mxu1 %vm1682_vm1, %v1790_v52 }
 0x41b   : > { %3329 = vmatpush3.bf16.xpose.msra.mxu0 %v1986_v21  ;;  %v1787_v22 = vpop.f32.mrf.mxu1  ;;  %3330 = vmatprep.mubr.msk.bf16.mxu0 %vm3791_vm0, %v3790_v14 }
 0x41c   : > { %3336 = vmatprep.mubr.msk.bf16.mxu1 %vm3791_vm0, %v3790_v14  ;;  %v3780_v22 = vld [vmem:[%s3981_s26 + $0x8] sm:$0xff] }
 0x41d   : > { %v3327_v23 = vpop.f32.mrf.mxu1 }
 0x422   : > { %3331 = vmatmul.mubr.msk.bf16.vlgmr.msra.gmra.mxu0 %vm1682_vm1, %v1978_v24  ;;  %v3781_v24 = vld [vmem:[%s3981_s26 + $0x18] sm:$0xff] }
 0x423   : > { %2221 = vmatprep.mubr.bf16.mxu0 %v3793_v8 }
 0x4da   : > { %v4542_v25 = vpop.f32.mrf.mxu0  ;;  %v4544_v26 = vpop.f32.mrf.mxu1 }
 0x4db   : > { %v1972_v9 = vadd.f32 %v3778_v18, %v4542_v25  ;;  %v1974_v52 = vadd.f32 %v3779_v19, %v4544_v26 }
 0x4dc   : > { %v4546_v28 = vpop.f32.mrf.mxu0  ;;  %v4548_v29 = vpop.f32.mrf.mxu1 }
 0x4dd   : > { %v1973_v23 = vadd.f32 %v3780_v22, %v4546_v28 }
 0x4de   : > { %v1928_v30 = vpop.f32.mrf.mxu0  ;;  %v1969_v31 = vpop.f32.mrf.mxu1 }
 0x4df   : > { %v1975_v30 = vadd.f32 %v3781_v24, %v4548_v29 }
 0x4e0   : > { %v1929_v32 = vpop.f32.mrf.mxu0  ;;  %v1970_v33 = vpop.f32.mrf.mxu1 }
 0x4e2   : > { %v2022_v34 = vpop.f32.mrf.mxu0 }
 0x4e3   : > { %v2023_v35 = vadd.f32 %v4475_v46, %v2022_v34 }
 0x4e4   : > { %v3332_v36 = vpop.f32.mrf.mxu0 }
 0x4e5   : > { %v2028_v37 = vsel %vm1729_vm3, %v2023_v35, -inf }
 0x4e6   : > { %2029 = vmax.xlane.f32.xlu0 %v2028_v37  ;;  %v2025_v38 = vpop.f32.mrf.mxu0 }
 0x4e8   : > { %v3333_v39 = vpop.f32.mrf.mxu0 }
 0x4fc   : > { %2041 = vrot.lane.b32.xlu0 %v4465_v40, %s3792_s20  ;;  %v3690_v40 = vld [vmem:[%s4800_s3 + $0xe4] ss:$16 sps:$4 sm:$0xff]  }
 0x4fd   : > { %2197 = vmatprep.subr.bf16.mxu0 %v3690_v40  ;;  %v3714_v40 = vld [vmem:[%s4800_s3 + $0x164] ss:$16 sps:$4 sm:$0xff]  }
 0x4fe   : > { %2198 = vmatpush1.bf16.msra.mxu0 %v3688_v51  ;;  %v3712_v51 = vld [vmem:[%s4800_s3 + $0x160] ss:$16 sps:$4 sm:$0xff]  }
 0x4ff   : > { %2199 = vmatprep.subr.bf16.mxu0 %v3696_v54  ;;  %v3720_v54 = vld [vmem:[%s4800_s3 + $0x144] ss:$16 sps:$4 sm:$0xff]  }
 0x502   : > { %2200 = vmatpush1.bf16.msra.mxu0 %v3694_v55  ;;  %v3718_v55 = vld [vmem:[%s4800_s3 + $0x140] ss:$16 sps:$4 sm:$0xff]  }
 0x503   : > { %2201 = vmatprep.subr.bf16.mxu0 %v3702_v56  ;;  %v3726_v56 = vld [vmem:[%s4800_s3 + $0x124] ss:$16 sps:$4 sm:$0xff]  }
 0x506   : > { %2202 = vmatpush1.bf16.msra.mxu0 %v3700_v57  ;;  %v3724_v57 = vld [vmem:[%s4800_s3 + $0x120] ss:$16 sps:$4 sm:$0xff]  }
 0x507   : > { %2203 = vmatprep.subr.bf16.mxu0 %v3708_v58  ;;  %v3732_v58 = vld [vmem:[%s4800_s3 + $0x104] ss:$16 sps:$4 sm:$0xff]  }
 0x50a   : > { %2204 = vmatpush1.bf16.msra.mxu0 %v3706_v59  ;;  %v3730_v59 = vld [vmem:[%s4800_s3 + $0x100] ss:$16 sps:$4 sm:$0xff]  }
 0x50b   : > { %3340 = vmatprep.subr.bf16.mxu0 %v3790_v14 }
 0x56f   : > { %v2030_v41 = vpop.xlane.xlu0 %2029 }
 0x570   : > { %v2031_v43 = vsub.f32 %v2023_v35, %v2030_v41 }
 0x572   : > { %v2032_v44 = vmul.f32 1.442695, %v2031_v43 }
 0x573   : > { %v2042_v45 = vpop.permute.xlu0 %2041 }
 0x574   : > { %3764 = vpow2.f32 %v2032_v44  ;;  %v2047_v47 = vsel %vm1746_vm2, %v2042_v45, 0 }
 0x575   : > { %3335 = vmatpush3.bf16.msra.mxu1 %v2047_v47 }
 0x576   : > { %2238 = vmatprep.subr.bf16.mxu1 %v3693_v53  ;;  %v3717_v53 = vld [vmem:[%s4800_s3 + $0x16c] ss:$16 sps:$4 sm:$0xff]  }
 0x581   : > { %v3765_v48 = vpop.eup %3764 }
 0x582   : > { %v2034_v50 = vsel %vm1729_vm3, %v3765_v48, 0.0 }
 0x583   : > { %2035 = vadd.xlane.f32.xlu1 %v2034_v50 }
 0x60c   : > { %v2036_v60 = vpop.xlane.xlu1 %2035 }
 0x60d   : > { %3766 = vrcp.f32 %v2036_v60 }
 0x61a   : > { %v3767_v61 = vpop.eup %3766 }
 0x61b   : > { %v2038_v62 = vmul.f32 %v3767_v61, %v3765_v48 }
 0x61d   : > { %v2039_v0 = vpack.c.bf16 %v2038_v62, %v2038_v62 }
 0x61f   : > { %3337 = vmatmul.mubr.msk.bf16.vlgmr.msra.gmra.mxu1 %vm1729_vm3, %v2039_v0 }
 0x620   : > { %2239 = vmatpush1.bf16.msra.mxu1 %v3691_v63  ;;  %2262 = vmatprep.mubr.bf16.mxu1 %v3793_v8  ;;  %v3715_v63 = vld [vmem:[%s4800_s3 + $0x168] ss:$16 sps:$4 sm:$0xff]  }
 0x621   : > { %2240 = vmatprep.subr.bf16.mxu1 %v3699_v1  ;;  %v3723_v1 = vld [vmem:[%s4800_s3 + $0x14c] ss:$16 sps:$4 sm:$0xff]  }
 0x624   : > { %2241 = vmatpush1.bf16.msra.mxu1 %v3697_v2  ;;  %v3721_v2 = vld [vmem:[%s4800_s3 + $0x148] ss:$16 sps:$4 sm:$0xff]  }
 0x625   : > { %2242 = vmatprep.subr.bf16.mxu1 %v3705_v3  ;;  %v3729_v3 = vld [vmem:[%s4800_s3 + $0x12c] ss:$16 sps:$4 sm:$0xff]  }
 0x628   : > { %2243 = vmatpush1.bf16.msra.mxu1 %v3703_v4  ;;  %v3727_v4 = vld [vmem:[%s4800_s3 + $0x128] ss:$16 sps:$4 sm:$0xff]  }
 0x629   : > { %2244 = vmatprep.subr.bf16.mxu1 %v3711_v5  ;;  %v3735_v5 = vld [vmem:[%s4800_s3 + $0x10c] ss:$16 sps:$4 sm:$0xff]  }
 0x62c   : > { %2245 = vmatpush1.bf16.msra.mxu1 %v3709_v6  ;;  %v3733_v6 = vld [vmem:[%s4800_s3 + $0x108] ss:$16 sps:$4 sm:$0xff]  }
 0x62d   : > { %3346 = vmatprep.subr.bf16.mxu1 %v3790_v14 }
 0x6df   : > { %v2083_v11 = vpop.f32.mrf.mxu1 }
 0x6e0   : > { %v2089_v12 = vpack.c.bf16 %v2083_v11, %v2083_v11 }
 0x6e1   : > { %v3338_v13 = vpop.f32.mrf.mxu1 }
 0x6e2   : > { %3254 = vmatmul.mubr.msk.bf16.vlgmr.msra.gmra.mxu0 %vm1682_vm1, %v2089_v12  ;;  %3255 = vmatmul.mubr.msk.bf16.vlgmr.msra.gmra.mxu1 %vm1682_vm1, %v2089_v12 }
 0x6e3   : > { %3341 = vmatpush3.bf16.xpose.msra.mxu0 %v2281_v15  ;;  %3347 = vmatpush3.bf16.msra.mxu1 %v2340_v16  ;;  %v2086_v27 = vpop.f32.mrf.mxu1 }
 0x6e4   : > { %3342 = vmatprep.mubr.msk.bf16.mxu0 %vm3791_vm0, %v3790_v14  ;;  %3348 = vmatprep.mubr.msk.bf16.mxu1 %vm3791_vm0, %v3790_v14 }
 0x6e5   : > { %v3339_v42 = vpop.f32.mrf.mxu1  ;;  %2490 = vmatprep.subr.bf16.mxu0 %v3714_v40  ;;  %2531 = vmatprep.subr.bf16.mxu1 %v3717_v53  ;;  %v3739_v53 = vld [vmem:[%s4800_s3 + $0x1e8] ss:$16 sps:$4 sm:$0xff]  }
 0x6ea   : > { %3343 = vmatmul.mubr.msk.bf16.vlgmr.msra.gmra.mxu0 %vm1682_vm1, %v2275_v17 }
 0x6eb   : > { %2514 = vmatprep.mubr.bf16.mxu0 %v3793_v8  ;;  %2491 = vmatpush1.bf16.msra.mxu0 %v3712_v51 }
 0x6ec   : > { %2492 = vmatprep.subr.bf16.mxu0 %v3720_v54 }
 0x6ef   : > { %2493 = vmatpush1.bf16.msra.mxu0 %v3718_v55  ;;  %v3747_v55 = vld [vmem:[%s4800_s3 + $0x1cc] ss:$16 sps:$4 sm:$0xff]  }
 0x6f0   : > { %2494 = vmatprep.subr.bf16.mxu0 %v3726_v56  ;;  %v3745_v56 = vld [vmem:[%s4800_s3 + $0x1c8] ss:$16 sps:$4 sm:$0xff]  }
 0x6f3   : > { %2495 = vmatpush1.bf16.msra.mxu0 %v3724_v57  ;;  %v3753_v57 = vld [vmem:[%s4800_s3 + $0x1ac] ss:$16 sps:$4 sm:$0xff]  }
 0x6f4   : > { %2496 = vmatprep.subr.bf16.mxu0 %v3732_v58  ;;  %v3751_v58 = vld [vmem:[%s4800_s3 + $0x1a8] ss:$16 sps:$4 sm:$0xff]  }
 0x6f7   : > { %2497 = vmatpush1.bf16.msra.mxu0 %v3730_v59  ;;  %v3759_v59 = vld [vmem:[%s4800_s3 + $0x18c] ss:$16 sps:$4 sm:$0xff]  }
 0x6f8   : > { %3352 = vmatprep.subr.bf16.mxu0 %v3790_v14 }
 0x7a2   : > { %v2223_v20 = vpop.f32.mrf.mxu0  ;;  %v2264_v21 = vpop.f32.mrf.mxu1 }
 0x7a3   : > { %v4635_v31 = vadd.f32 %v2223_v20, %v1972_v9  ;;  %v4637_v49 = vadd.f32 %v2264_v21, %v1974_v52 }
 0x7a4   : > { %v2225_v32 = vpop.f32.mrf.mxu0  ;;  %v2266_v33 = vpop.f32.mrf.mxu1 }
 0x7a5   : > { %v4639_v34 = vadd.f32 %v2225_v32, %v1973_v23  ;;  %v4641_v25 = vadd.f32 %v2266_v33, %v1975_v30 }
 0x7a6   : > { %v2227_v35 = vpop.f32.mrf.mxu0  ;;  %v2268_v26 = vpop.f32.mrf.mxu1 }
 0x7a8   : > { %v2228_v36 = vpop.f32.mrf.mxu0  ;;  %v2269_v37 = vpop.f32.mrf.mxu1 }
 0x7aa   : > { %v2317_v38 = vpop.f32.mrf.mxu0 }
 0x7ab   : > { %v2318_v28 = vadd.f32 %v4475_v46, %v2317_v38 }
 0x7ac   : > { %v3344_v39 = vpop.f32.mrf.mxu0 }
 0x7ad   : > { %v2323_v29 = vsel %vm1729_vm3, %v2318_v28, -inf  ;;  %v3736_v39 = vld [vmem:[%s4800_s3 + $0x1e0] ss:$16 sps:$4 sm:$0xff]  }
 0x7ae   : > { %2324 = vmax.xlane.f32.xlu0 %v2323_v29  ;;  %v2320_v41 = vpop.f32.mrf.mxu0  ;;  %v3741_v29 = vld [vmem:[%s4800_s3 + $0x1ec] ss:$16 sps:$4 sm:$0xff]  }
 0x7af   : > { %v3744_v41 = vld [vmem:[%s4800_s3 + $0x1c4] ss:$16 sps:$4 sm:$0xff]  }
 0x7b0   : > { %v3345_v43 = vpop.f32.mrf.mxu0 }
 0x7b1   : > { %v3742_v43 = vld [vmem:[%s4800_s3 + $0x1c0] ss:$16 sps:$4 sm:$0xff]  }
 0x7c4   : > { %2569 = vrot.lane.b32.xlu0 %v2275_v17, %s3792_s20 }
 0x837   : > { %v2325_v44 = vpop.xlane.xlu0 %2324 }
 0x838   : > { %v2326_v45 = vsub.f32 %v2318_v28, %v2325_v44  ;;  %v3750_v44 = vld [vmem:[%s4800_s3 + $0x1a4] ss:$16 sps:$4 sm:$0xff]  }
 0x83a   : > { %v2327_v47 = vmul.f32 1.442695, %v2326_v45  ;;  %v3748_v45 = vld [vmem:[%s4800_s3 + $0x1a0] ss:$16 sps:$4 sm:$0xff]  }
 0x83b   : > { %v2570_v42 = vpop.permute.xlu0 %2569 }
 0x83c   : > { %3768 = vpow2.f32 %v2327_v47  ;;  %v3756_v47 = vld [vmem:[%s4800_s3 + $0x184] ss:$16 sps:$4 sm:$0xff]  }
 0x849   : > { %v3769_v48 = vpop.eup %3768 }
 0x84a   : > { %v2329_v50 = vsel %vm1729_vm3, %v3769_v48, 0.0 }
 0x84b   : > { %2330 = vadd.xlane.f32.xlu1 %v2329_v50 }
 0x85c   : > { %2572 = vrot.lane.b32.xlu1 %v2276_v7, %s3792_s20 }
 0x8d4   : > { %v2331_v60 = vpop.xlane.xlu1 %2330 }
 0x8d5   : > { %3770 = vrcp.f32 %v2331_v60 }
 0x8d8   : > { %v2573_v7 = vpop.permute.xlu1 %2572 }
 0x8d9   : > { %v2578_v15 = vsel %vm1682_vm1, %v2573_v7, 0 }
 0x8e2   : > { %v3771_v61 = vpop.eup %3770 }
 0x8e3   : > { %v2333_v62 = vmul.f32 %v3771_v61, %v3769_v48  ;;  %v3754_v48 = vld [vmem:[%s4800_s3 + $0x180] ss:$16 sps:$4 sm:$0xff]  }
 0x8e5   : > { %v2334_v0 = vpack.c.bf16 %v2333_v62, %v2333_v62 }
 0x8e7   : > { %3349 = vmatmul.mubr.msk.bf16.vlgmr.msra.gmra.mxu1 %vm1729_vm3, %v2334_v0 }
 0x8e8   : > { %2532 = vmatpush1.bf16.msra.mxu1 %v3715_v63  ;;  %2555 = vmatprep.mubr.bf16.mxu1 %v3793_v8 }
 0x8e9   : > { %2533 = vmatprep.subr.bf16.mxu1 %v3723_v1 }
 0x8ec   : > { %2534 = vmatpush1.bf16.msra.mxu1 %v3721_v2 }
 0x8ed   : > { %2535 = vmatprep.subr.bf16.mxu1 %v3729_v3 }
 0x8f0   : > { %2536 = vmatpush1.bf16.msra.mxu1 %v3727_v4 }
 0x8f1   : > { %2537 = vmatprep.subr.bf16.mxu1 %v3735_v5 }
 0x8f4   : > { %2538 = vmatpush1.bf16.msra.mxu1 %v3733_v6 }
 0x8f5   : > { %3358 = vmatprep.subr.bf16.mxu1 %v3790_v14 }
 0x9a7   : > { %v2376_v11 = vpop.f32.mrf.mxu1 }
 0x9a8   : > { %v2382_v12 = vpack.c.bf16 %v2376_v11, %v2376_v11 }
 0x9a9   : > { %v3350_v13 = vpop.f32.mrf.mxu1 }
 0x9aa   : > { %3274 = vmatmul.mubr.msk.bf16.vlgmr.msra.gmra.mxu0 %vm1682_vm1, %v2382_v12  ;;  %3275 = vmatmul.mubr.msk.bf16.vlgmr.msra.gmra.mxu1 %vm1682_vm1, %v2382_v12 }
 0x9ab   : > { %3353 = vmatpush3.bf16.xpose.msra.mxu0 %v2578_v15  ;;  %v2379_v16 = vpop.f32.mrf.mxu1  ;;  %3354 = vmatprep.mubr.msk.bf16.mxu0 %vm3791_vm0, %v3790_v14 }
 0x9ac   : > { %3360 = vmatprep.mubr.msk.bf16.mxu1 %vm3791_vm0, %v3790_v14 }
 0x9ad   : > { %v3351_v27 = vpop.f32.mrf.mxu1 }
 0x9b2   : > { %3355 = vmatmul.mubr.msk.bf16.vlgmr.msra.gmra.mxu0 %vm1682_vm1, %v2570_v42 }
 0x9b3   : > { %2813 = vmatprep.mubr.bf16.mxu0 %v3793_v8 }
 0xa6a   : > { %v2516_v17 = vpop.f32.mrf.mxu0  ;;  %v2557_v18 = vpop.f32.mrf.mxu1 }
 0xa6b   : > { %v4710_v9 = vadd.f32 %v2516_v17, %v4635_v31  ;;  %v4713_v19 = vadd.f32 %v2557_v18, %v4637_v49 }
 0xa6c   : > { %v2518_v52 = vpop.f32.mrf.mxu0  ;;  %v2559_v20 = vpop.f32.mrf.mxu1 }
 0xa6d   : > { %v4716_v21 = vadd.f32 %v2518_v52, %v4639_v34  ;;  %v4719_v14 = vadd.f32 %v2559_v20, %v4641_v25 }
 0xa6e   : > { %v2520_v22 = vpop.f32.mrf.mxu0  ;;  %v2561_v23 = vpop.f32.mrf.mxu1 }
 0xa70   : > { %v2521_v24 = vpop.f32.mrf.mxu0  ;;  %v2562_v30 = vpop.f32.mrf.mxu1 }
 0xa72   : > { %v2614_v32 = vpop.f32.mrf.mxu0 }
 0xa73   : > { %v2615_v33 = vadd.f32 %v4475_v46, %v2614_v32 }
 0xa74   : > { %v3356_v31 = vpop.f32.mrf.mxu0 }
 0xa75   : > { %v2620_v35 = vsel %vm1729_vm3, %v2615_v33, -inf }
 0xa76   : > { %2621 = vmax.xlane.f32.xlu1 %v2620_v35  ;;  %v2617_v49 = vpop.f32.mrf.mxu0 }
 0xa78   : > { %v3357_v26 = vpop.f32.mrf.mxu0 }
 0xa79   : > { %v2896_v26 = vlaneseq }
 0xa87   : > { %2633 = vrot.lane.b32.xlu1 %v4612_v10, %s3792_s20  ;;  %v3738_v10 = vld [vmem:[%s4800_s3 + $0x1e4] ss:$16 sps:$4 sm:$0xff]  }
 0xa88   : > { %2789 = vmatprep.subr.bf16.mxu0 %v3738_v10 }
 0xa89   : > { %2790 = vmatpush1.bf16.msra.mxu0 %v3736_v39 }
 0xa8a   : > { %2791 = vmatprep.subr.bf16.mxu0 %v3744_v41 }
 0xa8d   : > { %2792 = vmatpush1.bf16.msra.mxu0 %v3742_v43 }
 0xa8e   : > { %2793 = vmatprep.subr.bf16.mxu0 %v3750_v44 }
 0xa91   : > { %2794 = vmatpush1.bf16.msra.mxu0 %v3748_v45 }
 0xa92   : > { %2795 = vmatprep.subr.bf16.mxu0 %v3756_v47 }
 0xa95   : > { %2796 = vmatpush1.bf16.msra.mxu0 %v3754_v48 }
 0xaff   : > { %v2622_v34 = vpop.xlane.xlu1 %2621 }
 0xb00   : > { %v2623_v36 = vsub.f32 %v2615_v33, %v2622_v34  ;;  %v2897_v34 = vshrl.u32 %v2896_v26, 7 }
 0xb02   : > { %v2624_v25 = vmul.f32 1.442695, %v2623_v36  ;;  %v2898_v36 = vsub.s32 0, %v2897_v34 }
 0xb03   : > { %v2634_v37 = vpop.permute.xlu1 %2633 }
 0xb04   : > { %3772 = vpow2.f32 %v2624_v25  ;;  %v2639_v38 = vsel %vm1746_vm2, %v2634_v37, 0  ;;  %v2902_v25 = vsub.s32 1, %v2897_v34  ;;  %v2906_v37 = vsub.s32 2, %v2897_v34 }
 0xb05   : > { %3359 = vmatpush3.bf16.msra.mxu1 %v2639_v38  ;;  %v2910_v38 = vsub.s32 3, %v2897_v34 }
 0xb06   : > { %2830 = vmatprep.subr.bf16.mxu1 %v3741_v29 }
 0xb11   : > { %v3773_v28 = vpop.eup %3772 }
 0xb12   : > { %v2626_v46 = vsel %vm1729_vm3, %v3773_v28, 0.0 }
 0xb13   : > { %2627 = vadd.xlane.f32.xlu0 %v2626_v46  ;;  %v2920_v46 = vld [vmem:[%s4802_s5] sm:$0xf] }
 0xb14   : > { %v2925_v44 = vrot.slane %v2920_v46, %v2898_v36  ;;  %v2929_v45 = vrot.slane %v2920_v46, %v2902_v25  ;;  %v2933_v47 = vrot.slane %v2920_v46, %v2906_v37  ;;  %v2937_v48 = vrot.slane %v2920_v46, %v2910_v38 }
 0xb9c   : > { %v2628_v50 = vpop.xlane.xlu0 %2627 }
 0xb9d   : > { %3774 = vrcp.f32 %v2628_v50 }
 0xbaa   : > { %v3775_v51 = vpop.eup %3774 }
 0xbab   : > { %v2630_v40 = vmul.f32 %v3775_v51, %v3773_v28  ;;  %v2894_v28 = vld [vmem:[%s4801_s4] sm:$0xf] }
 0xbac   : > { %v2899_v39 = vrot.slane %v2894_v28, %v2898_v36  ;;  %v2903_v10 = vrot.slane %v2894_v28, %v2902_v25  ;;  %v2907_v29 = vrot.slane %v2894_v28, %v2906_v37  ;;  %v2911_v41 = vrot.slane %v2894_v28, %v2910_v38 }
 0xbad   : > { %v2631_v54 = vpack.c.bf16 %v2630_v40, %v2630_v40 }
 0xbaf   : > { %3361 = vmatmul.mubr.msk.bf16.vlgmr.msra.gmra.mxu1 %vm1729_vm3, %v2631_v54 }
 0xbb0   : > { %2831 = vmatpush1.bf16.msra.mxu1 %v3739_v53  ;;  %2854 = vmatprep.mubr.bf16.mxu1 %v3793_v8  ;;  %v3757_v8 = vld [vmem:[%s4800_s3 + $0x188] ss:$16 sps:$4 sm:$0xff]  }
 0xbb1   : > { %2832 = vmatprep.subr.bf16.mxu1 %v3747_v55 }
 0xbb4   : > { %2833 = vmatpush1.bf16.msra.mxu1 %v3745_v56 }
 0xbb5   : > { %2834 = vmatprep.subr.bf16.mxu1 %v3753_v57 }
 0xbb8   : > { %2835 = vmatpush1.bf16.msra.mxu1 %v3751_v58 }
 0xbb9   : > { %2836 = vmatprep.subr.bf16.mxu1 %v3759_v59 }
 0xbbc   : > { %2837 = vmatpush1.bf16.msra.mxu1 %v3757_v8 }
 0xc6f   : > { %v2675_v60 = vpop.f32.mrf.mxu1 }
 0xc70   : > { %v2681_v61 = vpack.c.bf16 %v2675_v60, %v2675_v60 }
 0xc71   : > { %v3362_v62 = vpop.f32.mrf.mxu1 }
 0xc72   : > { %3294 = vmatmul.mubr.msk.bf16.vlgmr.msra.gmra.mxu0 %vm1682_vm1, %v2681_v61  ;;  %3295 = vmatmul.mubr.msk.bf16.vlgmr.msra.gmra.mxu1 %vm1682_vm1, %v2681_v61 }
 0xc73   : > { %v2678_v63 = vpop.f32.mrf.mxu1 }
 0xc75   : > { %v3363_v0 = vpop.f32.mrf.mxu1 }
 0xd32   : > { %v2815_v1 = vpop.f32.mrf.mxu0  ;;  %v2856_v2 = vpop.f32.mrf.mxu1 }
 0xd33   : > { %v2863_v5 = vadd.f32 %v2815_v1, %v4710_v9  ;;  %v2865_v12 = vadd.f32 %v2856_v2, %v4713_v19 }
 0xd34   : > { %v2817_v3 = vpop.f32.mrf.mxu0  ;;  %v2858_v4 = vpop.f32.mrf.mxu1 }
 0xd35   : > { %v2864_v6 = vadd.f32 %v2817_v3, %v4716_v21  ;;  %v2866_v27 = vadd.f32 %v2858_v4, %v4719_v14 }
 0xd36   : > { %v2819_v7 = vpop.f32.mrf.mxu0  ;;  %v2860_v11 = vpop.f32.mrf.mxu1 }
 0xd37   : > { %v2867_v13 = vadd.f32 %v2864_v6, %v2863_v5 }
 0xd38   : > { %v2820_v15 = vpop.f32.mrf.mxu0  ;;  %v2861_v16 = vpop.f32.mrf.mxu1 }
 0xd39   : > { %v2868_v42 = vadd.f32 %v2867_v13, %v2865_v12 }
 0xd3b   : > { %v2869_v17 = vadd.f32 %v2868_v42, %v2866_v27 }
 0xd3d   : > { %2870 = vadd.xlane.f32.xlu0 %v2869_v17 }
 0xdc6   : > { %v2871_v18 = vpop.xlane.xlu0 %2870 }
 0xdc7   : > { %v2873_v52 = vmul.f32 0.001953125, %v2871_v18 }
 0xdc9   : > { %v2874_v20 = vsub.f32 %v2863_v5, %v2873_v52  ;;  %v2875_v22 = vsub.f32 %v2864_v6, %v2873_v52  ;;  %v2876_v23 = vsub.f32 %v2865_v12, %v2873_v52  ;;  %v2877_v9 = vsub.f32 %v2866_v27, %v2873_v52 }
 0xdcb   : > { %v2878_v24 = vmul.f32 %v2874_v20, %v2874_v20  ;;  %v2879_v21 = vmul.f32 %v2875_v22, %v2875_v22  ;;  %v2880_v30 = vmul.f32 %v2876_v23, %v2876_v23  ;;  %v2881_v33 = vmul.f32 %v2877_v9, %v2877_v9 }
 0xdcd   : > { %v2882_v32 = vadd.f32 %v2879_v21, %v2878_v24 }
 0xdcf   : > { %v2883_v19 = vadd.f32 %v2882_v32, %v2880_v30 }
 0xdd1   : > { %v2884_v31 = vadd.f32 %v2883_v19, %v2881_v33 }
 0xdd3   : > { %2885 = vadd.xlane.f32.xlu1 %v2884_v31 }
 0xe5c   : > { %v2886_v35 = vpop.xlane.xlu1 %2885 }
 0xe5d   : > { %v2887_v49 = vmul.f32 0.001953125, %v2886_v35 }
 0xe5f   : > { %v2888_v14 = vadd.f32 1e-06, %v2887_v49 }
 0xe61   : > { %3776 = vrsqrt.f32 %v2888_v14 }
 0xe6e   : > { %v3777_v43 = vpop.eup %3776 }
 0xe6f   : > { %v2890_v50 = vmul.f32 %v3777_v43, %v2874_v20  ;;  %v2891_v51 = vmul.f32 %v3777_v43, %v2875_v22  ;;  %v2892_v40 = vmul.f32 %v3777_v43, %v2876_v23  ;;  %v2893_v53 = vmul.f32 %v3777_v43, %v2877_v9 }
 0xe71   : > { %v2916_v54 = vmul.f32 %v2899_v39, %v2890_v50  ;;  %v2917_v55 = vmul.f32 %v2903_v10, %v2891_v51  ;;  %v2918_v56 = vmul.f32 %v2907_v29, %v2892_v40  ;;  %v2919_v57 = vmul.f32 %v2911_v41, %v2893_v53 }
 0xe73   : > { %v2942_v58 = vadd.f32 %v2925_v44, %v2916_v54  ;;  %v2943_v59 = vadd.f32 %v2929_v45, %v2917_v55  ;;  %v2944_v8 = vadd.f32 %v2933_v47, %v2918_v56  ;;  %v2945_v60 = vadd.f32 %v2937_v48, %v2919_v57 }
 0xe75   : > { %2946 = vst [vmem:[%s265_s18] sm:$0xff] %v2942_v58  ;;  %2947 = vst [vmem:[%s265_s18 + $0x8] sm:$0xff] %v2943_v59 }
 0xe76   : > { %2948 = vst [vmem:[%s265_s18 + $0x10] sm:$0xff] %v2944_v8  ;;  %2949 = vst [vmem:[%s265_s18 + $0x18] sm:$0xff] %v2945_v60 }
 0xe77 PF: > { %s16_s21 = sadd.s32 1, %s3788_s21  }
 0xe78   : > { %p13_p4 = scmp.ge.s32.totalorder %s16_s21, 4  }
 0xe7a   :  { %15 = sbr.rel (!%p13_p4) target bundleno = 1 (0x1), region = 77 }

// kernel: encoder_p_forward.9
= control target key start
LH: loop header
LB: loop body
LE: loop exit
PB: predicated region body
PF: predicated region fallthrough
CT: control target
= control target key end

     0   :  { %12 = vsyncpa [#allocation3], 0  ;;  %s2441_s0 = inlined_call_operand.vmem [shape: f32[16,512], index: 0, kind: input, shape index: {}]   ;;  %s2442_s1 = inlined_call_operand.vmem [shape: bf16[512,256], index: 1, kind: input, shape index: {}]   ;;  %s2443_s2 = inlined_call_operand.vmem [shape: f32[1,256], index: 2, kind: input, shape index: {}]   ;;  %s2444_s3 = inlined_call_operand.vmem [shape: bf16[256,512], index: 3, kind: input, shape index: {}]   ;;  %s2445_s4 = inlined_call_operand.vmem [shape: f32[1,512], index: 4, kind: input, shape index: {}]   ;;  %s2446_s5 = inlined_call_operand.vmem [shape: f32[1,512], index: 5, kind: input, shape index: {}]   ;;  %s2447_s6 = inlined_call_operand.vmem [shape: f32[1,512], index: 6, kind: input, shape index: {}]   ;;  %s2448_s7 = inlined_call_operand.hbm [shape: f32[16,512], index: 7, kind: output, shape index: {}]  }
   0x1   :  { %14 = vsyncpa [#allocation3 + $0x1], 0  ;;  %s1894_s24 = smov 0   ;;  %s1896_s25 = smov 0  }
   0x2   :  { %s1898_s26 = smov 0   ;;  %s1900_s27 = smov 0  }
   0x3 LB: > { %s1915_s28 = sadd.s32 4294967295, %s1851_s27   ;;  %s1416_s29 = sadd.s32 4294967294, %s1851_s27   ;;  %s1851_s27 = sphi %s1900_s27, %s2454_s27   ;;  %s1847_s26 = sphi %s1898_s26, %s2453_s26   ;;  %s1843_s25 = sphi %s1896_s25, %s2452_s25   ;;  %s1839_s24 = sphi %s1894_s24, %s2451_s24  }
   0x4   : > { %s1919_s30 = sadd.s32 1, %s1851_s27   ;;  %s179_s8 = sadd.s32 1, %s1847_s26 }
   0x5   : > { %s176_s9 = ssub.s32 %s1851_s27, %s1919_s30  ;;  %p189_p0 = scmp.ne.s32.totalorder %s1847_s26, %s1843_s25 }
   0x6   : > { %p177_p1 = scmp.eq.s32.totalorder %s176_s9, 0  ;;  %p190_p2 = scmp.eq.s32.totalorder %s1915_s28, 1 }
   0x7   : > { %p195_p3 = scmp.ne.s32.totalorder %s1843_s25, %s1839_s24  ;;  %p196_p4 = scmp.eq.s32.totalorder %s1416_s29, 1 }
   0x8   : > { %s1930_s10 = scalar_select %p177_p1, %s1847_s26, %s179_s8  }
   0x9   : > { %p1932_p5 = por %p190_p2, %p189_p0  ;;  %p1936_p6 = por %p196_p4, %p195_p3 }
   0xa   : > { %p1419_p7 = scmp.ge.s32.totalorder %s1851_s27, 1  ;;  %p240_p8 = scmp.lt.s32.totalorder %s1851_s27, 3 }
   0xc   : > { %p241_p9 = pnand %p1419_p7, %p240_p8 }
   0xd   : > { %p272_p10 = scmp.lt.s32.totalorder (!%p241_p9), %s1915_s28, 1  ;;  %s1557_s21 = sshll.u32 (!%p241_p9), %s1915_s28, 9 }
   0xe   : > { %244 = sbr.rel (%p241_p9) target bundleno = 819 (0x333), region = 48  ;;  %s2398_s13 = scalar_lea.hbm (!%p241_p9), %s2448_s7, %s1557_s21 }
   0xf   : > { %s1853_s14 = smov (!%p241_p9), [#allocation2]  }
  0x10   : > { %s1795_s15 = sshll.u32 (!%p241_p9), %s1853_s14, 4  ;;  %s1796_s15 = int_to_ptr.vmem [resolvable:$false] %s1795_s15 }
  0x11   : > { %s1797_s16 = scalar_lea.vmem (!%p241_p9), %s1796_s15, 1024 }
  0x13   : > { %v1597_v0 = vld [vmem:[%s2442_s1 + $0x74] ss:$8 sps:$4 sm:$0xff]   ;;  %v1601_v2 = vld [vmem:[%s2442_s1 + $0x70] ss:$8 sps:$4 sm:$0xff]   ;;  %v1603_v4 = vld [vmem:[%s2442_s1 + $0x64] ss:$8 sps:$4 sm:$0xff]  }
  0x14   : > { %v1599_v1 = vld [vmem:[%s2442_s1 + $0x174] ss:$8 sps:$4 sm:$0xff]   ;;  %681 = vmatprep.subr.bf16.mxu0 %v1597_v0  ;;  %v1602_v3 = vld [vmem:[%s2442_s1 + $0x170] ss:$8 sps:$4 sm:$0xff]   ;;  %v1605_v5 = vld [vmem:[%s2442_s1 + $0x164] ss:$8 sps:$4 sm:$0xff]  }
  0x15   : > { %722 = vmatprep.subr.bf16.mxu1 %v1599_v1  ;;  %682 = vmatpush1.bf16.msra.mxu0 %v1601_v2  ;;  %v1607_v6 = vld [vmem:[%s2442_s1 + $0x60] ss:$8 sps:$4 sm:$0xff]   ;;  %v1609_v8 = vld [vmem:[%s2442_s1 + $0x54] ss:$8 sps:$4 sm:$0xff]   ;;  %v1613_v10 = vld [vmem:[%s2442_s1 + $0x50] ss:$8 sps:$4 sm:$0xff]  }
  0x16   : > { %723 = vmatpush1.bf16.msra.mxu1 %v1602_v3  ;;  %683 = vmatprep.subr.bf16.mxu0 %v1603_v4  ;;  %v1608_v7 = vld [vmem:[%s2442_s1 + $0x160] ss:$8 sps:$4 sm:$0xff]   ;;  %v1611_v9 = vld [vmem:[%s2442_s1 + $0x154] ss:$8 sps:$4 sm:$0xff]   ;;  %v1614_v11 = vld [vmem:[%s2442_s1 + $0x150] ss:$8 sps:$4 sm:$0xff]  }
  0x17   : > { %724 = vmatprep.subr.bf16.mxu1 %v1605_v5  ;;  %v1615_v12 = vld [vmem:[%s2442_s1 + $0x44] ss:$8 sps:$4 sm:$0xff]   ;;  %v1619_v14 = vld [vmem:[%s2442_s1 + $0x40] ss:$8 sps:$4 sm:$0xff]   ;;  %v1621_v16 = vld [vmem:[%s2442_s1 + $0x34] ss:$8 sps:$4 sm:$0xff]  }
  0x18   : > { %v1617_v13 = vld [vmem:[%s2442_s1 + $0x144] ss:$8 sps:$4 sm:$0xff]   ;;  %v1620_v15 = vld [vmem:[%s2442_s1 + $0x140] ss:$8 sps:$4 sm:$0xff]   ;;  %v1623_v17 = vld [vmem:[%s2442_s1 + $0x134] ss:$8 sps:$4 sm:$0xff]  }
  0x19   : > { %684 = vmatpush1.bf16.msra.mxu0 %v1607_v6  ;;  %v1625_v18 = vld [vmem:[%s2442_s1 + $0x30] ss:$8 sps:$4 sm:$0xff]   ;;  %v1627_v20 = vld [vmem:[%s2442_s1 + $0x24] ss:$8 sps:$4 sm:$0xff]   ;;  %v1631_v22 = vld [vmem:[%s2442_s1 + $0x20] ss:$8 sps:$4 sm:$0xff]  }
  0x1a   : > { %725 = vmatpush1.bf16.msra.mxu1 %v1608_v7  ;;  %685 = vmatprep.subr.bf16.mxu0 %v1609_v8  ;;  %v1626_v19 = vld [vmem:[%s2442_s1 + $0x130] ss:$8 sps:$4 sm:$0xff]   ;;  %v1629_v21 = vld [vmem:[%s2442_s1 + $0x124] ss:$8 sps:$4 sm:$0xff]   ;;  %v1632_v23 = vld [vmem:[%s2442_s1 + $0x120] ss:$8 sps:$4 sm:$0xff]  }
  0x1b   : > { %726 = vmatprep.subr.bf16.mxu1 %v1611_v9  ;;  %v1633_v24 = vld [vmem:[%s2442_s1 + $0x14] ss:$8 sps:$4 sm:$0xff]   ;;  %v1637_v26 = vld [vmem:[%s2442_s1 + $0x10] ss:$8 sps:$4 sm:$0xff]   ;;  %v1639_v28 = vld [vmem:[%s2442_s1 + $0x4] ss:$8 sps:$4 sm:$0xff]  }
  0x1c   : > { %v1635_v25 = vld [vmem:[%s2442_s1 + $0x114] ss:$8 sps:$4 sm:$0xff]   ;;  %v1638_v27 = vld [vmem:[%s2442_s1 + $0x110] ss:$8 sps:$4 sm:$0xff]   ;;  %v1641_v29 = vld [vmem:[%s2442_s1 + $0x104] ss:$8 sps:$4 sm:$0xff]  }
  0x1d   : > { %686 = vmatpush1.bf16.msra.mxu0 %v1613_v10  ;;  %v1643_v30 = vld [vmem:[%s2442_s1] ss:$8 sps:$4 sm:$0xff]   ;;  %v1645_v32 = vld [vmem:[%s2442_s1 + $0xf4] ss:$8 sps:$4 sm:$0xff]   ;;  %v1649_v34 = vld [vmem:[%s2442_s1 + $0xf0] ss:$8 sps:$4 sm:$0xff]  }
  0x1e   : > { %727 = vmatpush1.bf16.msra.mxu1 %v1614_v11  ;;  %687 = vmatprep.subr.bf16.mxu0 %v1615_v12  ;;  %v1644_v31 = vld [vmem:[%s2442_s1 + $0x100] ss:$8 sps:$4 sm:$0xff]   ;;  %v1647_v33 = vld [vmem:[%s2442_s1 + $0x1f4] ss:$8 sps:$4 sm:$0xff]   ;;  %v1650_v35 = vld [vmem:[%s2442_s1 + $0x1f0] ss:$8 sps:$4 sm:$0xff]  }
  0x1f   : > { %728 = vmatprep.subr.bf16.mxu1 %v1617_v13  ;;  %v1651_v36 = vld [vmem:[%s2442_s1 + $0xe4] ss:$8 sps:$4 sm:$0xff]   ;;  %s273_s17 = scalar_select %p272_p10, %s1915_s28, 1  ;;  %v1655_v38 = vld [vmem:[%s2442_s1 + $0xe0] ss:$8 sps:$4 sm:$0xff]  }
  0x20   : > { %v1653_v37 = vld [vmem:[%s2442_s1 + $0x1e4] ss:$8 sps:$4 sm:$0xff]   ;;  %v1656_v39 = vld [vmem:[%s2442_s1 + $0x1e0] ss:$8 sps:$4 sm:$0xff]   ;;  %v1657_v40 = vld [vmem:[%s2442_s1 + $0xd4] ss:$8 sps:$4 sm:$0xff]  }
  0x21   : > { %688 = vmatpush1.bf16.msra.mxu0 %v1619_v14  ;;  %s1556_s9 = sshll.u32 %s273_s17, 5  ;;  %v1659_v41 = vld [vmem:[%s2442_s1 + $0x1d4] ss:$8 sps:$4 sm:$0xff]   ;;  %v1661_v42 = vld [vmem:[%s2442_s1 + $0xd0] ss:$8 sps:$4 sm:$0xff]  }
  0x22   : > { %729 = vmatpush1.bf16.msra.mxu1 %v1620_v15  ;;  %689 = vmatprep.subr.bf16.mxu0 %v1621_v16  ;;  %v1662_v43 = vld [vmem:[%s2442_s1 + $0x1d0] ss:$8 sps:$4 sm:$0xff]   ;;  %s2079_s22 = scalar_lea.vmem %s2441_s0, %s1556_s9  ;;  %v1663_v44 = vld [vmem:[%s2442_s1 + $0xc4] ss:$8 sps:$4 sm:$0xff]   ;;  %v1667_v47 = vld [vmem:[%s2442_s1 + $0xc0] ss:$8 sps:$4 sm:$0xff]  }
  0x23   : > { %730 = vmatprep.subr.bf16.mxu1 %v1623_v17  ;;  %v1665_v45 = vld [vmem:[%s2442_s1 + $0x1c4] ss:$8 sps:$4 sm:$0xff]   ;;  %v1668_v48 = vld [vmem:[%s2442_s1 + $0x1c0] ss:$8 sps:$4 sm:$0xff]   ;;  %v2099_v50 = vld [vmem:[%s2079_s22 + $0x18] sm:$0xff]  ;;  %s269_s9 = sand.u32 1, %s1843_s25  }
  0x24   : > { %v2088_v46 = vld [vmem:[%s2079_s22 + $0x8] sm:$0xff]  ;;  %v1669_v51 = vld [vmem:[%s2442_s1 + $0xb4] ss:$8 sps:$4 sm:$0xff]   ;;  %v284_v52 = vpack.c.bf16 %v2099_v50, %v2099_v50  ;;  %v1673_v54 = vld [vmem:[%s2442_s1 + $0xb0] ss:$8 sps:$4 sm:$0xff]   ;;  %s1420_s18 = sshll.u32 %s269_s9, 5 }
  0x25   : > { %690 = vmatpush1.bf16.msra.mxu0 %v1625_v18  ;;  %v282_v49 = vpack.c.bf16 %v2088_v46, %v2088_v46  ;;  %v1671_v53 = vld [vmem:[%s2442_s1 + $0x1b4] ss:$8 sps:$4 sm:$0xff]   ;;  %v1674_v55 = vld [vmem:[%s2442_s1 + $0x1b0] ss:$8 sps:$4 sm:$0xff]   ;;  %v1675_v56 = vld [vmem:[%s2442_s1 + $0xa4] ss:$8 sps:$4 sm:$0xff]  }
  0x26   : > { %731 = vmatpush1.bf16.msra.mxu1 %v1626_v19  ;;  %691 = vmatprep.subr.bf16.mxu0 %v1627_v20  ;;  %v1677_v57 = vld [vmem:[%s2442_s1 + $0x1a4] ss:$8 sps:$4 sm:$0xff]   ;;  %v1679_v58 = vld [vmem:[%s2442_s1 + $0xa0] ss:$8 sps:$4 sm:$0xff]   ;;  %v1681_v60 = vld [vmem:[%s2442_s1 + $0x94] ss:$8 sps:$4 sm:$0xff]  }
  0x27   : > { %732 = vmatprep.subr.bf16.mxu1 %v1629_v21  ;;  %713 = vmatprep.mubr.bf16.mxu0 %v282_v49  ;;  %v1680_v59 = vld [vmem:[%s2442_s1 + $0x1a0] ss:$8 sps:$4 sm:$0xff]   ;;  %v1683_v61 = vld [vmem:[%s2442_s1 + $0x194] ss:$8 sps:$4 sm:$0xff]   ;;  %v1685_v62 = vld [vmem:[%s2442_s1 + $0x90] ss:$8 sps:$4 sm:$0xff]  }
  0x28   : > { %754 = vmatprep.mubr.bf16.mxu1 %v284_v52  ;;  %v1686_v63 = vld [vmem:[%s2442_s1 + $0x190] ss:$8 sps:$4 sm:$0xff]   ;;  %v1687_v0 = vld [vmem:[%s2442_s1 + $0x84] ss:$8 sps:$4 sm:$0xff]   ;;  %v1691_v2 = vld [vmem:[%s2442_s1 + $0x80] ss:$8 sps:$4 sm:$0xff]  }
  0x29   : > { %692 = vmatpush1.bf16.msra.mxu0 %v1631_v22  ;;  %v1689_v1 = vld [vmem:[%s2442_s1 + $0x184] ss:$8 sps:$4 sm:$0xff]   ;;  %v1692_v3 = vld [vmem:[%s2442_s1 + $0x180] ss:$8 sps:$4 sm:$0xff]   ;;  %v2155_v5 = vld [vmem:[%s2079_s22 + $0x10] sm:$0xff]  ;;  %s271_s17 = scalar_lea.vmem [#allocation2], %s1420_s18 }
  0x2a   : > { %733 = vmatpush1.bf16.msra.mxu1 %v1632_v23  ;;  %693 = vmatprep.subr.bf16.mxu0 %v1633_v24  ;;  %v2152_v4 = vld [vmem:[%s2079_s22] sm:$0xff]  ;;  %v1698_v7 = vld [vmem:[%s2444_s3 + $0xec] ss:$16 sps:$4 sm:$0xff]   ;;  %v283_v9 = vpack.c.bf16 %v2155_v5, %v2155_v5  ;;  %v1696_v11 = vld [vmem:[%s2444_s3 + $0xe8] ss:$16 sps:$4 sm:$0xff]   ;;  %s1357_s23 = sshll.u32 %s271_s17, 4  ;;  %s2400_s23 = int_to_ptr.vmem [resolvable:$true] %s1357_s23 }
  0x2b   : > { %734 = vmatprep.subr.bf16.mxu1 %v1635_v25  ;;  %v1695_v6 = vld [vmem:[%s2444_s3 + $0xe4] ss:$16 sps:$4 sm:$0xff]   ;;  %v281_v8 = vpack.c.bf16 %v2152_v4, %v2152_v4  ;;  %v1693_v10 = vld [vmem:[%s2444_s3 + $0xe0] ss:$16 sps:$4 sm:$0xff]   ;;  %v1704_v13 = vld [vmem:[%s2444_s3 + $0xcc] ss:$16 sps:$4 sm:$0xff]   ;;  %p1798_p0 = scmp.lt.s32.totalorder %s2400_s23, %s1796_s15 }
  0x2c   : > { %v1701_v12 = vld [vmem:[%s2444_s3 + $0xc4] ss:$16 sps:$4 sm:$0xff]   ;;  %v1699_v14 = vld [vmem:[%s2444_s3 + $0xc0] ss:$16 sps:$4 sm:$0xff]   ;;  %v1702_v15 = vld [vmem:[%s2444_s3 + $0xc8] ss:$16 sps:$4 sm:$0xff]  }
  0x2d   : > { %694 = vmatpush1.bf16.msra.mxu0 %v1637_v26  ;;  %v1707_v16 = vld [vmem:[%s2444_s3 + $0xa4] ss:$16 sps:$4 sm:$0xff]   ;;  %v1710_v17 = vld [vmem:[%s2444_s3 + $0xac] ss:$16 sps:$4 sm:$0xff]   ;;  %v1705_v18 = vld [vmem:[%s2444_s3 + $0xa0] ss:$16 sps:$4 sm:$0xff]  }
  0x2e   : > { %735 = vmatpush1.bf16.msra.mxu1 %v1638_v27  ;;  %695 = vmatprep.subr.bf16.mxu0 %v1639_v28  ;;  %v1708_v19 = vld [vmem:[%s2444_s3 + $0xa8] ss:$16 sps:$4 sm:$0xff]   ;;  %v1713_v20 = vld [vmem:[%s2444_s3 + $0x84] ss:$16 sps:$4 sm:$0xff]   ;;  %v1716_v21 = vld [vmem:[%s2444_s3 + $0x8c] ss:$16 sps:$4 sm:$0xff]  }
  0x2f   : > { %736 = vmatprep.subr.bf16.mxu1 %v1641_v29  ;;  %v1711_v22 = vld [vmem:[%s2444_s3 + $0x80] ss:$16 sps:$4 sm:$0xff]   ;;  %v1714_v23 = vld [vmem:[%s2444_s3 + $0x88] ss:$16 sps:$4 sm:$0xff]   ;;  %v1719_v24 = vld [vmem:[%s2444_s3 + $0x64] ss:$16 sps:$4 sm:$0xff]  }
  0x30   : > { %v1722_v25 = vld [vmem:[%s2444_s3 + $0x6c] ss:$16 sps:$4 sm:$0xff]   ;;  %v1717_v26 = vld [vmem:[%s2444_s3 + $0x60] ss:$16 sps:$4 sm:$0xff]   ;;  %v1720_v27 = vld [vmem:[%s2444_s3 + $0x68] ss:$16 sps:$4 sm:$0xff]  }
  0x31   : > { %696 = vmatpush1.bf16.msra.mxu0 %v1643_v30  ;;  %v1725_v28 = vld [vmem:[%s2444_s3 + $0x44] ss:$16 sps:$4 sm:$0xff]   ;;  %v1728_v29 = vld [vmem:[%s2444_s3 + $0x4c] ss:$16 sps:$4 sm:$0xff]   ;;  %v1723_v30 = vld [vmem:[%s2444_s3 + $0x40] ss:$16 sps:$4 sm:$0xff]  }
  0x32   : > { %737 = vmatpush1.bf16.msra.mxu1 %v1644_v31  ;;  %697 = vmatprep.subr.bf16.mxu0 %v1645_v32  ;;  %v1726_v31 = vld [vmem:[%s2444_s3 + $0x48] ss:$16 sps:$4 sm:$0xff]   ;;  %v1731_v32 = vld [vmem:[%s2444_s3 + $0x24] ss:$16 sps:$4 sm:$0xff]   ;;  %v1753_v52 = vld [vmem:[%s2444_s3 + $0x1a0] ss:$16 sps:$4 sm:$0xff]  }
  0x33   : > { %738 = vmatprep.subr.bf16.mxu1 %v1647_v33  ;;  %v1734_v33 = vld [vmem:[%s2444_s3 + $0x2c] ss:$16 sps:$4 sm:$0xff]   ;;  %v1755_v49 = vld [vmem:[%s2444_s3 + $0x1a4] ss:$16 sps:$4 sm:$0xff]   ;;  %s1343_s28 = scalar_lea.sflag [#allocation3], %s269_s9  ;;  %s1791_s22 = scalar_lea.vmem %s2400_s23, 512 }
  0x34   : > { %p1792_p11 = scmp.ne.s32.totalorder %s2400_s23, %s1791_s22  ;;  %p1799_p1 = scmp.lt.s32.totalorder %s1797_s16, %s1791_s22 }
  0x35   : > { %698 = vmatpush2.bf16.msra.mxu0 %v1649_v34  ;;  %v1729_v34 = vld [vmem:[%s2444_s3 + $0x20] ss:$16 sps:$4 sm:$0xff]  }
  0x36   : > { %739 = vmatpush2.bf16.msra.mxu1 %v1650_v35  ;;  %699 = vmatprep.subr.bf16.mxu0 %v1651_v36  ;;  %v1732_v35 = vld [vmem:[%s2444_s3 + $0x28] ss:$16 sps:$4 sm:$0xff]   ;;  %v1737_v36 = vld [vmem:[%s2444_s3 + $0x4] ss:$16 sps:$4 sm:$0xff]   ;;  %p1793_p12 = pnand %p1792_p11, %p1932_p5  ;;  %p1800_p2 = por %p1799_p1, %p1798_p0 }
  0x37   : > { %740 = vmatprep.subr.bf16.mxu1 %v1653_v37  ;;  %v1740_v37 = vld [vmem:[%s2444_s3 + $0xc] ss:$16 sps:$4 sm:$0xff]  }
  0x38   : > { %p1794_p13 = pneg %p1793_p12 }
  0x39   : > { %700 = vmatpush2.bf16.msra.mxu0 %v1655_v38  ;;  %v1735_v38 = vld [vmem:[%s2444_s3] ss:$16 sps:$4 sm:$0xff]  }
  0x3a   : > { %741 = vmatpush2.bf16.msra.mxu1 %v1656_v39  ;;  %701 = vmatprep.subr.bf16.mxu0 %v1657_v40  ;;  %v1738_v39 = vld [vmem:[%s2444_s3 + $0x8] ss:$16 sps:$4 sm:$0xff]   ;;  %v1743_v40 = vld [vmem:[%s2444_s3 + $0x1e4] ss:$16 sps:$4 sm:$0xff]   ;;  %p1801_p3 = pnand %p1800_p2, %p1794_p13 }
  0x3b   : > { %742 = vmatprep.subr.bf16.mxu1 %v1659_v41  ;;  %v1746_v41 = vld [vmem:[%s2444_s3 + $0x1ec] ss:$16 sps:$4 sm:$0xff]  }
  0x3d   : > { %702 = vmatpush2.bf16.msra.mxu0 %v1661_v42  ;;  %v1741_v42 = vld [vmem:[%s2444_s3 + $0x1e0] ss:$16 sps:$4 sm:$0xff]  }
  0x3e   : > { %743 = vmatpush2.bf16.msra.mxu1 %v1662_v43  ;;  %703 = vmatprep.subr.bf16.mxu0 %v1663_v44  ;;  %v1744_v43 = vld [vmem:[%s2444_s3 + $0x1e8] ss:$16 sps:$4 sm:$0xff]   ;;  %v1749_v44 = vld [vmem:[%s2444_s3 + $0x1c4] ss:$16 sps:$4 sm:$0xff]  }
  0x3f   : > { %744 = vmatprep.subr.bf16.mxu1 %v1665_v45  ;;  %v1752_v45 = vld [vmem:[%s2444_s3 + $0x1cc] ss:$16 sps:$4 sm:$0xff]  }
  0x41   : > { %704 = vmatpush2.bf16.msra.mxu0 %v1667_v47  ;;  %v1747_v47 = vld [vmem:[%s2444_s3 + $0x1c0] ss:$16 sps:$4 sm:$0xff]  }
  0x42   : > { %745 = vmatpush2.bf16.msra.mxu1 %v1668_v48  ;;  %705 = vmatprep.subr.bf16.mxu0 %v1669_v51  ;;  %v1750_v48 = vld [vmem:[%s2444_s3 + $0x1c8] ss:$16 sps:$4 sm:$0xff]   ;;  %v1758_v51 = vld [vmem:[%s2444_s3 + $0x1ac] ss:$16 sps:$4 sm:$0xff]  }
  0x43   : > { %746 = vmatprep.subr.bf16.mxu1 %v1671_v53  ;;  %v1756_v53 = vld [vmem:[%s2444_s3 + $0x1a8] ss:$16 sps:$4 sm:$0xff]  }
  0x45   : > { %706 = vmatpush2.bf16.msra.mxu0 %v1673_v54  ;;  %v1761_v54 = vld [vmem:[%s2444_s3 + $0x184] ss:$16 sps:$4 sm:$0xff]  }
  0x46   : > { %747 = vmatpush2.bf16.msra.mxu1 %v1674_v55  ;;  %707 = vmatprep.subr.bf16.mxu0 %v1675_v56  ;;  %v1764_v55 = vld [vmem:[%s2444_s3 + $0x18c] ss:$16 sps:$4 sm:$0xff]   ;;  %v1759_v56 = vld [vmem:[%s2444_s3 + $0x180] ss:$16 sps:$4 sm:$0xff]  }
  0x47   : > { %748 = vmatprep.subr.bf16.mxu1 %v1677_v57  ;;  %v1762_v57 = vld [vmem:[%s2444_s3 + $0x188] ss:$16 sps:$4 sm:$0xff]  }
  0x49   : > { %708 = vmatpush2.bf16.msra.mxu0 %v1679_v58  ;;  %v1767_v58 = vld [vmem:[%s2444_s3 + $0x164] ss:$16 sps:$4 sm:$0xff]  }
  0x4a   : > { %749 = vmatpush2.bf16.msra.mxu1 %v1680_v59  ;;  %709 = vmatprep.subr.bf16.mxu0 %v1681_v60  ;;  %v1770_v59 = vld [vmem:[%s2444_s3 + $0x16c] ss:$16 sps:$4 sm:$0xff]   ;;  %v1765_v60 = vld [vmem:[%s2444_s3 + $0x160] ss:$16 sps:$4 sm:$0xff]  }
  0x4b   : > { %750 = vmatprep.subr.bf16.mxu1 %v1683_v61  ;;  %v1768_v61 = vld [vmem:[%s2444_s3 + $0x168] ss:$16 sps:$4 sm:$0xff]  }
  0x4d   : > { %710 = vmatpush2.bf16.msra.mxu0 %v1685_v62  ;;  %v1773_v62 = vld [vmem:[%s2444_s3 + $0x144] ss:$16 sps:$4 sm:$0xff]  }
  0x4e   : > { %751 = vmatpush2.bf16.msra.mxu1 %v1686_v63  ;;  %711 = vmatprep.subr.bf16.mxu0 %v1687_v0  ;;  %v1776_v63 = vld [vmem:[%s2444_s3 + $0x14c] ss:$16 sps:$4 sm:$0xff]   ;;  %v1771_v0 = vld [vmem:[%s2444_s3 + $0x140] ss:$16 sps:$4 sm:$0xff]  }
  0x4f   : > { %752 = vmatprep.subr.bf16.mxu1 %v1689_v1  ;;  %v1774_v1 = vld [vmem:[%s2444_s3 + $0x148] ss:$16 sps:$4 sm:$0xff]  }
  0x51   : > { %712 = vmatpush2.bf16.msra.mxu0 %v1691_v2  ;;  %v1779_v2 = vld [vmem:[%s2444_s3 + $0x124] ss:$16 sps:$4 sm:$0xff]  }
  0x52   : > { %753 = vmatpush2.bf16.msra.mxu1 %v1692_v3  ;;  %1173 = vmatprep.subr.bf16.mxu0 %v1695_v6  ;;  %v1782_v3 = vld [vmem:[%s2444_s3 + $0x12c] ss:$16 sps:$4 sm:$0xff]   ;;  %v1777_v6 = vld [vmem:[%s2444_s3 + $0x120] ss:$16 sps:$4 sm:$0xff]  }
  0x53   : > { %1214 = vmatprep.subr.bf16.mxu1 %v1698_v7  ;;  %v1780_v7 = vld [vmem:[%s2444_s3 + $0x128] ss:$16 sps:$4 sm:$0xff]  }
  0x54   : > { %714 = vmatmul.mubr.bf16.vlgmr.msra.gmra.mxu0 %v281_v8  ;;  %v1785_v8 = vld [vmem:[%s2444_s3 + $0x104] ss:$16 sps:$4 sm:$0xff]  }
  0x55   : > { %755 = vmatmul.mubr.bf16.vlgmr.msra.gmra.mxu1 %v283_v9  ;;  %1174 = vmatpush1.bf16.msra.mxu0 %v1693_v10  ;;  %v1788_v9 = vld [vmem:[%s2444_s3 + $0x10c] ss:$16 sps:$4 sm:$0xff]   ;;  %v1783_v10 = vld [vmem:[%s2444_s3 + $0x100] ss:$16 sps:$4 sm:$0xff]  }
  0x56   : > { %1215 = vmatpush1.bf16.msra.mxu1 %v1696_v11  ;;  %1175 = vmatprep.subr.bf16.mxu0 %v1701_v12  ;;  %v1786_v11 = vld [vmem:[%s2444_s3 + $0x108] ss:$16 sps:$4 sm:$0xff]   ;;  %v351_v12 = vlaneseq }
  0x57   : > { %1216 = vmatprep.subr.bf16.mxu1 %v1704_v13 }
  0x58   : > { %v352_v13 = vshrl.u32 %v351_v12, 7 }
  0x59   : > { %1176 = vmatpush1.bf16.msra.mxu0 %v1699_v14 }
  0x5a   : > { %1217 = vmatpush1.bf16.msra.mxu1 %v1702_v15  ;;  %1177 = vmatprep.subr.bf16.mxu0 %v1707_v16  ;;  %v2353_v14 = vsub.s32 0, %v352_v13  ;;  %v349_v15 = vld [vmem:[%s2443_s2] sm:$0x3]  ;;  %v2358_v16 = vsub.s32 1, %v352_v13 }
  0x5b   : > { %1218 = vmatprep.subr.bf16.mxu1 %v1710_v17 }
  0x5c   : > { %v354_v17 = vrot.slane %v349_v15, %v2353_v14 }
  0x5d   : > { %1178 = vmatpush1.bf16.msra.mxu0 %v1705_v18  ;;  %v358_v18 = vrot.slane %v349_v15, %v2358_v16  ;;  %v1312_v15 = vld [vmem:[%s2447_s6] sm:$0xf] }
  0x5e   : > { %1219 = vmatpush1.bf16.msra.mxu1 %v1708_v19  ;;  %1179 = vmatprep.subr.bf16.mxu0 %v1713_v20 }
  0x5f   : > { %1220 = vmatprep.subr.bf16.mxu1 %v1716_v21 }
  0x61   : > { %1180 = vmatpush1.bf16.msra.mxu0 %v1711_v22 }
  0x62   : > { %1221 = vmatpush1.bf16.msra.mxu1 %v1714_v23  ;;  %1181 = vmatprep.subr.bf16.mxu0 %v1719_v24 }
  0x63   : > { %1222 = vmatprep.subr.bf16.mxu1 %v1722_v25 }
  0x65   : > { %1182 = vmatpush1.bf16.msra.mxu0 %v1717_v26 }
  0x66   : > { %1223 = vmatpush1.bf16.msra.mxu1 %v1720_v27  ;;  %1183 = vmatprep.subr.bf16.mxu0 %v1725_v28 }
  0x67   : > { %1224 = vmatprep.subr.bf16.mxu1 %v1728_v29 }
  0x69   : > { %1184 = vmatpush1.bf16.msra.mxu0 %v1723_v30 }
  0x6a   : > { %1225 = vmatpush1.bf16.msra.mxu1 %v1726_v31  ;;  %1185 = vmatprep.subr.bf16.mxu0 %v1731_v32 }
  0x6b   : > { %1226 = vmatprep.subr.bf16.mxu1 %v1734_v33 }
  0x6d   : > { %1186 = vmatpush1.bf16.msra.mxu0 %v1729_v34 }
  0x6e   : > { %1227 = vmatpush1.bf16.msra.mxu1 %v1732_v35  ;;  %1187 = vmatprep.subr.bf16.mxu0 %v1737_v36  ;;  %v831_v35 = vld [vmem:[%s2445_s4] sm:$0xf]  ;;  %v2365_v36 = vsub.s32 2, %v352_v13 }
  0x6f   : > { %1228 = vmatprep.subr.bf16.mxu1 %v1740_v37  ;;  %v836_v37 = vrot.slane %v831_v35, %v2353_v14 }
  0x71   : > { %1188 = vmatpush1.bf16.msra.mxu0 %v1735_v38  ;;  %v2368_v38 = vsub.s32 3, %v352_v13  ;;  %v1286_v13 = vld [vmem:[%s2446_s5] sm:$0xf] }
  0x72   : > { %1229 = vmatpush1.bf16.msra.mxu1 %v1738_v39  ;;  %1189 = vmatprep.subr.bf16.mxu0 %v1743_v40  ;;  %v844_v39 = vrot.slane %v831_v35, %v2365_v36  ;;  %v840_v40 = vrot.slane %v831_v35, %v2358_v16 }
  0x73   : > { %1230 = vmatprep.subr.bf16.mxu1 %v1746_v41 }
  0x75   : > { %1190 = vmatpush2.bf16.msra.mxu0 %v1741_v42 }
  0x76   : > { %1231 = vmatpush2.bf16.msra.mxu1 %v1744_v43  ;;  %1191 = vmatprep.subr.bf16.mxu0 %v1749_v44  ;;  %v848_v44 = vrot.slane %v831_v35, %v2368_v38 }
  0x77   : > { %1232 = vmatprep.subr.bf16.mxu1 %v1752_v45 }
  0x79   : > { %1192 = vmatpush2.bf16.msra.mxu0 %v1747_v47 }
  0x7a   : > { %1233 = vmatpush2.bf16.msra.mxu1 %v1750_v48  ;;  %1193 = vmatprep.subr.bf16.mxu0 %v1755_v49 }
  0x7b   : > { %1234 = vmatprep.subr.bf16.mxu1 %v1758_v51 }
  0x7d   : > { %1194 = vmatpush2.bf16.msra.mxu0 %v1753_v52 }
  0x7e   : > { %1235 = vmatpush2.bf16.msra.mxu1 %v1756_v53  ;;  %1195 = vmatprep.subr.bf16.mxu0 %v1761_v54 }
  0x7f   : > { %1236 = vmatprep.subr.bf16.mxu1 %v1764_v55 }
  0x81   : > { %1196 = vmatpush2.bf16.msra.mxu0 %v1759_v56 }
  0x82   : > { %1237 = vmatpush2.bf16.msra.mxu1 %v1762_v57  ;;  %1197 = vmatprep.subr.bf16.mxu0 %v1767_v58 }
  0x83   : > { %1238 = vmatprep.subr.bf16.mxu1 %v1770_v59 }
  0x85   : > { %1198 = vmatpush2.bf16.msra.mxu0 %v1765_v60 }
  0x86   : > { %1239 = vmatpush2.bf16.msra.mxu1 %v1768_v61  ;;  %1199 = vmatprep.subr.bf16.mxu0 %v1773_v62 }
  0x87   : > { %1240 = vmatprep.subr.bf16.mxu1 %v1776_v63 }
  0x89   : > { %1200 = vmatpush2.bf16.msra.mxu0 %v1771_v0 }
  0x8a   : > { %1241 = vmatpush2.bf16.msra.mxu1 %v1774_v1  ;;  %1201 = vmatprep.subr.bf16.mxu0 %v1779_v2 }
  0x8b   : > { %1242 = vmatprep.subr.bf16.mxu1 %v1782_v3 }
  0x8d   : > { %1202 = vmatpush2.bf16.msra.mxu0 %v1777_v6 }
  0x8e   : > { %1243 = vmatpush2.bf16.msra.mxu1 %v1780_v7  ;;  %1203 = vmatprep.subr.bf16.mxu0 %v1785_v8 }
  0x8f   : > { %1244 = vmatprep.subr.bf16.mxu1 %v1788_v9 }
  0x91   : > { %1204 = vmatpush2.bf16.msra.mxu0 %v1783_v10 }
  0x92   : > { %1245 = vmatpush2.bf16.msra.mxu1 %v1786_v11 }
 0x114   : > { %v715_v19 = vpop.f32.mrf.mxu0 }
 0x115   : > { %v756_v20 = vpop.f32.mrf.mxu1  ;;  %v716_v21 = vadd.f32 %v715_v19, %v354_v17  ;;  %v1299_v17 = vrot.slane %v1286_v13, %v2365_v36  ;;  %v1291_v19 = vrot.slane %v1286_v13, %v2353_v14 }
 0x116   : > { %v717_v22 = vpop.f32.mrf.mxu0 }
 0x117   : > { %v758_v23 = vpop.f32.mrf.mxu1  ;;  %v757_v24 = vadd.f32 %v756_v20, %v716_v21  ;;  %v718_v25 = vadd.f32 %v717_v22, %v358_v18  ;;  %v1303_v18 = vrot.slane %v1286_v13, %v2368_v38  ;;  %v1295_v20 = vrot.slane %v1286_v13, %v2358_v16 }
 0x118   : > { %v719_v26 = vpop.f32.mrf.mxu0  ;;  %v1325_v22 = vrot.slane %v1312_v15, %v2365_v36 }
 0x119   : > { %v760_v27 = vpop.f32.mrf.mxu1  ;;  %v759_v28 = vadd.f32 %v758_v23, %v718_v25  ;;  %v763_v29 = vmax.f32 %v757_v24, 0.0  ;;  %v1329_v23 = vrot.slane %v1312_v15, %v2368_v38  ;;  %v1317_v24 = vrot.slane %v1312_v15, %v2353_v14 }
 0x11a   : > { %v720_v30 = vpop.f32.mrf.mxu0  ;;  %v1321_v25 = vrot.slane %v1312_v15, %v2358_v16 }
 0x11b   : > { %v761_v31 = vpop.f32.mrf.mxu1  ;;  %v764_v32 = vmax.f32 %v759_v28, 0.0  ;;  %v765_v34 = vpack.c.bf16 %v763_v29, %v763_v29 }
 0x11d   : > { %v766_v33 = vpack.c.bf16 %v764_v32, %v764_v32 }
 0x11f   : > { %1205 = vmatprep.mubr.bf16.mxu0 %v766_v33  ;;  %1246 = vmatprep.mubr.bf16.mxu1 %v766_v33 }
 0x120   : > { %1206 = vmatmul.mubr.bf16.vlgmr.msra.gmra.mxu0 %v765_v34  ;;  %1247 = vmatmul.mubr.bf16.vlgmr.msra.gmra.mxu1 %v765_v34 }
 0x1e0   : > { %v1207_v41 = vpop.f32.mrf.mxu0  ;;  %v1248_v42 = vpop.f32.mrf.mxu1 }
 0x1e1   : > { %v1208_v43 = vadd.f32 %v1207_v41, %v836_v37  ;;  %v1249_v48 = vadd.f32 %v1248_v42, %v844_v39 }
 0x1e2   : > { %v1209_v45 = vpop.f32.mrf.mxu0  ;;  %v1250_v47 = vpop.f32.mrf.mxu1 }
 0x1e3   : > { %v1210_v49 = vadd.f32 %v1209_v45, %v840_v40  ;;  %v1255_v53 = vadd.f32 %v1208_v43, %v2152_v4  ;;  %v1251_v55 = vadd.f32 %v1250_v47, %v848_v44  ;;  %v1257_v58 = vadd.f32 %v1249_v48, %v2155_v5 }
 0x1e4   : > { %v1211_v51 = vpop.f32.mrf.mxu0  ;;  %v1252_v52 = vpop.f32.mrf.mxu1 }
 0x1e5   : > { %v1256_v54 = vadd.f32 %v1210_v49, %v2088_v46  ;;  %v1258_v60 = vadd.f32 %v1251_v55, %v2099_v50 }
 0x1e6   : > { %v1212_v56 = vpop.f32.mrf.mxu0  ;;  %v1253_v57 = vpop.f32.mrf.mxu1 }
 0x1e7   : > { %v1259_v59 = vadd.f32 %v1256_v54, %v1255_v53 }
 0x1e9   : > { %v1260_v61 = vadd.f32 %v1259_v59, %v1257_v58 }
 0x1eb   : > { %v1261_v62 = vadd.f32 %v1260_v61, %v1258_v60 }
 0x1ed   : > { %1262 = vadd.xlane.f32.xlu0 %v1261_v62 }
 0x276   : > { %v1263_v63 = vpop.xlane.xlu0 %1262 }
 0x277   : > { %v1265_v0 = vmul.f32 0.001953125, %v1263_v63 }
 0x279   : > { %v1266_v1 = vsub.f32 %v1255_v53, %v1265_v0  ;;  %v1267_v2 = vsub.f32 %v1256_v54, %v1265_v0  ;;  %v1268_v3 = vsub.f32 %v1257_v58, %v1265_v0  ;;  %v1269_v4 = vsub.f32 %v1258_v60, %v1265_v0 }
 0x27b   : > { %v1270_v46 = vmul.f32 %v1266_v1, %v1266_v1  ;;  %v1271_v6 = vmul.f32 %v1267_v2, %v1267_v2  ;;  %v1272_v7 = vmul.f32 %v1268_v3, %v1268_v3  ;;  %v1273_v9 = vmul.f32 %v1269_v4, %v1269_v4 }
 0x27d   : > { %v1274_v8 = vadd.f32 %v1271_v6, %v1270_v46 }
 0x27f   : > { %v1275_v5 = vadd.f32 %v1274_v8, %v1272_v7 }
 0x281   : > { %v1276_v10 = vadd.f32 %v1275_v5, %v1273_v9 }
 0x283   : > { %1277 = vadd.xlane.f32.xlu0 %v1276_v10 }
 0x30c   : > { %v1278_v50 = vpop.xlane.xlu0 %1277 }
 0x30d   : > { %v1279_v11 = vmul.f32 0.001953125, %v1278_v50 }
 0x30f   : > { %v1280_v12 = vadd.f32 1e-06, %v1279_v11 }
 0x311   : > { %1789 = vrsqrt.f32 %v1280_v12 }
 0x31e   : > { %v1790_v21 = vpop.eup %1789 }
 0x31f   : > { %v1282_v26 = vmul.f32 %v1790_v21, %v1266_v1  ;;  %v1283_v27 = vmul.f32 %v1790_v21, %v1267_v2  ;;  %v1284_v28 = vmul.f32 %v1790_v21, %v1268_v3  ;;  %v1285_v29 = vmul.f32 %v1790_v21, %v1269_v4 }
 0x321   : > { %v1308_v30 = vmul.f32 %v1291_v19, %v1282_v26  ;;  %v1309_v31 = vmul.f32 %v1295_v20, %v1283_v27  ;;  %v1310_v32 = vmul.f32 %v1299_v17, %v1284_v28  ;;  %v1311_v33 = vmul.f32 %v1303_v18, %v1285_v29 }
 0x323   : > { %v1334_v34 = vadd.f32 %v1317_v24, %v1308_v30  ;;  %v1335_v35 = vadd.f32 %v1321_v25, %v1309_v31  ;;  %v1336_v36 = vadd.f32 %v1325_v22, %v1310_v32  ;;  %v1337_v37 = vadd.f32 %v1329_v23, %v1311_v33 }
 0x325   : > { %1338 = vst [vmem:[%s271_s17] sm:$0xff] %v1334_v34  ;;  %1339 = vst [vmem:[%s271_s17 + $0x8] sm:$0xff] %v1335_v35 }
 0x326   : > { %1340 = vst [vmem:[%s271_s17 + $0x10] sm:$0xff] %v1336_v36  ;;  %1341 = vst [vmem:[%s271_s17 + $0x18] sm:$0xff] %v1337_v37 }
 0x327   : > { %1804 = shalt.err (!%p1801_p3)
}
 0x328   : > { %s1805_s18 = scalar_lea.hbm %s2398_s13, 512  ;;  %s1809_s20 = scalar_lea.hbm %s2448_s7, 1024 }
 0x329   : > { %p1806_p4 = scmp.ne.s32.totalorder %s2398_s13, %s1805_s18  ;;  %p1810_p9 = scmp.lt.s32.totalorder %s2398_s13, %s2448_s7 }
 0x32a   : > { %p1811_p10 = scmp.lt.s32.totalorder %s1809_s20, %s1805_s18 }
 0x32b   : > { %p1807_p7 = pnand %p1806_p4, %p1932_p5 }
 0x32c   : > { %p1812_p11 = por %p1811_p10, %p1810_p9 }
 0x32d   : > { %p1808_p8 = pneg %p1807_p7 }
 0x32f   : > { %p1813_p12 = pnand %p1812_p11, %p1808_p8 }
 0x331   : > { %1816 = shalt.err (!%p1813_p12)
}
 0x332   : > { %1558 = dma.vmem_to_hbm [thread:$0]  (%p1932_p5), %s2400_s23, 512, %s2398_s13, %s1343_s28  }
 0x333 PF: > { %p1564_p13 = scmp.ge.s32.totalorder %s1851_s27, 2  ;;  %s1369_s29 = sand.u32 1, %s1839_s24  }
 0x334   : > { %s1370_s8 = scalar_lea.sflag [#allocation3], %s1369_s29 }
 0x335   : > { %p1561_p0 = pnand %p1564_p13, %p1936_p6 }
 0x337   : > { %p1562_p1 = pneg %p1561_p0 }
 0x339   : > { %1834 = dma.done.wait (%p1562_p1), %s1370_s8, 512  }
 0x33a   : > { %1836 = vsyncadd (%p1562_p1), %s1370_s8, 4294966784  ;;  %p17_p2 = scmp.ge.s32.totalorder %s1919_s30, 4   ;;  %s2451_s24 = smov %s1843_s25 }
 0x33b   : > { %s2452_s25 = smov %s1847_s26  ;;  %s2453_s26 = smov %s1930_s10 }
 0x33c   : > { %s2454_s27 = smov %s1919_s30  ;;  %19 = sbr.rel (!%p17_p2) target bundleno = 3 (0x3), region = 83 }
 0x341   :  { %1375 = vsyncpa [#allocation3], 1 }
 0x342   :  { %1377 = vsyncpa [#allocation3 + $0x1], 1 }

</bundles_post_ra>
